<compile_context>
chip_gen: v7x
topology: tpu7x:2x2x1
jax: 0.10.0
libtpu: 0.0.40
codegen_flags: <defaults>
</compile_context>

<pallas_src>
import math

import jax
import jax.numpy as jnp
import numpy as np
from jax import lax
from jax.experimental import pallas as pl
from jax.experimental.pallas import tpu as pltpu

LN_EPS = 1e-5
INV_SQRT2 = 1.0 / math.sqrt(2.0)


def _gelu_exact(x):
    # PyTorch nn.GELU() default = exact erf formulation.
    return 0.5 * x * (1.0 + lax.erf(x * INV_SQRT2))


def _matmul(a, w):
    # MXU matmul; operands may be bf16 (native MXU input), accumulate in f32.
    return jnp.dot(a.astype(w.dtype), w, preferred_element_type=jnp.float32)


def _ln_gelu(y, inv_n):
    # LayerNorm(elementwise_affine=False) + GELU.
    # Independent reductions (sum, sum of squares) so the two XLU reduces overlap;
    # clamp the variance at 0 to guard against f32 cancellation.
    s1 = jnp.sum(y, axis=-1, keepdims=True)
    s2 = jnp.sum(y * y, axis=-1, keepdims=True)
    mean = s1 * inv_n
    var = jnp.maximum(s2 * inv_n - mean * mean, 0.0)   # biased var, matches nn.LayerNorm
    yn = (y - mean) * lax.rsqrt(var + LN_EPS)
    return _gelu_exact(yn)


def _make_encoder_kernel(num_seq_layers, h_dim, z_dim):
    inv_h = 1.0 / float(h_dim)

    def kernel(x_ref, s_ref, w0x_ref, w0s_ref, b0_ref, wh_ref, bh_ref,
               whd_ref, bhd_ref, eps_ref, out_ref):
        # x2h: (x | s) @ W0 + b0 done as two dots (no concat materialization).
        y0 = (_matmul(x_ref[...], w0x_ref[...])
              + _matmul(s_ref[...], w0s_ref[...])
              + b0_ref[...])
        h = _ln_gelu(y0, inv_h)

        # seq_nn: (num_h_layers - 1) stacked LinearReLU blocks.
        # fori_loop(unroll=True) bounds vreg live ranges at production h_dim while
        # keeping the short loop fully visible to the LLO scheduler.
        if num_seq_layers > 0:
            def layer(i, hc):
                return _ln_gelu(_matmul(hc, wh_ref[i]) + bh_ref[i], inv_h)
            h = lax.fori_loop(0, num_seq_layers, layer, h, unroll=True)

        # Fused heads: one (h_dim, 2*z_dim) matmul -> [mu | logvar].
        yh = _matmul(h, whd_ref[...]) + bhd_ref[...]
        mu = yh[:, :z_dim]
        lv = yh[:, z_dim:]
        # softplus (numerically stable; log1p for large |lv|), matches torch.nn.Softplus
        sigma = jnp.maximum(lv, 0.0) + jnp.log1p(jnp.exp(-jnp.abs(lv)))
        # Normal(mu, sigma).rsample() with externally supplied standard-normal eps.
        z = mu + sigma * eps_ref[...]

        # Single full-block, lane-dense output store: [z | mu | sigma].
        out_ref[...] = jnp.concatenate([z, mu, sigma], axis=-1)

    return kernel


def _detect_num_tensorcores():
    """Best-effort TensorCore-per-chip detection; falls back to 1 (v5e/v6e)."""
    try:
        d = jax.devices()[0]
        for attr in ("num_cores", "core_count", "num_tensorcores"):
            v = getattr(d, attr, None)
            if isinstance(v, int) and v > 0:
                return v
    except Exception:
        pass
    return 1


def _vmem_capacity_bytes():
    """Generation-aware physical VMEM capacity (v5e/v6e 128 MiB, v7x 64 MiB)."""
    try:
        info = pltpu.get_tpu_info()
        cap = int(getattr(info, "vmem_capacity_bytes", 0))
        if cap > 0:
            return cap
    except Exception:
        pass
    return 64 << 20   # conservative fallback (v7x)


def _vmem_limit_bytes(tile_b, x_dim, batch_num, h_dim, z_dim, num_seq,
                      mm_bytes, weight_bufs):
    f32 = 4
    # double-buffered batch-tiled I/O (x, s, eps, output slab)
    io = 2 * tile_b * (x_dim + batch_num + z_dim + 3 * z_dim) * f32
    # weights/biases (single-buffered by default via pl.Buffered(1))
    wts = weight_bufs * (((x_dim + batch_num) * h_dim + num_seq * h_dim * h_dim
                          + h_dim * 2 * z_dim) * mm_bytes
                         + ((1 + num_seq) * h_dim + 2 * z_dim) * f32)
    # live activations / temporaries inside the body (generous)
    act = 6 * tile_b * h_dim * f32
    est = io + wts + act
    # Headroom below the detected physical VMEM (not a hardcoded v7x ceiling).
    usable = int(_vmem_capacity_bytes() * 0.85)
    return int(min(usable, max(2 * est + (8 << 20), 32 << 20)))


def encoder_batch_forward(x, s, eps, params, *, tile_b=None, num_cores=None,
                          max_tile_b=1024, matmul_dtype=jnp.bfloat16,
                          weight_buffer_count=1):
    """EncoderBatch.forward (use_ambient=False, norm_input=False).

    tile_b=None → auto: one full-batch tile per TensorCore, i.e. a single grid
    step on 1-TC parts (v5e/v6e, avoids per-step pipelining overhead) and
    ceil(B/num_cores) steps on multi-TC parts (v7x: pass num_cores=2 if
    detection reports 1), capped at max_tile_b rows. Explicit tile_b is kept a
    multiple of 8.
    matmul_dtype=bf16 is the native MXU input dtype on all generations; all
    bias/LayerNorm/GELU/softplus math stays in f32.
    """
    x = x.astype(jnp.float32)
    s = s.astype(jnp.float32)
    eps = eps.astype(jnp.float32)

    B, x_dim = x.shape
    _, batch_num = s.shape
    h_dim = params["w0"].shape[1]
    z_dim = params["wmu"].shape[1]
    num_seq = params["wh"].shape[0]

    # Split W0 into the x-part and the batch-one-hot part (removes the concat).
    # TODO(synk): for very large batch_num, replace s @ W0_s with an index lookup.
    w0x = params["w0"][:x_dim].astype(matmul_dtype)
    w0s = params["w0"][x_dim:].astype(matmul_dtype)
    wh = params["wh"].astype(matmul_dtype)
    # Fuse the two heads into a single (h_dim, 2*z_dim) weight / bias.
    w_heads = jnp.concatenate([params["wmu"], params["wlv"]], axis=-1).astype(matmul_dtype)
    b_heads = jnp.concatenate([params["bmu"], params["blv"]], axis=-1).astype(jnp.float32)
    b0 = params["b0"].astype(jnp.float32)
    bh = params["bh"].astype(jnp.float32)

    # --- tile_b selection (generation-aware) ---
    if num_cores is None:
        num_cores = _detect_num_tensorcores()
    if tile_b is None:
        tile_b = -(-B // max(num_cores, 1))          # ceil(B / num_cores)
        tile_b = min(tile_b, max_tile_b)
    tile_b = min(int(tile_b), B)
    if tile_b < B:
        tile_b = max(8, (tile_b // 8) * 8)           # (8,128) sublane constraint
    grid = (pl.cdiv(B, tile_b),)

    kernel = _make_encoder_kernel(num_seq, h_dim, z_dim)

    # Constant-index weight/bias specs: single-buffered by default (halves weight
    # VMEM vs. the default double-buffered pipeline; matters on v7x's 64 MiB VMEM
    # once h_dim is production-sized).
    weight_mode = (pl.Buffered(weight_buffer_count)
                   if weight_buffer_count != 2 else None)

    def const_spec(shape):
        nd = len(shape)
        if weight_mode is None:
            return pl.BlockSpec(shape, lambda i, _nd=nd: (0,) * _nd)
        return pl.BlockSpec(shape, lambda i, _nd=nd: (0,) * _nd,
                            pipeline_mode=weight_mode)

    vmem_limit = _vmem_limit_bytes(
        tile_b, x_dim, batch_num, h_dim, z_dim, num_seq,
        jnp.dtype(matmul_dtype).itemsize, max(weight_buffer_count, 1))

    out = pl.pallas_call(
        kernel,
        out_shape=jax.ShapeDtypeStruct((B, 3 * z_dim), jnp.float32),
        grid=grid,
        in_specs=[
            pl.BlockSpec((tile_b, x_dim), lambda i: (i, 0)),       # x   (batch-tiled)
            pl.BlockSpec((tile_b, batch_num), lambda i: (i, 0)),   # s   (batch-tiled)
            const_spec(w0x.shape),                                 # W0_x
            const_spec(w0s.shape),                                 # W0_s
            const_spec(b0.shape),                                  # b0
            const_spec(wh.shape),                                  # stacked seq weights
            const_spec(bh.shape),                                  # stacked seq biases
            const_spec(w_heads.shape),                             # fused head weights
            const_spec(b_heads.shape),                             # fused head biases
            pl.BlockSpec((tile_b, z_dim), lambda i: (i, 0)),       # eps (batch-tiled)
        ],
        out_specs=pl.BlockSpec((tile_b, 3 * z_dim), lambda i: (i, 0)),
        compiler_params=pltpu.CompilerParams(
            dimension_semantics=("parallel",),
            vmem_limit_bytes=vmem_limit,
        ),
    )(x, s, w0x, w0s, b0, wh, bh, w_heads, b_heads, eps)

    z = out[:, :z_dim]
    mu = out[:, z_dim:2 * z_dim]
    sigma = out[:, 2 * z_dim:]
    # qz (a torch.distributions.Normal) is represented by its parameters.
    return z, (mu, sigma)


def init_params(key, x_dim, batch_num, h_dim, z_dim, num_h_layers):
    """Deterministic synthetic init mirroring nn.Linear's U(-1/sqrt(fan_in), ...)."""
    in_dim = x_dim + batch_num
    num_seq = num_h_layers - 1
    keys = jax.random.split(key, 3 + num_seq)

    def linear(k, fan_in, fan_out):
        bound = 1.0 / math.sqrt(fan_in)
        kw, kb = jax.random.split(k)
        w = jax.random.uniform(kw, (fan_in, fan_out), jnp.float32, -bound, bound)
        b = jax.random.uniform(kb, (1, fan_out), jnp.float32, -bound, bound)
        return w, b

    w0, b0 = linear(keys[0], in_dim, h_dim)
    whs, bhs = [], []
    for i in range(num_seq):
        w, b = linear(keys[1 + i], h_dim, h_dim)
        whs.append(w)
        bhs.append(b)
    wh = jnp.stack(whs, axis=0)                       # (num_seq, h_dim, h_dim)
    bh = jnp.stack(bhs, axis=0)                       # (num_seq, 1, h_dim)
    wmu, bmu = linear(keys[1 + num_seq], h_dim, z_dim)
    wlv, blv = linear(keys[2 + num_seq], h_dim, z_dim)
    return dict(w0=w0, b0=b0, wh=wh, bh=bh, wmu=wmu, bmu=bmu, wlv=wlv, blv=blv)


def _reference_forward(x, s, eps, params):
    """Pure-JAX reference of the original module math (for correctness check)."""
    xs = jnp.concatenate([x, s], axis=-1)

    def layer(h, w, b):
        y = h @ w + b
        mean = jnp.mean(y, axis=-1, keepdims=True)
        var = jnp.mean(jnp.square(y - mean), axis=-1, keepdims=True)
        yn = (y - mean) / jnp.sqrt(var + LN_EPS)
        return 0.5 * yn * (1.0 + lax.erf(yn * INV_SQRT2))

    h = layer(xs, params["w0"], params["b0"])
    for i in range(params["wh"].shape[0]):
        h = layer(h, params["wh"][i], params["bh"][i])
    mu = h @ params["wmu"] + params["bmu"]
    lv = h @ params["wlv"] + params["blv"]
    sigma = jax.nn.softplus(lv)
    return mu + sigma * eps, (mu, sigma)


if __name__ == "__main__":
    # Small shapes consistent with the module (MLP encoder over a batch of rows).
    num_h_layers = 3
    x_dim = 16
    batch_num = 4      # number of experimental batches (one-hot s)
    h_dim = 32
    z_dim = 8
    B = 512

    key = jax.random.PRNGKey(0)
    k_params, k_x, k_s, k_eps = jax.random.split(key, 4)

    params = init_params(k_params, x_dim, batch_num, h_dim, z_dim, num_h_layers)
    x = jax.random.normal(k_x, (B, x_dim), jnp.float32)
    s_idx = jax.random.randint(k_s, (B,), 0, batch_num)
    s = jax.nn.one_hot(s_idx, batch_num, dtype=jnp.float32)   # batch one-hot covariate
    eps = jax.random.normal(k_eps, (B, z_dim), jnp.float32)   # rsample noise

    z_ref, (mu_ref, sigma_ref) = _reference_forward(x, s, eps, params)

    # f32 matmul operands, auto tile (single grid step on 1-TC parts): strict check.
    z, (mu, sigma) = encoder_batch_forward(x, s, eps, params,
                                           matmul_dtype=jnp.float32)
    jax.block_until_ready((z, mu, sigma))
    np.testing.assert_allclose(np.asarray(z), np.asarray(z_ref), rtol=1e-4, atol=1e-4)
    np.testing.assert_allclose(np.asarray(mu), np.asarray(mu_ref), rtol=1e-4, atol=1e-4)
    np.testing.assert_allclose(np.asarray(sigma), np.asarray(sigma_ref), rtol=1e-4, atol=1e-4)

    # f32, explicit tile_b=256 (2-step parallel grid, the v7x 2-TensorCore shape).
    z2, (mu2, sigma2) = encoder_batch_forward(x, s, eps, params, tile_b=256,
                                              matmul_dtype=jnp.float32)
    jax.block_until_ready((z2, mu2, sigma2))
    np.testing.assert_allclose(np.asarray(z2), np.asarray(z_ref), rtol=1e-4, atol=1e-4)
    np.testing.assert_allclose(np.asarray(mu2), np.asarray(mu_ref), rtol=1e-4, atol=1e-4)
    np.testing.assert_allclose(np.asarray(sigma2), np.asarray(sigma_ref), rtol=1e-4, atol=1e-4)

    # Default bf16 matmul operands (native MXU input dtype); coarse sanity bound,
    # since reduced-precision matmuls deviate from the f32 reference.
    z16, (mu16, sigma16) = encoder_batch_forward(x, s, eps, params)
    jax.block_until_ready((z16, mu16, sigma16))
    np.testing.assert_allclose(np.asarray(z16), np.asarray(z_ref), rtol=2e-1, atol=2e-1)
    np.testing.assert_allclose(np.asarray(mu16), np.asarray(mu_ref), rtol=2e-1, atol=2e-1)
    np.testing.assert_allclose(np.asarray(sigma16), np.asarray(sigma_ref), rtol=2e-1, atol=2e-1)

    print("KERNEL_OK")
</pallas_src>

<mosaic_0001>
module attributes {stable_mosaic.version = 11 : i64} {
  func.func @kernel(%arg0: i32, %arg1: memref<512x16xf32, #tpu.memory_space<vmem>>, %arg2: memref<512x4xf32, #tpu.memory_space<vmem>>, %arg3: memref<16x32xf32, #tpu.memory_space<vmem>>, %arg4: memref<4x32xf32, #tpu.memory_space<vmem>>, %arg5: memref<1x32xf32, #tpu.memory_space<vmem>>, %arg6: memref<2x32x32xf32, #tpu.memory_space<vmem>>, %arg7: memref<2x1x32xf32, #tpu.memory_space<vmem>>, %arg8: memref<32x16xf32, #tpu.memory_space<vmem>>, %arg9: memref<1x16xf32, #tpu.memory_space<vmem>>, %arg10: memref<512x8xf32, #tpu.memory_space<vmem>>, %arg11: memref<512x24xf32, #tpu.memory_space<vmem>>) attributes {dimension_semantics = [#tpu.dimension_semantics<parallel>], iteration_bounds = array<i64: 1>, scalar_prefetch = 0 : i64, scratch_operands = 0 : i64, tpu.core_type = #tpu.core_type<tc>, window_params = [{transform_indices = @transform_0, window_bounds = array<i64: 512, 16>}, {transform_indices = @transform_1, window_bounds = array<i64: 512, 4>}, {pipeline_mode = #tpu.pipeline_mode<synchronous>, transform_indices = @transform_2, window_bounds = array<i64: 16, 32>}, {pipeline_mode = #tpu.pipeline_mode<synchronous>, transform_indices = @transform_3, window_bounds = array<i64: 4, 32>}, {pipeline_mode = #tpu.pipeline_mode<synchronous>, transform_indices = @transform_4, window_bounds = array<i64: 1, 32>}, {pipeline_mode = #tpu.pipeline_mode<synchronous>, transform_indices = @transform_5, window_bounds = array<i64: 2, 32, 32>}, {pipeline_mode = #tpu.pipeline_mode<synchronous>, transform_indices = @transform_6, window_bounds = array<i64: 2, 1, 32>}, {pipeline_mode = #tpu.pipeline_mode<synchronous>, transform_indices = @transform_7, window_bounds = array<i64: 32, 16>}, {pipeline_mode = #tpu.pipeline_mode<synchronous>, transform_indices = @transform_8, window_bounds = array<i64: 1, 16>}, {transform_indices = @transform_9, window_bounds = array<i64: 512, 8>}, {transform_indices = @transform_10, window_bounds = array<i64: 512, 24>}]} {
    %c0 = arith.constant 0 : index
    %c0_0 = arith.constant 0 : index
    %0 = vector.load %arg1[%c0, %c0_0] : memref<512x16xf32, #tpu.memory_space<vmem>>, vector<512x16xf32>
    %c0_1 = arith.constant 0 : index
    %c0_2 = arith.constant 0 : index
    %1 = vector.load %arg3[%c0_1, %c0_2] : memref<16x32xf32, #tpu.memory_space<vmem>>, vector<16x32xf32>
    %cst = arith.constant dense<0.000000e+00> : vector<512x32xf32>
    %2 = tpu.matmul %0, %1, %cst {dimension_numbers = #tpu.dot_dimension_numbers<[1], [0], [0], [1], [0, 0, 1, 1], [], []>} : vector<512x16xf32>, vector<16x32xf32>, vector<512x32xf32> -> vector<512x32xf32>
    %c0_3 = arith.constant 0 : index
    %c0_4 = arith.constant 0 : index
    %3 = vector.load %arg2[%c0_3, %c0_4] : memref<512x4xf32, #tpu.memory_space<vmem>>, vector<512x4xf32>
    %c0_5 = arith.constant 0 : index
    %c0_6 = arith.constant 0 : index
    %4 = vector.load %arg4[%c0_5, %c0_6] : memref<4x32xf32, #tpu.memory_space<vmem>>, vector<4x32xf32>
    %cst_7 = arith.constant dense<0.000000e+00> : vector<512x32xf32>
    %5 = tpu.matmul %3, %4, %cst_7 {dimension_numbers = #tpu.dot_dimension_numbers<[1], [0], [0], [1], [0, 0, 1, 1], [], []>} : vector<512x4xf32>, vector<4x32xf32>, vector<512x32xf32> -> vector<512x32xf32>
    %6 = arith.addf %2, %5 : vector<512x32xf32>
    %c0_8 = arith.constant 0 : index
    %c0_9 = arith.constant 0 : index
    %7 = vector.load %arg5[%c0_8, %c0_9] : memref<1x32xf32, #tpu.memory_space<vmem>>, vector<1x32xf32>
    %8 = vector.broadcast %7 : vector<1x32xf32> to vector<512x32xf32>
    %9 = arith.addf %6, %8 : vector<512x32xf32>
    %cst_10 = arith.constant dense<0.000000e+00> : vector<512xf32>
    %10 = vector.multi_reduction <add>, %9, %cst_10 [1] : vector<512x32xf32> to vector<512xf32>
    %11 = vector.shape_cast %10 : vector<512xf32> to vector<512x1xf32>
    %12 = arith.mulf %9, %9 : vector<512x32xf32>
    %cst_11 = arith.constant dense<0.000000e+00> : vector<512xf32>
    %13 = vector.multi_reduction <add>, %12, %cst_11 [1] : vector<512x32xf32> to vector<512xf32>
    %14 = vector.shape_cast %13 : vector<512xf32> to vector<512x1xf32>
    %cst_12 = arith.constant 3.125000e-02 : f32
    %15 = vector.broadcast %cst_12 : f32 to vector<512x1xf32>
    %16 = arith.mulf %11, %15 : vector<512x1xf32>
    %cst_13 = arith.constant 3.125000e-02 : f32
    %17 = vector.broadcast %cst_13 : f32 to vector<512x1xf32>
    %18 = arith.mulf %14, %17 : vector<512x1xf32>
    %19 = arith.mulf %16, %16 : vector<512x1xf32>
    %20 = arith.subf %18, %19 : vector<512x1xf32>
    %cst_14 = arith.constant 0.000000e+00 : f32
    %21 = vector.broadcast %cst_14 : f32 to vector<512x1xf32>
    %22 = arith.maximumf %20, %21 : vector<512x1xf32>
    %23 = vector.broadcast %16 : vector<512x1xf32> to vector<512x32xf32>
    %24 = arith.subf %9, %23 : vector<512x32xf32>
    %cst_15 = arith.constant 9.99999974E-6 : f32
    %25 = vector.broadcast %cst_15 : f32 to vector<512x1xf32>
    %26 = arith.addf %22, %25 : vector<512x1xf32>
    %27 = math.rsqrt %26 : vector<512x1xf32>
    %28 = vector.broadcast %27 : vector<512x1xf32> to vector<512x32xf32>
    %29 = arith.mulf %24, %28 : vector<512x32xf32>
    %cst_16 = arith.constant 5.000000e-01 : f32
    %30 = vector.broadcast %cst_16 : f32 to vector<512x32xf32>
    %31 = arith.mulf %30, %29 : vector<512x32xf32>
    %cst_17 = arith.constant 0.707106769 : f32
    %32 = vector.broadcast %cst_17 : f32 to vector<512x32xf32>
    %33 = arith.mulf %29, %32 : vector<512x32xf32>
    %34 = math.erf %33 : vector<512x32xf32>
    %cst_18 = arith.constant 1.000000e+00 : f32
    %35 = vector.broadcast %cst_18 : f32 to vector<512x32xf32>
    %36 = arith.addf %35, %34 : vector<512x32xf32>
    %37 = arith.mulf %31, %36 : vector<512x32xf32>
    %c0_i32 = arith.constant 0 : i32
    %38 = arith.index_cast %c0_i32 : i32 to index
    %c0_19 = arith.constant 0 : index
    %c0_20 = arith.constant 0 : index
    %39 = vector.load %arg6[%38, %c0_19, %c0_20] : memref<2x32x32xf32, #tpu.memory_space<vmem>>, vector<1x32x32xf32>
    %40 = vector.shape_cast %39 : vector<1x32x32xf32> to vector<32x32xf32>
    %cst_21 = arith.constant dense<0.000000e+00> : vector<512x32xf32>
    %41 = tpu.matmul %37, %40, %cst_21 {dimension_numbers = #tpu.dot_dimension_numbers<[1], [0], [0], [1], [0, 0, 1, 1], [], []>} : vector<512x32xf32>, vector<32x32xf32>, vector<512x32xf32> -> vector<512x32xf32>
    %42 = arith.index_cast %c0_i32 : i32 to index
    %c0_22 = arith.constant 0 : index
    %c0_23 = arith.constant 0 : index
    %43 = vector.load %arg7[%42, %c0_22, %c0_23] : memref<2x1x32xf32, #tpu.memory_space<vmem>>, vector<1x1x32xf32>
    %44 = vector.shape_cast %43 : vector<1x1x32xf32> to vector<1x32xf32>
    %45 = vector.broadcast %44 : vector<1x32xf32> to vector<512x32xf32>
    %46 = arith.addf %41, %45 : vector<512x32xf32>
    %cst_24 = arith.constant dense<0.000000e+00> : vector<512xf32>
    %47 = vector.multi_reduction <add>, %46, %cst_24 [1] : vector<512x32xf32> to vector<512xf32>
    %48 = vector.shape_cast %47 : vector<512xf32> to vector<512x1xf32>
    %49 = arith.mulf %46, %46 : vector<512x32xf32>
    %cst_25 = arith.constant dense<0.000000e+00> : vector<512xf32>
    %50 = vector.multi_reduction <add>, %49, %cst_25 [1] : vector<512x32xf32> to vector<512xf32>
    %51 = vector.shape_cast %50 : vector<512xf32> to vector<512x1xf32>
    %cst_26 = arith.constant 3.125000e-02 : f32
    %52 = vector.broadcast %cst_26 : f32 to vector<512x1xf32>
    %53 = arith.mulf %48, %52 : vector<512x1xf32>
    %cst_27 = arith.constant 3.125000e-02 : f32
    %54 = vector.broadcast %cst_27 : f32 to vector<512x1xf32>
    %55 = arith.mulf %51, %54 : vector<512x1xf32>
    %56 = arith.mulf %53, %53 : vector<512x1xf32>
    %57 = arith.subf %55, %56 : vector<512x1xf32>
    %cst_28 = arith.constant 0.000000e+00 : f32
    %58 = vector.broadcast %cst_28 : f32 to vector<512x1xf32>
    %59 = arith.maximumf %57, %58 : vector<512x1xf32>
    %60 = vector.broadcast %53 : vector<512x1xf32> to vector<512x32xf32>
    %61 = arith.subf %46, %60 : vector<512x32xf32>
    %cst_29 = arith.constant 9.99999974E-6 : f32
    %62 = vector.broadcast %cst_29 : f32 to vector<512x1xf32>
    %63 = arith.addf %59, %62 : vector<512x1xf32>
    %64 = math.rsqrt %63 : vector<512x1xf32>
    %65 = vector.broadcast %64 : vector<512x1xf32> to vector<512x32xf32>
    %66 = arith.mulf %61, %65 : vector<512x32xf32>
    %cst_30 = arith.constant 5.000000e-01 : f32
    %67 = vector.broadcast %cst_30 : f32 to vector<512x32xf32>
    %68 = arith.mulf %67, %66 : vector<512x32xf32>
    %cst_31 = arith.constant 0.707106769 : f32
    %69 = vector.broadcast %cst_31 : f32 to vector<512x32xf32>
    %70 = arith.mulf %66, %69 : vector<512x32xf32>
    %71 = math.erf %70 : vector<512x32xf32>
    %cst_32 = arith.constant 1.000000e+00 : f32
    %72 = vector.broadcast %cst_32 : f32 to vector<512x32xf32>
    %73 = arith.addf %72, %71 : vector<512x32xf32>
    %74 = arith.mulf %68, %73 : vector<512x32xf32>
    %c1_i32 = arith.constant 1 : i32
    %75 = arith.index_cast %c1_i32 : i32 to index
    %c0_33 = arith.constant 0 : index
    %c0_34 = arith.constant 0 : index
    %76 = vector.load %arg6[%75, %c0_33, %c0_34] : memref<2x32x32xf32, #tpu.memory_space<vmem>>, vector<1x32x32xf32>
    %77 = vector.shape_cast %76 : vector<1x32x32xf32> to vector<32x32xf32>
    %cst_35 = arith.constant dense<0.000000e+00> : vector<512x32xf32>
    %78 = tpu.matmul %74, %77, %cst_35 {dimension_numbers = #tpu.dot_dimension_numbers<[1], [0], [0], [1], [0, 0, 1, 1], [], []>} : vector<512x32xf32>, vector<32x32xf32>, vector<512x32xf32> -> vector<512x32xf32>
    %79 = arith.index_cast %c1_i32 : i32 to index
    %c0_36 = arith.constant 0 : index
    %c0_37 = arith.constant 0 : index
    %80 = vector.load %arg7[%79, %c0_36, %c0_37] : memref<2x1x32xf32, #tpu.memory_space<vmem>>, vector<1x1x32xf32>
    %81 = vector.shape_cast %80 : vector<1x1x32xf32> to vector<1x32xf32>
    %82 = vector.broadcast %81 : vector<1x32xf32> to vector<512x32xf32>
    %83 = arith.addf %78, %82 : vector<512x32xf32>
    %cst_38 = arith.constant dense<0.000000e+00> : vector<512xf32>
    %84 = vector.multi_reduction <add>, %83, %cst_38 [1] : vector<512x32xf32> to vector<512xf32>
    %85 = vector.shape_cast %84 : vector<512xf32> to vector<512x1xf32>
    %86 = arith.mulf %83, %83 : vector<512x32xf32>
    %cst_39 = arith.constant dense<0.000000e+00> : vector<512xf32>
    %87 = vector.multi_reduction <add>, %86, %cst_39 [1] : vector<512x32xf32> to vector<512xf32>
    %88 = vector.shape_cast %87 : vector<512xf32> to vector<512x1xf32>
    %cst_40 = arith.constant 3.125000e-02 : f32
    %89 = vector.broadcast %cst_40 : f32 to vector<512x1xf32>
    %90 = arith.mulf %85, %89 : vector<512x1xf32>
    %cst_41 = arith.constant 3.125000e-02 : f32
    %91 = vector.broadcast %cst_41 : f32 to vector<512x1xf32>
    %92 = arith.mulf %88, %91 : vector<512x1xf32>
    %93 = arith.mulf %90, %90 : vector<512x1xf32>
    %94 = arith.subf %92, %93 : vector<512x1xf32>
    %cst_42 = arith.constant 0.000000e+00 : f32
    %95 = vector.broadcast %cst_42 : f32 to vector<512x1xf32>
    %96 = arith.maximumf %94, %95 : vector<512x1xf32>
    %97 = vector.broadcast %90 : vector<512x1xf32> to vector<512x32xf32>
    %98 = arith.subf %83, %97 : vector<512x32xf32>
    %cst_43 = arith.constant 9.99999974E-6 : f32
    %99 = vector.broadcast %cst_43 : f32 to vector<512x1xf32>
    %100 = arith.addf %96, %99 : vector<512x1xf32>
    %101 = math.rsqrt %100 : vector<512x1xf32>
    %102 = vector.broadcast %101 : vector<512x1xf32> to vector<512x32xf32>
    %103 = arith.mulf %98, %102 : vector<512x32xf32>
    %cst_44 = arith.constant 5.000000e-01 : f32
    %104 = vector.broadcast %cst_44 : f32 to vector<512x32xf32>
    %105 = arith.mulf %104, %103 : vector<512x32xf32>
    %cst_45 = arith.constant 0.707106769 : f32
    %106 = vector.broadcast %cst_45 : f32 to vector<512x32xf32>
    %107 = arith.mulf %103, %106 : vector<512x32xf32>
    %108 = math.erf %107 : vector<512x32xf32>
    %cst_46 = arith.constant 1.000000e+00 : f32
    %109 = vector.broadcast %cst_46 : f32 to vector<512x32xf32>
    %110 = arith.addf %109, %108 : vector<512x32xf32>
    %111 = arith.mulf %105, %110 : vector<512x32xf32>
    %c2_i32 = arith.constant 2 : i32
    %c0_47 = arith.constant 0 : index
    %c0_48 = arith.constant 0 : index
    %112 = vector.load %arg8[%c0_47, %c0_48] : memref<32x16xf32, #tpu.memory_space<vmem>>, vector<32x16xf32>
    %cst_49 = arith.constant dense<0.000000e+00> : vector<512x16xf32>
    %113 = tpu.matmul %111, %112, %cst_49 {dimension_numbers = #tpu.dot_dimension_numbers<[1], [0], [0], [1], [0, 0, 1, 1], [], []>} : vector<512x32xf32>, vector<32x16xf32>, vector<512x16xf32> -> vector<512x16xf32>
    %c0_50 = arith.constant 0 : index
    %c0_51 = arith.constant 0 : index
    %114 = vector.load %arg9[%c0_50, %c0_51] : memref<1x16xf32, #tpu.memory_space<vmem>>, vector<1x16xf32>
    %115 = vector.broadcast %114 : vector<1x16xf32> to vector<512x16xf32>
    %116 = arith.addf %113, %115 : vector<512x16xf32>
    %117 = vector.extract_strided_slice %116 {offsets = [0, 0], sizes = [512, 8], strides = [1, 1]} : vector<512x16xf32> to vector<512x8xf32>
    %118 = vector.extract_strided_slice %116 {offsets = [0, 8], sizes = [512, 8], strides = [1, 1]} : vector<512x16xf32> to vector<512x8xf32>
    %cst_52 = arith.constant 0.000000e+00 : f32
    %119 = vector.broadcast %cst_52 : f32 to vector<512x8xf32>
    %120 = arith.maximumf %118, %119 : vector<512x8xf32>
    %121 = math.absf %118 : vector<512x8xf32>
    %cst_53 = arith.constant 0.000000e+00 : f32
    %122 = vector.broadcast %cst_53 : f32 to vector<512x8xf32>
    %123 = arith.subf %122, %121 : vector<512x8xf32>
    %124 = math.exp %123 : vector<512x8xf32>
    %125 = math.log1p %124 : vector<512x8xf32>
    %126 = arith.addf %120, %125 : vector<512x8xf32>
    %c0_54 = arith.constant 0 : index
    %c0_55 = arith.constant 0 : index
    %127 = vector.load %arg10[%c0_54, %c0_55] : memref<512x8xf32, #tpu.memory_space<vmem>>, vector<512x8xf32>
    %128 = arith.mulf %126, %127 : vector<512x8xf32>
    %129 = arith.addf %117, %128 : vector<512x8xf32>
    %130 = tpu.concatenate %129, %117, %126 in 1 : vector<512x8xf32>, vector<512x8xf32>, vector<512x8xf32> -> vector<512x24xf32>
    %c0_56 = arith.constant 0 : index
    %c0_57 = arith.constant 0 : index
    %131 = vector.load %arg11[%c0_56, %c0_57] : memref<512x24xf32, #tpu.memory_space<vmem>>, vector<512x24xf32>
    tpu.vector_store %arg11[%c0_56, %c0_57], %130 {strides = array<i32>} : memref<512x24xf32, #tpu.memory_space<vmem>>, vector<512x24xf32>,
    return
  }
  func.func @transform_0(%arg0: i32) -> (i32, i32) {
    %c0_i32 = arith.constant 0 : i32
    %c0_i32_0 = arith.constant 0 : i32
    return %arg0, %c0_i32 : i32, i32
  }
  func.func @transform_1(%arg0: i32) -> (i32, i32) {
    %c0_i32 = arith.constant 0 : i32
    %c0_i32_0 = arith.constant 0 : i32
    return %arg0, %c0_i32 : i32, i32
  }
  func.func @transform_2(%arg0: i32) -> (i32, i32) {
    %c0_i32 = arith.constant 0 : i32
    %c0_i32_0 = arith.constant 0 : i32
    %c0_i32_1 = arith.constant 0 : i32
    return %c0_i32, %c0_i32_0 : i32, i32
  }
  func.func @transform_3(%arg0: i32) -> (i32, i32) {
    %c0_i32 = arith.constant 0 : i32
    %c0_i32_0 = arith.constant 0 : i32
    %c0_i32_1 = arith.constant 0 : i32
    return %c0_i32, %c0_i32_0 : i32, i32
  }
  func.func @transform_4(%arg0: i32) -> (i32, i32) {
    %c0_i32 = arith.constant 0 : i32
    %c0_i32_0 = arith.constant 0 : i32
    %c0_i32_1 = arith.constant 0 : i32
    return %c0_i32, %c0_i32_0 : i32, i32
  }
  func.func @transform_5(%arg0: i32) -> (i32, i32, i32) {
    %c0_i32 = arith.constant 0 : i32
    %c0_i32_0 = arith.constant 0 : i32
    %c0_i32_1 = arith.constant 0 : i32
    %c0_i32_2 = arith.constant 0 : i32
    return %c0_i32, %c0_i32_0, %c0_i32_1 : i32, i32, i32
  }
  func.func @transform_6(%arg0: i32) -> (i32, i32, i32) {
    %c0_i32 = arith.constant 0 : i32
    %c0_i32_0 = arith.constant 0 : i32
    %c0_i32_1 = arith.constant 0 : i32
    %c0_i32_2 = arith.constant 0 : i32
    return %c0_i32, %c0_i32_0, %c0_i32_1 : i32, i32, i32
  }
  func.func @transform_7(%arg0: i32) -> (i32, i32) {
    %c0_i32 = arith.constant 0 : i32
    %c0_i32_0 = arith.constant 0 : i32
    %c0_i32_1 = arith.constant 0 : i32
    return %c0_i32, %c0_i32_0 : i32, i32
  }
  func.func @transform_8(%arg0: i32) -> (i32, i32) {
    %c0_i32 = arith.constant 0 : i32
    %c0_i32_0 = arith.constant 0 : i32
    %c0_i32_1 = arith.constant 0 : i32
    return %c0_i32, %c0_i32_0 : i32, i32
  }
  func.func @transform_9(%arg0: i32) -> (i32, i32) {
    %c0_i32 = arith.constant 0 : i32
    %c0_i32_0 = arith.constant 0 : i32
    return %arg0, %c0_i32 : i32, i32
  }
  func.func @transform_10(%arg0: i32) -> (i32, i32) {
    %c0_i32 = arith.constant 0 : i32
    %c0_i32_0 = arith.constant 0 : i32
    return %arg0, %c0_i32 : i32, i32
  }
}

</mosaic_0001>

<bundles_post_ra>
// kernel: tpu_custom_call.1
= control target key start
LH: loop header
LB: loop body
LE: loop exit
PB: predicated region body
PF: predicated region fallthrough
CT: control target
= control target key end

     0   :  { %vm359_vm0 = vcmask 1043456   ;;  %vm166_vm1 = vcmask 31744   ;;  %s11870_s24 = smov 8   ;;  %vm748_vm2 = vcmask 130048   ;;  %vm1397_vm3 = vcmask 261120   ;;  %s11871_s30 = smov 120   ;;  %s19185_s3 = inlined_call_operand.vmem [shape: f32[4,32], index: 3, kind: input, shape index: {}]   ;;  %s19186_s1 = inlined_call_operand.vmem [shape: f32[512,4], index: 1, kind: input, shape index: {}]   ;;  %s19187_s2 = inlined_call_operand.vmem [shape: f32[16,32], index: 2, kind: input, shape index: {}]   ;;  %s19188_s9 = inlined_call_operand.vmem [shape: f32[512,8], index: 9, kind: input, shape index: {}]   ;;  %s19189_s0 = inlined_call_operand.vmem [shape: f32[512,16], index: 0, kind: input, shape index: {}]   ;;  %s19190_s4 = inlined_call_operand.vmem [shape: f32[1,32], index: 4, kind: input, shape index: {}]   ;;  %s19191_s5 = inlined_call_operand.vmem [shape: f32[2,32,32], index: 5, kind: input, shape index: {}]   ;;  %s19192_s6 = inlined_call_operand.vmem [shape: f32[2,1,32], index: 6, kind: input, shape index: {}]   ;;  %s19193_s7 = inlined_call_operand.vmem [shape: f32[32,16], index: 7, kind: input, shape index: {}]   ;;  %s19194_s8 = inlined_call_operand.vmem [shape: f32[1,16], index: 8, kind: input, shape index: {}]   ;;  %s19195_s10 = inlined_call_operand.vmem [shape: f32[512,24], index: 10, kind: output, shape index: {}]  }
   0x1   :  { %v165_v0 = vld [vmem:[%s19185_s3] sm:$0xf]  ;;  %v102_v2 = vld [vmem:[%s19186_s1 + $0x8] sm:$0xff]  ;;  %v103_v5 = vld [vmem:[%s19186_s1 + $0x10] sm:$0xff] }
   0x2   :  { %v101_v1 = vld [vmem:[%s19186_s1] sm:$0xff]  ;;  %10235 = vmatprep.subr.msk.mxu0 %vm359_vm0, %v165_v0  ;;  %v100_v4 = vld [vmem:[%s19187_s2 + $0x8] sm:$0xff]  ;;  %10773 = vmatprep.subr.msk.mxu1 %vm359_vm0, %v165_v0  ;;  %v104_v7 = vld [vmem:[%s19186_s1 + $0x18] sm:$0xff] }
   0x3   :  { %10237 = vmatprep.mubr.msk.f32.mxu0 %vm166_vm1, %v101_v1  ;;  %v99_v3 = vld [vmem:[%s19187_s2] sm:$0xff]  ;;  %10236 = vmatpush3.msk.msra.mxu0 %vm359_vm0, %v165_v0  ;;  %v106_v9 = vld [vmem:[%s19186_s1 + $0x28] sm:$0xff]  ;;  %v107_v10 = vld [vmem:[%s19186_s1 + $0x30] sm:$0xff] }
   0x4   :  { %v10745_v6 = vpack.c.bf16 %v100_v4, %v99_v3  ;;  %10238 = vmatmul.mubr.msk.f32.vlgmr.msra.gmra.mrb[0].mxu0 %vm166_vm1, %v102_v2  ;;  %10774 = vmatpush3.msk.msra.mxu1 %vm359_vm0, %v165_v0  ;;  %v105_v8 = vld [vmem:[%s19186_s1 + $0x20] sm:$0xff]  ;;  %v108_v11 = vld [vmem:[%s19186_s1 + $0x38] sm:$0xff]  ;;  %v110_v13 = vld [vmem:[%s19186_s1 + $0x48] sm:$0xff] }
   0x5   :  { %10240 = vmatprep.mubr.msk.f32.mxu0 %vm166_vm1, %v103_v5  ;;  %v109_v12 = vld [vmem:[%s19186_s1 + $0x40] sm:$0xff]  ;;  %v111_v14 = vld [vmem:[%s19186_s1 + $0x50] sm:$0xff]  ;;  %v112_v15 = vld [vmem:[%s19186_s1 + $0x58] sm:$0xff] }
   0x6   :  { %10746 = vmatprep.subr.bf16.mxu0 %v10745_v6  ;;  %v113_v16 = vld [vmem:[%s19186_s1 + $0x60] sm:$0xff]  ;;  %v8157_v17 = vld [vmem:[%s19188_s9 + $0x8] sm:$0xff]  ;;  %v8158_v20 = vld [vmem:[%s19188_s9 + $0x10] sm:$0xff] }
   0x7   :  { %10748 = vmatpush3.bf16.msra.mxu0 %v10745_v6  ;;  %8286 = vrot.lane.b32.xlu1 %v8157_v17, %s11870_s24  ;;  %v8156_v18 = vld [vmem:[%s19188_s9] sm:$0xff]  ;;  %v114_v19 = vld [vmem:[%s19186_s1 + $0x68] sm:$0xff]  ;;  %v115_v21 = vld [vmem:[%s19186_s1 + $0x70] sm:$0xff] }
   0x8   :  { %10241 = vmatmul.mubr.msk.f32.gmra.mrb[2].mxu0 %vm166_vm1, %v104_v7  ;;  %8284 = vrot.lane.b32.xlu0 %v8156_v18, %s11870_s24  ;;  %v8160_v22 = vld [vmem:[%s19188_s9 + $0x20] sm:$0xff]  ;;  %v116_v23 = vld [vmem:[%s19186_s1 + $0x78] sm:$0xff]  ;;  %v8162_v26 = vld [vmem:[%s19188_s9 + $0x30] sm:$0xff] }
   0x9   :  { %10243 = vmatprep.mubr.msk.f32.mxu0 %vm166_vm1, %v105_v8  ;;  %v8159_v24 = vld [vmem:[%s19188_s9 + $0x18] sm:$0xff]  ;;  %v117_v25 = vld [vmem:[%s19186_s1 + $0x80] sm:$0xff]  ;;  %v118_v28 = vld [vmem:[%s19186_s1 + $0x88] sm:$0xff] }
   0xa   :  { %v133_v27 = vld [vmem:[%s19186_s1 + $0x100] sm:$0xff]  ;;  %v8161_v29 = vld [vmem:[%s19188_s9 + $0x28] sm:$0xff]  ;;  %v119_v31 = vld [vmem:[%s19186_s1 + $0x90] sm:$0xff] }
   0xb   :  { %8288 = vrot.lane.b32.xlu1 %v8158_v20, %s11870_s24  ;;  %v134_v30 = vld [vmem:[%s19186_s1 + $0x108] sm:$0xff]  ;;  %v8164_v32 = vld [vmem:[%s19188_s9 + $0x40] sm:$0xff]  ;;  %10285 = vmatprep.mubr.msk.f32.mxu1 %vm166_vm1, %v133_v27  ;;  %v135_v33 = vld [vmem:[%s19186_s1 + $0x110] sm:$0xff] }
   0xc   :  { %10244 = vmatmul.mubr.msk.f32.gmra.mrb[4].mxu0 %vm166_vm1, %v106_v9  ;;  %8292 = vrot.lane.b32.xlu0 %v8160_v22, %s11870_s24  ;;  %v136_v34 = vld [vmem:[%s19186_s1 + $0x118] sm:$0xff]  ;;  %v121_v37 = vld [vmem:[%s19186_s1 + $0xa0] sm:$0xff]  ;;  %v8166_v38 = vld [vmem:[%s19188_s9 + $0x50] sm:$0xff] }
   0xd   :  { %10246 = vmatprep.mubr.msk.f32.mxu0 %vm166_vm1, %v107_v10  ;;  %10286 = vmatmul.mubr.msk.f32.vlgmr.msra.gmra.mrb[0].mxu1 %vm166_vm1, %v134_v30  ;;  %v120_v35 = vld [vmem:[%s19186_s1 + $0x98] sm:$0xff]  ;;  %v137_v39 = vld [vmem:[%s19186_s1 + $0x120] sm:$0xff]  ;;  %v138_v40 = vld [vmem:[%s19186_s1 + $0x128] sm:$0xff] }
   0xe   :  { %v8163_v36 = vld [vmem:[%s19188_s9 + $0x38] sm:$0xff]  ;;  %10288 = vmatprep.mubr.msk.f32.mxu1 %vm166_vm1, %v135_v33  ;;  %v122_v41 = vld [vmem:[%s19186_s1 + $0xa8] sm:$0xff]  ;;  %v123_v43 = vld [vmem:[%s19186_s1 + $0xb0] sm:$0xff] }
   0xf   :  { %8290 = vrot.lane.b32.xlu1 %v8159_v24, %s11870_s24  ;;  %v8165_v42 = vld [vmem:[%s19188_s9 + $0x48] sm:$0xff]  ;;  %v8168_v44 = vld [vmem:[%s19188_s9 + $0x60] sm:$0xff]  ;;  %v139_v45 = vld [vmem:[%s19186_s1 + $0x130] sm:$0xff] }
  0x10   :  { %10247 = vmatmul.mubr.msk.f32.gmra.mrb[6].mxu0 %vm166_vm1, %v108_v11  ;;  %8296 = vrot.lane.b32.xlu0 %v8162_v26, %s11870_s24  ;;  %v140_v46 = vld [vmem:[%s19186_s1 + $0x138] sm:$0xff]  ;;  %v125_v49 = vld [vmem:[%s19186_s1 + $0xc0] sm:$0xff]  ;;  %v8170_v50 = vld [vmem:[%s19188_s9 + $0x70] sm:$0xff] }
  0x11   :  { %10249 = vmatprep.mubr.msk.f32.mxu0 %vm166_vm1, %v109_v12  ;;  %10289 = vmatmul.mubr.msk.f32.gmra.mrb[2].mxu1 %vm166_vm1, %v136_v34  ;;  %v124_v47 = vld [vmem:[%s19186_s1 + $0xb8] sm:$0xff]  ;;  %v141_v51 = vld [vmem:[%s19186_s1 + $0x140] sm:$0xff]  ;;  %v142_v52 = vld [vmem:[%s19186_s1 + $0x148] sm:$0xff] }
  0x12   :  { %10291 = vmatprep.mubr.msk.f32.mxu1 %vm166_vm1, %v137_v39  ;;  %v8167_v48 = vld [vmem:[%s19188_s9 + $0x58] sm:$0xff]  ;;  %v126_v53 = vld [vmem:[%s19186_s1 + $0xc8] sm:$0xff]  ;;  %v127_v55 = vld [vmem:[%s19186_s1 + $0xd0] sm:$0xff] }
  0x13   :  { %8294 = vrot.lane.b32.xlu1 %v8161_v29, %s11870_s24  ;;  %v8169_v54 = vld [vmem:[%s19188_s9 + $0x68] sm:$0xff]  ;;  %v8172_v56 = vld [vmem:[%s19188_s9 + $0x80] sm:$0xff]  ;;  %v143_v57 = vld [vmem:[%s19186_s1 + $0x150] sm:$0xff] }
  0x14   :  { %10250 = vmatmul.mubr.msk.f32.gmra.mrb[8].mxu0 %vm166_vm1, %v110_v13  ;;  %8300 = vrot.lane.b32.xlu0 %v8164_v32, %s11870_s24  ;;  %v144_v58 = vld [vmem:[%s19186_s1 + $0x158] sm:$0xff]  ;;  %v129_v61 = vld [vmem:[%s19186_s1 + $0xe0] sm:$0xff]  ;;  %v8174_v62 = vld [vmem:[%s19188_s9 + $0x90] sm:$0xff] }
  0x15   :  { %10252 = vmatprep.mubr.msk.f32.mxu0 %vm166_vm1, %v111_v14  ;;  %10292 = vmatmul.mubr.msk.f32.gmra.mrb[4].mxu1 %vm166_vm1, %v138_v40  ;;  %v128_v59 = vld [vmem:[%s19186_s1 + $0xd8] sm:$0xff]  ;;  %v145_v63 = vld [vmem:[%s19186_s1 + $0x160] sm:$0xff]  ;;  %v146_v0 = vld [vmem:[%s19186_s1 + $0x168] sm:$0xff] }
  0x16   :  { %10294 = vmatprep.mubr.msk.f32.mxu1 %vm166_vm1, %v139_v45  ;;  %v8171_v60 = vld [vmem:[%s19188_s9 + $0x78] sm:$0xff]  ;;  %v130_v1 = vld [vmem:[%s19186_s1 + $0xe8] sm:$0xff]  ;;  %v131_v3 = vld [vmem:[%s19186_s1 + $0xf0] sm:$0xff] }
  0x17   :  { %8298 = vrot.lane.b32.xlu1 %v8163_v36, %s11870_s24  ;;  %v8173_v2 = vld [vmem:[%s19188_s9 + $0x88] sm:$0xff]  ;;  %v8176_v4 = vld [vmem:[%s19188_s9 + $0xa0] sm:$0xff]  ;;  %v147_v5 = vld [vmem:[%s19186_s1 + $0x170] sm:$0xff] }
  0x18   :  { %10253 = vmatmul.mubr.msk.f32.gmra.mrb[10].mxu0 %vm166_vm1, %v112_v15  ;;  %8304 = vrot.lane.b32.xlu0 %v8166_v38, %s11870_s24  ;;  %v148_v6 = vld [vmem:[%s19186_s1 + $0x178] sm:$0xff]  ;;  %v35_v9 = vld [vmem:[%s19189_s0] sm:$0xff]  ;;  %v8178_v10 = vld [vmem:[%s19188_s9 + $0xb0] sm:$0xff] }
  0x19   :  { %10255 = vmatprep.mubr.msk.f32.mxu0 %vm166_vm1, %v113_v16  ;;  %10295 = vmatmul.mubr.msk.f32.gmra.mrb[6].mxu1 %vm166_vm1, %v140_v46  ;;  %v132_v7 = vld [vmem:[%s19186_s1 + $0xf8] sm:$0xff]  ;;  %v149_v11 = vld [vmem:[%s19186_s1 + $0x180] sm:$0xff]  ;;  %v150_v12 = vld [vmem:[%s19186_s1 + $0x188] sm:$0xff] }
  0x1a   :  { %10297 = vmatprep.mubr.msk.f32.mxu1 %vm166_vm1, %v141_v51  ;;  %v8175_v8 = vld [vmem:[%s19188_s9 + $0x98] sm:$0xff]  ;;  %v36_v13 = vld [vmem:[%s19189_s0 + $0x8] sm:$0xff]  ;;  %v37_v15 = vld [vmem:[%s19189_s0 + $0x10] sm:$0xff] }
  0x1b   :  { %8302 = vrot.lane.b32.xlu1 %v8165_v42, %s11870_s24  ;;  %v8177_v14 = vld [vmem:[%s19188_s9 + $0xa8] sm:$0xff]  ;;  %v8180_v16 = vld [vmem:[%s19188_s9 + $0xc0] sm:$0xff]  ;;  %v151_v17 = vld [vmem:[%s19186_s1 + $0x190] sm:$0xff] }
  0x1c   :  { %10256 = vmatmul.mubr.msk.f32.gmra.mrb[12].mxu0 %vm166_vm1, %v114_v19  ;;  %8308 = vrot.lane.b32.xlu0 %v8168_v44, %s11870_s24  ;;  %v152_v18 = vld [vmem:[%s19186_s1 + $0x198] sm:$0xff]  ;;  %v8182_v22 = vld [vmem:[%s19188_s9 + $0xd0] sm:$0xff]  ;;  %v154_v24 = vld [vmem:[%s19186_s1 + $0x1a8] sm:$0xff] }
  0x1d   :  { %10258 = vmatprep.mubr.msk.f32.mxu0 %vm166_vm1, %v115_v21  ;;  %10298 = vmatmul.mubr.msk.f32.gmra.mrb[8].mxu1 %vm166_vm1, %v142_v52  ;;  %v38_v19 = vld [vmem:[%s19189_s0 + $0x18] sm:$0xff]  ;;  %v39_v21 = vld [vmem:[%s19189_s0 + $0x20] sm:$0xff]  ;;  %v8181_v26 = vld [vmem:[%s19188_s9 + $0xc8] sm:$0xff] }
  0x1e   :  { %10300 = vmatprep.mubr.msk.f32.mxu1 %vm166_vm1, %v143_v57  ;;  %v8179_v20 = vld [vmem:[%s19188_s9 + $0xb8] sm:$0xff]  ;;  %v41_v27 = vld [vmem:[%s19189_s0 + $0x30] sm:$0xff]  ;;  %v44_v33 = vld [vmem:[%s19189_s0 + $0x48] sm:$0xff] }
  0x1f   :  { %8306 = vrot.lane.b32.xlu1 %v8167_v48, %s11870_s24  ;;  %v42_v29 = vld [vmem:[%s19189_s0 + $0x38] sm:$0xff]  ;;  %v8186_v32 = vld [vmem:[%s19188_s9 + $0xf0] sm:$0xff]  ;;  %v8185_v34 = vld [vmem:[%s19188_s9 + $0xe8] sm:$0xff] }
  0x20   :  { %10259 = vmatmul.mubr.msk.f32.gmra.mrb[14].mxu0 %vm166_vm1, %v116_v23  ;;  %8312 = vrot.lane.b32.xlu0 %v8170_v50, %s11870_s24  ;;  %v153_v23 = vld [vmem:[%s19186_s1 + $0x1a0] sm:$0xff]  ;;  %v8183_v30 = vld [vmem:[%s19188_s9 + $0xd8] sm:$0xff]  ;;  %v8190_v40 = vld [vmem:[%s19188_s9 + $0x110] sm:$0xff] }
  0x21   :  { %10261 = vmatprep.mubr.msk.f32.mxu0 %vm166_vm1, %v117_v25  ;;  %10301 = vmatmul.mubr.msk.f32.gmra.mrb[10].mxu1 %vm166_vm1, %v144_v58  ;;  %v40_v25 = vld [vmem:[%s19189_s0 + $0x28] sm:$0xff]  ;;  %v8188_v36 = vld [vmem:[%s19188_s9 + $0x100] sm:$0xff]  ;;  %v8187_v38 = vld [vmem:[%s19188_s9 + $0xf8] sm:$0xff] }
  0x22   :  { %10303 = vmatprep.mubr.msk.f32.mxu1 %vm166_vm1, %v145_v63  ;;  %v47_v39 = vld [vmem:[%s19189_s0 + $0x60] sm:$0xff]  ;;  %v8189_v42 = vld [vmem:[%s19188_s9 + $0x108] sm:$0xff]  ;;  %v50_v45 = vld [vmem:[%s19189_s0 + $0x78] sm:$0xff] }
  0x23   :  { %8310 = vrot.lane.b32.xlu1 %v8169_v54, %s11870_s24  ;;  %v8192_v44 = vld [vmem:[%s19188_s9 + $0x120] sm:$0xff]  ;;  %v8191_v46 = vld [vmem:[%s19188_s9 + $0x118] sm:$0xff]  ;;  %v8194_v48 = vld [vmem:[%s19188_s9 + $0x130] sm:$0xff] }
  0x24   :  { %10262 = vmatmul.mubr.msk.f32.gmra.mrb[16].mxu0 %vm166_vm1, %v118_v28  ;;  %8316 = vrot.lane.b32.xlu0 %v8172_v56, %s11870_s24  ;;  %v8184_v28 = vld [vmem:[%s19188_s9 + $0xe0] sm:$0xff]  ;;  %v8193_v50 = vld [vmem:[%s19188_s9 + $0x128] sm:$0xff]  ;;  %v53_v51 = vld [vmem:[%s19189_s0 + $0x90] sm:$0xff] }
  0x25   :  { %10264 = vmatprep.mubr.msk.f32.mxu0 %vm166_vm1, %v119_v31  ;;  %10304 = vmatmul.mubr.msk.f32.gmra.mrb[12].mxu1 %vm166_vm1, %v146_v0  ;;  %v43_v31 = vld [vmem:[%s19189_s0 + $0x40] sm:$0xff]  ;;  %v8195_v54 = vld [vmem:[%s19188_s9 + $0x138] sm:$0xff]  ;;  %v8198_v56 = vld [vmem:[%s19188_s9 + $0x150] sm:$0xff] }
  0x26   :  { %10306 = vmatprep.mubr.msk.f32.mxu1 %vm166_vm1, %v147_v5  ;;  %v8196_v52 = vld [vmem:[%s19188_s9 + $0x140] sm:$0xff]  ;;  %v56_v57 = vld [vmem:[%s19189_s0 + $0xa8] sm:$0xff]  ;;  %v8202_v0 = vld [vmem:[%s19188_s9 + $0x170] sm:$0xff] }
  0x27   :  { %8314 = vrot.lane.b32.xlu1 %v8171_v60, %s11870_s24  ;;  %v8197_v58 = vld [vmem:[%s19188_s9 + $0x148] sm:$0xff]  ;;  %v8200_v60 = vld [vmem:[%s19188_s9 + $0x160] sm:$0xff]  ;;  %v62_v5 = vld [vmem:[%s19189_s0 + $0xd8] sm:$0xff] }
  0x28   :  { %10265 = vmatmul.mubr.msk.f32.gmra.mrb[18].mxu0 %vm166_vm1, %v120_v35  ;;  %8320 = vrot.lane.b32.xlu0 %v8174_v62, %s11870_s24  ;;  %v45_v35 = vld [vmem:[%s19189_s0 + $0x50] sm:$0xff]  ;;  %v8199_v62 = vld [vmem:[%s19188_s9 + $0x158] sm:$0xff]  ;;  %v59_v63 = vld [vmem:[%s19189_s0 + $0xc0] sm:$0xff] }
  0x29   :  { %10267 = vmatprep.mubr.msk.f32.mxu0 %vm166_vm1, %v121_v37  ;;  %10307 = vmatmul.mubr.msk.f32.gmra.mrb[14].mxu1 %vm166_vm1, %v148_v6  ;;  %v46_v37 = vld [vmem:[%s19189_s0 + $0x58] sm:$0xff] }
  0x2a   :  { %10309 = vmatprep.mubr.msk.f32.mxu1 %vm166_vm1, %v149_v11  ;;  %v8203_v6 = vld [vmem:[%s19188_s9 + $0x178] sm:$0xff]  ;;  %v65_v11 = vld [vmem:[%s19189_s0 + $0xf0] sm:$0xff] }
  0x2b   :  { %8318 = vrot.lane.b32.xlu1 %v8173_v2, %s11870_s24  ;;  %v8201_v2 = vld [vmem:[%s19188_s9 + $0x168] sm:$0xff] }
  0x2c   :  { %10268 = vmatmul.mubr.msk.f32.gmra.mrb[20].mxu0 %vm166_vm1, %v122_v41  ;;  %8324 = vrot.lane.b32.xlu0 %v8176_v4, %s11870_s24  ;;  %v48_v41 = vld [vmem:[%s19189_s0 + $0x68] sm:$0xff]  ;;  %v8204_v4 = vld [vmem:[%s19188_s9 + $0x180] sm:$0xff] }
  0x2d   :  { %10270 = vmatprep.mubr.msk.f32.mxu0 %vm166_vm1, %v123_v43  ;;  %10310 = vmatmul.mubr.msk.f32.gmra.mrb[16].mxu1 %vm166_vm1, %v150_v12  ;;  %v49_v43 = vld [vmem:[%s19189_s0 + $0x70] sm:$0xff]  ;;  %v8208_v12 = vld [vmem:[%s19188_s9 + $0x1a0] sm:$0xff] }
  0x2e   :  { %10312 = vmatprep.mubr.msk.f32.mxu1 %vm166_vm1, %v151_v17  ;;  %v68_v17 = vld [vmem:[%s19189_s0 + $0x108] sm:$0xff] }
  0x2f   :  { %8322 = vrot.lane.b32.xlu1 %v8175_v8, %s11870_s24  ;;  %v8206_v8 = vld [vmem:[%s19188_s9 + $0x190] sm:$0xff] }
  0x30   :  { %10271 = vmatmul.mubr.msk.f32.gmra.mrb[22].mxu0 %vm166_vm1, %v124_v47  ;;  %8328 = vrot.lane.b32.xlu0 %v8178_v10, %s11870_s24  ;;  %v51_v47 = vld [vmem:[%s19189_s0 + $0x80] sm:$0xff]  ;;  %v8205_v10 = vld [vmem:[%s19188_s9 + $0x188] sm:$0xff] }
  0x31   :  { %10273 = vmatprep.mubr.msk.f32.mxu0 %vm166_vm1, %v125_v49  ;;  %10313 = vmatmul.mubr.msk.f32.gmra.mrb[18].mxu1 %vm166_vm1, %v152_v18  ;;  %v52_v49 = vld [vmem:[%s19189_s0 + $0x88] sm:$0xff] }
  0x32   :  { %10315 = vmatprep.mubr.msk.f32.mxu1 %vm166_vm1, %v153_v23  ;;  %v8209_v18 = vld [vmem:[%s19188_s9 + $0x1a8] sm:$0xff]  ;;  %v71_v23 = vld [vmem:[%s19189_s0 + $0x120] sm:$0xff] }
  0x33   :  { %8326 = vrot.lane.b32.xlu1 %v8177_v14, %s11870_s24  ;;  %v8207_v14 = vld [vmem:[%s19188_s9 + $0x198] sm:$0xff] }
  0x34   :  { %10274 = vmatmul.mubr.msk.f32.gmra.mrb[24].mxu0 %vm166_vm1, %v126_v53  ;;  %8332 = vrot.lane.b32.xlu0 %v8180_v16, %s11870_s24  ;;  %v54_v53 = vld [vmem:[%s19189_s0 + $0x98] sm:$0xff]  ;;  %v8210_v16 = vld [vmem:[%s19188_s9 + $0x1b0] sm:$0xff] }
  0x35   :  { %10276 = vmatprep.mubr.msk.f32.mxu0 %vm166_vm1, %v127_v55  ;;  %10316 = vmatmul.mubr.msk.f32.gmra.mrb[20].mxu1 %vm166_vm1, %v154_v24  ;;  %v55_v55 = vld [vmem:[%s19189_s0 + $0xa0] sm:$0xff]  ;;  %v72_v24 = vld [vmem:[%s19189_s0 + $0x128] sm:$0xff] }
  0x37   :  { %8330 = vrot.lane.b32.xlu1 %v8179_v20, %s11870_s24  ;;  %v8212_v20 = vld [vmem:[%s19188_s9 + $0x1c0] sm:$0xff] }
  0x38   :  { %10277 = vmatmul.mubr.msk.f32.gmra.mrb[26].mxu0 %vm166_vm1, %v128_v59  ;;  %8336 = vrot.lane.b32.xlu0 %v8182_v22, %s11870_s24  ;;  %v57_v59 = vld [vmem:[%s19189_s0 + $0xb0] sm:$0xff]  ;;  %v8211_v22 = vld [vmem:[%s19188_s9 + $0x1b8] sm:$0xff] }
  0x39   :  { %10279 = vmatprep.mubr.msk.f32.mxu0 %vm166_vm1, %v129_v61  ;;  %v58_v61 = vld [vmem:[%s19189_s0 + $0xb8] sm:$0xff] }
  0x3b   :  { %8334 = vrot.lane.b32.xlu1 %v8181_v26, %s11870_s24  ;;  %v73_v26 = vld [vmem:[%s19189_s0 + $0x130] sm:$0xff] }
  0x3c   :  { %10280 = vmatmul.mubr.msk.f32.gmra.mrb[28].mxu0 %vm166_vm1, %v130_v1  ;;  %8340 = vrot.lane.b32.xlu0 %v8184_v28, %s11870_s24  ;;  %v60_v1 = vld [vmem:[%s19189_s0 + $0xc8] sm:$0xff]  ;;  %v75_v28 = vld [vmem:[%s19189_s0 + $0x140] sm:$0xff] }
  0x3d   :  { %10282 = vmatprep.mubr.msk.f32.mxu0 %vm166_vm1, %v131_v3  ;;  %v61_v3 = vld [vmem:[%s19189_s0 + $0xd0] sm:$0xff] }
  0x3f   :  { %8338 = vrot.lane.b32.xlu1 %v8183_v30, %s11870_s24  ;;  %v77_v30 = vld [vmem:[%s19189_s0 + $0x150] sm:$0xff] }
  0x40   :  { %10283 = vmatmul.mubr.msk.f32.gmra.mrb[30].mxu0 %vm166_vm1, %v132_v7  ;;  %8344 = vrot.lane.b32.xlu0 %v8186_v32, %s11870_s24  ;;  %v63_v7 = vld [vmem:[%s19189_s0 + $0xe0] sm:$0xff] }
  0x41   :  { %10337 = vmatprep.mubr.msk.f32.mxu0 %vm748_vm2, %v35_v9  ;;  %v64_v9 = vld [vmem:[%s19189_s0 + $0xe8] sm:$0xff]  ;;  %v79_v32 = vld [vmem:[%s19189_s0 + $0x160] sm:$0xff] }
  0x43   :  { %8342 = vrot.lane.b32.xlu1 %v8185_v34, %s11870_s24  ;;  %v156_v34 = vld [vmem:[%s19186_s1 + $0x1b8] sm:$0xff] }
  0x44   :  { %10338 = vmatmul.mubr.msk.f32.vlgmr.msra.gmra.mrb[0].mxu0 %vm748_vm2, %v36_v13  ;;  %8348 = vrot.lane.b32.xlu0 %v8188_v36, %s11870_s24  ;;  %v66_v13 = vld [vmem:[%s19189_s0 + $0xf8] sm:$0xff]  ;;  %v81_v36 = vld [vmem:[%s19189_s0 + $0x170] sm:$0xff] }
  0x45   :  { %10340 = vmatprep.mubr.msk.f32.mxu0 %vm748_vm2, %v37_v15  ;;  %v67_v15 = vld [vmem:[%s19189_s0 + $0x100] sm:$0xff] }
  0x47   :  { %8346 = vrot.lane.b32.xlu1 %v8187_v38, %s11870_s24  ;;  %v83_v38 = vld [vmem:[%s19189_s0 + $0x180] sm:$0xff] }
  0x48   :  { %10341 = vmatmul.mubr.msk.f32.gmra.mrb[2].mxu0 %vm748_vm2, %v38_v19  ;;  %8352 = vrot.lane.b32.xlu0 %v8190_v40, %s11870_s24  ;;  %v69_v19 = vld [vmem:[%s19189_s0 + $0x110] sm:$0xff]  ;;  %v158_v40 = vld [vmem:[%s19186_s1 + $0x1c8] sm:$0xff] }
  0x49   :  { %10343 = vmatprep.mubr.msk.f32.mxu0 %vm748_vm2, %v39_v21  ;;  %v70_v21 = vld [vmem:[%s19189_s0 + $0x118] sm:$0xff] }
  0x4b   :  { %8350 = vrot.lane.b32.xlu1 %v8189_v42, %s11870_s24  ;;  %v85_v42 = vld [vmem:[%s19189_s0 + $0x190] sm:$0xff] }
  0x4c   :  { %10344 = vmatmul.mubr.msk.f32.gmra.mrb[4].mxu0 %vm748_vm2, %v40_v25  ;;  %8356 = vrot.lane.b32.xlu0 %v8192_v44, %s11870_s24  ;;  %v8213_v25 = vld [vmem:[%s19188_s9 + $0x1c8] sm:$0xff]  ;;  %v87_v44 = vld [vmem:[%s19189_s0 + $0x1a0] sm:$0xff] }
  0x4d   :  { %10346 = vmatprep.mubr.msk.f32.mxu0 %vm748_vm2, %v41_v27  ;;  %v74_v27 = vld [vmem:[%s19189_s0 + $0x138] sm:$0xff] }
  0x4f   :  { %8354 = vrot.lane.b32.xlu1 %v8191_v46, %s11870_s24  ;;  %v160_v46 = vld [vmem:[%s19186_s1 + $0x1d8] sm:$0xff] }
  0x50   :  { %10347 = vmatmul.mubr.msk.f32.gmra.mrb[6].mxu0 %vm748_vm2, %v42_v29  ;;  %8360 = vrot.lane.b32.xlu0 %v8194_v48, %s11870_s24  ;;  %v76_v29 = vld [vmem:[%s19189_s0 + $0x148] sm:$0xff]  ;;  %v89_v48 = vld [vmem:[%s19189_s0 + $0x1b0] sm:$0xff] }
  0x51   :  { %10349 = vmatprep.mubr.msk.f32.mxu0 %vm748_vm2, %v43_v31  ;;  %v78_v31 = vld [vmem:[%s19189_s0 + $0x158] sm:$0xff] }
  0x53   :  { %8358 = vrot.lane.b32.xlu1 %v8193_v50, %s11870_s24  ;;  %v91_v50 = vld [vmem:[%s19189_s0 + $0x1c0] sm:$0xff] }
  0x54   :  { %10350 = vmatmul.mubr.msk.f32.gmra.mrb[8].mxu0 %vm748_vm2, %v44_v33  ;;  %8364 = vrot.lane.b32.xlu0 %v8196_v52, %s11870_s24  ;;  %v155_v33 = vld [vmem:[%s19186_s1 + $0x1b0] sm:$0xff]  ;;  %v162_v52 = vld [vmem:[%s19186_s1 + $0x1e8] sm:$0xff] }
  0x55   :  { %10352 = vmatprep.mubr.msk.f32.mxu0 %vm748_vm2, %v45_v35  ;;  %10318 = vmatprep.mubr.msk.f32.mxu1 %vm166_vm1, %v155_v33  ;;  %v80_v35 = vld [vmem:[%s19189_s0 + $0x168] sm:$0xff] }
  0x56   :  { %10319 = vmatmul.mubr.msk.f32.gmra.mrb[22].mxu1 %vm166_vm1, %v156_v34 }
  0x57   :  { %8362 = vrot.lane.b32.xlu1 %v8195_v54, %s11870_s24  ;;  %v93_v54 = vld [vmem:[%s19189_s0 + $0x1d0] sm:$0xff] }
  0x58   :  { %10353 = vmatmul.mubr.msk.f32.gmra.mrb[10].mxu0 %vm748_vm2, %v46_v37  ;;  %8368 = vrot.lane.b32.xlu0 %v8198_v56, %s11870_s24  ;;  %v82_v37 = vld [vmem:[%s19189_s0 + $0x178] sm:$0xff]  ;;  %v95_v56 = vld [vmem:[%s19189_s0 + $0x1e0] sm:$0xff] }
  0x59   :  { %10355 = vmatprep.mubr.msk.f32.mxu0 %vm748_vm2, %v47_v39  ;;  %v157_v39 = vld [vmem:[%s19186_s1 + $0x1c0] sm:$0xff] }
  0x5a   :  { %10321 = vmatprep.mubr.msk.f32.mxu1 %vm166_vm1, %v157_v39 }
  0x5b   :  { %8366 = vrot.lane.b32.xlu1 %v8197_v58, %s11870_s24  ;;  %10322 = vmatmul.mubr.msk.f32.gmra.mrb[24].mxu1 %vm166_vm1, %v158_v40  ;;  %v164_v58 = vld [vmem:[%s19186_s1 + $0x1f8] sm:$0xff] }
  0x5c   :  { %10356 = vmatmul.mubr.msk.f32.gmra.mrb[12].mxu0 %vm748_vm2, %v48_v41  ;;  %8372 = vrot.lane.b32.xlu0 %v8200_v60, %s11870_s24  ;;  %v84_v41 = vld [vmem:[%s19189_s0 + $0x188] sm:$0xff]  ;;  %v97_v60 = vld [vmem:[%s19189_s0 + $0x1f0] sm:$0xff] }
  0x5d   :  { %10358 = vmatprep.mubr.msk.f32.mxu0 %vm748_vm2, %v49_v43  ;;  %v86_v43 = vld [vmem:[%s19189_s0 + $0x198] sm:$0xff] }
  0x5f   :  { %8370 = vrot.lane.b32.xlu1 %v8199_v62, %s11870_s24 }
  0x60   :  { %10359 = vmatmul.mubr.msk.f32.gmra.mrb[14].mxu0 %vm748_vm2, %v50_v45  ;;  %8376 = vrot.lane.b32.xlu0 %v8202_v0, %s11870_s24  ;;  %v159_v45 = vld [vmem:[%s19186_s1 + $0x1d0] sm:$0xff] }
  0x61   :  { %10361 = vmatprep.mubr.msk.f32.mxu0 %vm748_vm2, %v51_v47  ;;  %10324 = vmatprep.mubr.msk.f32.mxu1 %vm166_vm1, %v159_v45  ;;  %v88_v47 = vld [vmem:[%s19189_s0 + $0x1a8] sm:$0xff] }
  0x62   :  { %10325 = vmatmul.mubr.msk.f32.gmra.mrb[26].mxu1 %vm166_vm1, %v160_v46 }
  0x63   :  { %8374 = vrot.lane.b32.xlu1 %v8201_v2, %s11870_s24 }
  0x64   :  { %10362 = vmatmul.mubr.msk.f32.gmra.mrb[16].mxu0 %vm748_vm2, %v52_v49  ;;  %8380 = vrot.lane.b32.xlu0 %v8204_v4, %s11870_s24  ;;  %v90_v49 = vld [vmem:[%s19189_s0 + $0x1b8] sm:$0xff] }
  0x65   :  { %10364 = vmatprep.mubr.msk.f32.mxu0 %vm748_vm2, %v53_v51  ;;  %v161_v51 = vld [vmem:[%s19186_s1 + $0x1e0] sm:$0xff] }
  0x66   :  { %10327 = vmatprep.mubr.msk.f32.mxu1 %vm166_vm1, %v161_v51 }
  0x67   :  { %8378 = vrot.lane.b32.xlu1 %v8203_v6, %s11870_s24  ;;  %10328 = vmatmul.mubr.msk.f32.gmra.mrb[28].mxu1 %vm166_vm1, %v162_v52 }
  0x68   :  { %10365 = vmatmul.mubr.msk.f32.gmra.mrb[18].mxu0 %vm748_vm2, %v54_v53  ;;  %8384 = vrot.lane.b32.xlu0 %v8206_v8, %s11870_s24  ;;  %v92_v53 = vld [vmem:[%s19189_s0 + $0x1c8] sm:$0xff] }
  0x69   :  { %10367 = vmatprep.mubr.msk.f32.mxu0 %vm748_vm2, %v55_v55  ;;  %v94_v55 = vld [vmem:[%s19189_s0 + $0x1d8] sm:$0xff] }
  0x6b   :  { %8382 = vrot.lane.b32.xlu1 %v8205_v10, %s11870_s24 }
  0x6c   :  { %10368 = vmatmul.mubr.msk.f32.gmra.mrb[20].mxu0 %vm748_vm2, %v56_v57  ;;  %8388 = vrot.lane.b32.xlu0 %v8208_v12, %s11870_s24  ;;  %v163_v57 = vld [vmem:[%s19186_s1 + $0x1f0] sm:$0xff] }
  0x6d   :  { %10370 = vmatprep.mubr.msk.f32.mxu0 %vm748_vm2, %v57_v59  ;;  %10330 = vmatprep.mubr.msk.f32.mxu1 %vm166_vm1, %v163_v57  ;;  %v96_v59 = vld [vmem:[%s19189_s0 + $0x1e8] sm:$0xff] }
  0x6e   :  { %10331 = vmatmul.mubr.msk.f32.gmra.mrb[30].mxu1 %vm166_vm1, %v164_v58 }
  0x6f   :  { %8386 = vrot.lane.b32.xlu1 %v8207_v14, %s11870_s24  ;;  %v2743_v14 = vld [vmem:[%s19191_s5 + $0x8] sm:$0xff] }
  0x70   :  { %10371 = vmatmul.mubr.msk.f32.gmra.mrb[22].mxu0 %vm748_vm2, %v58_v61  ;;  %8392 = vrot.lane.b32.xlu0 %v8210_v16, %s11870_s24  ;;  %v98_v61 = vld [vmem:[%s19189_s0 + $0x1f8] sm:$0xff] }
  0x71   :  { %10373 = vmatprep.mubr.msk.f32.mxu0 %vm748_vm2, %v59_v63 }
  0x73   :  { %8390 = vrot.lane.b32.xlu1 %v8209_v18, %s11870_s24 }
  0x74   :  { %10374 = vmatmul.mubr.msk.f32.gmra.mrb[24].mxu0 %vm748_vm2, %v60_v1  ;;  %8396 = vrot.lane.b32.xlu0 %v8212_v20, %s11870_s24 }
  0x75   :  { %10376 = vmatprep.mubr.msk.f32.mxu0 %vm748_vm2, %v61_v3 }
  0x77   :  { %8394 = vrot.lane.b32.xlu1 %v8211_v22, %s11870_s24 }
  0x78   :  { %10377 = vmatmul.mubr.msk.f32.gmra.mrb[26].mxu0 %vm748_vm2, %v62_v5 }
  0x79   :  { %10379 = vmatprep.mubr.msk.f32.mxu0 %vm748_vm2, %v63_v7  ;;  %v12684_v62 = vpop.permute.xlu1 %8286 }
  0x7a   :  { %19327 = vst [vmem:[#allocation2_spill] sm:$0xff] %v12684_v62  ;;  %v12686_v63 = vpop.permute.xlu0 %8284 }
  0x7b   :  { %8398 = vrot.lane.b32.xlu1 %v8213_v25, %s11870_s24  ;;  %19328 = vst [vmem:[#allocation3_spill] sm:$0xff] %v12686_v63 }
  0x7c   :  { %10380 = vmatmul.mubr.msk.f32.gmra.mrb[28].mxu0 %vm748_vm2, %v64_v9 }
  0x7d   :  { %10382 = vmatprep.mubr.msk.f32.mxu0 %vm748_vm2, %v65_v11  ;;  %v12688_v0 = vpop.permute.xlu1 %8288  ;;  %v12713_v11 = vld [vmem:[%s19190_s4] ss:$0 sm:$0xff] }
  0x7e   :  { %19329 = vst [vmem:[#allocation4_spill] sm:$0xff] %v12688_v0  ;;  %v12690_v1 = vpop.permute.xlu0 %8292 }
  0x7f   :  { %19330 = vst [vmem:[#allocation5_spill] sm:$0xff] %v12690_v1 }
  0x80   :  { %10383 = vmatmul.mubr.msk.f32.gmra.mrb[30].mxu0 %vm748_vm2, %v66_v13  ;;  %v2742_v13 = vld [vmem:[%s19191_s5] sm:$0xff] }
  0x81   :  { %10385 = vmatprep.mubr.msk.f32.mxu0 %vm748_vm2, %v67_v15  ;;  %v12692_v2 = vpop.permute.xlu1 %8290 }
  0x82   :  { %19331 = vst [vmem:[#allocation6_spill] sm:$0xff] %v12692_v2  ;;  %v12694_v3 = vpop.permute.xlu0 %8296 }
  0x83   :  { %19332 = vst [vmem:[#allocation7_spill] sm:$0xff] %v12694_v3 }
  0x84   :  { %10386 = vmatmul.mubr.msk.f32.gmra.mrb[32].mxu0 %vm748_vm2, %v68_v17  ;;  %v10749_v17 = vpack.c.bf16 %v2743_v14, %v2742_v13 }
  0x85   :  { %10388 = vmatprep.mubr.msk.f32.mxu0 %vm748_vm2, %v69_v19  ;;  %v12696_v4 = vpop.permute.xlu1 %8294 }
  0x86   :  { %19333 = vst [vmem:[#allocation8_spill] sm:$0xff] %v12696_v4  ;;  %v12698_v5 = vpop.permute.xlu0 %8300  ;;  %10750 = vmatprep.subr.bf16.mxu1 %v10749_v17 }
  0x87   :  { %19334 = vst [vmem:[#allocation9_spill] sm:$0xff] %v12698_v5  ;;  %10752 = vmatpush3.bf16.msra.mxu1 %v10749_v17 }
  0x88   :  { %10389 = vmatmul.mubr.msk.f32.gmra.mrb[34].mxu0 %vm748_vm2, %v70_v21 }
  0x89   :  { %10391 = vmatprep.mubr.msk.f32.mxu0 %vm748_vm2, %v71_v23  ;;  %v12700_v6 = vpop.permute.xlu1 %8298 }
  0x8a   :  { %19335 = vst [vmem:[#allocation10_spill] sm:$0xff] %v12700_v6  ;;  %v12702_v7 = vpop.permute.xlu0 %8304 }
  0x8b   :  { %19336 = vst [vmem:[#allocation11_spill] sm:$0xff] %v12702_v7 }
  0x8c   :  { %10392 = vmatmul.mubr.msk.f32.gmra.mrb[36].mxu0 %vm748_vm2, %v72_v24 }
  0x8d   :  { %10394 = vmatprep.mubr.msk.f32.mxu0 %vm748_vm2, %v73_v26  ;;  %v12706_v9 = vpop.permute.xlu1 %8302 }
  0x8e   :  { %19337 = vst [vmem:[#allocation12_spill] sm:$0xff] %v12706_v9  ;;  %v12729_v20 = vpop.permute.xlu0 %8308 }
  0x8f   :  { %19339 = vst [vmem:[#allocation14_spill] sm:$0xff] %v12729_v20 }
  0x90   :  { %10395 = vmatmul.mubr.msk.f32.gmra.mrb[38].mxu0 %vm748_vm2, %v74_v27 }
  0x91   :  { %10397 = vmatprep.mubr.msk.f32.mxu0 %vm748_vm2, %v75_v28  ;;  %v12727_v19 = vpop.permute.xlu1 %8306 }
  0x92   :  { %19338 = vst [vmem:[#allocation13_spill] sm:$0xff] %v12727_v19  ;;  %v12747_v33 = vpop.permute.xlu0 %8312 }
  0x93   :  { %19340 = vst [vmem:[#allocation15_spill] sm:$0xff] %v12747_v33 }
  0x94   :  { %10398 = vmatmul.mubr.msk.f32.gmra.mrb[40].mxu0 %vm748_vm2, %v76_v29 }
  0x95   :  { %10400 = vmatprep.mubr.msk.f32.mxu0 %vm748_vm2, %v77_v30 }
  0x98   :  { %10401 = vmatmul.mubr.msk.f32.gmra.mrb[42].mxu0 %vm748_vm2, %v78_v31 }
  0x99   :  { %10403 = vmatprep.mubr.msk.f32.mxu0 %vm748_vm2, %v79_v32 }
  0x9c   :  { %10404 = vmatmul.mubr.msk.f32.gmra.mrb[44].mxu0 %vm748_vm2, %v80_v35 }
  0x9d   :  { %10406 = vmatprep.mubr.msk.f32.mxu0 %vm748_vm2, %v81_v36  ;;  %v12754_v36 = vpop.permute.xlu1 %8310 }
  0x9e   :  { %19341 = vst [vmem:[#allocation16_spill] sm:$0xff] %v12754_v36 }
  0xa0   :  { %10407 = vmatmul.mubr.msk.f32.gmra.mrb[46].mxu0 %vm748_vm2, %v82_v37 }
  0xa1   :  { %10409 = vmatprep.mubr.msk.f32.mxu0 %vm748_vm2, %v83_v38  ;;  %v12776_v51 = vpop.permute.xlu1 %8314 }
  0xa2   :  { %19343 = vst [vmem:[#allocation18_spill] sm:$0xff] %v12776_v51 }
  0xa4   :  { %10410 = vmatmul.mubr.msk.f32.gmra.mrb[48].mxu0 %vm748_vm2, %v84_v41 }
  0xa5   :  { %10412 = vmatprep.mubr.msk.f32.mxu0 %vm748_vm2, %v85_v42 }
  0xa8   :  { %10413 = vmatmul.mubr.msk.f32.gmra.mrb[50].mxu0 %vm748_vm2, %v86_v43 }
  0xa9   :  { %10415 = vmatprep.mubr.msk.f32.mxu0 %vm748_vm2, %v87_v44 }
  0xac   :  { %10416 = vmatmul.mubr.msk.f32.gmra.mrb[52].mxu0 %vm748_vm2, %v88_v47 }
  0xad   :  { %10418 = vmatprep.mubr.msk.f32.mxu0 %vm748_vm2, %v89_v48  ;;  %v12774_v48 = vpop.permute.xlu0 %8316 }
  0xae   :  { %19342 = vst [vmem:[#allocation17_spill] sm:$0xff] %v12774_v48 }
  0xb0   :  { %10419 = vmatmul.mubr.msk.f32.gmra.mrb[54].mxu0 %vm748_vm2, %v90_v49 }
  0xb1   :  { %10421 = vmatprep.mubr.msk.f32.mxu0 %vm748_vm2, %v91_v50  ;;  %v12785_v58 = vpop.permute.xlu0 %8320 }
  0xb2   :  { %19344 = vst [vmem:[#allocation19_spill] sm:$0xff] %v12785_v58 }
  0xb4   :  { %10422 = vmatmul.mubr.msk.f32.gmra.mrb[56].mxu0 %vm748_vm2, %v92_v53 }
  0xb5   :  { %10424 = vmatprep.mubr.msk.f32.mxu0 %vm748_vm2, %v93_v54 }
  0xb8   :  { %10425 = vmatmul.mubr.msk.f32.gmra.mrb[58].mxu0 %vm748_vm2, %v94_v55 }
  0xb9   :  { %10427 = vmatprep.mubr.msk.f32.mxu0 %vm748_vm2, %v95_v56 }
  0xbc   :  { %10428 = vmatmul.mubr.msk.f32.gmra.mrb[60].mxu0 %vm748_vm2, %v96_v59 }
  0xbd   :  { %10430 = vmatprep.mubr.msk.f32.mxu0 %vm748_vm2, %v97_v60 }
  0xc0   :  { %10431 = vmatmul.mubr.msk.f32.gmra.mrb[62].mxu0 %vm748_vm2, %v98_v61 }
  0xe0   :  { %v12704_v8 = vpop.f32.mrb[0].mxu1 }
  0xe1   :  { %v12708_v10 = vpop.f32.mrb[1].mxu1 }
  0xe4   :  { %v12735_v24 = vpop.f32.mrb[2].mxu1 }
  0xe5   :  { %v12737_v26 = vpop.f32.mrb[3].mxu1 }
  0xe8   :  { %v12759_v40 = vpop.f32.mrb[4].mxu1 }
  0xe9   :  { %v12761_v42 = vpop.f32.mrb[5].mxu1 }
  0xec   :  { %v12783_v57 = vpop.f32.mrb[6].mxu1 }
  0xed   :  { %v12791_v61 = vpop.f32.mrb[7].mxu1 }
 0x117   :  { %v10339_v12 = vpop.f32.mrb[0].mxu0 }
 0x118   :  { %v12722_v15 = vadd.f32 %v10339_v12, %v12713_v11  ;;  %v1007_v16 = vpop.f32.mrb[1].mxu0 }
 0x119   :  { %v12725_v18 = vadd.f32 %v12713_v11, %v1007_v16  ;;  %v12800_v16 = vpop.permute.xlu1 %8318 }
 0x11a   :  { %v1401_v21 = vsel %vm1397_vm3, %v12722_v15, 0.0  ;;  %v1591_v30 = vmul.f32 %v12722_v15, %v12722_v15  ;;  %19345 = vst [vmem:[#allocation20_spill] sm:$0xff] %v12800_v16 }
 0x11b   :  { %1402 = vadd.xlane.f32.xlu0 %v1401_v21  ;;  %v10342_v22 = vpop.f32.mrb[2].mxu0  ;;  %v1590_v23 = vmul.f32 %v12725_v18, %v12725_v18  ;;  %v1398_v29 = vsel %vm1397_vm3, %v12725_v18, 0.0 }
 0x11c   :  { %v1017_v25 = vpop.f32.mrb[3].mxu0  ;;  %v12740_v27 = vadd.f32 %v10342_v22, %v12713_v11  ;;  %v1657_v37 = vsel %vm1397_vm3, %v1591_v30, 0.0 }
 0x11d   :  { %v1654_v28 = vsel %vm1397_vm3, %v1590_v23, 0.0  ;;  %v12750_v34 = vadd.f32 %v12713_v11, %v1017_v25 }
 0x11e   :  { %1655 = vadd.xlane.f32.xlu1 %v1654_v28  ;;  %v1407_v35 = vsel %vm1397_vm3, %v12740_v27, 0.0  ;;  %v1593_v38 = vmul.f32 %v12740_v27, %v12740_v27  ;;  %v12807_v28 = vpop.permute.xlu0 %8324 }
 0x11f   :  { %1399 = vadd.xlane.f32.xlu0 %v1398_v29  ;;  %v10345_v31 = vpop.f32.mrb[4].mxu0  ;;  %v1404_v43 = vsel %vm1397_vm3, %v12750_v34, 0.0  ;;  %v1592_v44 = vmul.f32 %v12750_v34, %v12750_v34  ;;  %19346 = vst [vmem:[#allocation21_spill] sm:$0xff] %v12807_v28 }
 0x120   :  { %v1027_v32 = vpop.f32.mrb[5].mxu0  ;;  %v12768_v45 = vadd.f32 %v10345_v31, %v12713_v11  ;;  %v1663_v47 = vsel %vm1397_vm3, %v1593_v38, 0.0  ;;  %v12813_v31 = vpop.f32.mrb[8].mxu1 }
 0x121   :  { %v12771_v46 = vadd.f32 %v12713_v11, %v1027_v32  ;;  %v1660_v52 = vsel %vm1397_vm3, %v1592_v44, 0.0  ;;  %v12815_v32 = vpop.permute.xlu1 %8322  ;;  %v12821_v38 = vpop.f32.mrb[9].mxu1 }
 0x122   :  { %1408 = vadd.xlane.f32.xlu1 %v1407_v35  ;;  %v1595_v54 = vmul.f32 %v12768_v45, %v12768_v45  ;;  %v1413_v59 = vsel %vm1397_vm3, %v12768_v45, 0.0  ;;  %19347 = vst [vmem:[#allocation22_spill] sm:$0xff] %v12815_v32 }
 0x123   :  { %1658 = vadd.xlane.f32.xlu0 %v1657_v37  ;;  %v10348_v39 = vpop.f32.mrb[6].mxu0  ;;  %v1410_v53 = vsel %vm1397_vm3, %v12771_v46, 0.0  ;;  %v1594_v60 = vmul.f32 %v12771_v46, %v12771_v46 }
 0x124   :  { %v1037_v41 = vpop.f32.mrb[7].mxu0  ;;  %v12794_v12 = vadd.f32 %v10348_v39, %v12713_v11  ;;  %v1669_v14 = vsel %vm1397_vm3, %v1595_v54, 0.0 }
 0x125   :  { %v12797_v13 = vadd.f32 %v12713_v11, %v1037_v41  ;;  %v1666_v22 = vsel %vm1397_vm3, %v1594_v60, 0.0  ;;  %v12841_v54 = vpop.permute.xlu1 %8326 }
 0x126   :  { %1405 = vadd.xlane.f32.xlu1 %v1404_v43  ;;  %v1597_v25 = vmul.f32 %v12794_v12, %v12794_v12  ;;  %v1419_v35 = vsel %vm1397_vm3, %v12794_v12, 0.0  ;;  %19349 = vst [vmem:[#allocation24_spill] sm:$0xff] %v12841_v54 }
 0x127   :  { %1664 = vadd.xlane.f32.xlu0 %v1663_v47  ;;  %v10351_v49 = vpop.f32.mrb[8].mxu0  ;;  %v1416_v23 = vsel %vm1397_vm3, %v12797_v13, 0.0  ;;  %v1596_v37 = vmul.f32 %v12797_v13, %v12797_v13 }
 0x128   :  { %v1047_v50 = vpop.f32.mrb[9].mxu0  ;;  %v12824_v39 = vadd.f32 %v10351_v49, %v12713_v11  ;;  %v1675_v43 = vsel %vm1397_vm3, %v1597_v25, 0.0 }
 0x129   :  { %v12827_v41 = vadd.f32 %v12713_v11, %v1047_v50 }
 0x12a   :  { %1661 = vadd.xlane.f32.xlu1 %v1660_v52  ;;  %v1672_v52 = vsel %vm1397_vm3, %v1596_v37, 0.0  ;;  %v1599_v50 = vmul.f32 %v12824_v39, %v12824_v39 }
 0x12b   :  { %1411 = vadd.xlane.f32.xlu0 %v1410_v53  ;;  %v10354_v55 = vpop.f32.mrb[10].mxu0  ;;  %v12835_v53 = vpop.permute.xlu0 %8328  ;;  %v1422_v49 = vsel %vm1397_vm3, %v12827_v41, 0.0 }
 0x12c   :  { %v1057_v56 = vpop.f32.mrb[11].mxu0  ;;  %19348 = vst [vmem:[#allocation23_spill] sm:$0xff] %v12835_v53  ;;  %v12854_v25 = vadd.f32 %v10354_v55, %v12713_v11  ;;  %v1681_v37 = vsel %vm1397_vm3, %v1599_v50, 0.0  ;;  %v12866_v53 = vpop.permute.xlu1 %8330 }
 0x12d   :  { %19350 = vst [vmem:[#allocation25_spill] sm:$0xff] %v12866_v53 }
 0x12e   :  { %1414 = vadd.xlane.f32.xlu1 %v1413_v59 }
 0x12f   :  { %1670 = vadd.xlane.f32.xlu0 %v1669_v14  ;;  %v10357_v17 = vpop.f32.mrb[12].mxu0  ;;  %v12847_v14 = vpop.f32.mrb[10].mxu1 }
 0x130   :  { %v1067_v21 = vpop.f32.mrb[13].mxu0  ;;  %v12869_v54 = vpop.permute.xlu0 %8332 }
 0x131   :  { %19351 = vst [vmem:[#allocation26_spill] sm:$0xff] %v12869_v54  ;;  %v12889_v54 = vadd.f32 %v12713_v11, %v1067_v21  ;;  %v12894_v32 = vpop.permute.xlu1 %8334  ;;  %v2745_v21 = vld [vmem:[%s19191_s5 + $0x18] sm:$0xff] }
 0x132   :  { %1667 = vadd.xlane.f32.xlu1 %v1666_v22  ;;  %v1425_v22 = vsel %vm1397_vm3, %v12824_v39, 0.0  ;;  %19352 = vst [vmem:[#allocation27_spill] sm:$0xff] %v12894_v32 }
 0x133   :  { %1417 = vadd.xlane.f32.xlu0 %v1416_v23  ;;  %v12809_v29 = vpop.f32.mrb[14].mxu0  ;;  %v1598_v23 = vmul.f32 %v12827_v41, %v12827_v41 }
 0x134   :  { %v12811_v30 = vpop.f32.mrb[15].mxu0  ;;  %v12898_v16 = vpop.permute.xlu0 %8336 }
 0x135   :  { %v1678_v28 = vsel %vm1397_vm3, %v1598_v23, 0.0  ;;  %19353 = vst [vmem:[#allocation28_spill] sm:$0xff] %v12898_v16  ;;  %v12917_v20 = vpop.permute.xlu1 %8338 }
 0x136   :  { %1420 = vadd.xlane.f32.xlu1 %v1419_v35  ;;  %v12857_v35 = vadd.f32 %v12713_v11, %v1057_v56  ;;  %v1601_v56 = vmul.f32 %v12854_v25, %v12854_v25  ;;  %19354 = vst [vmem:[#allocation29_spill] sm:$0xff] %v12917_v20 }
 0x137   :  { %1676 = vadd.xlane.f32.xlu0 %v1675_v43  ;;  %v12830_v44 = vpop.f32.mrb[16].mxu0  ;;  %v12860_v43 = vpop.f32.mrb[11].mxu1 }
 0x138   :  { %v12832_v47 = vpop.f32.mrb[17].mxu0  ;;  %v1428_v55 = vsel %vm1397_vm3, %v12857_v35, 0.0  ;;  %v1600_v23 = vmul.f32 %v12857_v35, %v12857_v35  ;;  %v12883_v53 = vpop.f32.mrb[12].mxu1  ;;  %v12963_v3 = vadd.f32 %v12830_v44, %v12713_v11 }
 0x139   :  { %v12892_v58 = vpop.f32.mrb[13].mxu1  ;;  %v12933_v36 = vpop.permute.xlu0 %8340 }
 0x13a   :  { %1673 = vadd.xlane.f32.xlu1 %v1672_v52  ;;  %19357 = vst [vmem:[#allocation32_spill] sm:$0xff] %v12933_v36  ;;  %v12947_v36 = vpop.permute.xlu1 %8342  ;;  %19360 = vst [vmem:[#allocation35_spill] sm:$0xff] %v12963_v3 }
 0x13b   :  { %1423 = vadd.xlane.f32.xlu0 %v1422_v49  ;;  %v12843_v59 = vpop.f32.mrb[18].mxu0  ;;  %19358 = vst [vmem:[#allocation33_spill] sm:$0xff] %v12947_v36 }
 0x13c   :  { %v12845_v60 = vpop.f32.mrb[19].mxu0 }
 0x13e   :  { %1426 = vadd.xlane.f32.xlu1 %v1425_v22  ;;  %v12975_v0 = vpop.permute.xlu1 %8346 }
 0x13f   :  { %1682 = vadd.xlane.f32.xlu0 %v1681_v37  ;;  %v12862_v52 = vpop.f32.mrb[20].mxu0  ;;  %v1431_v37 = vsel %vm1397_vm3, %v12854_v25, 0.0  ;;  %19362 = vst [vmem:[#allocation37_spill] sm:$0xff] %v12975_v0 }
 0x140   :  { %v12864_v49 = vpop.f32.mrb[21].mxu0 }
 0x142   :  { %1679 = vadd.xlane.f32.xlu1 %v1678_v28  ;;  %v12886_v28 = vadd.f32 %v10357_v17, %v12713_v11  ;;  %v2744_v17 = vld [vmem:[%s19191_s5 + $0x10] sm:$0xff]  ;;  %v13010_v0 = vpop.permute.xlu1 %8350 }
 0x143   :  { %1429 = vadd.xlane.f32.xlu0 %v1428_v55  ;;  %v12875_v50 = vpop.f32.mrb[22].mxu0  ;;  %v1687_v55 = vsel %vm1397_vm3, %v1601_v56, 0.0  ;;  %v1684_v56 = vsel %vm1397_vm3, %v1600_v23, 0.0  ;;  %19366 = vst [vmem:[#allocation41_spill] sm:$0xff] %v13010_v0 }
 0x144   :  { %v12877_v22 = vpop.f32.mrb[23].mxu0  ;;  %v1603_v16 = vmul.f32 %v12886_v28, %v12886_v28  ;;  %v1437_v23 = vsel %vm1397_vm3, %v12886_v28, 0.0 }
 0x146   :  { %1432 = vadd.xlane.f32.xlu1 %v1431_v37  ;;  %v10753_v37 = vpack.c.bf16 %v2745_v21, %v2744_v17  ;;  %v1602_v17 = vmul.f32 %v12889_v54, %v12889_v54  ;;  %v12923_v21 = vpop.f32.mrb[14].mxu1 }
 0x147   :  { %1688 = vadd.xlane.f32.xlu0 %v1687_v55  ;;  %v12896_v48 = vpop.f32.mrb[24].mxu0  ;;  %v1434_v55 = vsel %vm1397_vm3, %v12889_v54, 0.0  ;;  %v12936_v20 = vpop.f32.mrb[15].mxu1 }
 0x148   :  { %v12900_v33 = vpop.f32.mrb[25].mxu0  ;;  %10754 = vmatprep.subr.bf16.mxu1 %v10753_v37  ;;  %v1690_v5 = vsel %vm1397_vm3, %v1602_v17, 0.0  ;;  %v12959_v17 = vpop.f32.mrb[16].mxu1 }
 0x149   :  { %10756 = vmatpush3.bf16.msra.mxu1 %v10753_v37  ;;  %v1693_v37 = vsel %vm1397_vm3, %v1603_v16, 0.0  ;;  %v12970_v36 = vpop.f32.mrb[17].mxu1 }
 0x14a   :  { %1685 = vadd.xlane.f32.xlu1 %v1684_v56  ;;  %v12927_v56 = vadd.f32 %v12809_v29, %v12713_v11 }
 0x14b   :  { %1435 = vadd.xlane.f32.xlu0 %v1434_v55  ;;  %v12913_v32 = vpop.f32.mrb[26].mxu0  ;;  %v12931_v55 = vadd.f32 %v12713_v11, %v12811_v30 }
 0x14c   :  { %v12915_v51 = vpop.f32.mrb[27].mxu0  ;;  %19355 = vst [vmem:[#allocation30_spill] sm:$0xff] %v12927_v56  ;;  %v1605_v30 = vmul.f32 %v12927_v56, %v12927_v56  ;;  %v1443_v9 = vsel %vm1397_vm3, %v12927_v56, 0.0 }
 0x14d   :  { %19356 = vst [vmem:[#allocation31_spill] sm:$0xff] %v12931_v55  ;;  %v1440_v29 = vsel %vm1397_vm3, %v12931_v55, 0.0 }
 0x14e   :  { %1438 = vadd.xlane.f32.xlu1 %v1437_v23  ;;  %v12951_v23 = vpop.permute.xlu0 %8344 }
 0x14f   :  { %1694 = vadd.xlane.f32.xlu0 %v1693_v37  ;;  %v12938_v7 = vpop.f32.mrb[28].mxu0  ;;  %19359 = vst [vmem:[#allocation34_spill] sm:$0xff] %v12951_v23  ;;  %v1699_v23 = vsel %vm1397_vm3, %v1605_v30, 0.0  ;;  %v1607_v30 = vmul.f32 %v12963_v3, %v12963_v3 }
 0x150   :  { %v12940_v19 = vpop.f32.mrb[29].mxu0 }
 0x152   :  { %1691 = vadd.xlane.f32.xlu1 %v1690_v5  ;;  %v1604_v5 = vmul.f32 %v12931_v55, %v12931_v55 }
 0x153   :  { %1441 = vadd.xlane.f32.xlu0 %v1440_v29  ;;  %v12949_v16 = vpop.f32.mrb[30].mxu0  ;;  %v12967_v29 = vadd.f32 %v12713_v11, %v12832_v47  ;;  %v12981_v47 = vpop.permute.xlu0 %8348 }
 0x154   :  { %v12953_v37 = vpop.f32.mrb[31].mxu0  ;;  %v1696_v44 = vsel %vm1397_vm3, %v1604_v5, 0.0  ;;  %19363 = vst [vmem:[#allocation38_spill] sm:$0xff] %v12981_v47  ;;  %v1449_v5 = vsel %vm1397_vm3, %v12963_v3, 0.0  ;;  %v13001_v47 = vadd.f32 %v12843_v59, %v12713_v11 }
 0x155   :  { %19361 = vst [vmem:[#allocation36_spill] sm:$0xff] %v12967_v29 }
 0x156   :  { %1444 = vadd.xlane.f32.xlu1 %v1443_v9  ;;  %v1446_v9 = vsel %vm1397_vm3, %v12967_v29, 0.0  ;;  %19364 = vst [vmem:[#allocation39_spill] sm:$0xff] %v13001_v47 }
 0x157   :  { %1700 = vadd.xlane.f32.xlu0 %v1699_v23  ;;  %v10387_v6 = vpop.f32.mrb[32].mxu0 }
 0x158   :  { %v12973_v1 = vadd.f32 %v10387_v6, %v12704_v8  ;;  %v1167_v4 = vpop.f32.mrb[33].mxu0 }
 0x159   :  { %v12979_v2 = vadd.f32 %v1167_v4, %v12708_v10  ;;  %v1606_v4 = vmul.f32 %v12967_v29, %v12967_v29 }
 0x15a   :  { %1697 = vadd.xlane.f32.xlu1 %v1696_v44  ;;  %v12997_v44 = vpop.f32.mrb[18].mxu1 }
 0x15b   :  { %1447 = vadd.xlane.f32.xlu0 %v1446_v9  ;;  %v10390_v6 = vpop.f32.mrb[34].mxu0  ;;  %v1705_v9 = vsel %vm1397_vm3, %v1607_v30, 0.0  ;;  %v1702_v62 = vsel %vm1397_vm3, %v1606_v4, 0.0  ;;  %v1455_v4 = vsel %vm1397_vm3, %v13001_v47, 0.0 }
 0x15c   :  { %v12988_v8 = vadd.f32 %v10390_v6, %v12735_v24  ;;  %v1177_v23 = vpop.f32.mrb[35].mxu0  ;;  %v13005_v24 = vadd.f32 %v12713_v11, %v12845_v60  ;;  %v13008_v6 = vpop.f32.mrb[19].mxu1 }
 0x15d   :  { %v12995_v10 = vadd.f32 %v1177_v23, %v12737_v26  ;;  %v13012_v23 = vpop.permute.xlu0 %8352  ;;  %v13048_v0 = vpop.f32.mrb[20].mxu1 }
 0x15e   :  { %19365 = vst [vmem:[#allocation40_spill] sm:$0xff] %v13005_v24  ;;  %1450 = vadd.xlane.f32.xlu1 %v1449_v5  ;;  %19367 = vst [vmem:[#allocation42_spill] sm:$0xff] %v13012_v23  ;;  %v1452_v30 = vsel %vm1397_vm3, %v13005_v24, 0.0  ;;  %v1609_v5 = vmul.f32 %v13001_v47, %v13001_v47  ;;  %v13053_v47 = vpop.f32.mrb[21].mxu1 }
 0x15f   :  { %1706 = vadd.xlane.f32.xlu0 %v1705_v9  ;;  %v10393_v26 = vpop.f32.mrb[36].mxu0 }
 0x160   :  { %v13015_v63 = vadd.f32 %v10393_v26, %v12759_v40  ;;  %v1187_v59 = vpop.f32.mrb[37].mxu0  ;;  %v13028_v26 = vpop.permute.xlu1 %8354 }
 0x161   :  { %v13019_v60 = vadd.f32 %v1187_v59, %v12761_v42  ;;  %19368 = vst [vmem:[#allocation43_spill] sm:$0xff] %v13028_v26  ;;  %v13039_v59 = vadd.f32 %v12862_v52, %v12713_v11 }
 0x162   :  { %1703 = vadd.xlane.f32.xlu1 %v1702_v62  ;;  %v1608_v62 = vmul.f32 %v13005_v24, %v13005_v24 }
 0x163   :  { %1453 = vadd.xlane.f32.xlu0 %v1452_v30  ;;  %v10396_v9 = vpop.f32.mrb[38].mxu0  ;;  %19369 = vst [vmem:[#allocation44_spill] sm:$0xff] %v13039_v59  ;;  %v13045_v30 = vpop.permute.xlu0 %8356 }
 0x164   :  { %v13026_v23 = vadd.f32 %v10396_v9, %v12783_v57  ;;  %v1197_v40 = vpop.f32.mrb[39].mxu0  ;;  %v13043_v57 = vadd.f32 %v12713_v11, %v12864_v49  ;;  %19371 = vst [vmem:[#allocation46_spill] sm:$0xff] %v13045_v30  ;;  %v1711_v9 = vsel %vm1397_vm3, %v1609_v5, 0.0  ;;  %v1708_v52 = vsel %vm1397_vm3, %v1608_v62, 0.0 }
 0x165   :  { %v13035_v42 = vadd.f32 %v1197_v40, %v12791_v61  ;;  %v1611_v5 = vmul.f32 %v13039_v59, %v13039_v59 }
 0x166   :  { %19370 = vst [vmem:[#allocation45_spill] sm:$0xff] %v13043_v57  ;;  %1456 = vadd.xlane.f32.xlu1 %v1455_v4  ;;  %v1458_v4 = vsel %vm1397_vm3, %v13043_v57, 0.0  ;;  %v1610_v62 = vmul.f32 %v13043_v57, %v13043_v57 }
 0x167   :  { %1712 = vadd.xlane.f32.xlu0 %v1711_v9  ;;  %v10399_v26 = vpop.f32.mrb[40].mxu0  ;;  %v13063_v9 = vpop.permute.xlu1 %8358 }
 0x168   :  { %v13051_v61 = vadd.f32 %v10399_v26, %v12813_v31  ;;  %v1207_v40 = vpop.f32.mrb[41].mxu0  ;;  %19372 = vst [vmem:[#allocation47_spill] sm:$0xff] %v13063_v9  ;;  %v13068_v24 = vpop.permute.xlu0 %8360 }
 0x169   :  { %v13057_v49 = vadd.f32 %v1207_v40, %v12821_v38  ;;  %19373 = vst [vmem:[#allocation48_spill] sm:$0xff] %v13068_v24  ;;  %v1461_v38 = vsel %vm1397_vm3, %v13039_v59, 0.0  ;;  %v10320_v24 = vpop.f32.mrb[22].mxu1 }
 0x16a   :  { %1709 = vadd.xlane.f32.xlu1 %v1708_v52  ;;  %v13079_v52 = vadd.f32 %v12875_v50, %v12713_v11  ;;  %v1714_v50 = vsel %vm1397_vm3, %v1610_v62, 0.0 }
 0x16b   :  { %1459 = vadd.xlane.f32.xlu0 %v1458_v4  ;;  %v10402_v31 = vpop.f32.mrb[42].mxu0  ;;  %v1717_v4 = vsel %vm1397_vm3, %v1611_v5, 0.0 }
 0x16c   :  { %v13066_v26 = vadd.f32 %v10402_v31, %v12847_v14  ;;  %v1217_v30 = vpop.f32.mrb[43].mxu0  ;;  %19374 = vst [vmem:[#allocation49_spill] sm:$0xff] %v13079_v52  ;;  %v13083_v14 = vadd.f32 %v12713_v11, %v12877_v22  ;;  %v1613_v5 = vmul.f32 %v13079_v52, %v13079_v52  ;;  %v1467_v62 = vsel %vm1397_vm3, %v13079_v52, 0.0 }
 0x16d   :  { %v13075_v40 = vadd.f32 %v1217_v30, %v12860_v43  ;;  %v13089_v43 = vpop.f32.mrb[23].mxu1  ;;  %v13091_v30 = vpop.permute.xlu1 %8362 }
 0x16e   :  { %19375 = vst [vmem:[#allocation50_spill] sm:$0xff] %v13083_v14  ;;  %1462 = vadd.xlane.f32.xlu1 %v1461_v38  ;;  %19376 = vst [vmem:[#allocation51_spill] sm:$0xff] %v13091_v30  ;;  %v1464_v22 = vsel %vm1397_vm3, %v13083_v14, 0.0  ;;  %v13101_v38 = vpop.permute.xlu0 %8364 }
 0x16f   :  { %1718 = vadd.xlane.f32.xlu0 %v1717_v4  ;;  %v10405_v31 = vpop.f32.mrb[44].mxu0  ;;  %19377 = vst [vmem:[#allocation52_spill] sm:$0xff] %v13101_v38 }
 0x170   :  { %v13087_v9 = vadd.f32 %v10405_v31, %v12883_v53  ;;  %v1227_v59 = vpop.f32.mrb[45].mxu0 }
 0x171   :  { %v13095_v57 = vadd.f32 %v1227_v59, %v12892_v58  ;;  %v1612_v58 = vmul.f32 %v13083_v14, %v13083_v14 }
 0x172   :  { %1715 = vadd.xlane.f32.xlu1 %v1714_v50  ;;  %v13115_v50 = vadd.f32 %v12896_v48, %v12713_v11  ;;  %v13127_v52 = vpop.permute.xlu0 %8368 }
 0x173   :  { %1465 = vadd.xlane.f32.xlu0 %v1464_v22  ;;  %v10408_v53 = vpop.f32.mrb[46].mxu0  ;;  %v13119_v22 = vadd.f32 %v12713_v11, %v12900_v33  ;;  %19381 = vst [vmem:[#allocation56_spill] sm:$0xff] %v13127_v52  ;;  %v1720_v48 = vsel %vm1397_vm3, %v1612_v58, 0.0 }
 0x174   :  { %v13104_v4 = vadd.f32 %v10408_v53, %v12923_v21  ;;  %v1237_v31 = vpop.f32.mrb[47].mxu0  ;;  %19378 = vst [vmem:[#allocation53_spill] sm:$0xff] %v13115_v50  ;;  %v1723_v21 = vsel %vm1397_vm3, %v1613_v5, 0.0  ;;  %v13122_v53 = vpop.permute.xlu1 %8366  ;;  %v1615_v5 = vmul.f32 %v13115_v50, %v13115_v50 }
 0x175   :  { %v13111_v59 = vadd.f32 %v1237_v31, %v12936_v20  ;;  %19379 = vst [vmem:[#allocation54_spill] sm:$0xff] %v13119_v22  ;;  %19380 = vst [vmem:[#allocation55_spill] sm:$0xff] %v13122_v53  ;;  %v10323_v31 = vpop.f32.mrb[24].mxu1  ;;  %v1470_v33 = vsel %vm1397_vm3, %v13119_v22, 0.0  ;;  %v1614_v58 = vmul.f32 %v13119_v22, %v13119_v22 }
 0x176   :  { %1468 = vadd.xlane.f32.xlu1 %v1467_v62  ;;  %v709_v62 = vpop.f32.mrb[25].mxu1 }
 0x177   :  { %1724 = vadd.xlane.f32.xlu0 %v1723_v21  ;;  %v10411_v38 = vpop.f32.mrb[48].mxu0 }
 0x178   :  { %v13125_v30 = vadd.f32 %v10411_v38, %v12959_v17  ;;  %v1247_v20 = vpop.f32.mrb[49].mxu0  ;;  %v13140_v52 = vpop.permute.xlu1 %8370 }
 0x179   :  { %v13131_v14 = vadd.f32 %v1247_v20, %v12970_v36  ;;  %19382 = vst [vmem:[#allocation57_spill] sm:$0xff] %v13140_v52  ;;  %v1473_v36 = vsel %vm1397_vm3, %v13115_v50, 0.0  ;;  %v1726_v50 = vsel %vm1397_vm3, %v1614_v58, 0.0 }
 0x17a   :  { %1721 = vadd.xlane.f32.xlu1 %v1720_v48  ;;  %v13151_v48 = vadd.f32 %v12913_v32, %v12713_v11 }
 0x17b   :  { %1471 = vadd.xlane.f32.xlu0 %v1470_v33  ;;  %v10414_v17 = vpop.f32.mrb[50].mxu0  ;;  %v1729_v33 = vsel %vm1397_vm3, %v1615_v5, 0.0 }
 0x17c   :  { %v13138_v38 = vadd.f32 %v10414_v17, %v12997_v44  ;;  %v1257_v21 = vpop.f32.mrb[51].mxu0  ;;  %19383 = vst [vmem:[#allocation58_spill] sm:$0xff] %v13151_v48  ;;  %v13155_v44 = vadd.f32 %v12713_v11, %v12915_v51  ;;  %v13158_v17 = vpop.permute.xlu0 %8372  ;;  %v1617_v5 = vmul.f32 %v13151_v48, %v13151_v48  ;;  %v1479_v58 = vsel %vm1397_vm3, %v13151_v48, 0.0 }
 0x17d   :  { %v13147_v20 = vadd.f32 %v1257_v21, %v13008_v6  ;;  %19385 = vst [vmem:[#allocation60_spill] sm:$0xff] %v13158_v17  ;;  %v10326_v21 = vpop.f32.mrb[26].mxu1 }
 0x17e   :  { %19384 = vst [vmem:[#allocation59_spill] sm:$0xff] %v13155_v44  ;;  %1474 = vadd.xlane.f32.xlu1 %v1473_v36  ;;  %v1476_v51 = vsel %vm1397_vm3, %v13155_v44, 0.0  ;;  %v719_v36 = vpop.f32.mrb[27].mxu1 }
 0x17f   :  { %1730 = vadd.xlane.f32.xlu0 %v1729_v33  ;;  %v10417_v52 = vpop.f32.mrb[52].mxu0  ;;  %v13171_v33 = vpop.permute.xlu1 %8374 }
 0x180   :  { %v13161_v53 = vadd.f32 %v10417_v52, %v13048_v0  ;;  %v1267_v6 = vpop.f32.mrb[53].mxu0  ;;  %19386 = vst [vmem:[#allocation61_spill] sm:$0xff] %v13171_v33 }
 0x181   :  { %v13165_v32 = vadd.f32 %v1267_v6, %v13053_v47  ;;  %v1616_v47 = vmul.f32 %v13155_v44, %v13155_v44  ;;  %v13184_v6 = vadd.f32 %v12938_v7, %v12713_v11 }
 0x182   :  { %1727 = vadd.xlane.f32.xlu1 %v1726_v50 }
 0x183   :  { %1477 = vadd.xlane.f32.xlu0 %v1476_v51  ;;  %v10420_v0 = vpop.f32.mrb[54].mxu0  ;;  %19387 = vst [vmem:[#allocation62_spill] sm:$0xff] %v13184_v6  ;;  %v13188_v51 = vadd.f32 %v12713_v11, %v12940_v19  ;;  %v1732_v7 = vsel %vm1397_vm3, %v1616_v47, 0.0  ;;  %v1485_v47 = vsel %vm1397_vm3, %v13184_v6, 0.0 }
 0x184   :  { %v13173_v52 = vadd.f32 %v10420_v0, %v10320_v24  ;;  %v1277_v17 = vpop.f32.mrb[55].mxu0  ;;  %v13190_v24 = vpop.permute.xlu0 %8376  ;;  %v1735_v0 = vsel %vm1397_vm3, %v1617_v5, 0.0 }
 0x185   :  { %v13180_v50 = vadd.f32 %v1277_v17, %v13089_v43  ;;  %19388 = vst [vmem:[#allocation63_spill] sm:$0xff] %v13188_v51  ;;  %19389 = vst [vmem:[#allocation64_spill] sm:$0xff] %v13190_v24  ;;  %v10329_v43 = vpop.f32.mrb[28].mxu1  ;;  %v13195_v17 = vpop.permute.xlu1 %8378  ;;  %v1482_v19 = vsel %vm1397_vm3, %v13188_v51, 0.0 }
 0x186   :  { %1480 = vadd.xlane.f32.xlu1 %v1479_v58  ;;  %19390 = vst [vmem:[#allocation65_spill] sm:$0xff] %v13195_v17  ;;  %v1619_v58 = vmul.f32 %v13184_v6, %v13184_v6  ;;  %v729_v5 = vpop.f32.mrb[29].mxu1 }
 0x187   :  { %1736 = vadd.xlane.f32.xlu0 %v1735_v0  ;;  %v10423_v33 = vpop.f32.mrb[56].mxu0 }
 0x188   :  { %v13193_v48 = vadd.f32 %v10423_v33, %v10323_v31  ;;  %v1287_v44 = vpop.f32.mrb[57].mxu0  ;;  %v13204_v31 = vpop.permute.xlu0 %8380 }
 0x189   :  { %v13198_v22 = vadd.f32 %v1287_v44, %v709_v62  ;;  %19391 = vst [vmem:[#allocation66_spill] sm:$0xff] %v13204_v31  ;;  %v1618_v62 = vmul.f32 %v13188_v51, %v13188_v51 }
 0x18a   :  { %1733 = vadd.xlane.f32.xlu1 %v1732_v7  ;;  %v13216_v7 = vadd.f32 %v12949_v16, %v12713_v11 }
 0x18b   :  { %1483 = vadd.xlane.f32.xlu0 %v1482_v19  ;;  %v10426_v0 = vpop.f32.mrb[58].mxu0  ;;  %v13220_v19 = vadd.f32 %v12713_v11, %v12953_v37 }
 0x18c   :  { %v13206_v33 = vadd.f32 %v10426_v0, %v10326_v21  ;;  %v1297_v24 = vpop.f32.mrb[59].mxu0  ;;  %19392 = vst [vmem:[#allocation67_spill] sm:$0xff] %v13216_v7  ;;  %v1741_v21 = vsel %vm1397_vm3, %v1619_v58, 0.0  ;;  %v13223_v0 = vpop.permute.xlu1 %8382  ;;  %v1621_v58 = vmul.f32 %v13216_v7, %v13216_v7 }
 0x18d   :  { %v13212_v44 = vadd.f32 %v1297_v24, %v719_v36  ;;  %19393 = vst [vmem:[#allocation68_spill] sm:$0xff] %v13220_v19  ;;  %19394 = vst [vmem:[#allocation69_spill] sm:$0xff] %v13223_v0  ;;  %v10332_v36 = vpop.f32.mrb[30].mxu1  ;;  %v1738_v24 = vsel %vm1397_vm3, %v1618_v62, 0.0  ;;  %v13230_v16 = vpop.permute.xlu0 %8384  ;;  %v1488_v37 = vsel %vm1397_vm3, %v13220_v19, 0.0  ;;  %v1491_v62 = vsel %vm1397_vm3, %v13216_v7, 0.0 }
 0x18e   :  { %1486 = vadd.xlane.f32.xlu1 %v1485_v47  ;;  %19397 = vst [vmem:[#allocation72_spill] sm:$0xff] %v13230_v16  ;;  %v739_v47 = vpop.f32.mrb[31].mxu1 }
 0x18f   :  { %1742 = vadd.xlane.f32.xlu0 %v1741_v21  ;;  %v10429_v31 = vpop.f32.mrb[60].mxu0 }
 0x190   :  { %v13225_v17 = vadd.f32 %v10429_v31, %v10329_v43  ;;  %v1307_v6 = vpop.f32.mrb[61].mxu0  ;;  %v13238_v43 = vadd.f32 %v12713_v11, %v12973_v1  ;;  %v13244_v31 = vpop.permute.xlu1 %8386 }
 0x191   :  { %v13228_v51 = vadd.f32 %v1307_v6, %v729_v5  ;;  %v13242_v6 = vadd.f32 %v12713_v11, %v12979_v2  ;;  %19400 = vst [vmem:[#allocation75_spill] sm:$0xff] %v13244_v31  ;;  %v13255_v0 = vpop.permute.xlu0 %8388 }
 0x192   :  { %19395 = vst [vmem:[#allocation70_spill] sm:$0xff] %v13225_v17  ;;  %1739 = vadd.xlane.f32.xlu1 %v1738_v24  ;;  %19398 = vst [vmem:[#allocation73_spill] sm:$0xff] %v13238_v43  ;;  %v1620_v24 = vmul.f32 %v13220_v19, %v13220_v19  ;;  %v1623_v31 = vmul.f32 %v13238_v43, %v13238_v43 }
 0x193   :  { %19396 = vst [vmem:[#allocation71_spill] sm:$0xff] %v13228_v51  ;;  %1489 = vadd.xlane.f32.xlu0 %v1488_v37  ;;  %v10432_v21 = vpop.f32.mrb[62].mxu0  ;;  %19399 = vst [vmem:[#allocation74_spill] sm:$0xff] %v13242_v6  ;;  %v1747_v37 = vsel %vm1397_vm3, %v1621_v58, 0.0  ;;  %v1494_v2 = vsel %vm1397_vm3, %v13242_v6, 0.0  ;;  %v1497_v58 = vsel %vm1397_vm3, %v13238_v43, 0.0 }
 0x194   :  { %v1317_v5 = vpop.f32.mrb[63].mxu0  ;;  %v13253_v1 = vadd.f32 %v10432_v21, %v10332_v36  ;;  %19403 = vst [vmem:[#allocation78_spill] sm:$0xff] %v13255_v0  ;;  %v1744_v7 = vsel %vm1397_vm3, %v1620_v24, 0.0  ;;  %v13262_v19 = vpop.permute.xlu1 %8390  ;;  %v1622_v36 = vmul.f32 %v13242_v6, %v13242_v6  ;;  %v13274_v21 = vadd.f32 %v12713_v11, %v12995_v10 }
 0x195   :  { %v13250_v16 = vadd.f32 %v1317_v5, %v739_v47  ;;  %19404 = vst [vmem:[#allocation79_spill] sm:$0xff] %v13262_v19  ;;  %v13270_v47 = vadd.f32 %v12713_v11, %v12988_v8  ;;  %v1753_v5 = vsel %vm1397_vm3, %v1623_v31, 0.0 }
 0x196   :  { %1492 = vadd.xlane.f32.xlu1 %v1491_v62  ;;  %19402 = vst [vmem:[#allocation77_spill] sm:$0xff] %v13253_v1  ;;  %19406 = vst [vmem:[#allocation81_spill] sm:$0xff] %v13274_v21  ;;  %v1750_v62 = vsel %vm1397_vm3, %v1622_v36, 0.0  ;;  %v1500_v24 = vsel %vm1397_vm3, %v13274_v21, 0.0  ;;  %v1624_v31 = vmul.f32 %v13274_v21, %v13274_v21  ;;  %v13298_v36 = vadd.f32 %v12713_v11, %v13019_v60 }
 0x197   :  { %19401 = vst [vmem:[#allocation76_spill] sm:$0xff] %v13250_v16  ;;  %1748 = vadd.xlane.f32.xlu0 %v1747_v37  ;;  %19405 = vst [vmem:[#allocation80_spill] sm:$0xff] %v13270_v47  ;;  %v1625_v37 = vmul.f32 %v13270_v47, %v13270_v47  ;;  %v1503_v10 = vsel %vm1397_vm3, %v13270_v47, 0.0 }
 0x198   :  { %v13284_v8 = vpop.permute.xlu1 %8394  ;;  %19411 = vst [vmem:[#allocation86_spill] sm:$0xff] %v13298_v36 }
 0x199   :  { %19408 = vst [vmem:[#allocation83_spill] sm:$0xff] %v13284_v8 }
 0x19a   :  { %1745 = vadd.xlane.f32.xlu1 %v1744_v7  ;;  %v13277_v7 = vpop.permute.xlu0 %8392 }
 0x19b   :  { %1495 = vadd.xlane.f32.xlu0 %v1494_v2  ;;  %19407 = vst [vmem:[#allocation82_spill] sm:$0xff] %v13277_v7 }
 0x19e   :  { %1498 = vadd.xlane.f32.xlu1 %v1497_v58  ;;  %v13290_v2 = vpop.permute.xlu0 %8396  ;;  %v13294_v58 = vadd.f32 %v12713_v11, %v13015_v63  ;;  %v1506_v63 = vsel %vm1397_vm3, %v13298_v36, 0.0 }
 0x19f   :  { %1754 = vadd.xlane.f32.xlu0 %v1753_v5  ;;  %19409 = vst [vmem:[#allocation84_spill] sm:$0xff] %v13290_v2  ;;  %v1759_v5 = vsel %vm1397_vm3, %v1625_v37, 0.0  ;;  %v1756_v2 = vsel %vm1397_vm3, %v1624_v31, 0.0  ;;  %v13314_v37 = vadd.f32 %v12713_v11, %v13035_v42 }
 0x1a0   :  { %19410 = vst [vmem:[#allocation85_spill] sm:$0xff] %v13294_v58  ;;  %v1627_v60 = vmul.f32 %v13294_v58, %v13294_v58  ;;  %v1509_v31 = vsel %vm1397_vm3, %v13294_v58, 0.0 }
 0x1a1   :  { %19414 = vst [vmem:[#allocation89_spill] sm:$0xff] %v13314_v37  ;;  %v1628_v42 = vmul.f32 %v13314_v37, %v13314_v37 }
 0x1a2   :  { %1751 = vadd.xlane.f32.xlu1 %v1750_v62  ;;  %v13303_v62 = vadd.f32 %v12713_v11, %v13026_v23  ;;  %v1626_v23 = vmul.f32 %v13298_v36, %v13298_v36  ;;  %v1765_v8 = vsel %vm1397_vm3, %v1627_v60, 0.0  ;;  %v1512_v60 = vsel %vm1397_vm3, %v13314_v37, 0.0 }
 0x1a3   :  { %1501 = vadd.xlane.f32.xlu0 %v1500_v24  ;;  %v13305_v24 = vpop.permute.xlu1 %8398  ;;  %v1768_v37 = vsel %vm1397_vm3, %v1628_v42, 0.0  ;;  %v13370_v42 = vadd.f32 %v12713_v11, %v13087_v9  ;;  %v13384_v9 = vadd.f32 %v12713_v11, %v13095_v57 }
 0x1a4   :  { %19412 = vst [vmem:[#allocation87_spill] sm:$0xff] %v13303_v62  ;;  %19413 = vst [vmem:[#allocation88_spill] sm:$0xff] %v13305_v24  ;;  %v1762_v58 = vsel %vm1397_vm3, %v1626_v23, 0.0 }
 0x1a5   :  { %19419 = vst [vmem:[#allocation94_spill] sm:$0xff] %v13370_v42  ;;  %19420 = vst [vmem:[#allocation95_spill] sm:$0xff] %v13384_v9 }
 0x1a6   :  { %1504 = vadd.xlane.f32.xlu1 %v1503_v10  ;;  %v1629_v10 = vmul.f32 %v13303_v62, %v13303_v62 }
 0x1a7   :  { %1760 = vadd.xlane.f32.xlu0 %v1759_v5 }
 0x1a8   :  { %v1403_v7 = vpop.xlane.xlu0 %1402  ;;  %v1771_v36 = vsel %vm1397_vm3, %v1629_v10, 0.0  ;;  %v13356_v10 = vadd.f32 %v12713_v11, %v13075_v40 }
 0x1a9   :  { %v13329_v0 = vmul.f32 0.03125, %v1403_v7 }
 0x1aa   :  { %1757 = vadd.xlane.f32.xlu1 %v1756_v2  ;;  %v13325_v2 = vadd.f32 %v12713_v11, %v13051_v61  ;;  %v1515_v61 = vsel %vm1397_vm3, %v13303_v62, 0.0  ;;  %v13352_v62 = vadd.f32 %v12713_v11, %v13066_v26  ;;  %19418 = vst [vmem:[#allocation93_spill] sm:$0xff] %v13356_v10  ;;  %v1632_v40 = vmul.f32 %v13356_v10, %v13356_v10 }
 0x1ab   :  { %v1656_v5 = vpop.xlane.xlu1 %1655  ;;  %1507 = vadd.xlane.f32.xlu0 %v1506_v63  ;;  %v13335_v63 = vadd.f32 %v12713_v11, %v13057_v49 }
 0x1ac   :  { %v1400_v24 = vpop.xlane.xlu0 %1399  ;;  %19415 = vst [vmem:[#allocation90_spill] sm:$0xff] %v13325_v2  ;;  %v1910_v47 = vmul.f32 0.03125, %v1656_v5  ;;  %v1631_v23 = vmul.f32 %v13325_v2, %v13325_v2  ;;  %19417 = vst [vmem:[#allocation92_spill] sm:$0xff] %v13352_v62  ;;  %v1975_v5 = vmul.f32 %v13329_v0, %v13329_v0  ;;  %v13399_v57 = vsel %vm1397_vm3, %v1632_v40, 0.0 }
 0x1ad   :  { %v13331_v19 = vmul.f32 0.03125, %v1400_v24  ;;  %19416 = vst [vmem:[#allocation91_spill] sm:$0xff] %v13335_v63  ;;  %v1630_v49 = vmul.f32 %v13335_v63, %v13335_v63  ;;  %v1518_v26 = vsel %vm1397_vm3, %v13335_v63, 0.0  ;;  %v13388_v63 = vsel %vm1397_vm3, %v13352_v62, 0.0 }
 0x1ae   :  { %1510 = vadd.xlane.f32.xlu1 %v1509_v31 }
 0x1af   :  { %v1974_v7 = vmul.f32 %v13331_v19, %v13331_v19  ;;  %v1409_v24 = vpop.xlane.xlu1 %1408  ;;  %1766 = vadd.xlane.f32.xlu0 %v1765_v8  ;;  %v13360_v8 = vsel %vm1397_vm3, %v13325_v2, 0.0  ;;  %v1633_v2 = vmul.f32 %v13352_v62, %v13352_v62  ;;  %v1634_v62 = vmul.f32 %v13384_v9, %v13384_v9 }
 0x1b0   :  { %v1659_v31 = vpop.xlane.xlu0 %1658  ;;  %v13364_v43 = vmul.f32 0.03125, %v1409_v24 }
 0x1b1   :  { %v2038_v21 = vsub.f32 %v1910_v47, %v1974_v7  ;;  %v1911_v6 = vmul.f32 0.03125, %v1659_v31  ;;  %v1774_v7 = vsel %vm1397_vm3, %v1630_v49, 0.0 }
 0x1b2   :  { %1763 = vadd.xlane.f32.xlu1 %v1762_v58  ;;  %v13378_v58 = vsel %vm1397_vm3, %v1631_v23, 0.0 }
 0x1b3   :  { %v2102_v1 = vmax.f32 %v2038_v21, 0.0  ;;  %v2039_v16 = vsub.f32 %v1911_v6, %v1975_v5  ;;  %v1406_v47 = vpop.xlane.xlu1 %1405  ;;  %1513 = vadd.xlane.f32.xlu0 %v1512_v60  ;;  %v1635_v6 = vmul.f32 %v13370_v42, %v13370_v42  ;;  %v1977_v60 = vmul.f32 %v13364_v43, %v13364_v43 }
 0x1b4   :  { %v13380_v24 = vmul.f32 0.03125, %v1406_v47  ;;  %v1665_v31 = vpop.xlane.xlu0 %1664  ;;  %v13396_v5 = vsel %vm1397_vm3, %v13356_v10, 0.0  ;;  %v13402_v47 = vsel %vm1397_vm3, %v1633_v2, 0.0  ;;  %v13414_v2 = vadd.f32 %v12713_v11, %v13111_v59 }
 0x1b5   :  { %v2230_v21 = vadd.f32 1e-05, %v2102_v1  ;;  %v2103_v49 = vmax.f32 %v2039_v16, 0.0  ;;  %v1913_v23 = vmul.f32 0.03125, %v1665_v31  ;;  %v13408_v16 = vadd.f32 %v12713_v11, %v13104_v4 }
 0x1b6   :  { %1516 = vadd.xlane.f32.xlu1 %v1515_v61  ;;  %v1976_v61 = vmul.f32 %v13380_v24, %v13380_v24  ;;  %19422 = vst [vmem:[#allocation97_spill] sm:$0xff] %v13414_v2  ;;  %v13425_v4 = vsel %vm1397_vm3, %v1635_v6, 0.0  ;;  %v1636_v59 = vmul.f32 %v13414_v2, %v13414_v2  ;;  %v13440_v6 = vadd.f32 %v12713_v11, %v13131_v14 }
 0x1b7   :  { %10841 = vrsqrt.f32 %v2230_v21  ;;  %v2231_v1 = vadd.f32 1e-05, %v2103_v49  ;;  %v2041_v3 = vsub.f32 %v1913_v23, %v1977_v60  ;;  %v1662_v29 = vpop.xlane.xlu1 %1661  ;;  %1772 = vadd.xlane.f32.xlu0 %v1771_v36  ;;  %19421 = vst [vmem:[#allocation96_spill] sm:$0xff] %v13408_v16  ;;  %v13418_v21 = vsel %vm1397_vm3, %v13370_v42, 0.0 }
 0x1b8   :  { %v1912_v40 = vmul.f32 0.03125, %v1662_v29  ;;  %v1412_v31 = vpop.xlane.xlu0 %1411  ;;  %v13422_v36 = vsel %vm1397_vm3, %v13384_v9, 0.0  ;;  %v13428_v29 = vsel %vm1397_vm3, %v1634_v62, 0.0  ;;  %v1637_v23 = vmul.f32 %v13408_v16, %v13408_v16  ;;  %19424 = vst [vmem:[#allocation99_spill] sm:$0xff] %v13440_v6 }
 0x1b9   :  { %10843 = vrsqrt.f32 %v2231_v1  ;;  %v2105_v60 = vmax.f32 %v2041_v3, 0.0  ;;  %v13436_v42 = vadd.f32 %v12713_v11, %v13125_v30  ;;  %v13444_v62 = vsel %vm1397_vm3, %v13408_v16, 0.0 }
 0x1ba   :  { %v2040_v49 = vsub.f32 %v1912_v40, %v1976_v61  ;;  %1769 = vadd.xlane.f32.xlu1 %v1768_v37  ;;  %v13446_v61 = vmul.f32 0.03125, %v1412_v31  ;;  %v1638_v14 = vmul.f32 %v13440_v6, %v13440_v6 }
 0x1bb   :  { %v2233_v1 = vadd.f32 1e-05, %v2105_v60  ;;  %v1415_v3 = vpop.xlane.xlu1 %1414  ;;  %1519 = vadd.xlane.f32.xlu0 %v1518_v26  ;;  %19423 = vst [vmem:[#allocation98_spill] sm:$0xff] %v13436_v42  ;;  %v13452_v26 = vsel %vm1397_vm3, %v13414_v2, 0.0  ;;  %v1639_v9 = vmul.f32 %v13436_v42, %v13436_v42  ;;  %v13471_v2 = vadd.f32 %v12713_v11, %v13138_v38 }
 0x1bc   :  { %v2104_v37 = vmax.f32 %v2040_v49, 0.0  ;;  %v13448_v40 = vmul.f32 0.03125, %v1415_v3  ;;  %v1671_v60 = vpop.xlane.xlu0 %1670  ;;  %v13462_v49 = vsel %vm1397_vm3, %v1636_v59, 0.0  ;;  %v13465_v3 = vsel %vm1397_vm3, %v1637_v23, 0.0 }
 0x1bd   :  { %10845 = vrsqrt.f32 %v2233_v1  ;;  %v1915_v30 = vmul.f32 0.03125, %v1671_v60  ;;  %v2166_v1 = vsub.f32 %v12725_v18, %v13331_v19  ;;  %19425 = vst [vmem:[#allocation100_spill] sm:$0xff] %v13471_v2  ;;  %v1978_v59 = vmul.f32 %v13446_v61, %v13446_v61 }
 0x1be   :  { %v2232_v16 = vadd.f32 1e-05, %v2104_v37  ;;  %v1979_v31 = vmul.f32 %v13448_v40, %v13448_v40  ;;  %1522 = vadd.xlane.f32.xlu1 %v13360_v8  ;;  %v13475_v37 = vadd.f32 %v12713_v11, %v13147_v20  ;;  %v13479_v8 = vsel %vm1397_vm3, %v13436_v42, 0.0 }
 0x1bf   :  { %v1668_v60 = vpop.xlane.xlu1 %1667  ;;  %1775 = vadd.xlane.f32.xlu0 %v1774_v7  ;;  %v13485_v38 = vsel %vm1397_vm3, %v13440_v6, 0.0  ;;  %v13488_v10 = vsel %vm1397_vm3, %v1638_v14, 0.0  ;;  %v13491_v11 = vsel %vm1397_vm3, %v1639_v9, 0.0  ;;  %v1641_v20 = vmul.f32 %v13471_v2, %v13471_v2  ;;  %v13508_v14 = vld [vmem:[%s19190_s4] ss:$0 sm:$0xff] }
 0x1c0   :  { %19426 = vst [vmem:[#allocation101_spill] sm:$0xff] %v13475_v37  ;;  %10847 = vrsqrt.f32 %v2232_v16  ;;  %v2043_v23 = vsub.f32 %v1915_v30, %v1979_v31  ;;  %v1914_v18 = vmul.f32 0.03125, %v1668_v60  ;;  %v1418_v19 = vpop.xlane.xlu0 %1417  ;;  %v2167_v16 = vsub.f32 %v12722_v15, %v13329_v0 }
 0x1c1   :  { %v10842_v7 = vpop.eup %10841  ;;  %v13503_v9 = vsel %vm1397_vm3, %v13475_v37, 0.0  ;;  %v13512_v15 = vadd.f32 %v13508_v14, %v13161_v53  ;;  %v13516_v0 = vsel %vm1397_vm3, %v13471_v2, 0.0  ;;  %v13528_v55 = vsel %vm1397_vm3, %v1641_v20, 0.0 }
 0x1c2   :  { %v13497_v30 = vmul.f32 %v10842_v7, %v2166_v1  ;;  %v2107_v31 = vmax.f32 %v2043_v23, 0.0  ;;  %v2042_v60 = vsub.f32 %v1914_v18, %v1978_v59  ;;  %1778 = vadd.xlane.f32.xlu1 %v13378_v58  ;;  %v1640_v58 = vmul.f32 %v13475_v37, %v13475_v37 }
 0x1c3   :  { %v10844_v42 = vpop.eup %10843  ;;  %v1421_v6 = vpop.xlane.xlu1 %1420  ;;  %1525 = vadd.xlane.f32.xlu0 %v13396_v5  ;;  %19427 = vst [vmem:[#allocation102_spill] sm:$0xff] %v13512_v15  ;;  %v13523_v23 = vmul.f32 0.03125, %v1418_v19  ;;  %v2169_v2 = vsub.f32 %v12740_v27, %v13364_v43  ;;  %v1643_v27 = vmul.f32 %v13512_v15, %v13512_v15 }
 0x1c4   :  { %v2486_v5 = vmul.f32 0.70710677, %v13497_v30  ;;  %v13521_v1 = vmul.f32 %v10844_v42, %v2167_v16  ;;  %v2235_v59 = vadd.f32 1e-05, %v2107_v31  ;;  %v1677_v18 = vpop.xlane.xlu0 %1676  ;;  %v2106_v7 = vmax.f32 %v2042_v60, 0.0 }
 0x1c5   :  { %v13525_v56 = vmul.f32 0.03125, %v1421_v6  ;;  %v1917_v53 = vmul.f32 0.03125, %v1677_v18  ;;  %v13536_v42 = vadd.f32 %v13508_v14, %v13165_v32  ;;  %v1980_v43 = vmul.f32 %v13523_v23, %v13523_v23 }
 0x1c6   :  { %10849 = verf.f32 %v2486_v5  ;;  %v2487_v37 = vmul.f32 0.70710677, %v13521_v1  ;;  %1528 = vadd.xlane.f32.xlu1 %v13388_v63  ;;  %v2234_v6 = vadd.f32 1e-05, %v2106_v7  ;;  %v2168_v60 = vsub.f32 %v12750_v34, %v13380_v24 }
 0x1c7   :  { %19428 = vst [vmem:[#allocation103_spill] sm:$0xff] %v13536_v42  ;;  %v10846_v19 = vpop.eup %10845  ;;  %10851 = vrsqrt.f32 %v2235_v59  ;;  %v1981_v16 = vmul.f32 %v13525_v56, %v13525_v56  ;;  %v1674_v20 = vpop.xlane.xlu1 %1673  ;;  %1781 = vadd.xlane.f32.xlu0 %v13399_v57  ;;  %v13550_v59 = vsel %vm1397_vm3, %v1640_v58, 0.0  ;;  %v13556_v7 = vsel %vm1397_vm3, %v13512_v15, 0.0 }
 0x1c8   :  { %10853 = verf.f32 %v2487_v37  ;;  %v1916_v63 = vmul.f32 0.03125, %v1674_v20  ;;  %v1424_v31 = vpop.xlane.xlu0 %1423  ;;  %v13545_v32 = vmul.f32 %v10846_v19, %v2169_v2  ;;  %v1642_v2 = vmul.f32 %v13536_v42, %v13536_v42 }
 0x1c9   :  { %10855 = vrsqrt.f32 %v2234_v6  ;;  %v2045_v5 = vsub.f32 %v1917_v53, %v1981_v16  ;;  %v13565_v58 = vsel %vm1397_vm3, %v13536_v42, 0.0  ;;  %v13571_v6 = vmul.f32 0.03125, %v1424_v31 }
 0x1ca   :  { %v10848_v57 = vpop.eup %10847  ;;  %v2044_v18 = vsub.f32 %v1916_v63, %v1980_v43  ;;  %1784 = vadd.xlane.f32.xlu1 %v13402_v47  ;;  %v2489_v37 = vmul.f32 0.70710677, %v13545_v32  ;;  %v13569_v47 = vadd.f32 %v13508_v14, %v13173_v52  ;;  %v13576_v43 = vsel %vm1397_vm3, %v1643_v27, 0.0 }
 0x1cb   :  { %v2109_v19 = vmax.f32 %v2045_v5, 0.0  ;;  %v1427_v34 = vpop.xlane.xlu1 %1426  ;;  %1531 = vadd.xlane.f32.xlu0 %v13422_v36  ;;  %v13561_v24 = vmul.f32 %v10848_v57, %v2168_v60  ;;  %v13581_v5 = vadd.f32 %v13508_v14, %v13180_v50  ;;  %v13587_v31 = vsel %vm1397_vm3, %v1642_v2, 0.0 }
 0x1cc   :  { %19429 = vst [vmem:[#allocation104_spill] sm:$0xff] %v13569_v47  ;;  %v2108_v53 = vmax.f32 %v2044_v18, 0.0  ;;  %v13573_v16 = vmul.f32 0.03125, %v1427_v34  ;;  %v1683_v20 = vpop.xlane.xlu0 %1682  ;;  %10857 = verf.f32 %v2489_v37  ;;  %v2171_v27 = vsub.f32 %v12768_v45, %v13448_v40 }
 0x1cd   :  { %v2237_v36 = vadd.f32 1e-05, %v2109_v19  ;;  %v1919_v63 = vmul.f32 0.03125, %v1683_v20  ;;  %v2488_v60 = vmul.f32 0.70710677, %v13561_v24  ;;  %v13594_v50 = vsel %vm1397_vm3, %v13569_v47, 0.0 }
 0x1ce   :  { %v2236_v57 = vadd.f32 1e-05, %v2108_v53  ;;  %v1983_v52 = vmul.f32 %v13573_v16, %v13573_v16  ;;  %1534 = vadd.xlane.f32.xlu1 %v13418_v21  ;;  %19430 = vst [vmem:[#allocation105_spill] sm:$0xff] %v13594_v50  ;;  %v1645_v19 = vmul.f32 %v13569_v47, %v13569_v47  ;;  %v1982_v21 = vmul.f32 %v13571_v6, %v13571_v6 }
 0x1cf   :  { %10859 = vrsqrt.f32 %v2237_v36  ;;  %v1680_v18 = vpop.xlane.xlu1 %1679  ;;  %1787 = vadd.xlane.f32.xlu0 %v13428_v29  ;;  %v2422_v40 = vmul.f32 0.5, %v13497_v30  ;;  %v13603_v29 = vsel %vm1397_vm3, %v13581_v5, 0.0  ;;  %v2170_v47 = vsub.f32 %v12771_v46, %v13446_v61 }
 0x1d0   :  { %v10850_v34 = vpop.eup %10849  ;;  %10861 = vrsqrt.f32 %v2236_v57  ;;  %v2047_v37 = vsub.f32 %v1919_v63, %v1983_v52  ;;  %v1918_v2 = vmul.f32 0.03125, %v1680_v18  ;;  %v1430_v53 = vpop.xlane.xlu0 %1429  ;;  %v2423_v18 = vmul.f32 0.5, %v13521_v1 }
 0x1d1   :  { %v10852_v45 = vpop.eup %10851  ;;  %v2614_v20 = vadd.f32 1.0, %v10850_v34  ;;  %10863 = verf.f32 %v2488_v60  ;;  %v13611_v30 = vmul.f32 0.03125, %v1430_v53 }
 0x1d2   :  { %v10854_v36 = vpop.eup %10853  ;;  %v2111_v57 = vmax.f32 %v2047_v37, 0.0  ;;  %v2046_v15 = vsub.f32 %v1918_v2, %v1982_v21  ;;  %1790 = vadd.xlane.f32.xlu1 %v13425_v4  ;;  %v13608_v63 = vmul.f32 %v10852_v45, %v2171_v27  ;;  %v1644_v21 = vmul.f32 %v13581_v5, %v13581_v5 }
 0x1d3   :  { %v10856_v52 = vpop.eup %10855  ;;  %v1433_v60 = vpop.xlane.xlu1 %1432  ;;  %1537 = vadd.xlane.f32.xlu0 %v13452_v26  ;;  %v2678_v34 = vmul.f32 %v2614_v20, %v2422_v40  ;;  %v2615_v42 = vadd.f32 1.0, %v10854_v36  ;;  %v2173_v20 = vsub.f32 %v12794_v12, %v13525_v56 }
 0x1d4   :  { %v2239_v51 = vadd.f32 1e-05, %v2111_v57  ;;  %v2110_v50 = vmax.f32 %v2046_v15, 0.0  ;;  %v13614_v17 = vmul.f32 0.03125, %v1433_v60  ;;  %v1689_v46 = vpop.xlane.xlu0 %1688  ;;  %v13616_v61 = vmul.f32 %v10856_v52, %v2170_v47 }
 0x1d5   :  { %v1921_v4 = vmul.f32 0.03125, %v1689_v46  ;;  %10441 = vmatprep.mubr.msk.f32.mxu1 %vm1397_vm3, %v2678_v34  ;;  %v2679_v27 = vmul.f32 %v2615_v42, %v2423_v18  ;;  %v2491_v1 = vmul.f32 0.70710677, %v13608_v63  ;;  %v13627_v15 = vadd.f32 %v13508_v14, %v13193_v48 }
 0x1d6   :  { %10865 = vrsqrt.f32 %v2239_v51  ;;  %v2238_v26 = vadd.f32 1e-05, %v2110_v50  ;;  %v1985_v37 = vmul.f32 %v13614_v17, %v13614_v17  ;;  %1540 = vadd.xlane.f32.xlu1 %v13444_v62  ;;  %v2490_v42 = vmul.f32 0.70710677, %v13616_v61  ;;  %v10858_v62 = vpop.eup %10857 }
 0x1d7   :  { %10442 = vmatmul.mubr.msk.f32.vlgmr.msra.gmra.mrb[32].mxu1 %vm1397_vm3, %v2679_v27  ;;  %v1686_v47 = vpop.xlane.xlu1 %1685  ;;  %1793 = vadd.xlane.f32.xlu0 %v13462_v49  ;;  %10867 = verf.f32 %v2491_v1  ;;  %v13634_v51 = vadd.f32 %v13508_v14, %v13198_v22  ;;  %v13637_v50 = vsel %vm1397_vm3, %v1645_v19, 0.0  ;;  %v1984_v48 = vmul.f32 %v13611_v30, %v13611_v30 }
 0x1d8   :  { %10869 = vrsqrt.f32 %v2238_v26  ;;  %v2049_v2 = vsub.f32 %v1921_v4, %v1985_v37  ;;  %v1920_v53 = vmul.f32 0.03125, %v1686_v47  ;;  %v1436_v45 = vpop.xlane.xlu0 %1435  ;;  %v2172_v49 = vsub.f32 %v12797_v13, %v13523_v23 }
 0x1d9   :  { %v10860_v40 = vpop.eup %10859  ;;  %10871 = verf.f32 %v2490_v42  ;;  %v13646_v22 = vsel %vm1397_vm3, %v1644_v21, 0.0  ;;  %v13651_v52 = vsel %vm1397_vm3, %v13627_v15, 0.0  ;;  %v1647_v18 = vmul.f32 %v13627_v15, %v13627_v15 }
 0x1da   :  { %v10862_v19 = vpop.eup %10861  ;;  %v2113_v36 = vmax.f32 %v2049_v2, 0.0  ;;  %v2048_v57 = vsub.f32 %v1920_v53, %v1984_v48  ;;  %1796 = vadd.xlane.f32.xlu1 %v13465_v3  ;;  %v13655_v23 = vmul.f32 0.03125, %v1436_v45  ;;  %v2617_v56 = vadd.f32 1.0, %v10858_v62 }
 0x1db   :  { %v10864_v13 = vpop.eup %10863  ;;  %v1439_v12 = vpop.xlane.xlu1 %1438  ;;  %1543 = vadd.xlane.f32.xlu0 %v13485_v38  ;;  %v13658_v60 = vmul.f32 %v10862_v19, %v2172_v49  ;;  %v13660_v34 = vmul.f32 %v10860_v40, %v2173_v20  ;;  %v2424_v26 = vmul.f32 0.5, %v13561_v24  ;;  %v2425_v37 = vmul.f32 0.5, %v13545_v32 }
 0x1dc   :  { %v2241_v46 = vadd.f32 1e-05, %v2113_v36  ;;  %v2112_v3 = vmax.f32 %v2048_v57, 0.0  ;;  %v13662_v4 = vmul.f32 0.03125, %v1439_v12  ;;  %v1695_v27 = vpop.xlane.xlu0 %1694  ;;  %v2616_v1 = vadd.f32 1.0, %v10864_v13 }
 0x1dd   :  { %v1923_v21 = vmul.f32 0.03125, %v1695_v27  ;;  %v2492_v47 = vmul.f32 0.70710677, %v13658_v60  ;;  %v13672_v62 = vsel %vm1397_vm3, %v13634_v51, 0.0  ;;  %v2681_v2 = vmul.f32 %v2617_v56, %v2425_v37 }
 0x1de   :  { %10873 = vrsqrt.f32 %v2241_v46  ;;  %v2240_v38 = vadd.f32 1e-05, %v2112_v3  ;;  %v1987_v42 = vmul.f32 %v13662_v4, %v13662_v4  ;;  %1546 = vadd.xlane.f32.xlu1 %v13479_v8  ;;  %v2680_v48 = vmul.f32 %v2616_v1, %v2424_v26 }
 0x1df   :  { %v1692_v53 = vpop.xlane.xlu1 %1691  ;;  %1799 = vadd.xlane.f32.xlu0 %v13488_v10  ;;  %10875 = verf.f32 %v2492_v47  ;;  %v2493_v32 = vmul.f32 0.70710677, %v13660_v34  ;;  %v1986_v45 = vmul.f32 %v13655_v23, %v13655_v23  ;;  %v2174_v19 = vsub.f32 %v12827_v41, %v13571_v6 }
 0x1e0   :  { %v10866_v24 = vpop.eup %10865  ;;  %10877 = vrsqrt.f32 %v2240_v38  ;;  %v2051_v40 = vsub.f32 %v1923_v21, %v1987_v42  ;;  %v1922_v49 = vmul.f32 0.03125, %v1692_v53  ;;  %v1442_v8 = vpop.xlane.xlu0 %1441  ;;  %v2175_v36 = vsub.f32 %v12824_v39, %v13573_v16  ;;  %10444 = vmatprep.mubr.msk.f32.mxu1 %vm1397_vm3, %v2680_v48 }
 0x1e1   :  { %v10868_v20 = vpop.eup %10867  ;;  %10879 = verf.f32 %v2493_v32  ;;  %v1646_v10 = vmul.f32 %v13634_v51, %v13634_v51  ;;  %10445 = vmatmul.mubr.msk.f32.gmra.mrb[34].mxu1 %vm1397_vm3, %v2681_v2  ;;  %v13689_v56 = vadd.f32 %v13508_v14, %v13206_v33  ;;  %v13692_v41 = vsel %vm1397_vm3, %v1647_v18, 0.0 }
 0x1e2   :  { %v10870_v57 = vpop.eup %10869  ;;  %v2115_v13 = vmax.f32 %v2051_v40, 0.0  ;;  %v2050_v12 = vsub.f32 %v1922_v49, %v1986_v45  ;;  %1802 = vadd.xlane.f32.xlu1 %v13491_v11  ;;  %v13694_v6 = vmul.f32 0.03125, %v1442_v8  ;;  %v2619_v46 = vadd.f32 1.0, %v10868_v20 }
 0x1e3   :  { %v10872_v39 = vpop.eup %10871  ;;  %v1445_v16 = vpop.xlane.xlu1 %1444  ;;  %1549 = vadd.xlane.f32.xlu0 %v13503_v9  ;;  %v13697_v3 = vmul.f32 %v10870_v57, %v2174_v19  ;;  %v13699_v27 = vmul.f32 %v10866_v24, %v2175_v36  ;;  %v2426_v18 = vmul.f32 0.5, %v13616_v61  ;;  %v13707_v38 = vadd.f32 %v13508_v14, %v13212_v44 }
 0x1e4   :  { %v2243_v1 = vadd.f32 1e-05, %v2115_v13  ;;  %v2114_v11 = vmax.f32 %v2050_v12, 0.0  ;;  %v13701_v21 = vmul.f32 0.03125, %v1445_v16  ;;  %v1701_v33 = vpop.xlane.xlu0 %1700  ;;  %v2618_v26 = vadd.f32 1.0, %v10872_v39 }
 0x1e5   :  { %v1925_v37 = vmul.f32 0.03125, %v1701_v33  ;;  %v2494_v47 = vmul.f32 0.70710677, %v13697_v3  ;;  %v2427_v48 = vmul.f32 0.5, %v13608_v63  ;;  %v1988_v2 = vmul.f32 %v13694_v6, %v13694_v6 }
 0x1e6   :  { %10881 = vrsqrt.f32 %v2243_v1  ;;  %v2242_v9 = vadd.f32 1e-05, %v2114_v11  ;;  %v1989_v42 = vmul.f32 %v13701_v21, %v13701_v21  ;;  %1552 = vadd.xlane.f32.xlu1 %v13516_v0  ;;  %v2682_v53 = vmul.f32 %v2618_v26, %v2426_v18 }
 0x1e7   :  { %v1698_v61 = vpop.xlane.xlu1 %1697  ;;  %1805 = vadd.xlane.f32.xlu0 %v13550_v59  ;;  %10883 = verf.f32 %v2494_v47  ;;  %v2495_v44 = vmul.f32 0.70710677, %v13699_v27  ;;  %v2683_v45 = vmul.f32 %v2619_v46, %v2427_v48  ;;  %v2176_v0 = vsub.f32 %v12857_v35, %v13611_v30 }
 0x1e8   :  { %v10874_v32 = vpop.eup %10873  ;;  %10885 = vrsqrt.f32 %v2242_v9  ;;  %v2053_v24 = vsub.f32 %v1925_v37, %v1989_v42  ;;  %v1924_v40 = vmul.f32 0.03125, %v1698_v61  ;;  %v1448_v49 = vpop.xlane.xlu0 %1447  ;;  %v2177_v63 = vsub.f32 %v12854_v25, %v13614_v17  ;;  %10447 = vmatprep.mubr.msk.f32.mxu1 %vm1397_vm3, %v2682_v53 }
 0x1e9   :  { %v10876_v8 = vpop.eup %10875  ;;  %10887 = verf.f32 %v2495_v44  ;;  %v13723_v59 = vsel %vm1397_vm3, %v1646_v10, 0.0  ;;  %10448 = vmatmul.mubr.msk.f32.gmra.mrb[36].mxu1 %vm1397_vm3, %v2683_v45  ;;  %v2428_v57 = vmul.f32 0.5, %v13658_v60  ;;  %v13728_v30 = vmul.f32 0.03125, %v1448_v49 }
 0x1ea   :  { %v10878_v20 = vpop.eup %10877  ;;  %v2117_v19 = vmax.f32 %v2053_v24, 0.0  ;;  %v2052_v36 = vsub.f32 %v1924_v40, %v1988_v2  ;;  %1808 = vadd.xlane.f32.xlu1 %v13528_v55  ;;  %v2620_v13 = vadd.f32 1.0, %v10876_v8  ;;  %v13733_v10 = vmul.f32 %v10874_v32, %v2177_v63 }
 0x1eb   :  { %v10880_v35 = vpop.eup %10879  ;;  %v1451_v25 = vpop.xlane.xlu1 %1450  ;;  %1555 = vadd.xlane.f32.xlu0 %v13565_v58  ;;  %v13731_v17 = vmul.f32 %v10878_v20, %v2176_v0  ;;  %v13737_v12 = vsel %vm1397_vm3, %v13689_v56, 0.0  ;;  %v2429_v11 = vmul.f32 0.5, %v13660_v34  ;;  %v1649_v18 = vmul.f32 %v13689_v56, %v13689_v56 }
 0x1ec   :  { %v2245_v39 = vadd.f32 1e-05, %v2117_v19  ;;  %v2116_v16 = vmax.f32 %v2052_v36, 0.0  ;;  %v13739_v55 = vmul.f32 0.03125, %v1451_v25  ;;  %v1707_v60 = vpop.xlane.xlu0 %1706  ;;  %v2684_v46 = vmul.f32 %v2620_v13, %v2428_v57 }
 0x1ed   :  { %v1927_v1 = vmul.f32 0.03125, %v1707_v60  ;;  %v2621_v33 = vadd.f32 1.0, %v10880_v35  ;;  %v2496_v58 = vmul.f32 0.70710677, %v13731_v17  ;;  %v2497_v34 = vmul.f32 0.70710677, %v13733_v10 }
 0x1ee   :  { %10889 = vrsqrt.f32 %v2245_v39  ;;  %v2244_v26 = vadd.f32 1e-05, %v2116_v16  ;;  %v1991_v37 = vmul.f32 %v13739_v55, %v13739_v55  ;;  %10450 = vmatprep.mubr.msk.f32.mxu1 %vm1397_vm3, %v2684_v46  ;;  %1558 = vadd.xlane.f32.xlu1 %v13556_v7  ;;  %v13753_v42 = vsel %vm1397_vm3, %v13707_v38, 0.0  ;;  %v19432_v46 = vld [vmem:[#allocation105_spill] sm:$0xff] }
 0x1ef   :  { %v2685_v47 = vmul.f32 %v2621_v33, %v2429_v11  ;;  %v1704_v9 = vpop.xlane.xlu1 %1703  ;;  %1811 = vadd.xlane.f32.xlu0 %v13587_v31  ;;  %10891 = verf.f32 %v2496_v58  ;;  %v1990_v2 = vmul.f32 %v13728_v30, %v13728_v30  ;;  %v2178_v32 = vsub.f32 %v12889_v54, %v13655_v23 }
 0x1f0   :  { %v10882_v48 = vpop.eup %10881  ;;  %10893 = vrsqrt.f32 %v2244_v26  ;;  %v2055_v7 = vsub.f32 %v1927_v1, %v1991_v37  ;;  %v1926_v53 = vmul.f32 0.03125, %v1704_v9  ;;  %v1454_v61 = vpop.xlane.xlu0 %1453  ;;  %v2179_v31 = vsub.f32 %v12886_v28, %v13662_v4  ;;  %v19431_v28 = vld [vmem:[#allocation70_spill] sm:$0xff] }
 0x1f1   :  { %v10884_v44 = vpop.eup %10883  ;;  %10451 = vmatmul.mubr.msk.f32.gmra.mrb[38].mxu1 %vm1397_vm3, %v2685_v47  ;;  %10895 = verf.f32 %v2497_v34  ;;  %v1648_v24 = vmul.f32 %v13707_v38, %v13707_v38  ;;  %v2430_v8 = vmul.f32 0.5, %v13697_v3  ;;  %v13766_v20 = vmul.f32 0.03125, %v1454_v61 }
 0x1f2   :  { %v10886_v45 = vpop.eup %10885  ;;  %v2119_v40 = vmax.f32 %v2055_v7, 0.0  ;;  %v2054_v49 = vsub.f32 %v1926_v53, %v1990_v2  ;;  %1814 = vadd.xlane.f32.xlu1 %v13576_v43  ;;  %v2622_v0 = vadd.f32 1.0, %v10884_v44  ;;  %v13771_v23 = vadd.f32 %v13508_v14, %v19431_v28  ;;  %v19434_v2 = vld [vmem:[#allocation31_spill] sm:$0xff] }
 0x1f3   :  { %v10888_v63 = vpop.eup %10887  ;;  %v1457_v54 = vpop.xlane.xlu1 %1456  ;;  %1561 = vadd.xlane.f32.xlu0 %v13603_v29  ;;  %v13773_v4 = vmul.f32 %v10886_v45, %v2178_v32  ;;  %v13775_v19 = vmul.f32 %v10882_v48, %v2179_v31  ;;  %v2431_v25 = vmul.f32 0.5, %v13699_v27  ;;  %v13786_v1 = vsel %vm1397_vm3, %v1649_v18, 0.0  ;;  %v19433_v27 = vld [vmem:[#allocation71_spill] sm:$0xff] }
 0x1f4   :  { %v2247_v36 = vadd.f32 1e-05, %v2119_v40  ;;  %v2118_v57 = vmax.f32 %v2054_v49, 0.0  ;;  %v13777_v43 = vmul.f32 0.03125, %v1457_v54  ;;  %v1713_v3 = vpop.xlane.xlu0 %1712  ;;  %v2686_v13 = vmul.f32 %v2622_v0, %v2430_v8 }
 0x1f5   :  { %v1929_v35 = vmul.f32 0.03125, %v1713_v3  ;;  %v2623_v39 = vadd.f32 1.0, %v10888_v63  ;;  %v2498_v29 = vmul.f32 0.70710677, %v13773_v4  ;;  %v13791_v58 = vadd.f32 %v13508_v14, %v19433_v27 }
 0x1f6   :  { %10897 = vrsqrt.f32 %v2247_v36  ;;  %v2246_v16 = vadd.f32 1e-05, %v2118_v57  ;;  %v1993_v60 = vmul.f32 %v13777_v43, %v13777_v43  ;;  %10453 = vmatprep.mubr.msk.f32.mxu1 %vm1397_vm3, %v2686_v13  ;;  %1564 = vadd.xlane.f32.xlu1 %v19432_v46  ;;  %v2499_v26 = vmul.f32 0.70710677, %v13775_v19 }
 0x1f7   :  { %v2687_v11 = vmul.f32 %v2623_v39, %v2431_v25  ;;  %v1710_v33 = vpop.xlane.xlu1 %1709  ;;  %1817 = vadd.xlane.f32.xlu0 %v13646_v22  ;;  %10899 = verf.f32 %v2498_v29  ;;  %v1992_v47 = vmul.f32 %v13766_v20, %v13766_v20  ;;  %v2180_v7 = vsub.f32 %v19434_v2, %v13694_v6  ;;  %v19435_v22 = vld [vmem:[#allocation30_spill] sm:$0xff] }
 0x1f8   :  { %v10890_v37 = vpop.eup %10889  ;;  %10901 = vrsqrt.f32 %v2246_v16  ;;  %v2057_v9 = vsub.f32 %v1929_v35, %v1993_v60  ;;  %v1928_v34 = vmul.f32 0.03125, %v1710_v33  ;;  %v1460_v18 = vpop.xlane.xlu0 %1459  ;;  %v2181_v53 = vsub.f32 %v19435_v22, %v13701_v21 }
 0x1f9   :  { %v10892_v48 = vpop.eup %10891  ;;  %10454 = vmatmul.mubr.msk.f32.gmra.mrb[40].mxu1 %vm1397_vm3, %v2687_v11  ;;  %10903 = verf.f32 %v2499_v26  ;;  %v13802_v61 = vsel %vm1397_vm3, %v1648_v24, 0.0  ;;  %v2432_v45 = vmul.f32 0.5, %v13731_v17  ;;  %v13806_v8 = vmul.f32 0.03125, %v1460_v18  ;;  %v19436_v26 = vld [vmem:[#allocation36_spill] sm:$0xff] }
 0x1fa   :  { %v10894_v44 = vpop.eup %10893  ;;  %v2121_v32 = vmax.f32 %v2057_v9, 0.0  ;;  %v2056_v31 = vsub.f32 %v1928_v34, %v1992_v47  ;;  %1820 = vadd.xlane.f32.xlu1 %v13637_v50  ;;  %v2624_v40 = vadd.f32 1.0, %v10892_v48  ;;  %v13813_v24 = vsel %vm1397_vm3, %v13771_v23, 0.0 }
 0x1fb   :  { %v10896_v49 = vpop.eup %10895  ;;  %v1463_v6 = vpop.xlane.xlu1 %1462  ;;  %1567 = vadd.xlane.f32.xlu0 %v13672_v62  ;;  %v13809_v21 = vmul.f32 %v10894_v44, %v2180_v7  ;;  %v13815_v0 = vmul.f32 %v10890_v37, %v2181_v53  ;;  %v2433_v57 = vmul.f32 0.5, %v13733_v10  ;;  %v1651_v25 = vmul.f32 %v13771_v23, %v13771_v23 }
 0x1fc   :  { %v2249_v63 = vadd.f32 1e-05, %v2121_v32  ;;  %v2120_v54 = vmax.f32 %v2056_v31, 0.0  ;;  %v13817_v50 = vmul.f32 0.03125, %v1463_v6  ;;  %v1719_v17 = vpop.xlane.xlu0 %1718  ;;  %v2688_v28 = vmul.f32 %v2624_v40, %v2432_v45 }
 0x1fd   :  { %v1931_v36 = vmul.f32 0.03125, %v1719_v17  ;;  %v2625_v3 = vadd.f32 1.0, %v10896_v49  ;;  %v2500_v62 = vmul.f32 0.70710677, %v13809_v21  ;;  %v13830_v10 = vsel %vm1397_vm3, %v13791_v58, 0.0 }
 0x1fe   :  { %10905 = vrsqrt.f32 %v2249_v63  ;;  %v2248_v13 = vadd.f32 1e-05, %v2120_v54  ;;  %v1995_v35 = vmul.f32 %v13817_v50, %v13817_v50  ;;  %10456 = vmatprep.mubr.msk.f32.mxu1 %vm1397_vm3, %v2688_v28  ;;  %1570 = vadd.xlane.f32.xlu1 %v13651_v52  ;;  %v2501_v16 = vmul.f32 0.70710677, %v13815_v0  ;;  %v19438_v28 = vld [vmem:[#allocation76_spill] sm:$0xff] }
 0x1ff   :  { %v2689_v39 = vmul.f32 %v2625_v3, %v2433_v57  ;;  %v1716_v29 = vpop.xlane.xlu1 %1715  ;;  %1823 = vadd.xlane.f32.xlu0 %v13723_v59  ;;  %10907 = verf.f32 %v2500_v62  ;;  %v1994_v46 = vmul.f32 %v13806_v8, %v13806_v8  ;;  %v2182_v37 = vsub.f32 %v19436_v26, %v13728_v30  ;;  %v19437_v59 = vld [vmem:[#allocation35_spill] sm:$0xff] }
 0x200   :  { %v10898_v60 = vpop.eup %10897  ;;  %10909 = vrsqrt.f32 %v2248_v13  ;;  %v2059_v52 = vsub.f32 %v1931_v36, %v1995_v35  ;;  %v1930_v11 = vmul.f32 0.03125, %v1716_v29  ;;  %v1466_v33 = vpop.xlane.xlu0 %1465  ;;  %v2183_v47 = vsub.f32 %v19437_v59, %v13739_v55 }
 0x201   :  { %v10900_v27 = vpop.eup %10899  ;;  %10457 = vmatmul.mubr.msk.f32.gmra.mrb[42].mxu1 %vm1397_vm3, %v2689_v39  ;;  %10911 = verf.f32 %v2501_v16  ;;  %v1650_v9 = vmul.f32 %v13791_v58, %v13791_v58  ;;  %v2434_v2 = vmul.f32 0.5, %v13773_v4  ;;  %v13844_v53 = vmul.f32 0.03125, %v1466_v33  ;;  %v19439_v16 = vld [vmem:[#allocation40_spill] sm:$0xff] }
 0x202   :  { %v10902_v34 = vpop.eup %10901  ;;  %v2123_v18 = vmax.f32 %v2059_v52, 0.0  ;;  %v2058_v48 = vsub.f32 %v1930_v11, %v1994_v46  ;;  %1826 = vadd.xlane.f32.xlu1 %v13692_v41  ;;  %v2626_v7 = vadd.f32 1.0, %v10900_v27  ;;  %v13848_v55 = vsel %vm1397_vm3, %v1651_v25, 0.0  ;;  %v19440_v46 = vld [vmem:[#allocation39_spill] sm:$0xff]  ;;  %v19441_v52 = vld [vmem:[#allocation77_spill] sm:$0xff] }
 0x203   :  { %v10904_v22 = vpop.eup %10903  ;;  %v1469_v30 = vpop.xlane.xlu1 %1468  ;;  %1573 = vadd.xlane.f32.xlu0 %v13753_v42  ;;  %v13850_v44 = vmul.f32 %v10902_v34, %v2182_v37  ;;  %v13852_v32 = vmul.f32 %v10898_v60, %v2183_v47  ;;  %v2435_v6 = vmul.f32 0.5, %v13775_v19  ;;  %v13864_v36 = vadd.f32 %v13508_v14, %v19438_v28 }
 0x204   :  { %v2251_v31 = vadd.f32 1e-05, %v2123_v18  ;;  %v2122_v45 = vmax.f32 %v2058_v48, 0.0  ;;  %v13854_v40 = vmul.f32 0.03125, %v1469_v30  ;;  %v1725_v41 = vpop.xlane.xlu0 %1724  ;;  %v2690_v4 = vmul.f32 %v2626_v7, %v2434_v2 }
 0x205   :  { %v1933_v49 = vmul.f32 0.03125, %v1725_v41  ;;  %v2627_v63 = vadd.f32 1.0, %v10904_v22  ;;  %v2502_v54 = vmul.f32 0.70710677, %v13850_v44  ;;  %v1834_v19 = vsel %vm1397_vm3, %v1650_v9, 0.0 }
 0x206   :  { %10913 = vrsqrt.f32 %v2251_v31  ;;  %v2250_v42 = vadd.f32 1e-05, %v2122_v45  ;;  %v1997_v17 = vmul.f32 %v13854_v40, %v13854_v40  ;;  %10459 = vmatprep.mubr.msk.f32.mxu1 %vm1397_vm3, %v2690_v4  ;;  %1576 = vadd.xlane.f32.xlu1 %v13737_v12  ;;  %v2503_v62 = vmul.f32 0.70710677, %v13852_v32 }
 0x207   :  { %v2691_v57 = vmul.f32 %v2627_v63, %v2435_v6  ;;  %v1722_v3 = vpop.xlane.xlu1 %1721  ;;  %1829 = vadd.xlane.f32.xlu0 %v13802_v61  ;;  %10915 = verf.f32 %v2502_v54  ;;  %v1996_v35 = vmul.f32 %v13844_v53, %v13844_v53  ;;  %v2184_v60 = vsub.f32 %v19439_v16, %v13766_v20 }
 0x208   :  { %v10906_v13 = vpop.eup %10905  ;;  %10917 = vrsqrt.f32 %v2250_v42  ;;  %v2061_v25 = vsub.f32 %v1933_v49, %v1997_v17  ;;  %v1932_v12 = vmul.f32 0.03125, %v1722_v3  ;;  %v1472_v39 = vpop.xlane.xlu0 %1471  ;;  %v2185_v61 = vsub.f32 %v19440_v46, %v13777_v43 }
 0x209   :  { %v10908_v29 = vpop.eup %10907  ;;  %10460 = vmatmul.mubr.msk.f32.gmra.mrb[44].mxu1 %vm1397_vm3, %v2691_v57  ;;  %v13878_v11 = vadd.f32 %v13508_v14, %v19441_v52  ;;  %10919 = verf.f32 %v2503_v62  ;;  %v2436_v37 = vmul.f32 0.5, %v13809_v21  ;;  %v13882_v20 = vmul.f32 0.03125, %v1472_v39  ;;  %v19442_v57 = vld [vmem:[#allocation45_spill] sm:$0xff] }
 0x20a   :  { %v10910_v33 = vpop.eup %10909  ;;  %v2125_v27 = vmax.f32 %v2061_v25, 0.0  ;;  %v2060_v26 = vsub.f32 %v1932_v12, %v1996_v35  ;;  %1832 = vadd.xlane.f32.xlu1 %v13786_v1  ;;  %v2628_v59 = vadd.f32 1.0, %v10908_v29  ;;  %v1652_v43 = vmul.f32 %v13864_v36, %v13864_v36 }
 0x20b   :  { %v10912_v47 = vpop.eup %10911  ;;  %v1475_v9 = vpop.xlane.xlu1 %1474  ;;  %1579 = vadd.xlane.f32.xlu0 %v13830_v10  ;;  %v13887_v14 = vmul.f32 %v10910_v33, %v2184_v60  ;;  %v13889_v34 = vmul.f32 %v10906_v13, %v2185_v61  ;;  %v2437_v22 = vmul.f32 0.5, %v13815_v0  ;;  %v1584_v41 = vsel %vm1397_vm3, %v13864_v36, 0.0 }
 0x20c   :  { %v2253_v18 = vadd.f32 1e-05, %v2125_v27  ;;  %v2124_v48 = vmax.f32 %v2060_v26, 0.0  ;;  %v13891_v2 = vmul.f32 0.03125, %v1475_v9  ;;  %v1731_v1 = vpop.xlane.xlu0 %1730  ;;  %v2692_v21 = vmul.f32 %v2628_v59, %v2436_v37 }
 0x20d   :  { %v1935_v7 = vmul.f32 0.03125, %v1731_v1  ;;  %v2629_v30 = vadd.f32 1.0, %v10912_v47  ;;  %v2504_v31 = vmul.f32 0.70710677, %v13887_v14  ;;  %v1587_v0 = vsel %vm1397_vm3, %v13878_v11, 0.0 }
 0x20e   :  { %10921 = vrsqrt.f32 %v2253_v18  ;;  %v2252_v10 = vadd.f32 1e-05, %v2124_v48  ;;  %v1999_v45 = vmul.f32 %v13891_v2, %v13891_v2  ;;  %10462 = vmatprep.mubr.msk.f32.mxu1 %vm1397_vm3, %v2692_v21  ;;  %1582 = vadd.xlane.f32.xlu1 %v13813_v24  ;;  %v2505_v6 = vmul.f32 0.70710677, %v13889_v34 }
 0x20f   :  { %v2693_v4 = vmul.f32 %v2629_v30, %v2437_v22  ;;  %v1728_v49 = vpop.xlane.xlu1 %1727  ;;  %1835 = vadd.xlane.f32.xlu0 %v1834_v19  ;;  %10923 = verf.f32 %v2504_v31  ;;  %v1998_v54 = vmul.f32 %v13882_v20, %v13882_v20  ;;  %v2186_v3 = vsub.f32 %v19442_v57, %v13806_v8  ;;  %v19443_v19 = vld [vmem:[#allocation44_spill] sm:$0xff] }
 0x210   :  { %v10914_v63 = vpop.eup %10913  ;;  %10925 = vrsqrt.f32 %v2252_v10  ;;  %v2063_v42 = vsub.f32 %v1935_v7, %v1999_v45  ;;  %v1934_v17 = vmul.f32 0.03125, %v1728_v49  ;;  %v1478_v24 = vpop.xlane.xlu0 %1477  ;;  %v2187_v62 = vsub.f32 %v19443_v19, %v13817_v50  ;;  %v19444_v45 = vld [vmem:[#allocation50_spill] sm:$0xff] }
 0x211   :  { %v10916_v28 = vpop.eup %10915  ;;  %10463 = vmatmul.mubr.msk.f32.gmra.mrb[46].mxu1 %vm1397_vm3, %v2693_v4  ;;  %v1840_v13 = vsel %vm1397_vm3, %v1652_v43, 0.0  ;;  %10927 = verf.f32 %v2505_v6  ;;  %v2438_v39 = vmul.f32 0.5, %v13850_v44  ;;  %v13914_v60 = vmul.f32 0.03125, %v1478_v24  ;;  %v19445_v4 = vld [vmem:[#allocation49_spill] sm:$0xff] }
 0x212   :  { %v10918_v35 = vpop.eup %10917  ;;  %v2127_v25 = vmax.f32 %v2063_v42, 0.0  ;;  %v2062_v12 = vsub.f32 %v1934_v17, %v1998_v54  ;;  %1838 = vadd.xlane.f32.xlu1 %v13848_v55  ;;  %v2630_v29 = vadd.f32 1.0, %v10916_v28  ;;  %v1653_v50 = vmul.f32 %v13878_v11, %v13878_v11 }
 0x213   :  { %v10920_v16 = vpop.eup %10919  ;;  %v1481_v8 = vpop.xlane.xlu1 %1480  ;;  %1585 = vadd.xlane.f32.xlu0 %v1584_v41  ;;  %v13918_v46 = vmul.f32 %v10918_v35, %v2186_v3  ;;  %v13920_v61 = vmul.f32 %v10914_v63, %v2187_v62  ;;  %v2439_v37 = vmul.f32 0.5, %v13852_v32  ;;  %v2000_v7 = vmul.f32 %v13914_v60, %v13914_v60 }
 0x214   :  { %v2255_v52 = vadd.f32 1e-05, %v2127_v25  ;;  %v2126_v33 = vmax.f32 %v2062_v12, 0.0  ;;  %v13922_v27 = vmul.f32 0.03125, %v1481_v8  ;;  %v1737_v55 = vpop.xlane.xlu0 %1736  ;;  %v2694_v26 = vmul.f32 %v2630_v29, %v2438_v39 }
 0x215   :  { %v1937_v44 = vmul.f32 0.03125, %v1737_v55  ;;  %v2631_v59 = vadd.f32 1.0, %v10920_v16  ;;  %v2506_v47 = vmul.f32 0.70710677, %v13918_v46  ;;  %v1843_v1 = vsel %vm1397_vm3, %v1653_v50, 0.0 }
 0x216   :  { %10929 = vrsqrt.f32 %v2255_v52  ;;  %v2254_v9 = vadd.f32 1e-05, %v2126_v33  ;;  %v2001_v43 = vmul.f32 %v13922_v27, %v13922_v27  ;;  %10465 = vmatprep.mubr.msk.f32.mxu1 %vm1397_vm3, %v2694_v26  ;;  %1588 = vadd.xlane.f32.xlu1 %v1587_v0  ;;  %v2507_v21 = vmul.f32 0.70710677, %v13920_v61 }
 0x217   :  { %v2695_v18 = vmul.f32 %v2631_v59, %v2439_v37  ;;  %v1734_v48 = vpop.xlane.xlu1 %1733  ;;  %1841 = vadd.xlane.f32.xlu0 %v1840_v13  ;;  %10931 = verf.f32 %v2506_v47  ;;  %v2188_v41 = vsub.f32 %v19444_v45, %v13844_v53  ;;  %v2189_v49 = vsub.f32 %v19445_v4, %v13854_v40  ;;  %v19446_v37 = vld [vmem:[#allocation54_spill] sm:$0xff]  ;;  %v19447_v47 = vld [vmem:[#allocation53_spill] sm:$0xff] }
 0x218   :  { %v10922_v32 = vpop.eup %10921  ;;  %10933 = vrsqrt.f32 %v2254_v9  ;;  %v2065_v22 = vsub.f32 %v1937_v44, %v2001_v43  ;;  %v1936_v30 = vmul.f32 0.03125, %v1734_v48  ;;  %v1484_v31 = vpop.xlane.xlu0 %1483  ;;  %v2440_v54 = vmul.f32 0.5, %v13887_v14 }
 0x219   :  { %v10924_v10 = vpop.eup %10923  ;;  %10466 = vmatmul.mubr.msk.f32.gmra.mrb[48].mxu1 %vm1397_vm3, %v2695_v18  ;;  %10935 = verf.f32 %v2507_v21  ;;  %v13939_v24 = vmul.f32 0.03125, %v1484_v31  ;;  %v13943_v53 = vmul.f32 %v10922_v32, %v2189_v49  ;;  %v2441_v25 = vmul.f32 0.5, %v13889_v34 }
 0x21a   :  { %v10926_v0 = vpop.eup %10925  ;;  %v2129_v6 = vmax.f32 %v2065_v22, 0.0  ;;  %v2064_v63 = vsub.f32 %v1936_v30, %v2000_v7  ;;  %1844 = vadd.xlane.f32.xlu1 %v1843_v1  ;;  %v2632_v42 = vadd.f32 1.0, %v10924_v10  ;;  %v2190_v59 = vsub.f32 %v19446_v37, %v13882_v20 }
 0x21b   :  { %v10928_v17 = vpop.eup %10927  ;;  %v1487_v28 = vpop.xlane.xlu1 %1486  ;;  %v13941_v57 = vmul.f32 %v10926_v0, %v2188_v41  ;;  %v2509_v50 = vmul.f32 0.70710677, %v13943_v53  ;;  %v2002_v34 = vmul.f32 %v13939_v24, %v13939_v24  ;;  %v2191_v9 = vsub.f32 %v19447_v47, %v13891_v2 }
 0x21c   :  { %v2257_v3 = vadd.f32 1e-05, %v2129_v6  ;;  %v2128_v40 = vmax.f32 %v2064_v63, 0.0  ;;  %v13945_v19 = vmul.f32 0.03125, %v1487_v28  ;;  %v1743_v62 = vpop.xlane.xlu0 %1742  ;;  %v2696_v13 = vmul.f32 %v2632_v42, %v2440_v54 }
 0x21d   :  { %v1939_v35 = vmul.f32 0.03125, %v1743_v62  ;;  %v2633_v12 = vadd.f32 1.0, %v10928_v17  ;;  %v2508_v14 = vmul.f32 0.70710677, %v13941_v57  ;;  %v2442_v1 = vmul.f32 0.5, %v13918_v46 }
 0x21e   :  { %10937 = vrsqrt.f32 %v2257_v3  ;;  %v2256_v39 = vadd.f32 1e-05, %v2128_v40  ;;  %v2003_v29 = vmul.f32 %v13945_v19, %v13945_v19  ;;  %10468 = vmatprep.mubr.msk.f32.mxu1 %vm1397_vm3, %v2696_v13  ;;  %v2443_v49 = vmul.f32 0.5, %v13920_v61  ;;  %v8215_v13 = vld [vmem:[%s19188_s9 + $0x1d8] sm:$0xff] }
 0x21f   :  { %v2697_v16 = vmul.f32 %v2633_v12, %v2441_v25  ;;  %v1740_v8 = vpop.xlane.xlu1 %1739  ;;  %10939 = verf.f32 %v2508_v14  ;;  %v19448_v25 = vld [vmem:[#allocation59_spill] sm:$0xff]  ;;  %v19449_v14 = vld [vmem:[#allocation58_spill] sm:$0xff] }
 0x220   :  { %v10930_v52 = vpop.eup %10929  ;;  %10941 = vrsqrt.f32 %v2256_v39  ;;  %v2067_v33 = vsub.f32 %v1939_v35, %v2003_v29  ;;  %v1938_v55 = vmul.f32 0.03125, %v1740_v8  ;;  %v1490_v26 = vpop.xlane.xlu0 %1489  ;;  %v2192_v12 = vsub.f32 %v19448_v25, %v13914_v60 }
 0x221   :  { %v10932_v44 = vpop.eup %10931  ;;  %10469 = vmatmul.mubr.msk.f32.gmra.mrb[50].mxu1 %vm1397_vm3, %v2697_v16  ;;  %10943 = verf.f32 %v2509_v50  ;;  %v13961_v7 = vmul.f32 0.03125, %v1490_v26  ;;  %v13965_v31 = vmul.f32 %v10930_v52, %v2191_v9  ;;  %v2193_v39 = vsub.f32 %v19449_v14, %v13922_v27  ;;  %v8217_v9 = vld [vmem:[%s19188_s9 + $0x1e8] sm:$0xff] }
 0x222   :  { %v10934_v43 = vpop.eup %10933  ;;  %v2131_v18 = vmax.f32 %v2067_v33, 0.0  ;;  %v2066_v48 = vsub.f32 %v1938_v55, %v2002_v34  ;;  %v2634_v21 = vadd.f32 1.0, %v10932_v44  ;;  %v2444_v50 = vmul.f32 0.5, %v13941_v57  ;;  %v8214_v34 = vld [vmem:[%s19188_s9 + $0x1d0] sm:$0xff] }
 0x223   :  { %v10936_v32 = vpop.eup %10935  ;;  %v1493_v22 = vpop.xlane.xlu1 %1492  ;;  %v13963_v30 = vmul.f32 %v10934_v43, %v2190_v59  ;;  %v2511_v17 = vmul.f32 0.70710677, %v13965_v31  ;;  %v2004_v61 = vmul.f32 %v13961_v7, %v13961_v7 }
 0x224   :  { %v2259_v20 = vadd.f32 1e-05, %v2131_v18  ;;  %v2130_v10 = vmax.f32 %v2066_v48, 0.0  ;;  %v13967_v2 = vmul.f32 0.03125, %v1493_v22  ;;  %v1749_v45 = vpop.xlane.xlu0 %1748  ;;  %v2698_v41 = vmul.f32 %v2634_v21, %v2442_v1 }
 0x225   :  { %v1941_v4 = vmul.f32 0.03125, %v1749_v45  ;;  %v2635_v0 = vadd.f32 1.0, %v10936_v32  ;;  %v2510_v46 = vmul.f32 0.70710677, %v13963_v30  ;;  %v2445_v18 = vmul.f32 0.5, %v13943_v53 }
 0x226   :  { %10945 = vrsqrt.f32 %v2259_v20  ;;  %v2258_v6 = vadd.f32 1e-05, %v2130_v10  ;;  %v2005_v63 = vmul.f32 %v13967_v2, %v13967_v2  ;;  %10471 = vmatprep.mubr.msk.f32.mxu1 %vm1397_vm3, %v2698_v41  ;;  %v8216_v20 = vld [vmem:[%s19188_s9 + $0x1e0] sm:$0xff] }
 0x227   :  { %v2699_v54 = vmul.f32 %v2635_v0, %v2443_v49  ;;  %v1746_v42 = vpop.xlane.xlu1 %1745  ;;  %10947 = verf.f32 %v2510_v46 }
 0x228   :  { %v10938_v28 = vpop.eup %10937  ;;  %10949 = vrsqrt.f32 %v2258_v6  ;;  %v2069_v3 = vsub.f32 %v1941_v4, %v2005_v63  ;;  %v1940_v40 = vmul.f32 0.03125, %v1746_v42  ;;  %v1496_v62 = vpop.xlane.xlu0 %1495  ;;  %v19450_v6 = vld [vmem:[#allocation63_spill] sm:$0xff] }
 0x229   :  { %v10940_v35 = vpop.eup %10939  ;;  %10472 = vmatmul.mubr.msk.f32.gmra.mrb[52].mxu1 %vm1397_vm3, %v2699_v54  ;;  %10951 = verf.f32 %v2511_v17  ;;  %v13989_v55 = vmul.f32 0.03125, %v1496_v62  ;;  %v13993_v27 = vmul.f32 %v10938_v28, %v2193_v39  ;;  %v2194_v63 = vsub.f32 %v19450_v6, %v13939_v24  ;;  %v19451_v54 = vld [vmem:[#allocation62_spill] sm:$0xff] }
 0x22a   :  { %v10942_v29 = vpop.eup %10941  ;;  %v2133_v16 = vmax.f32 %v2069_v3, 0.0  ;;  %v2068_v8 = vsub.f32 %v1940_v40, %v2004_v61  ;;  %v2636_v52 = vadd.f32 1.0, %v10940_v35  ;;  %v2195_v42 = vsub.f32 %v19451_v54, %v13945_v19 }
 0x22b   :  { %v10944_v33 = vpop.eup %10943  ;;  %v1499_v60 = vpop.xlane.xlu1 %1498  ;;  %v13991_v26 = vmul.f32 %v10942_v29, %v2192_v12  ;;  %8402 = vrot.lane.b32.xlu1 %v8215_v13, %s11870_s24  ;;  %v2006_v32 = vmul.f32 %v13989_v55, %v13989_v55  ;;  %v2513_v45 = vmul.f32 0.70710677, %v13993_v27  ;;  %v2446_v3 = vmul.f32 0.5, %v13963_v30 }
 0x22c   :  { %v2261_v44 = vadd.f32 1e-05, %v2133_v16  ;;  %v2132_v37 = vmax.f32 %v2068_v8, 0.0  ;;  %v13996_v59 = vmul.f32 0.03125, %v1499_v60  ;;  %v1755_v57 = vpop.xlane.xlu0 %1754  ;;  %v2700_v47 = vmul.f32 %v2636_v52, %v2444_v50 }
 0x22d   :  { %v1943_v43 = vmul.f32 0.03125, %v1755_v57  ;;  %v2637_v48 = vadd.f32 1.0, %v10944_v33  ;;  %v2512_v1 = vmul.f32 0.70710677, %v13991_v26  ;;  %8400 = vrot.lane.b32.xlu0 %v8214_v34, %s11870_s24  ;;  %v2447_v8 = vmul.f32 0.5, %v13965_v31 }
 0x22e   :  { %10953 = vrsqrt.f32 %v2261_v44  ;;  %v2260_v21 = vadd.f32 1e-05, %v2132_v37  ;;  %v2007_v22 = vmul.f32 %v13996_v59, %v13996_v59  ;;  %10474 = vmatprep.mubr.msk.f32.mxu1 %vm1397_vm3, %v2700_v47 }
 0x22f   :  { %v2701_v53 = vmul.f32 %v2637_v48, %v2445_v18  ;;  %v1752_v10 = vpop.xlane.xlu1 %1751  ;;  %10955 = verf.f32 %v2512_v1  ;;  %8406 = vrot.lane.b32.xlu1 %v8217_v9, %s11870_s24  ;;  %v19452_v18 = vld [vmem:[#allocation68_spill] sm:$0xff]  ;;  %v19453_v1 = vld [vmem:[#allocation67_spill] sm:$0xff] }
 0x230   :  { %v10946_v41 = vpop.eup %10945  ;;  %10957 = vrsqrt.f32 %v2260_v21  ;;  %v2071_v4 = vsub.f32 %v1943_v43, %v2007_v22  ;;  %v1942_v49 = vmul.f32 0.03125, %v1752_v10  ;;  %v1502_v0 = vpop.xlane.xlu0 %1501  ;;  %v2196_v48 = vsub.f32 %v19452_v18, %v13961_v7 }
 0x231   :  { %v10948_v46 = vpop.eup %10947  ;;  %10475 = vmatmul.mubr.msk.f32.gmra.mrb[54].mxu1 %vm1397_vm3, %v2701_v53  ;;  %10959 = verf.f32 %v2513_v45  ;;  %8404 = vrot.lane.b32.xlu0 %v8216_v20, %s11870_s24  ;;  %v14021_v13 = vmul.f32 0.03125, %v1502_v0  ;;  %v14025_v24 = vmul.f32 %v10946_v41, %v2195_v42  ;;  %v2197_v21 = vsub.f32 %v19453_v1, %v13967_v2 }
 0x232   :  { %v10950_v17 = vpop.eup %10949  ;;  %v2135_v28 = vmax.f32 %v2071_v4, 0.0  ;;  %v2070_v61 = vsub.f32 %v1942_v49, %v2006_v32  ;;  %v2638_v40 = vadd.f32 1.0, %v10948_v46  ;;  %v2448_v53 = vmul.f32 0.5, %v13991_v26 }
 0x233   :  { %v10952_v62 = vpop.eup %10951  ;;  %v1505_v35 = vpop.xlane.xlu1 %1504  ;;  %v14023_v25 = vmul.f32 %v10950_v17, %v2194_v63  ;;  %v2008_v34 = vmul.f32 %v14021_v13, %v14021_v13  ;;  %v2515_v37 = vmul.f32 0.70710677, %v14025_v24  ;;  %v2449_v42 = vmul.f32 0.5, %v13993_v27 }
 0x234   :  { %v2263_v19 = vadd.f32 1e-05, %v2135_v28  ;;  %v2134_v12 = vmax.f32 %v2070_v61, 0.0  ;;  %v14027_v14 = vmul.f32 0.03125, %v1505_v35  ;;  %v1761_v39 = vpop.xlane.xlu0 %1760  ;;  %v2702_v29 = vmul.f32 %v2638_v40, %v2446_v3 }
 0x235   :  { %v1945_v16 = vmul.f32 0.03125, %v1761_v39  ;;  %v2639_v50 = vadd.f32 1.0, %v10952_v62  ;;  %v2514_v30 = vmul.f32 0.70710677, %v14023_v25 }
 0x236   :  { %10961 = vrsqrt.f32 %v2263_v19  ;;  %v2262_v52 = vadd.f32 1e-05, %v2134_v12  ;;  %v2009_v33 = vmul.f32 %v14027_v14, %v14027_v14  ;;  %10477 = vmatprep.mubr.msk.f32.mxu1 %vm1397_vm3, %v2702_v29 }
 0x237   :  { %v2703_v60 = vmul.f32 %v2639_v50, %v2447_v8  ;;  %v1758_v44 = vpop.xlane.xlu1 %1757  ;;  %10963 = verf.f32 %v2514_v30  ;;  %v19455_v50 = vld [vmem:[#allocation73_spill] sm:$0xff] }
 0x238   :  { %v10954_v57 = vpop.eup %10953  ;;  %10965 = vrsqrt.f32 %v2262_v52  ;;  %v2073_v31 = vsub.f32 %v1945_v16, %v2009_v33  ;;  %v1944_v47 = vmul.f32 0.03125, %v1758_v44  ;;  %v1508_v9 = vpop.xlane.xlu0 %1507  ;;  %v19454_v16 = vld [vmem:[#allocation74_spill] sm:$0xff]  ;;  %v2199_v30 = vsub.f32 %v19455_v50, %v13996_v59 }
 0x239   :  { %v10956_v43 = vpop.eup %10955  ;;  %10478 = vmatmul.mubr.msk.f32.gmra.mrb[56].mxu1 %vm1397_vm3, %v2703_v60  ;;  %10967 = verf.f32 %v2515_v37  ;;  %v14043_v41 = vmul.f32 0.03125, %v1508_v9  ;;  %v14047_v0 = vmul.f32 %v10954_v57, %v2197_v21  ;;  %v2198_v8 = vsub.f32 %v19454_v16, %v13989_v55 }
 0x23a   :  { %v10958_v32 = vpop.eup %10957  ;;  %v2137_v22 = vmax.f32 %v2073_v31, 0.0  ;;  %v2072_v20 = vsub.f32 %v1944_v47, %v2008_v34  ;;  %v2640_v10 = vadd.f32 1.0, %v10956_v43  ;;  %v2450_v60 = vmul.f32 0.5, %v14023_v25 }
 0x23b   :  { %v10960_v45 = vpop.eup %10959  ;;  %v1511_v4 = vpop.xlane.xlu1 %1510  ;;  %v14045_v49 = vmul.f32 %v10958_v32, %v2196_v48  ;;  %v2010_v61 = vmul.f32 %v14043_v41, %v14043_v41  ;;  %v2517_v35 = vmul.f32 0.70710677, %v14047_v0  ;;  %v2451_v21 = vmul.f32 0.5, %v14025_v24 }
 0x23c   :  { %v2265_v7 = vadd.f32 1e-05, %v2137_v22  ;;  %v2136_v46 = vmax.f32 %v2072_v20, 0.0  ;;  %v14049_v2 = vmul.f32 0.03125, %v1511_v4  ;;  %v1767_v6 = vpop.xlane.xlu0 %1766  ;;  %v2704_v63 = vmul.f32 %v2640_v10, %v2448_v53 }
 0x23d   :  { %v1947_v54 = vmul.f32 0.03125, %v1767_v6  ;;  %v2641_v17 = vadd.f32 1.0, %v10960_v45  ;;  %v2516_v26 = vmul.f32 0.70710677, %v14045_v49 }
 0x23e   :  { %10969 = vrsqrt.f32 %v2265_v7  ;;  %v2264_v28 = vadd.f32 1e-05, %v2136_v46  ;;  %v2011_v3 = vmul.f32 %v14049_v2, %v14049_v2  ;;  %10480 = vmatprep.mubr.msk.f32.mxu1 %vm1397_vm3, %v2704_v63 }
 0x23f   :  { %v2705_v40 = vmul.f32 %v2641_v17, %v2449_v42  ;;  %v1764_v62 = vpop.xlane.xlu1 %1763  ;;  %10971 = verf.f32 %v2516_v26  ;;  %v19457_v17 = vld [vmem:[#allocation80_spill] sm:$0xff] }
 0x240   :  { %v10962_v19 = vpop.eup %10961  ;;  %10973 = vrsqrt.f32 %v2264_v28  ;;  %v2075_v27 = vsub.f32 %v1947_v54, %v2011_v3  ;;  %v1946_v12 = vmul.f32 0.03125, %v1764_v62  ;;  %v1514_v39 = vpop.xlane.xlu0 %1513  ;;  %v19456_v54 = vld [vmem:[#allocation81_spill] sm:$0xff]  ;;  %v2201_v26 = vsub.f32 %v19457_v17, %v14027_v14 }
 0x241   :  { %v10964_v29 = vpop.eup %10963  ;;  %10481 = vmatmul.mubr.msk.f32.gmra.mrb[58].mxu1 %vm1397_vm3, %v2705_v40  ;;  %10975 = verf.f32 %v2517_v35  ;;  %v14065_v57 = vmul.f32 0.03125, %v1514_v39  ;;  %v14069_v9 = vmul.f32 %v10962_v19, %v2199_v30  ;;  %v2200_v42 = vsub.f32 %v19456_v54, %v14021_v13 }
 0x242   :  { %v10966_v52 = vpop.eup %10965  ;;  %v2139_v34 = vmax.f32 %v2075_v27, 0.0  ;;  %v2074_v33 = vsub.f32 %v1946_v12, %v2010_v61  ;;  %v2642_v44 = vadd.f32 1.0, %v10964_v29  ;;  %v2452_v62 = vmul.f32 0.5, %v14045_v49 }
 0x243   :  { %v10968_v37 = vpop.eup %10967  ;;  %v1517_v31 = vpop.xlane.xlu1 %1516  ;;  %v14067_v47 = vmul.f32 %v10966_v52, %v2198_v8  ;;  %v2012_v20 = vmul.f32 %v14065_v57, %v14065_v57  ;;  %v2519_v4 = vmul.f32 0.70710677, %v14069_v9  ;;  %v2453_v52 = vmul.f32 0.5, %v14047_v0 }
 0x244   :  { %v2267_v55 = vadd.f32 1e-05, %v2139_v34  ;;  %v2138_v43 = vmax.f32 %v2074_v33, 0.0  ;;  %v14071_v59 = vmul.f32 0.03125, %v1517_v31  ;;  %v1773_v18 = vpop.xlane.xlu0 %1772  ;;  %v2706_v48 = vmul.f32 %v2642_v44, %v2450_v60 }
 0x245   :  { %v1949_v1 = vmul.f32 0.03125, %v1773_v18  ;;  %v2643_v32 = vadd.f32 1.0, %v10968_v37  ;;  %v2518_v25 = vmul.f32 0.70710677, %v14067_v47  ;;  %v19458_v18 = vld [vmem:[#allocation86_spill] sm:$0xff] }
 0x246   :  { %10977 = vrsqrt.f32 %v2267_v55  ;;  %v2266_v22 = vadd.f32 1e-05, %v2138_v43  ;;  %v2013_v53 = vmul.f32 %v14071_v59, %v14071_v59  ;;  %10483 = vmatprep.mubr.msk.f32.mxu1 %vm1397_vm3, %v2706_v48  ;;  %v2202_v0 = vsub.f32 %v19458_v18, %v14043_v41 }
 0x247   :  { %v2707_v10 = vmul.f32 %v2643_v32, %v2451_v21  ;;  %v1770_v45 = vpop.xlane.xlu1 %1769  ;;  %10979 = verf.f32 %v2518_v25  ;;  %v19459_v32 = vld [vmem:[#allocation85_spill] sm:$0xff]  ;;  %v2455_v41 = vmul.f32 0.5, %v14069_v9 }
 0x248   :  { %v10970_v7 = vpop.eup %10969  ;;  %10981 = vrsqrt.f32 %v2266_v22  ;;  %v2077_v24 = vsub.f32 %v1949_v1, %v2013_v53  ;;  %v1948_v46 = vmul.f32 0.03125, %v1770_v45  ;;  %v1520_v6 = vpop.xlane.xlu0 %1519  ;;  %v2203_v25 = vsub.f32 %v19459_v32, %v14049_v2 }
 0x249   :  { %v10972_v63 = vpop.eup %10971  ;;  %10484 = vmatmul.mubr.msk.f32.gmra.mrb[60].mxu1 %vm1397_vm3, %v2707_v10  ;;  %v14086_v28 = vmul.f32 0.03125, %v1520_v6  ;;  %10983 = verf.f32 %v2519_v4  ;;  %v14093_v39 = vmul.f32 %v10970_v7, %v2201_v26  ;;  %v2454_v45 = vmul.f32 0.5, %v14067_v47 }
 0x24a   :  { %v10974_v61 = vpop.eup %10973  ;;  %v2141_v3 = vmax.f32 %v2077_v24, 0.0  ;;  %v2076_v40 = vsub.f32 %v1948_v46, %v2012_v20  ;;  %v2644_v35 = vadd.f32 1.0, %v10972_v63 }
 0x24b   :  { %v10976_v19 = vpop.eup %10975  ;;  %v2014_v27 = vmul.f32 %v14086_v28, %v14086_v28  ;;  %v1523_v12 = vpop.xlane.xlu1 %1522  ;;  %v14091_v13 = vmul.f32 %v10974_v61, %v2200_v42  ;;  %v2521_v55 = vmul.f32 0.70710677, %v14093_v39 }
 0x24c   :  { %v2269_v14 = vadd.f32 1e-05, %v2141_v3  ;;  %v2140_v29 = vmax.f32 %v2076_v40, 0.0  ;;  %v14095_v16 = vmul.f32 0.03125, %v1523_v12  ;;  %v1776_v8 = vpop.xlane.xlu0 %1775  ;;  %v2708_v50 = vmul.f32 %v2644_v35, %v2452_v62 }
 0x24d   :  { %v1950_v30 = vmul.f32 0.03125, %v1776_v8  ;;  %v2645_v49 = vadd.f32 1.0, %v10976_v19  ;;  %v2520_v34 = vmul.f32 0.70710677, %v14091_v13 }
 0x24e   :  { %10985 = vrsqrt.f32 %v2269_v14  ;;  %v2268_v33 = vadd.f32 1e-05, %v2140_v29  ;;  %v2015_v60 = vmul.f32 %v14095_v16, %v14095_v16  ;;  %10486 = vmatprep.mubr.msk.f32.mxu1 %vm1397_vm3, %v2708_v50  ;;  %v19460_v14 = vld [vmem:[#allocation89_spill] sm:$0xff] }
 0x24f   :  { %v2078_v44 = vsub.f32 %v1950_v30, %v2014_v27  ;;  %v2709_v37 = vmul.f32 %v2645_v49, %v2453_v52  ;;  %v1779_v31 = vpop.xlane.xlu1 %1778  ;;  %10987 = verf.f32 %v2520_v34  ;;  %v2204_v29 = vsub.f32 %v19460_v14, %v14065_v57  ;;  %v19461_v52 = vld [vmem:[#allocation87_spill] sm:$0xff] }
 0x250   :  { %v10978_v43 = vpop.eup %10977  ;;  %10989 = vrsqrt.f32 %v2268_v33  ;;  %v1951_v48 = vmul.f32 0.03125, %v1779_v31  ;;  %v1526_v1 = vpop.xlane.xlu0 %1525  ;;  %v2205_v49 = vsub.f32 %v19461_v52, %v14071_v59  ;;  %v2457_v57 = vmul.f32 0.5, %v14093_v39 }
 0x251   :  { %v10980_v21 = vpop.eup %10979  ;;  %v2142_v22 = vmax.f32 %v2078_v44, 0.0  ;;  %10487 = vmatmul.mubr.msk.f32.gmra.mrb[62].mxu1 %vm1397_vm3, %v2709_v37  ;;  %v14108_v20 = vmul.f32 0.03125, %v1526_v1  ;;  %10991 = verf.f32 %v2521_v55  ;;  %v14116_v63 = vmul.f32 %v10978_v43, %v2203_v25 }
 0x252   :  { %v10982_v53 = vpop.eup %10981  ;;  %v2079_v10 = vsub.f32 %v1951_v48, %v2015_v60  ;;  %v2646_v4 = vadd.f32 1.0, %v10980_v21  ;;  %v2456_v37 = vmul.f32 0.5, %v14091_v13 }
 0x253   :  { %v10984_v7 = vpop.eup %10983  ;;  %v2270_v24 = vadd.f32 1e-05, %v2142_v22  ;;  %v2016_v46 = vmul.f32 %v14108_v20, %v14108_v20  ;;  %v1529_v6 = vpop.xlane.xlu1 %1528  ;;  %v14114_v2 = vmul.f32 %v10982_v53, %v2202_v0  ;;  %v2523_v27 = vmul.f32 0.70710677, %v14116_v63  ;;  %v19462_v53 = vld [vmem:[#allocation91_spill] sm:$0xff] }
 0x254   :  { %v2143_v54 = vmax.f32 %v2079_v10, 0.0  ;;  %v14118_v42 = vmul.f32 0.03125, %v1529_v6  ;;  %v1782_v17 = vpop.xlane.xlu0 %1781  ;;  %v2710_v26 = vmul.f32 %v2646_v4, %v2454_v45  ;;  %v2647_v61 = vadd.f32 1.0, %v10984_v7 }
 0x255   :  { %10993 = vrsqrt.f32 %v2270_v24  ;;  %v1952_v47 = vmul.f32 0.03125, %v1782_v17  ;;  %v2522_v9 = vmul.f32 0.70710677, %v14114_v2  ;;  %v2206_v10 = vsub.f32 %v19462_v53, %v14086_v28 }
 0x256   :  { %v2271_v3 = vadd.f32 1e-05, %v2143_v54  ;;  %v2017_v40 = vmul.f32 %v14118_v42, %v14118_v42  ;;  %10489 = vmatprep.mubr.msk.f32.mxu1 %vm1397_vm3, %v2710_v26  ;;  %v2711_v62 = vmul.f32 %v2647_v61, %v2455_v41  ;;  %v19463_v61 = vld [vmem:[#allocation90_spill] sm:$0xff] }
 0x257   :  { %v2080_v35 = vsub.f32 %v1952_v47, %v2016_v46  ;;  %v1785_v19 = vpop.xlane.xlu1 %1784  ;;  %10995 = verf.f32 %v2522_v9  ;;  %v2207_v47 = vsub.f32 %v19463_v61, %v14095_v16 }
 0x258   :  { %v10986_v12 = vpop.eup %10985  ;;  %10997 = vrsqrt.f32 %v2271_v3  ;;  %v1953_v8 = vmul.f32 0.03125, %v1785_v19  ;;  %10490 = vmatmul.mubr.msk.f32.gmra.mrb[64].mxu1 %vm1397_vm3, %v2711_v62  ;;  %v1532_v50 = vpop.xlane.xlu0 %1531 }
 0x259   :  { %v10988_v30 = vpop.eup %10987  ;;  %v2144_v34 = vmax.f32 %v2080_v35, 0.0  ;;  %v14130_v33 = vmul.f32 0.03125, %v1532_v50  ;;  %10999 = verf.f32 %v2523_v27  ;;  %v14138_v59 = vmul.f32 %v10986_v12, %v2205_v49 }
 0x25a   :  { %v10990_v60 = vpop.eup %10989  ;;  %v2081_v44 = vsub.f32 %v1953_v8, %v2017_v40  ;;  %v2648_v31 = vadd.f32 1.0, %v10988_v30  ;;  %v2458_v35 = vmul.f32 0.5, %v14114_v2  ;;  %v2459_v27 = vmul.f32 0.5, %v14116_v63 }
 0x25b   :  { %v10992_v55 = vpop.eup %10991  ;;  %v2272_v43 = vadd.f32 1e-05, %v2144_v34  ;;  %v2018_v18 = vmul.f32 %v14130_v33, %v14130_v33  ;;  %v1535_v0 = vpop.xlane.xlu1 %1534  ;;  %v14136_v48 = vmul.f32 %v10990_v60, %v2204_v29  ;;  %v2525_v6 = vmul.f32 0.70710677, %v14138_v59 }
 0x25c   :  { %v2145_v1 = vmax.f32 %v2081_v44, 0.0  ;;  %v14140_v21 = vmul.f32 0.03125, %v1535_v0  ;;  %v1788_v32 = vpop.xlane.xlu0 %1787  ;;  %v2712_v25 = vmul.f32 %v2648_v31, %v2456_v37  ;;  %v2649_v22 = vadd.f32 1.0, %v10992_v55  ;;  %v19464_v44 = vld [vmem:[#allocation93_spill] sm:$0xff] }
 0x25d   :  { %11001 = vrsqrt.f32 %v2272_v43  ;;  %v1954_v13 = vmul.f32 0.03125, %v1788_v32  ;;  %v2524_v39 = vmul.f32 0.70710677, %v14136_v48  ;;  %v2208_v37 = vsub.f32 %v19464_v44, %v14108_v20  ;;  %v19465_v20 = vld [vmem:[#allocation92_spill] sm:$0xff] }
 0x25e   :  { %v2273_v45 = vadd.f32 1e-05, %v2145_v1  ;;  %v2019_v4 = vmul.f32 %v14140_v21, %v14140_v21  ;;  %10492 = vmatprep.mubr.msk.f32.mxu1 %vm1397_vm3, %v2712_v25  ;;  %v2713_v41 = vmul.f32 %v2649_v22, %v2457_v57 }
 0x25f   :  { %v10994_v7 = vpop.eup %10993  ;;  %v2082_v24 = vsub.f32 %v1954_v13, %v2018_v18  ;;  %v1791_v46 = vpop.xlane.xlu1 %1790  ;;  %11003 = verf.f32 %v2524_v39  ;;  %v2209_v13 = vsub.f32 %v19465_v20, %v14118_v42 }
 0x260   :  { %11005 = vrsqrt.f32 %v2273_v45  ;;  %v1955_v54 = vmul.f32 0.03125, %v1791_v46  ;;  %10493 = vmatmul.mubr.msk.f32.gmra.mrb[66].mxu1 %vm1397_vm3, %v2713_v41  ;;  %v1538_v17 = vpop.xlane.xlu0 %1537  ;;  %v14150_v26 = vmul.f32 %v10994_v7, %v2206_v10  ;;  %v2461_v7 = vmul.f32 0.5, %v14138_v59  ;;  %v9766_v59 = vld [vmem:[%s19191_s5 + $0x28] sm:$0xff] }
 0x261   :  { %v10996_v28 = vpop.eup %10995  ;;  %v2146_v9 = vmax.f32 %v2082_v24, 0.0  ;;  %v14154_v3 = vmul.f32 0.03125, %v1538_v17  ;;  %11007 = verf.f32 %v2525_v6 }
 0x262   :  { %v10998_v40 = vpop.eup %10997  ;;  %v2083_v62 = vsub.f32 %v1955_v54, %v2019_v4  ;;  %v2650_v19 = vadd.f32 1.0, %v10996_v28  ;;  %v2526_v50 = vmul.f32 0.70710677, %v14150_v26  ;;  %v2460_v4 = vmul.f32 0.5, %v14136_v48  ;;  %v9765_v48 = vld [vmem:[%s19191_s5 + $0x20] sm:$0xff] }
 0x263   :  { %v11000_v12 = vpop.eup %10999  ;;  %v2274_v14 = vadd.f32 1e-05, %v2146_v9  ;;  %v2020_v29 = vmul.f32 %v14154_v3, %v14154_v3  ;;  %v1541_v8 = vpop.xlane.xlu1 %1540  ;;  %v14161_v16 = vmul.f32 %v10998_v40, %v2207_v47 }
 0x264   :  { %v2147_v30 = vmax.f32 %v2083_v62, 0.0  ;;  %v14163_v52 = vmul.f32 0.03125, %v1541_v8  ;;  %v1794_v49 = vpop.xlane.xlu0 %1793  ;;  %v2714_v34 = vmul.f32 %v2650_v19, %v2458_v35  ;;  %v2651_v60 = vadd.f32 1.0, %v11000_v12  ;;  %v19466_v19 = vld [vmem:[#allocation95_spill] sm:$0xff] }
 0x265   :  { %11009 = vrsqrt.f32 %v2274_v14  ;;  %v1956_v2 = vmul.f32 0.03125, %v1794_v49  ;;  %v2527_v63 = vmul.f32 0.70710677, %v14161_v16  ;;  %v10757_v49 = vpack.c.bf16 %v9766_v59, %v9765_v48 }
 0x266   :  { %v2275_v31 = vadd.f32 1e-05, %v2147_v30  ;;  %v2021_v57 = vmul.f32 %v14163_v52, %v14163_v52  ;;  %10495 = vmatprep.mubr.msk.f32.mxu1 %vm1397_vm3, %v2714_v34  ;;  %v2715_v55 = vmul.f32 %v2651_v60, %v2459_v27  ;;  %11011 = verf.f32 %v2526_v50 }
 0x267   :  { %v11002_v43 = vpop.eup %11001  ;;  %v2084_v18 = vsub.f32 %v1956_v2, %v2020_v29  ;;  %v1797_v0 = vpop.xlane.xlu1 %1796  ;;  %v2210_v27 = vsub.f32 %v19466_v19, %v14130_v33  ;;  %10758 = vmatprep.subr.bf16.mxu1 %v10757_v49 }
 0x268   :  { %11013 = vrsqrt.f32 %v2275_v31  ;;  %v1957_v1 = vmul.f32 0.03125, %v1797_v0  ;;  %10496 = vmatmul.mubr.msk.f32.gmra.mrb[68].mxu1 %vm1397_vm3, %v2715_v55  ;;  %v1544_v32 = vpop.xlane.xlu0 %1543  ;;  %v14172_v25 = vmul.f32 %v11002_v43, %v2208_v37  ;;  %v2462_v43 = vmul.f32 0.5, %v14150_v26 }
 0x269   :  { %v11004_v22 = vpop.eup %11003  ;;  %v2148_v39 = vmax.f32 %v2084_v18, 0.0  ;;  %v14176_v53 = vmul.f32 0.03125, %v1544_v32  ;;  %11015 = verf.f32 %v2527_v63  ;;  %v19467_v63 = vld [vmem:[#allocation94_spill] sm:$0xff]  ;;  %v2463_v0 = vmul.f32 0.5, %v14161_v16  ;;  %10760 = vmatpush3.bf16.msra.mxu1 %v10757_v49 }
 0x26a   :  { %v11006_v10 = vpop.eup %11005  ;;  %v2085_v45 = vsub.f32 %v1957_v1, %v2021_v57  ;;  %v2652_v41 = vadd.f32 1.0, %v11004_v22  ;;  %v2528_v17 = vmul.f32 0.70710677, %v14172_v25  ;;  %v2211_v44 = vsub.f32 %v19467_v63, %v14140_v21 }
 0x26b   :  { %v11008_v24 = vpop.eup %11007  ;;  %v2276_v46 = vadd.f32 1e-05, %v2148_v39  ;;  %v2022_v6 = vmul.f32 %v14176_v53, %v14176_v53  ;;  %v1547_v54 = vpop.xlane.xlu1 %1546  ;;  %v14183_v42 = vmul.f32 %v11006_v10, %v2209_v13 }
 0x26c   :  { %v2149_v28 = vmax.f32 %v2085_v45, 0.0  ;;  %v14185_v61 = vmul.f32 0.03125, %v1547_v54  ;;  %v1800_v47 = vpop.xlane.xlu0 %1799  ;;  %v2716_v9 = vmul.f32 %v2652_v41, %v2460_v4  ;;  %v2653_v40 = vadd.f32 1.0, %v11008_v24 }
 0x26d   :  { %11017 = vrsqrt.f32 %v2276_v46  ;;  %v1958_v62 = vmul.f32 0.03125, %v1800_v47  ;;  %v2529_v35 = vmul.f32 0.70710677, %v14183_v42 }
 0x26e   :  { %v2277_v12 = vadd.f32 1e-05, %v2149_v28  ;;  %v2023_v14 = vmul.f32 %v14185_v61, %v14185_v61  ;;  %10498 = vmatprep.mubr.msk.f32.mxu1 %vm1397_vm3, %v2716_v9  ;;  %v2717_v29 = vmul.f32 %v2653_v40, %v2461_v7  ;;  %11019 = verf.f32 %v2528_v17  ;;  %v19468_v7 = vld [vmem:[#allocation97_spill] sm:$0xff] }
 0x26f   :  { %v11010_v8 = vpop.eup %11009  ;;  %v2086_v50 = vsub.f32 %v1958_v62, %v2022_v6  ;;  %v1803_v30 = vpop.xlane.xlu1 %1802  ;;  %v2212_v24 = vsub.f32 %v19468_v7, %v14154_v3  ;;  %v19469_v3 = vld [vmem:[#allocation96_spill] sm:$0xff] }
 0x270   :  { %11021 = vrsqrt.f32 %v2277_v12  ;;  %v1959_v34 = vmul.f32 0.03125, %v1803_v30  ;;  %10499 = vmatmul.mubr.msk.f32.gmra.mrb[70].mxu1 %vm1397_vm3, %v2717_v29  ;;  %v1550_v60 = vpop.xlane.xlu0 %1549  ;;  %v14200_v2 = vmul.f32 %v11010_v8, %v2210_v27  ;;  %v11012_v33 = vpop.eup %11011  ;;  %v2213_v62 = vsub.f32 %v19469_v3, %v14163_v52 }
 0x271   :  { %v2150_v37 = vmax.f32 %v2086_v50, 0.0  ;;  %v14204_v31 = vmul.f32 0.03125, %v1550_v60  ;;  %11023 = verf.f32 %v2529_v35  ;;  %v2654_v18 = vadd.f32 1.0, %v11012_v33 }
 0x272   :  { %v11014_v57 = vpop.eup %11013  ;;  %v2087_v55 = vsub.f32 %v1959_v34, %v2023_v14  ;;  %v2530_v21 = vmul.f32 0.70710677, %v14200_v2  ;;  %v2464_v14 = vmul.f32 0.5, %v14172_v25  ;;  %v2465_v8 = vmul.f32 0.5, %v14183_v42 }
 0x273   :  { %v11016_v1 = vpop.eup %11015  ;;  %v2278_v32 = vadd.f32 1e-05, %v2150_v37  ;;  %v2024_v22 = vmul.f32 %v14204_v31, %v14204_v31  ;;  %v1553_v20 = vpop.xlane.xlu1 %1552  ;;  %v14211_v13 = vmul.f32 %v11014_v57, %v2211_v44  ;;  %v2718_v45 = vmul.f32 %v2654_v18, %v2462_v43 }
 0x274   :  { %v2151_v39 = vmax.f32 %v2087_v55, 0.0  ;;  %v14213_v10 = vmul.f32 0.03125, %v1553_v20  ;;  %v1806_v4 = vpop.xlane.xlu0 %1805  ;;  %v2655_v26 = vadd.f32 1.0, %v11016_v1  ;;  %v19470_v55 = vld [vmem:[#allocation99_spill] sm:$0xff] }
 0x275   :  { %11025 = vrsqrt.f32 %v2278_v32  ;;  %v1960_v41 = vmul.f32 0.03125, %v1806_v4  ;;  %v2531_v16 = vmul.f32 0.70710677, %v14211_v13  ;;  %10501 = vmatprep.mubr.msk.f32.mxu1 %vm1397_vm3, %v2718_v45  ;;  %v2214_v43 = vsub.f32 %v19470_v55, %v14176_v53  ;;  %v19471_v53 = vld [vmem:[#allocation98_spill] sm:$0xff] }
 0x276   :  { %v2279_v46 = vadd.f32 1e-05, %v2151_v39  ;;  %v2025_v6 = vmul.f32 %v14213_v10, %v14213_v10  ;;  %v2719_v54 = vmul.f32 %v2655_v26, %v2463_v0  ;;  %11027 = verf.f32 %v2530_v21 }
 0x277   :  { %v11018_v17 = vpop.eup %11017  ;;  %v2088_v28 = vsub.f32 %v1960_v41, %v2024_v22  ;;  %v1809_v47 = vpop.xlane.xlu1 %1808  ;;  %v2215_v26 = vsub.f32 %v19471_v53, %v14185_v61 }
 0x278   :  { %11029 = vrsqrt.f32 %v2279_v46  ;;  %10502 = vmatmul.mubr.msk.f32.gmra.mrb[72].mxu1 %vm1397_vm3, %v2719_v54  ;;  %v1961_v9 = vmul.f32 0.03125, %v1809_v47  ;;  %v1556_v40 = vpop.xlane.xlu0 %1555  ;;  %v14222_v48 = vmul.f32 %v11018_v17, %v2212_v24  ;;  %v11020_v59 = vpop.eup %11019  ;;  %v2466_v46 = vmul.f32 0.5, %v14200_v2 }
 0x279   :  { %v2152_v35 = vmax.f32 %v2088_v28, 0.0  ;;  %v14226_v19 = vmul.f32 0.03125, %v1556_v40  ;;  %11031 = verf.f32 %v2531_v16  ;;  %v2656_v29 = vadd.f32 1.0, %v11020_v59 }
 0x27a   :  { %v11022_v27 = vpop.eup %11021  ;;  %v2089_v12 = vsub.f32 %v1961_v9, %v2025_v6  ;;  %v2532_v60 = vmul.f32 0.70710677, %v14222_v48  ;;  %v2467_v54 = vmul.f32 0.5, %v14211_v13 }
 0x27b   :  { %v11024_v50 = vpop.eup %11023  ;;  %v2280_v30 = vadd.f32 1e-05, %v2152_v35  ;;  %v2026_v49 = vmul.f32 %v14226_v19, %v14226_v19  ;;  %v1559_v34 = vpop.xlane.xlu1 %1558  ;;  %v14233_v52 = vmul.f32 %v11022_v27, %v2213_v62  ;;  %v2720_v44 = vmul.f32 %v2656_v29, %v2464_v14 }
 0x27c   :  { %v2153_v33 = vmax.f32 %v2089_v12, 0.0  ;;  %v14235_v63 = vmul.f32 0.03125, %v1559_v34  ;;  %v1812_v37 = vpop.xlane.xlu0 %1811  ;;  %v2657_v57 = vadd.f32 1.0, %v11024_v50  ;;  %v19472_v12 = vld [vmem:[#allocation101_spill] sm:$0xff] }
 0x27d   :  { %11033 = vrsqrt.f32 %v2280_v30  ;;  %v1962_v25 = vmul.f32 0.03125, %v1812_v37  ;;  %v2533_v42 = vmul.f32 0.70710677, %v14233_v52  ;;  %10504 = vmatprep.mubr.msk.f32.mxu1 %vm1397_vm3, %v2720_v44  ;;  %v2216_v14 = vsub.f32 %v19472_v12, %v14204_v31  ;;  %v19473_v31 = vld [vmem:[#allocation100_spill] sm:$0xff] }
 0x27e   :  { %v2281_v18 = vadd.f32 1e-05, %v2153_v33  ;;  %v2027_v0 = vmul.f32 %v14235_v63, %v14235_v63  ;;  %v2721_v1 = vmul.f32 %v2657_v57, %v2465_v8  ;;  %11035 = verf.f32 %v2532_v60 }
 0x27f   :  { %v11026_v32 = vpop.eup %11025  ;;  %v2090_v22 = vsub.f32 %v1962_v25, %v2026_v49  ;;  %v1815_v20 = vpop.xlane.xlu1 %1814  ;;  %v2217_v57 = vsub.f32 %v19473_v31, %v14213_v10 }
 0x280   :  { %11037 = vrsqrt.f32 %v2281_v18  ;;  %10505 = vmatmul.mubr.msk.f32.gmra.mrb[74].mxu1 %vm1397_vm3, %v2721_v1  ;;  %v1963_v21 = vmul.f32 0.03125, %v1815_v20  ;;  %v1562_v39 = vpop.xlane.xlu0 %1561  ;;  %v14244_v45 = vmul.f32 %v11026_v32, %v2214_v43  ;;  %v11028_v4 = vpop.eup %11027  ;;  %v2468_v18 = vmul.f32 0.5, %v14222_v48 }
 0x281   :  { %v2154_v41 = vmax.f32 %v2090_v22, 0.0  ;;  %v14248_v16 = vmul.f32 0.03125, %v1562_v39  ;;  %11039 = verf.f32 %v2533_v42  ;;  %v2658_v6 = vadd.f32 1.0, %v11028_v4 }
 0x282   :  { %v11030_v7 = vpop.eup %11029  ;;  %v2091_v24 = vsub.f32 %v1963_v21, %v2027_v0  ;;  %v2534_v40 = vmul.f32 0.70710677, %v14244_v45  ;;  %v2469_v1 = vmul.f32 0.5, %v14233_v52 }
 0x283   :  { %v11032_v17 = vpop.eup %11031  ;;  %v2282_v28 = vadd.f32 1e-05, %v2154_v41  ;;  %v2028_v47 = vmul.f32 %v14248_v16, %v14248_v16  ;;  %v1565_v9 = vpop.xlane.xlu1 %1564  ;;  %v14255_v61 = vmul.f32 %v11030_v7, %v2215_v26  ;;  %v2722_v62 = vmul.f32 %v2658_v6, %v2466_v46 }
 0x284   :  { %v2155_v59 = vmax.f32 %v2091_v24, 0.0  ;;  %v14257_v3 = vmul.f32 0.03125, %v1565_v9  ;;  %v1818_v35 = vpop.xlane.xlu0 %1817  ;;  %v2659_v27 = vadd.f32 1.0, %v11032_v17  ;;  %v19474_v24 = vld [vmem:[#allocation103_spill] sm:$0xff] }
 0x285   :  { %11041 = vrsqrt.f32 %v2282_v28  ;;  %v1964_v2 = vmul.f32 0.03125, %v1818_v35  ;;  %v2535_v13 = vmul.f32 0.70710677, %v14255_v61  ;;  %10507 = vmatprep.mubr.msk.f32.mxu1 %vm1397_vm3, %v2722_v62  ;;  %v2218_v46 = vsub.f32 %v19474_v24, %v14226_v19  ;;  %v19475_v19 = vld [vmem:[#allocation102_spill] sm:$0xff] }
 0x286   :  { %v2283_v29 = vadd.f32 1e-05, %v2155_v59  ;;  %v2029_v8 = vmul.f32 %v14257_v3, %v14257_v3  ;;  %v2723_v50 = vmul.f32 %v2659_v27, %v2467_v54  ;;  %11043 = verf.f32 %v2534_v40 }
 0x287   :  { %v11034_v30 = vpop.eup %11033  ;;  %v2092_v49 = vsub.f32 %v1964_v2, %v2028_v47  ;;  %v1821_v34 = vpop.xlane.xlu1 %1820  ;;  %v2219_v27 = vsub.f32 %v19475_v19, %v14235_v63 }
 0x288   :  { %11045 = vrsqrt.f32 %v2283_v29  ;;  %10508 = vmatmul.mubr.msk.f32.gmra.mrb[76].mxu1 %vm1397_vm3, %v2723_v50  ;;  %v1965_v60 = vmul.f32 0.03125, %v1821_v34  ;;  %v1568_v33 = vpop.xlane.xlu0 %1567  ;;  %v14266_v44 = vmul.f32 %v11034_v30, %v2216_v14  ;;  %v11036_v37 = vpop.eup %11035  ;;  %v2470_v29 = vmul.f32 0.5, %v14244_v45 }
 0x289   :  { %v2156_v25 = vmax.f32 %v2092_v49, 0.0  ;;  %v14270_v42 = vmul.f32 0.03125, %v1568_v33  ;;  %11047 = verf.f32 %v2535_v13  ;;  %v2660_v0 = vadd.f32 1.0, %v11036_v37 }
 0x28a   :  { %v11038_v55 = vpop.eup %11037  ;;  %v2093_v43 = vsub.f32 %v1965_v60, %v2029_v8  ;;  %v2536_v39 = vmul.f32 0.70710677, %v14266_v44  ;;  %v2471_v50 = vmul.f32 0.5, %v14255_v61  ;;  %v2472_v24 = vmul.f32 0.5, %v14266_v44 }
 0x28b   :  { %v11040_v32 = vpop.eup %11039  ;;  %v2284_v22 = vadd.f32 1e-05, %v2156_v25  ;;  %v2030_v20 = vmul.f32 %v14270_v42, %v14270_v42  ;;  %v1571_v21 = vpop.xlane.xlu1 %1570  ;;  %v14277_v10 = vmul.f32 %v11038_v55, %v2217_v57  ;;  %v2724_v26 = vmul.f32 %v2660_v0, %v2468_v18 }
 0x28c   :  { %v2157_v4 = vmax.f32 %v2093_v43, 0.0  ;;  %v14279_v53 = vmul.f32 0.03125, %v1571_v21  ;;  %v1824_v41 = vpop.xlane.xlu0 %1823  ;;  %v2661_v7 = vadd.f32 1.0, %v11040_v32  ;;  %v2220_v43 = vsub.f32 %v13581_v5, %v14248_v16  ;;  %v19476_v5 = vld [vmem:[#allocation104_spill] sm:$0xff] }
 0x28d   :  { %11049 = vrsqrt.f32 %v2284_v22  ;;  %v1966_v48 = vmul.f32 0.03125, %v1824_v41  ;;  %v2537_v52 = vmul.f32 0.70710677, %v14277_v10  ;;  %10510 = vmatprep.mubr.msk.f32.mxu1 %vm1397_vm3, %v2724_v26  ;;  %v2221_v16 = vsub.f32 %v19476_v5, %v14257_v3 }
 0x28e   :  { %v2285_v6 = vadd.f32 1e-05, %v2157_v4  ;;  %v2031_v54 = vmul.f32 %v14279_v53, %v14279_v53  ;;  %v2725_v17 = vmul.f32 %v2661_v7, %v2469_v1  ;;  %11051 = verf.f32 %v2536_v39 }
 0x28f   :  { %v11042_v28 = vpop.eup %11041  ;;  %v2094_v47 = vsub.f32 %v1966_v48, %v2030_v20  ;;  %v1827_v9 = vpop.xlane.xlu1 %1826 }
 0x290   :  { %11053 = vrsqrt.f32 %v2285_v6  ;;  %10511 = vmatmul.mubr.msk.f32.gmra.mrb[78].mxu1 %vm1397_vm3, %v2725_v17  ;;  %v1967_v40 = vmul.f32 0.03125, %v1827_v9  ;;  %v1574_v59 = vpop.xlane.xlu0 %1573  ;;  %v14288_v62 = vmul.f32 %v11042_v28, %v2218_v46  ;;  %v11044_v35 = vpop.eup %11043  ;;  %v2473_v6 = vmul.f32 0.5, %v14277_v10 }
 0x291   :  { %v2158_v2 = vmax.f32 %v2094_v47, 0.0  ;;  %v14292_v13 = vmul.f32 0.03125, %v1574_v59  ;;  %11055 = verf.f32 %v2537_v52  ;;  %v2662_v8 = vadd.f32 1.0, %v11044_v35 }
 0x292   :  { %v11046_v12 = vpop.eup %11045  ;;  %v2095_v14 = vsub.f32 %v1967_v40, %v2031_v54  ;;  %v2538_v33 = vmul.f32 0.70710677, %v14288_v62 }
 0x293   :  { %v11048_v30 = vpop.eup %11047  ;;  %v2286_v49 = vadd.f32 1e-05, %v2158_v2  ;;  %v2032_v34 = vmul.f32 %v14292_v13, %v14292_v13  ;;  %v1577_v60 = vpop.xlane.xlu1 %1576  ;;  %v14299_v63 = vmul.f32 %v11046_v12, %v2219_v27  ;;  %v2726_v57 = vmul.f32 %v2662_v8, %v2470_v29 }
 0x294   :  { %v2159_v37 = vmax.f32 %v2095_v14, 0.0  ;;  %v14301_v31 = vmul.f32 0.03125, %v1577_v60  ;;  %v1830_v25 = vpop.xlane.xlu0 %1829  ;;  %v2663_v55 = vadd.f32 1.0, %v11048_v30  ;;  %v2222_v2 = vsub.f32 %v13634_v51, %v14270_v42 }
 0x295   :  { %11057 = vrsqrt.f32 %v2286_v49  ;;  %v1968_v45 = vmul.f32 0.03125, %v1830_v25  ;;  %v2539_v61 = vmul.f32 0.70710677, %v14299_v63  ;;  %10513 = vmatprep.mubr.msk.f32.mxu1 %vm1397_vm3, %v2726_v57  ;;  %v2223_v51 = vsub.f32 %v13627_v15, %v14279_v53 }
 0x296   :  { %v2287_v18 = vadd.f32 1e-05, %v2159_v37  ;;  %v2033_v0 = vmul.f32 %v14301_v31, %v14301_v31  ;;  %v2727_v1 = vmul.f32 %v2663_v55, %v2471_v50  ;;  %11059 = verf.f32 %v2538_v33 }
 0x297   :  { %v11050_v32 = vpop.eup %11049  ;;  %v2096_v22 = vsub.f32 %v1968_v45, %v2032_v34  ;;  %v1833_v20 = vpop.xlane.xlu1 %1832  ;;  %v2474_v55 = vmul.f32 0.5, %v14288_v62 }
 0x298   :  { %11061 = vrsqrt.f32 %v2287_v18  ;;  %10514 = vmatmul.mubr.msk.f32.gmra.mrb[80].mxu1 %vm1397_vm3, %v2727_v1  ;;  %v1969_v21 = vmul.f32 0.03125, %v1833_v20  ;;  %v1580_v39 = vpop.xlane.xlu0 %1579  ;;  %v14310_v4 = vmul.f32 %v11050_v32, %v2220_v43  ;;  %v11052_v26 = vpop.eup %11051 }
 0x299   :  { %v2160_v41 = vmax.f32 %v2096_v22, 0.0  ;;  %v14314_v7 = vmul.f32 0.03125, %v1580_v39  ;;  %11063 = verf.f32 %v2539_v61  ;;  %v2664_v46 = vadd.f32 1.0, %v11052_v26 }
 0x29a   :  { %v11054_v48 = vpop.eup %11053  ;;  %v2097_v52 = vsub.f32 %v1969_v21, %v2033_v0  ;;  %v2540_v9 = vmul.f32 0.70710677, %v14310_v4  ;;  %v2475_v61 = vmul.f32 0.5, %v14299_v63  ;;  %v2224_v26 = vsub.f32 %v13707_v38, %v14292_v13 }
 0x29b   :  { %v11056_v54 = vpop.eup %11055  ;;  %v2288_v17 = vadd.f32 1e-05, %v2160_v41  ;;  %v2034_v28 = vmul.f32 %v14314_v7, %v14314_v7  ;;  %v1583_v47 = vpop.xlane.xlu1 %1582  ;;  %v14321_v3 = vmul.f32 %v11054_v48, %v2221_v16  ;;  %v2728_v35 = vmul.f32 %v2664_v46, %v2472_v24 }
 0x29c   :  { %v2161_v40 = vmax.f32 %v2097_v52, 0.0  ;;  %v14323_v59 = vmul.f32 0.03125, %v1583_v47  ;;  %v1836_v19 = vpop.xlane.xlu0 %1835  ;;  %v2665_v27 = vadd.f32 1.0, %v11056_v54  ;;  %v2225_v54 = vsub.f32 %v13689_v56, %v14301_v31 }
 0x29d   :  { %11065 = vrsqrt.f32 %v2288_v17  ;;  %v1970_v44 = vmul.f32 0.03125, %v1836_v19  ;;  %v2541_v10 = vmul.f32 0.70710677, %v14321_v3  ;;  %10516 = vmatprep.mubr.msk.f32.mxu1 %vm1397_vm3, %v2728_v35  ;;  %v2477_v19 = vmul.f32 0.5, %v14321_v3  ;;  %v9768_v3 = vld [vmem:[%s19191_s5 + $0x38] sm:$0xff] }
 0x29e   :  { %v2289_v12 = vadd.f32 1e-05, %v2161_v40  ;;  %v2035_v14 = vmul.f32 %v14323_v59, %v14323_v59  ;;  %v2729_v29 = vmul.f32 %v2665_v27, %v2473_v6  ;;  %11067 = verf.f32 %v2540_v9  ;;  %v14357_v6 = vld [vmem:[%s19192_s6] ss:$0 sm:$0xff] }
 0x29f   :  { %v11058_v8 = vpop.eup %11057  ;;  %v2098_v50 = vsub.f32 %v1970_v44, %v2034_v28  ;;  %v1839_v30 = vpop.xlane.xlu1 %1838  ;;  %v2476_v40 = vmul.f32 0.5, %v14310_v4  ;;  %v9767_v4 = vld [vmem:[%s19191_s5 + $0x30] sm:$0xff] }
 0x2a0   :  { %11069 = vrsqrt.f32 %v2289_v12  ;;  %10517 = vmatmul.mubr.msk.f32.gmra.mrb[82].mxu1 %vm1397_vm3, %v2729_v29  ;;  %v1971_v49 = vmul.f32 0.03125, %v1839_v30  ;;  %v1586_v34 = vpop.xlane.xlu0 %1585  ;;  %v14332_v60 = vmul.f32 %v11058_v8, %v2222_v2  ;;  %v11060_v33 = vpop.eup %11059 }
 0x2a1   :  { %v2162_v42 = vmax.f32 %v2098_v50, 0.0  ;;  %v14336_v37 = vmul.f32 0.03125, %v1586_v34  ;;  %11071 = verf.f32 %v2541_v10  ;;  %v2666_v45 = vadd.f32 1.0, %v11060_v33 }
 0x2a2   :  { %v11062_v57 = vpop.eup %11061  ;;  %v2099_v25 = vsub.f32 %v1971_v49, %v2035_v14  ;;  %v2542_v32 = vmul.f32 0.70710677, %v14332_v60  ;;  %v2226_v50 = vsub.f32 %v13791_v58, %v14314_v7  ;;  %v10761_v7 = vpack.c.bf16 %v9768_v3, %v9767_v4 }
 0x2a3   :  { %v11064_v43 = vpop.eup %11063  ;;  %v2290_v18 = vadd.f32 1e-05, %v2162_v42  ;;  %v2036_v0 = vmul.f32 %v14336_v37, %v14336_v37  ;;  %v1589_v1 = vpop.xlane.xlu1 %1588  ;;  %v14343_v15 = vmul.f32 %v11062_v57, %v2223_v51  ;;  %v2730_v20 = vmul.f32 %v2666_v45, %v2474_v55 }
 0x2a4   :  { %v2163_v53 = vmax.f32 %v2099_v25, 0.0  ;;  %v14345_v22 = vmul.f32 0.03125, %v1589_v1  ;;  %v1842_v21 = vpop.xlane.xlu0 %1841  ;;  %v2667_v39 = vadd.f32 1.0, %v11064_v43  ;;  %v2227_v45 = vsub.f32 %v13771_v23, %v14323_v59  ;;  %10762 = vmatprep.subr.bf16.mxu1 %v10761_v7 }
 0x2a5   :  { %11073 = vrsqrt.f32 %v2290_v18  ;;  %v1972_v62 = vmul.f32 0.03125, %v1842_v21  ;;  %v2543_v63 = vmul.f32 0.70710677, %v14343_v15  ;;  %10519 = vmatprep.mubr.msk.f32.mxu1 %vm1397_vm3, %v2730_v20  ;;  %10764 = vmatpush3.bf16.msra.mxu1 %v10761_v7 }
 0x2a6   :  { %v2291_v5 = vadd.f32 1e-05, %v2163_v53  ;;  %v2037_v16 = vmul.f32 %v14345_v22, %v14345_v22  ;;  %v2731_v41 = vmul.f32 %v2667_v39, %v2475_v61  ;;  %11075 = verf.f32 %v2542_v32 }
 0x2a7   :  { %v11066_v48 = vpop.eup %11065  ;;  %v2100_v52 = vsub.f32 %v1972_v62, %v2036_v0  ;;  %v1845_v24 = vpop.xlane.xlu1 %1844  ;;  %v2478_v0 = vmul.f32 0.5, %v14332_v60  ;;  %v2479_v39 = vmul.f32 0.5, %v14343_v15 }
 0x2a8   :  { %11077 = vrsqrt.f32 %v2291_v5  ;;  %10520 = vmatmul.mubr.msk.f32.gmra.mrb[84].mxu1 %vm1397_vm3, %v2731_v41  ;;  %v1973_v46 = vmul.f32 0.03125, %v1845_v24  ;;  %v14359_v38 = vmul.f32 %v11066_v48, %v2224_v26  ;;  %v11068_v13 = vpop.eup %11067 }
 0x2a9   :  { %v2164_v17 = vmax.f32 %v2100_v52, 0.0  ;;  %11079 = verf.f32 %v2543_v63  ;;  %v2668_v35 = vadd.f32 1.0, %v11068_v13  ;;  %v2228_v63 = vsub.f32 %v13864_v36, %v14336_v37 }
 0x2aa   :  { %v11070_v28 = vpop.eup %11069  ;;  %v2101_v47 = vsub.f32 %v1973_v46, %v2037_v16  ;;  %v10443_v9 = vpop.f32.mrb[32].mxu1  ;;  %v2544_v12 = vmul.f32 0.70710677, %v14359_v38  ;;  %v2229_v52 = vsub.f32 %v13878_v11, %v14345_v22 }
 0x2ab   :  { %v11072_v27 = vpop.eup %11071  ;;  %v2292_v44 = vadd.f32 1e-05, %v2164_v17  ;;  %v14366_v10 = vadd.f32 %v10443_v9, %v14357_v6  ;;  %v3011_v2 = vpop.f32.mrb[33].mxu1  ;;  %v14369_v14 = vmul.f32 %v11070_v28, %v2225_v54  ;;  %v2732_v29 = vmul.f32 %v2668_v35, %v2476_v40 }
 0x2ac   :  { %v2165_v56 = vmax.f32 %v2101_v47, 0.0  ;;  %v14372_v31 = vadd.f32 %v14357_v6, %v3011_v2  ;;  %v2669_v8 = vadd.f32 1.0, %v11072_v27  ;;  %v2480_v54 = vmul.f32 0.5, %v14359_v38 }
 0x2ad   :  { %11081 = vrsqrt.f32 %v2292_v44  ;;  %v3333_v30 = vsel %vm1397_vm3, %v14366_v10, 0.0  ;;  %v3523_v49 = vmul.f32 %v14366_v10, %v14366_v10  ;;  %10522 = vmatprep.mubr.msk.f32.mxu1 %vm1397_vm3, %v2732_v29  ;;  %v2545_v58 = vmul.f32 0.70710677, %v14369_v14 }
 0x2ae   :  { %v2293_v34 = vadd.f32 1e-05, %v2165_v56  ;;  %3334 = vadd.xlane.f32.xlu1 %v3333_v30  ;;  %v2733_v33 = vmul.f32 %v2669_v8, %v2477_v19  ;;  %v3330_v51 = vsel %vm1397_vm3, %v14372_v31, 0.0  ;;  %v3522_v42 = vmul.f32 %v14372_v31, %v14372_v31 }
 0x2af   :  { %v11074_v57 = vpop.eup %11073  ;;  %3331 = vadd.xlane.f32.xlu0 %v3330_v51  ;;  %11083 = verf.f32 %v2544_v12  ;;  %v3589_v61 = vsel %vm1397_vm3, %v3523_v49, 0.0  ;;  %v2481_v9 = vmul.f32 0.5, %v14369_v14 }
 0x2b0   :  { %11085 = vrsqrt.f32 %v2293_v34  ;;  %10523 = vmatmul.mubr.msk.f32.gmra.mrb[86].mxu1 %vm1397_vm3, %v2733_v33  ;;  %v2418_v25 = vmul.f32 %v11074_v57, %v2226_v50  ;;  %v11076_v55 = vpop.eup %11075  ;;  %v3586_v18 = vsel %vm1397_vm3, %v3522_v42, 0.0 }
 0x2b1   :  { %11087 = verf.f32 %v2545_v58  ;;  %v2670_v1 = vadd.f32 1.0, %v11076_v55 }
 0x2b2   :  { %v11078_v43 = vpop.eup %11077  ;;  %3590 = vadd.xlane.f32.xlu1 %v3589_v61  ;;  %v2546_v32 = vmul.f32 0.70710677, %v2418_v25  ;;  %v2482_v29 = vmul.f32 0.5, %v2418_v25 }
 0x2b3   :  { %v11080_v53 = vpop.eup %11079  ;;  %3587 = vadd.xlane.f32.xlu0 %v3586_v18  ;;  %v2419_v20 = vmul.f32 %v11078_v43, %v2227_v45  ;;  %v2734_v21 = vmul.f32 %v2670_v1, %v2478_v0 }
 0x2b4   :  { %v2671_v23 = vadd.f32 1.0, %v11080_v53  ;;  %11089 = verf.f32 %v2546_v32  ;;  %v10446_v59 = vpop.f32.mrb[34].mxu1 }
 0x2b5   :  { %v2547_v62 = vmul.f32 0.70710677, %v2419_v20  ;;  %v14402_v26 = vadd.f32 %v10446_v59, %v14357_v6  ;;  %v3021_v60 = vpop.f32.mrb[35].mxu1  ;;  %10525 = vmatprep.mubr.msk.f32.mxu1 %vm1397_vm3, %v2734_v21  ;;  %v2483_v33 = vmul.f32 0.5, %v2419_v20 }
 0x2b6   :  { %v2735_v5 = vmul.f32 %v2671_v23, %v2479_v39  ;;  %v14406_v41 = vadd.f32 %v14357_v6, %v3021_v60 }
 0x2b7   :  { %v11082_v16 = vpop.eup %11081  ;;  %11091 = verf.f32 %v2547_v62  ;;  %v3339_v15 = vsel %vm1397_vm3, %v14402_v26, 0.0  ;;  %v3525_v36 = vmul.f32 %v14402_v26, %v14402_v26 }
 0x2b8   :  { %10526 = vmatmul.mubr.msk.f32.gmra.mrb[88].mxu1 %vm1397_vm3, %v2735_v5  ;;  %v2420_v37 = vmul.f32 %v11082_v16, %v2228_v63  ;;  %3340 = vadd.xlane.f32.xlu1 %v3339_v15  ;;  %v3336_v24 = vsel %vm1397_vm3, %v14406_v41, 0.0  ;;  %v3524_v46 = vmul.f32 %v14406_v41, %v14406_v41 }
 0x2b9   :  { %v11084_v48 = vpop.eup %11083  ;;  %3337 = vadd.xlane.f32.xlu0 %v3336_v24  ;;  %v3595_v35 = vsel %vm1397_vm3, %v3525_v36, 0.0 }
 0x2ba   :  { %v11086_v13 = vpop.eup %11085  ;;  %v2672_v17 = vadd.f32 1.0, %v11084_v48  ;;  %v2548_v28 = vmul.f32 0.70710677, %v2420_v37  ;;  %v3592_v27 = vsel %vm1397_vm3, %v3524_v46, 0.0  ;;  %v2484_v18 = vmul.f32 0.5, %v2420_v37 }
 0x2bb   :  { %v11088_v47 = vpop.eup %11087  ;;  %v2421_v40 = vmul.f32 %v11086_v13, %v2229_v52 }
 0x2bc   :  { %v2736_v11 = vmul.f32 %v2672_v17, %v2480_v54  ;;  %v2673_v22 = vadd.f32 1.0, %v11088_v47  ;;  %11093 = verf.f32 %v2548_v28  ;;  %v10449_v19 = vpop.f32.mrb[36].mxu1  ;;  %3596 = vadd.xlane.f32.xlu1 %v3595_v35 }
 0x2bd   :  { %v2549_v44 = vmul.f32 0.70710677, %v2421_v40  ;;  %v14424_v12 = vadd.f32 %v10449_v19, %v14357_v6  ;;  %v3031_v38 = vpop.f32.mrb[37].mxu1  ;;  %3593 = vadd.xlane.f32.xlu0 %v3592_v27  ;;  %v2485_v39 = vmul.f32 0.5, %v2421_v40 }
 0x2be   :  { %v11090_v2 = vpop.eup %11089  ;;  %10528 = vmatprep.mubr.msk.f32.mxu1 %vm1397_vm3, %v2736_v11  ;;  %v2737_v14 = vmul.f32 %v2673_v22, %v2481_v9  ;;  %v14428_v56 = vadd.f32 %v14357_v6, %v3031_v38 }
 0x2bf   :  { %v2674_v8 = vadd.f32 1.0, %v11090_v2  ;;  %11095 = verf.f32 %v2549_v44  ;;  %v3345_v4 = vsel %vm1397_vm3, %v14424_v12, 0.0  ;;  %v3527_v3 = vmul.f32 %v14424_v12, %v14424_v12 }
 0x2c0   :  { %10529 = vmatmul.mubr.msk.f32.gmra.mrb[90].mxu1 %vm1397_vm3, %v2737_v14  ;;  %3346 = vadd.xlane.f32.xlu1 %v3345_v4  ;;  %v3342_v30 = vsel %vm1397_vm3, %v14428_v56, 0.0  ;;  %v3526_v49 = vmul.f32 %v14428_v56, %v14428_v56 }
 0x2c1   :  { %v11092_v50 = vpop.eup %11091  ;;  %v2738_v34 = vmul.f32 %v2674_v8, %v2482_v29  ;;  %3343 = vadd.xlane.f32.xlu0 %v3342_v30  ;;  %v3601_v57 = vsel %vm1397_vm3, %v3527_v3, 0.0 }
 0x2c2   :  { %v2675_v51 = vadd.f32 1.0, %v11092_v50  ;;  %v3598_v55 = vsel %vm1397_vm3, %v3526_v49, 0.0 }
 0x2c3   :  { %10531 = vmatprep.mubr.msk.f32.mxu1 %vm1397_vm3, %v2738_v34 }
 0x2c4   :  { %v10452_v42 = vpop.f32.mrb[38].mxu1  ;;  %v2739_v58 = vmul.f32 %v2675_v51, %v2483_v33  ;;  %3602 = vadd.xlane.f32.xlu1 %v3601_v57 }
 0x2c5   :  { %v14442_v7 = vadd.f32 %v10452_v42, %v14357_v6  ;;  %v3041_v25 = vpop.f32.mrb[39].mxu1  ;;  %3599 = vadd.xlane.f32.xlu0 %v3598_v55 }
 0x2c6   :  { %v11094_v45 = vpop.eup %11093  ;;  %v14446_v61 = vadd.f32 %v14357_v6, %v3041_v25  ;;  %10532 = vmatmul.mubr.msk.f32.gmra.mrb[92].mxu1 %vm1397_vm3, %v2739_v58 }
 0x2c7   :  { %v3351_v43 = vsel %vm1397_vm3, %v14442_v7, 0.0  ;;  %v2676_v0 = vadd.f32 1.0, %v11094_v45  ;;  %v3529_v32 = vmul.f32 %v14442_v7, %v14442_v7 }
 0x2c8   :  { %v3348_v1 = vsel %vm1397_vm3, %v14446_v61, 0.0  ;;  %3352 = vadd.xlane.f32.xlu1 %v3351_v43  ;;  %v3528_v20 = vmul.f32 %v14446_v61, %v14446_v61 }
 0x2c9   :  { %v11096_v53 = vpop.eup %11095  ;;  %v2740_v21 = vmul.f32 %v2676_v0, %v2484_v18  ;;  %3349 = vadd.xlane.f32.xlu0 %v3348_v1  ;;  %v3607_v62 = vsel %vm1397_vm3, %v3529_v32, 0.0 }
 0x2ca   :  { %v2677_v23 = vadd.f32 1.0, %v11096_v53  ;;  %v3604_v16 = vsel %vm1397_vm3, %v3528_v20, 0.0 }
 0x2cb   :  { %10534 = vmatprep.mubr.msk.f32.mxu1 %vm1397_vm3, %v2740_v21 }
 0x2cc   :  { %v10455_v59 = vpop.f32.mrb[40].mxu1  ;;  %v2741_v63 = vmul.f32 %v2677_v23, %v2485_v39  ;;  %3608 = vadd.xlane.f32.xlu1 %v3607_v62 }
 0x2cd   :  { %v14460_v60 = vadd.f32 %v10455_v59, %v14357_v6  ;;  %v3051_v5 = vpop.f32.mrb[41].mxu1  ;;  %3605 = vadd.xlane.f32.xlu0 %v3604_v16 }
 0x2ce   :  { %v14464_v15 = vadd.f32 %v14357_v6, %v3051_v5  ;;  %10535 = vmatmul.mubr.msk.f32.gmra.mrb[94].mxu1 %vm1397_vm3, %v2741_v63 }
 0x2cf   :  { %v3357_v36 = vsel %vm1397_vm3, %v14460_v60, 0.0  ;;  %v3531_v48 = vmul.f32 %v14460_v60, %v14460_v60 }
 0x2d0   :  { %v3354_v37 = vsel %vm1397_vm3, %v14464_v15, 0.0  ;;  %3358 = vadd.xlane.f32.xlu1 %v3357_v36  ;;  %v3530_v52 = vmul.f32 %v14464_v15, %v14464_v15 }
 0x2d1   :  { %3355 = vadd.xlane.f32.xlu0 %v3354_v37  ;;  %v3613_v46 = vsel %vm1397_vm3, %v3531_v48, 0.0 }
 0x2d2   :  { %v3610_v17 = vsel %vm1397_vm3, %v3530_v52, 0.0 }
 0x2d4   :  { %v10458_v24 = vpop.f32.mrb[42].mxu1  ;;  %3614 = vadd.xlane.f32.xlu1 %v3613_v46 }
 0x2d5   :  { %v14477_v13 = vadd.f32 %v10458_v24, %v14357_v6  ;;  %v3061_v54 = vpop.f32.mrb[43].mxu1  ;;  %3611 = vadd.xlane.f32.xlu0 %v3610_v17 }
 0x2d6   :  { %v14481_v28 = vadd.f32 %v14357_v6, %v3061_v54 }
 0x2d7   :  { %v3363_v47 = vsel %vm1397_vm3, %v14477_v13, 0.0  ;;  %v3533_v40 = vmul.f32 %v14477_v13, %v14477_v13 }
 0x2d8   :  { %v3360_v9 = vsel %vm1397_vm3, %v14481_v28, 0.0  ;;  %3364 = vadd.xlane.f32.xlu1 %v3363_v47  ;;  %v3532_v35 = vmul.f32 %v14481_v28, %v14481_v28 }
 0x2d9   :  { %3361 = vadd.xlane.f32.xlu0 %v3360_v9  ;;  %v3619_v22 = vsel %vm1397_vm3, %v3533_v40, 0.0 }
 0x2da   :  { %v3616_v44 = vsel %vm1397_vm3, %v3532_v35, 0.0 }
 0x2dc   :  { %v10461_v11 = vpop.f32.mrb[44].mxu1  ;;  %3620 = vadd.xlane.f32.xlu1 %v3619_v22 }
 0x2dd   :  { %v14493_v19 = vadd.f32 %v10461_v11, %v14357_v6  ;;  %v3071_v27 = vpop.f32.mrb[45].mxu1  ;;  %3617 = vadd.xlane.f32.xlu0 %v3616_v44 }
 0x2de   :  { %v14497_v2 = vadd.f32 %v14357_v6, %v3071_v27 }
 0x2df   :  { %v3369_v38 = vsel %vm1397_vm3, %v14493_v19, 0.0  ;;  %v3535_v29 = vmul.f32 %v14493_v19, %v14493_v19 }
 0x2e0   :  { %v3366_v14 = vsel %vm1397_vm3, %v14497_v2, 0.0  ;;  %3370 = vadd.xlane.f32.xlu1 %v3369_v38  ;;  %v3534_v8 = vmul.f32 %v14497_v2, %v14497_v2 }
 0x2e1   :  { %3367 = vadd.xlane.f32.xlu0 %v3366_v14  ;;  %v3625_v3 = vsel %vm1397_vm3, %v3535_v29, 0.0 }
 0x2e2   :  { %v3622_v49 = vsel %vm1397_vm3, %v3534_v8, 0.0 }
 0x2e4   :  { %v10464_v4 = vpop.f32.mrb[46].mxu1  ;;  %3626 = vadd.xlane.f32.xlu1 %v3625_v3 }
 0x2e5   :  { %v14509_v50 = vadd.f32 %v10464_v4, %v14357_v6  ;;  %v3081_v30 = vpop.f32.mrb[47].mxu1  ;;  %3623 = vadd.xlane.f32.xlu0 %v3622_v49 }
 0x2e6   :  { %v14513_v34 = vadd.f32 %v14357_v6, %v3081_v30 }
 0x2e7   :  { %v3375_v33 = vsel %vm1397_vm3, %v14509_v50, 0.0  ;;  %v3537_v42 = vmul.f32 %v14509_v50, %v14509_v50 }
 0x2e8   :  { %v3372_v51 = vsel %vm1397_vm3, %v14513_v34, 0.0  ;;  %3376 = vadd.xlane.f32.xlu1 %v3375_v33  ;;  %v3536_v57 = vmul.f32 %v14513_v34, %v14513_v34 }
 0x2e9   :  { %3373 = vadd.xlane.f32.xlu0 %v3372_v51  ;;  %v3631_v25 = vsel %vm1397_vm3, %v3537_v42, 0.0 }
 0x2ea   :  { %v3628_v43 = vsel %vm1397_vm3, %v3536_v57, 0.0 }
 0x2ec   :  { %v10467_v58 = vpop.f32.mrb[48].mxu1  ;;  %3632 = vadd.xlane.f32.xlu1 %v3631_v25 }
 0x2ed   :  { %v14525_v55 = vadd.f32 %v10467_v58, %v14357_v6  ;;  %v3091_v45 = vpop.f32.mrb[49].mxu1  ;;  %3629 = vadd.xlane.f32.xlu0 %v3628_v43 }
 0x2ee   :  { %v14529_v18 = vadd.f32 %v14357_v6, %v3091_v45 }
 0x2ef   :  { %v3381_v0 = vsel %vm1397_vm3, %v14525_v55, 0.0  ;;  %v3539_v32 = vmul.f32 %v14525_v55, %v14525_v55 }
 0x2f0   :  { %v3378_v1 = vsel %vm1397_vm3, %v14529_v18, 0.0  ;;  %3382 = vadd.xlane.f32.xlu1 %v3381_v0  ;;  %v3538_v53 = vmul.f32 %v14529_v18, %v14529_v18 }
 0x2f1   :  { %3379 = vadd.xlane.f32.xlu0 %v3378_v1  ;;  %v3637_v21 = vsel %vm1397_vm3, %v3539_v32, 0.0 }
 0x2f2   :  { %v3634_v59 = vsel %vm1397_vm3, %v3538_v53, 0.0 }
 0x2f4   :  { %v10470_v20 = vpop.f32.mrb[50].mxu1  ;;  %3638 = vadd.xlane.f32.xlu1 %v3637_v21 }
 0x2f5   :  { %v14541_v39 = vadd.f32 %v10470_v20, %v14357_v6  ;;  %v3101_v23 = vpop.f32.mrb[51].mxu1  ;;  %3635 = vadd.xlane.f32.xlu0 %v3634_v59 }
 0x2f6   :  { %v14545_v62 = vadd.f32 %v14357_v6, %v3101_v23 }
 0x2f7   :  { %v3387_v63 = vsel %vm1397_vm3, %v14541_v39, 0.0  ;;  %v3541_v16 = vmul.f32 %v14541_v39, %v14541_v39 }
 0x2f8   :  { %v3384_v5 = vsel %vm1397_vm3, %v14545_v62, 0.0  ;;  %3388 = vadd.xlane.f32.xlu1 %v3387_v63  ;;  %v3540_v36 = vmul.f32 %v14545_v62, %v14545_v62 }
 0x2f9   :  { %3385 = vadd.xlane.f32.xlu0 %v3384_v5  ;;  %v3643_v48 = vsel %vm1397_vm3, %v3541_v16, 0.0 }
 0x2fa   :  { %v3640_v46 = vsel %vm1397_vm3, %v3540_v36, 0.0 }
 0x2fc   :  { %v10473_v37 = vpop.f32.mrb[52].mxu1  ;;  %3644 = vadd.xlane.f32.xlu1 %v3643_v48 }
 0x2fd   :  { %v14557_v52 = vadd.f32 %v10473_v37, %v14357_v6  ;;  %v3111_v24 = vpop.f32.mrb[53].mxu1  ;;  %3641 = vadd.xlane.f32.xlu0 %v3640_v46 }
 0x2fe   :  { %v14561_v54 = vadd.f32 %v14357_v6, %v3111_v24 }
 0x2ff   :  { %v3393_v17 = vsel %vm1397_vm3, %v14557_v52, 0.0  ;;  %v3543_v9 = vmul.f32 %v14557_v52, %v14557_v52 }
 0x300   :  { %v3390_v47 = vsel %vm1397_vm3, %v14561_v54, 0.0  ;;  %3394 = vadd.xlane.f32.xlu1 %v3393_v17  ;;  %v3542_v40 = vmul.f32 %v14561_v54, %v14561_v54 }
 0x301   :  { %3391 = vadd.xlane.f32.xlu0 %v3390_v47  ;;  %v3649_v11 = vsel %vm1397_vm3, %v3543_v9, 0.0 }
 0x302   :  { %v3646_v44 = vsel %vm1397_vm3, %v3542_v40, 0.0 }
 0x304   :  { %v10476_v35 = vpop.f32.mrb[54].mxu1  ;;  %3650 = vadd.xlane.f32.xlu1 %v3649_v11 }
 0x305   :  { %v14573_v22 = vadd.f32 %v10476_v35, %v14357_v6  ;;  %v3121_v27 = vpop.f32.mrb[55].mxu1  ;;  %3647 = vadd.xlane.f32.xlu0 %v3646_v44 }
 0x306   :  { %v14577_v38 = vadd.f32 %v14357_v6, %v3121_v27 }
 0x307   :  { %v3399_v14 = vsel %vm1397_vm3, %v14573_v22, 0.0  ;;  %v3545_v8 = vmul.f32 %v14573_v22, %v14573_v22 }
 0x308   :  { %v3396_v29 = vsel %vm1397_vm3, %v14577_v38, 0.0  ;;  %3400 = vadd.xlane.f32.xlu1 %v3399_v14  ;;  %v3544_v4 = vmul.f32 %v14577_v38, %v14577_v38 }
 0x309   :  { %3397 = vadd.xlane.f32.xlu0 %v3396_v29  ;;  %v3655_v30 = vsel %vm1397_vm3, %v3545_v8, 0.0 }
 0x30a   :  { %v3652_v51 = vsel %vm1397_vm3, %v3544_v4, 0.0 }
 0x30c   :  { %v10479_v3 = vpop.f32.mrb[56].mxu1  ;;  %3656 = vadd.xlane.f32.xlu1 %v3655_v30 }
 0x30d   :  { %v14589_v49 = vadd.f32 %v10479_v3, %v14357_v6  ;;  %v3131_v33 = vpop.f32.mrb[57].mxu1  ;;  %3653 = vadd.xlane.f32.xlu0 %v3652_v51 }
 0x30e   :  { %v14593_v42 = vadd.f32 %v14357_v6, %v3131_v33 }
 0x30f   :  { %v3405_v57 = vsel %vm1397_vm3, %v14589_v49, 0.0  ;;  %v3547_v25 = vmul.f32 %v14589_v49, %v14589_v49 }
 0x310   :  { %v3402_v58 = vsel %vm1397_vm3, %v14593_v42, 0.0  ;;  %3406 = vadd.xlane.f32.xlu1 %v3405_v57  ;;  %v3546_v45 = vmul.f32 %v14593_v42, %v14593_v42 }
 0x311   :  { %3403 = vadd.xlane.f32.xlu0 %v3402_v58  ;;  %v3661_v0 = vsel %vm1397_vm3, %v3547_v25, 0.0 }
 0x312   :  { %v3658_v53 = vsel %vm1397_vm3, %v3546_v45, 0.0 }
 0x314   :  { %v10482_v43 = vpop.f32.mrb[58].mxu1  ;;  %3662 = vadd.xlane.f32.xlu1 %v3661_v0 }
 0x315   :  { %v14605_v1 = vadd.f32 %v10482_v43, %v14357_v6  ;;  %v3141_v32 = vpop.f32.mrb[59].mxu1  ;;  %3659 = vadd.xlane.f32.xlu0 %v3658_v53 }
 0x316   :  { %v14609_v20 = vadd.f32 %v14357_v6, %v3141_v32  ;;  %v14665_v32 = vpop.permute.xlu1 %8402 }
 0x317   :  { %v3411_v21 = vsel %vm1397_vm3, %v14605_v1, 0.0  ;;  %v3549_v59 = vmul.f32 %v14605_v1, %v14605_v1  ;;  %19478 = vst [vmem:[#allocation105_spill] sm:$0xff] %v14665_v32 }
 0x318   :  { %v3408_v23 = vsel %vm1397_vm3, %v14609_v20, 0.0  ;;  %3412 = vadd.xlane.f32.xlu1 %v3411_v21  ;;  %v3548_v63 = vmul.f32 %v14609_v20, %v14609_v20  ;;  %v14669_v21 = vpop.permute.xlu0 %8400 }
 0x319   :  { %3409 = vadd.xlane.f32.xlu0 %v3408_v23  ;;  %v3667_v16 = vsel %vm1397_vm3, %v3549_v59, 0.0  ;;  %19479 = vst [vmem:[#allocation71_spill] sm:$0xff] %v14669_v21 }
 0x31a   :  { %v3664_v48 = vsel %vm1397_vm3, %v3548_v63, 0.0 }
 0x31c   :  { %v10485_v5 = vpop.f32.mrb[60].mxu1  ;;  %3668 = vadd.xlane.f32.xlu1 %v3667_v16 }
 0x31d   :  { %v14621_v36 = vadd.f32 %v10485_v5, %v14357_v6  ;;  %v3151_v37 = vpop.f32.mrb[61].mxu1  ;;  %3665 = vadd.xlane.f32.xlu0 %v3664_v48 }
 0x31e   :  { %v14625_v24 = vadd.f32 %v14357_v6, %v3151_v37 }
 0x31f   :  { %v3417_v46 = vsel %vm1397_vm3, %v14621_v36, 0.0  ;;  %v3551_v47 = vmul.f32 %v14621_v36, %v14621_v36 }
 0x320   :  { %v3414_v17 = vsel %vm1397_vm3, %v14625_v24, 0.0  ;;  %3418 = vadd.xlane.f32.xlu1 %v3417_v46  ;;  %v3550_v9 = vmul.f32 %v14625_v24, %v14625_v24  ;;  %v14681_v46 = vpop.permute.xlu1 %8406 }
 0x321   :  { %3415 = vadd.xlane.f32.xlu0 %v3414_v17  ;;  %v3673_v35 = vsel %vm1397_vm3, %v3551_v47, 0.0  ;;  %19482 = vst [vmem:[#allocation36_spill] sm:$0xff] %v14681_v46  ;;  %v14685_v47 = vpop.permute.xlu0 %8404 }
 0x322   :  { %v3670_v44 = vsel %vm1397_vm3, %v3550_v9, 0.0  ;;  %19483 = vst [vmem:[#allocation35_spill] sm:$0xff] %v14685_v47 }
 0x324   :  { %v10488_v40 = vpop.f32.mrb[62].mxu1  ;;  %3674 = vadd.xlane.f32.xlu1 %v3673_v35 }
 0x325   :  { %v14637_v11 = vadd.f32 %v10488_v40, %v14357_v6  ;;  %v3161_v27 = vpop.f32.mrb[63].mxu1  ;;  %3671 = vadd.xlane.f32.xlu0 %v3670_v44 }
 0x326   :  { %v14641_v14 = vadd.f32 %v14357_v6, %v3161_v27 }
 0x327   :  { %v3423_v29 = vsel %vm1397_vm3, %v14637_v11, 0.0  ;;  %v3553_v4 = vmul.f32 %v14637_v11, %v14637_v11 }
 0x328   :  { %v3420_v8 = vsel %vm1397_vm3, %v14641_v14, 0.0  ;;  %3424 = vadd.xlane.f32.xlu1 %v3423_v29  ;;  %v3552_v3 = vmul.f32 %v14641_v14, %v14641_v14 }
 0x329   :  { %3421 = vadd.xlane.f32.xlu0 %v3420_v8  ;;  %v3679_v33 = vsel %vm1397_vm3, %v3553_v4, 0.0 }
 0x32a   :  { %v3676_v25 = vsel %vm1397_vm3, %v3552_v3, 0.0 }
 0x32b   :  { %v10491_v30 = vpop.f32.mrb[64].mxu1 }
 0x32c   :  { %v14653_v51 = vadd.f32 %v10491_v30, %v14357_v6  ;;  %v3171_v57 = vpop.f32.mrb[65].mxu1  ;;  %3680 = vadd.xlane.f32.xlu1 %v3679_v33 }
 0x32d   :  { %v14656_v58 = vadd.f32 %v14357_v6, %v3171_v57  ;;  %3677 = vadd.xlane.f32.xlu0 %v3676_v25 }
 0x32e   :  { %v3429_v45 = vsel %vm1397_vm3, %v14653_v51, 0.0  ;;  %v3555_v0 = vmul.f32 %v14653_v51, %v14653_v51 }
 0x32f   :  { %19477 = vst [vmem:[#allocation70_spill] sm:$0xff] %v14656_v58  ;;  %v3426_v43 = vsel %vm1397_vm3, %v14656_v58, 0.0  ;;  %v3554_v53 = vmul.f32 %v14656_v58, %v14656_v58 }
 0x330   :  { %3430 = vadd.xlane.f32.xlu1 %v3429_v45  ;;  %v3685_v59 = vsel %vm1397_vm3, %v3555_v0, 0.0 }
 0x331   :  { %3427 = vadd.xlane.f32.xlu0 %v3426_v43  ;;  %v3682_v37 = vsel %vm1397_vm3, %v3554_v53, 0.0 }
 0x333   :  { %v10494_v23 = vpop.f32.mrb[66].mxu1 }
 0x334   :  { %v14673_v63 = vadd.f32 %v10494_v23, %v14357_v6  ;;  %v3181_v5 = vpop.f32.mrb[67].mxu1  ;;  %3686 = vadd.xlane.f32.xlu1 %v3685_v59 }
 0x335   :  { %v14676_v16 = vadd.f32 %v14357_v6, %v3181_v5  ;;  %3683 = vadd.xlane.f32.xlu0 %v3682_v37 }
 0x336   :  { %19480 = vst [vmem:[#allocation31_spill] sm:$0xff] %v14673_v63  ;;  %v3435_v48 = vsel %vm1397_vm3, %v14673_v63, 0.0  ;;  %v3557_v9 = vmul.f32 %v14673_v63, %v14673_v63 }
 0x337   :  { %19481 = vst [vmem:[#allocation30_spill] sm:$0xff] %v14676_v16  ;;  %v3432_v17 = vsel %vm1397_vm3, %v14676_v16, 0.0  ;;  %v3556_v40 = vmul.f32 %v14676_v16, %v14676_v16 }
 0x338   :  { %3436 = vadd.xlane.f32.xlu1 %v3435_v48  ;;  %v3691_v44 = vsel %vm1397_vm3, %v3557_v9, 0.0 }
 0x339   :  { %3433 = vadd.xlane.f32.xlu0 %v3432_v17  ;;  %v3688_v33 = vsel %vm1397_vm3, %v3556_v40, 0.0 }
 0x33b   :  { %v10497_v35 = vpop.f32.mrb[68].mxu1  ;;  %v3335_v27 = vpop.xlane.xlu1 %3334 }
 0x33c   :  { %v14693_v29 = vadd.f32 %v10497_v35, %v14357_v6  ;;  %v14695_v8 = vmul.f32 0.03125, %v3335_v27  ;;  %v3191_v4 = vpop.f32.mrb[69].mxu1  ;;  %v3332_v3 = vpop.xlane.xlu0 %3331  ;;  %3692 = vadd.xlane.f32.xlu1 %v3691_v44 }
 0x33d   :  { %v14698_v30 = vadd.f32 %v14357_v6, %v3191_v4  ;;  %v14701_v57 = vmul.f32 0.03125, %v3332_v3  ;;  %3689 = vadd.xlane.f32.xlu0 %v3688_v33 }
 0x33e   :  { %19484 = vst [vmem:[#allocation76_spill] sm:$0xff] %v14693_v29  ;;  %v3441_v25 = vsel %vm1397_vm3, %v14693_v29, 0.0  ;;  %v3907_v0 = vmul.f32 %v14695_v8, %v14695_v8  ;;  %v3559_v59 = vmul.f32 %v14693_v29, %v14693_v29 }
 0x33f   :  { %19485 = vst [vmem:[#allocation40_spill] sm:$0xff] %v14698_v30  ;;  %v3591_v45 = vpop.xlane.xlu1 %3590  ;;  %v3438_v43 = vsel %vm1397_vm3, %v14698_v30, 0.0  ;;  %v3906_v5 = vmul.f32 %v14701_v57, %v14701_v57  ;;  %v3558_v48 = vmul.f32 %v14698_v30, %v14698_v30 }
 0x340   :  { %v3843_v53 = vmul.f32 0.03125, %v3591_v45  ;;  %v3588_v23 = vpop.xlane.xlu0 %3587  ;;  %3442 = vadd.xlane.f32.xlu1 %v3441_v25  ;;  %v3697_v27 = vsel %vm1397_vm3, %v3559_v59, 0.0 }
 0x341   :  { %v3842_v37 = vmul.f32 0.03125, %v3588_v23  ;;  %3439 = vadd.xlane.f32.xlu0 %v3438_v43  ;;  %v3694_v25 = vsel %vm1397_vm3, %v3558_v48, 0.0 }
 0x342   :  { %v3971_v17 = vsub.f32 %v3843_v53, %v3907_v0 }
 0x343   :  { %v3970_v9 = vsub.f32 %v3842_v37, %v3906_v5  ;;  %v10500_v40 = vpop.f32.mrb[70].mxu1 }
 0x344   :  { %v4035_v35 = vmax.f32 %v3971_v17, 0.0  ;;  %v14717_v44 = vadd.f32 %v10500_v40, %v14357_v6  ;;  %v3201_v4 = vpop.f32.mrb[71].mxu1  ;;  %3698 = vadd.xlane.f32.xlu1 %v3697_v27 }
 0x345   :  { %v4034_v3 = vmax.f32 %v3970_v9, 0.0  ;;  %v14720_v33 = vadd.f32 %v14357_v6, %v3201_v4  ;;  %v3341_v23 = vpop.xlane.xlu1 %3340  ;;  %3695 = vadd.xlane.f32.xlu0 %v3694_v25 }
 0x346   :  { %19486 = vst [vmem:[#allocation39_spill] sm:$0xff] %v14717_v44  ;;  %v4163_v45 = vadd.f32 1e-05, %v4035_v35  ;;  %v3447_v43 = vsel %vm1397_vm3, %v14717_v44, 0.0  ;;  %v14725_v53 = vmul.f32 0.03125, %v3341_v23  ;;  %v3338_v59 = vpop.xlane.xlu0 %3337  ;;  %v3561_v17 = vmul.f32 %v14717_v44, %v14717_v44 }
 0x347   :  { %19487 = vst [vmem:[#allocation77_spill] sm:$0xff] %v14720_v33  ;;  %v4162_v0 = vadd.f32 1e-05, %v4034_v3  ;;  %v3444_v5 = vsel %vm1397_vm3, %v14720_v33, 0.0  ;;  %v14729_v37 = vmul.f32 0.03125, %v3338_v59  ;;  %v3560_v48 = vmul.f32 %v14720_v33, %v14720_v33 }
 0x348   :  { %11097 = vrsqrt.f32 %v4163_v45  ;;  %3448 = vadd.xlane.f32.xlu1 %v3447_v43  ;;  %v3909_v40 = vmul.f32 %v14725_v53, %v14725_v53  ;;  %v3703_v23 = vsel %vm1397_vm3, %v3561_v17, 0.0 }
 0x349   :  { %11099 = vrsqrt.f32 %v4162_v0  ;;  %v3597_v9 = vpop.xlane.xlu1 %3596  ;;  %3445 = vadd.xlane.f32.xlu0 %v3444_v5  ;;  %v3908_v3 = vmul.f32 %v14729_v37, %v14729_v37  ;;  %v3700_v5 = vsel %vm1397_vm3, %v3560_v48, 0.0  ;;  %v4099_v48 = vsub.f32 %v14366_v10, %v14695_v8 }
 0x34a   :  { %v3845_v35 = vmul.f32 0.03125, %v3597_v9  ;;  %v3594_v27 = vpop.xlane.xlu0 %3593 }
 0x34b   :  { %v10503_v4 = vpop.f32.mrb[72].mxu1  ;;  %v3844_v25 = vmul.f32 0.03125, %v3594_v27 }
 0x34c   :  { %v14740_v45 = vadd.f32 %v10503_v4, %v14357_v6  ;;  %v3211_v43 = vpop.f32.mrb[73].mxu1  ;;  %v3973_v0 = vsub.f32 %v3845_v35, %v3909_v40  ;;  %3704 = vadd.xlane.f32.xlu1 %v3703_v23 }
 0x34d   :  { %v14744_v59 = vadd.f32 %v14357_v6, %v3211_v43  ;;  %v3972_v9 = vsub.f32 %v3844_v25, %v3908_v3  ;;  %v3347_v47 = vpop.xlane.xlu1 %3346  ;;  %3701 = vadd.xlane.f32.xlu0 %v3700_v5  ;;  %v4098_v43 = vsub.f32 %v14372_v31, %v14701_v57 }
 0x34e   :  { %19488 = vst [vmem:[#allocation45_spill] sm:$0xff] %v14740_v45  ;;  %v3453_v46 = vsel %vm1397_vm3, %v14740_v45, 0.0  ;;  %v4037_v27 = vmax.f32 %v3973_v0, 0.0  ;;  %v14749_v21 = vmul.f32 0.03125, %v3347_v47  ;;  %v3344_v4 = vpop.xlane.xlu0 %3343  ;;  %v3563_v40 = vmul.f32 %v14740_v45, %v14740_v45 }
 0x34f   :  { %19489 = vst [vmem:[#allocation44_spill] sm:$0xff] %v14744_v59  ;;  %v3450_v17 = vsel %vm1397_vm3, %v14744_v59, 0.0  ;;  %v4036_v35 = vmax.f32 %v3972_v9, 0.0  ;;  %v14755_v23 = vmul.f32 0.03125, %v3344_v4  ;;  %v3562_v25 = vmul.f32 %v14744_v59, %v14744_v59 }
 0x350   :  { %v4165_v3 = vadd.f32 1e-05, %v4037_v27  ;;  %3454 = vadd.xlane.f32.xlu1 %v3453_v46  ;;  %v3911_v9 = vmul.f32 %v14749_v21, %v14749_v21  ;;  %v3709_v46 = vsel %vm1397_vm3, %v3563_v40, 0.0 }
 0x351   :  { %v4164_v0 = vadd.f32 1e-05, %v4036_v35  ;;  %v3603_v5 = vpop.xlane.xlu1 %3602  ;;  %3451 = vadd.xlane.f32.xlu0 %v3450_v17  ;;  %v3910_v27 = vmul.f32 %v14755_v23, %v14755_v23  ;;  %v3706_v35 = vsel %vm1397_vm3, %v3562_v25, 0.0 }
 0x352   :  { %v11098_v47 = vpop.eup %11097  ;;  %v3847_v4 = vmul.f32 0.03125, %v3603_v5  ;;  %v3600_v10 = vpop.xlane.xlu0 %3599 }
 0x353   :  { %v11100_v32 = vpop.eup %11099  ;;  %v14763_v45 = vmul.f32 %v11098_v47, %v4099_v48  ;;  %v10506_v8 = vpop.f32.mrb[74].mxu1  ;;  %11101 = vrsqrt.f32 %v4164_v0  ;;  %v3846_v59 = vmul.f32 0.03125, %v3600_v10 }
 0x354   :  { %v14771_v31 = vadd.f32 %v10506_v8, %v14357_v6  ;;  %v3221_v57 = vpop.f32.mrb[75].mxu1  ;;  %11103 = vrsqrt.f32 %v4165_v3  ;;  %3710 = vadd.xlane.f32.xlu1 %v3709_v46  ;;  %v4290_v48 = vmul.f32 %v11100_v32, %v4098_v43  ;;  %v3975_v40 = vsub.f32 %v3847_v4, %v3911_v9 }
 0x355   :  { %v14774_v17 = vadd.f32 %v14357_v6, %v3221_v57  ;;  %v4419_v47 = vmul.f32 0.70710677, %v14763_v45  ;;  %v3974_v0 = vsub.f32 %v3846_v59, %v3910_v27  ;;  %v3353_v5 = vpop.xlane.xlu1 %3352  ;;  %3707 = vadd.xlane.f32.xlu0 %v3706_v35 }
 0x356   :  { %19490 = vst [vmem:[#allocation50_spill] sm:$0xff] %v14771_v31  ;;  %v3459_v10 = vsel %vm1397_vm3, %v14771_v31, 0.0  ;;  %v14780_v8 = vmul.f32 0.03125, %v3353_v5  ;;  %v3350_v33 = vpop.xlane.xlu0 %3349  ;;  %v3565_v46 = vmul.f32 %v14771_v31, %v14771_v31  ;;  %v4418_v43 = vmul.f32 0.70710677, %v4290_v48 }
 0x357   :  { %19491 = vst [vmem:[#allocation49_spill] sm:$0xff] %v14774_v17  ;;  %v3456_v3 = vsel %vm1397_vm3, %v14774_v17, 0.0  ;;  %v4038_v25 = vmax.f32 %v3974_v0, 0.0  ;;  %v14786_v32 = vmul.f32 0.03125, %v3350_v33  ;;  %v3564_v59 = vmul.f32 %v14774_v17, %v14774_v17 }
 0x358   :  { %3460 = vadd.xlane.f32.xlu1 %v3459_v10  ;;  %11105 = verf.f32 %v4419_v47  ;;  %v4039_v9 = vmax.f32 %v3975_v40, 0.0  ;;  %v3913_v27 = vmul.f32 %v14780_v8, %v14780_v8  ;;  %v3715_v31 = vsel %vm1397_vm3, %v3565_v46, 0.0 }
 0x359   :  { %v3609_v4 = vpop.xlane.xlu1 %3608  ;;  %3457 = vadd.xlane.f32.xlu0 %v3456_v3  ;;  %v4166_v0 = vadd.f32 1e-05, %v4038_v25  ;;  %v3912_v33 = vmul.f32 %v14786_v32, %v14786_v32  ;;  %11107 = verf.f32 %v4418_v43  ;;  %v4100_v46 = vsub.f32 %v14406_v41, %v14729_v37 }
 0x35a   :  { %v3849_v57 = vmul.f32 0.03125, %v3609_v4  ;;  %v3606_v35 = vpop.xlane.xlu0 %3605  ;;  %v3712_v4 = vsel %vm1397_vm3, %v3564_v59, 0.0  ;;  %v4167_v25 = vadd.f32 1e-05, %v4039_v9 }
 0x35b   :  { %v10509_v5 = vpop.f32.mrb[76].mxu1  ;;  %v3848_v10 = vmul.f32 0.03125, %v3606_v35  ;;  %11109 = vrsqrt.f32 %v4166_v0 }
 0x35c   :  { %v14796_v17 = vadd.f32 %v10509_v5, %v14357_v6  ;;  %v3231_v47 = vpop.f32.mrb[77].mxu1  ;;  %v3977_v40 = vsub.f32 %v3849_v57, %v3913_v27  ;;  %3716 = vadd.xlane.f32.xlu1 %v3715_v31  ;;  %v4101_v31 = vsub.f32 %v14402_v26, %v14725_v53  ;;  %11111 = vrsqrt.f32 %v4167_v25 }
 0x35d   :  { %v14799_v3 = vadd.f32 %v14357_v6, %v3231_v47  ;;  %v11102_v44 = vpop.eup %11101  ;;  %v3976_v30 = vsub.f32 %v3848_v10, %v3912_v33  ;;  %v3359_v29 = vpop.xlane.xlu1 %3358  ;;  %3713 = vadd.xlane.f32.xlu0 %v3712_v4  ;;  %v4355_v33 = vmul.f32 0.5, %v14763_v45 }
 0x35e   :  { %19492 = vst [vmem:[#allocation54_spill] sm:$0xff] %v14796_v17  ;;  %v3465_v35 = vsel %vm1397_vm3, %v14796_v17, 0.0  ;;  %v11104_v5 = vpop.eup %11103  ;;  %v3356_v6 = vpop.xlane.xlu0 %3355  ;;  %v3567_v43 = vmul.f32 %v14796_v17, %v14796_v17  ;;  %v4041_v41 = vmax.f32 %v3977_v40, 0.0  ;;  %v14812_v37 = vmul.f32 0.03125, %v3359_v29 }
 0x35f   :  { %19493 = vst [vmem:[#allocation53_spill] sm:$0xff] %v14799_v3  ;;  %v3462_v59 = vsel %vm1397_vm3, %v14799_v3, 0.0  ;;  %v14814_v9 = vmul.f32 %v11102_v44, %v4100_v46  ;;  %v14820_v26 = vmul.f32 0.03125, %v3356_v6  ;;  %v3566_v53 = vmul.f32 %v14799_v3, %v14799_v3 }
 0x360   :  { %3466 = vadd.xlane.f32.xlu1 %v3465_v35  ;;  %v4040_v0 = vmax.f32 %v3976_v30, 0.0  ;;  %v4354_v44 = vmul.f32 0.5, %v4290_v48  ;;  %v3721_v4 = vsel %vm1397_vm3, %v3567_v43, 0.0  ;;  %v14827_v6 = vmul.f32 %v11104_v5, %v4101_v31  ;;  %v14834_v30 = vld [vmem:[%s19192_s6] ss:$0 sm:$0xff] }
 0x361   :  { %v3615_v29 = vpop.xlane.xlu1 %3614  ;;  %3463 = vadd.xlane.f32.xlu0 %v3462_v59  ;;  %v4420_v46 = vmul.f32 0.70710677, %v14814_v9  ;;  %v4169_v27 = vadd.f32 1e-05, %v4041_v41  ;;  %v3915_v57 = vmul.f32 %v14812_v37, %v14812_v37  ;;  %v3914_v59 = vmul.f32 %v14820_v26, %v14820_v26 }
 0x362   :  { %v3851_v10 = vmul.f32 0.03125, %v3615_v29  ;;  %v3612_v47 = vpop.xlane.xlu0 %3611  ;;  %v11106_v35 = vpop.eup %11105  ;;  %v3718_v31 = vsel %vm1397_vm3, %v3566_v53, 0.0  ;;  %v4168_v41 = vadd.f32 1e-05, %v4040_v0 }
 0x363   :  { %v10512_v40 = vpop.f32.mrb[78].mxu1  ;;  %v3850_v45 = vmul.f32 0.03125, %v3612_v47  ;;  %11113 = verf.f32 %v4420_v46  ;;  %v11108_v3 = vpop.eup %11107 }
 0x364   :  { %v14837_v48 = vadd.f32 %v14834_v30, %v10512_v40  ;;  %v3241_v25 = vpop.f32.mrb[79].mxu1  ;;  %3722 = vadd.xlane.f32.xlu1 %v3721_v4  ;;  %v3979_v29 = vsub.f32 %v3851_v10, %v3915_v57  ;;  %v4546_v57 = vadd.f32 1.0, %v11108_v3  ;;  %11115 = vrsqrt.f32 %v4169_v27 }
 0x365   :  { %v14842_v5 = vadd.f32 %v14834_v30, %v3241_v25  ;;  %v3365_v47 = vpop.xlane.xlu1 %3364  ;;  %3719 = vadd.xlane.f32.xlu0 %v3718_v31  ;;  %v3978_v17 = vsub.f32 %v3850_v45, %v3914_v59  ;;  %v4547_v25 = vadd.f32 1.0, %v11106_v35  ;;  %v4421_v35 = vmul.f32 0.70710677, %v14827_v6  ;;  %v11110_v31 = vpop.eup %11109 }
 0x366   :  { %19494 = vst [vmem:[#allocation59_spill] sm:$0xff] %v14837_v48  ;;  %v3471_v40 = vsel %vm1397_vm3, %v14837_v48, 0.0  ;;  %v3362_v16 = vpop.xlane.xlu0 %3361  ;;  %v3569_v53 = vmul.f32 %v14837_v48, %v14837_v48  ;;  %v14855_v0 = vmul.f32 0.03125, %v3365_v47  ;;  %11117 = vrsqrt.f32 %v4168_v41  ;;  %v11112_v45 = vpop.eup %11111 }
 0x367   :  { %19495 = vst [vmem:[#allocation58_spill] sm:$0xff] %v14842_v5  ;;  %v3468_v4 = vsel %vm1397_vm3, %v14842_v5, 0.0  ;;  %v3568_v10 = vmul.f32 %v14842_v5, %v14842_v5  ;;  %v14861_v59 = vmul.f32 0.03125, %v3362_v16  ;;  %v4043_v47 = vmax.f32 %v3979_v29, 0.0 }
 0x368   :  { %3472 = vadd.xlane.f32.xlu1 %v3471_v40  ;;  %v4610_v3 = vmul.f32 %v4546_v57, %v4354_v44  ;;  %v4042_v48 = vmax.f32 %v3978_v17, 0.0  ;;  %v4611_v27 = vmul.f32 %v4547_v25, %v4355_v33  ;;  %v3727_v16 = vsel %vm1397_vm3, %v3569_v53, 0.0 }
 0x369   :  { %v3621_v46 = vpop.xlane.xlu1 %3620  ;;  %3469 = vadd.xlane.f32.xlu0 %v3468_v4  ;;  %v3917_v40 = vmul.f32 %v14855_v0, %v14855_v0  ;;  %v3724_v44 = vsel %vm1397_vm3, %v3568_v10, 0.0  ;;  %v3916_v17 = vmul.f32 %v14861_v59, %v14861_v59  ;;  %11119 = verf.f32 %v4421_v35 }
 0x36a   :  { %v3853_v5 = vmul.f32 0.03125, %v3621_v46  ;;  %v3618_v63 = vpop.xlane.xlu0 %3617  ;;  %10545 = vmatprep.mubr.msk.f32.mxu1 %vm1397_vm3, %v4610_v3  ;;  %v19498_v4 = vsub.f32 %v14428_v56, %v14755_v23  ;;  %v4171_v25 = vadd.f32 1e-05, %v4043_v47  ;;  %v4356_v57 = vmul.f32 0.5, %v14814_v9 }
 0x36b   :  { %v10515_v58 = vpop.f32.mrb[80].mxu1  ;;  %v3852_v41 = vmul.f32 0.03125, %v3618_v63  ;;  %10546 = vmatmul.mubr.msk.f32.vlgmr.msra.gmra.mrb[96].mxu1 %vm1397_vm3, %v4611_v27  ;;  %v4170_v3 = vadd.f32 1e-05, %v4042_v48  ;;  %v19499_v56 = vsub.f32 %v14424_v12, %v14749_v21  ;;  %v4357_v47 = vmul.f32 0.5, %v14827_v6 }
 0x36c   :  { %v14871_v43 = vadd.f32 %v14834_v30, %v10515_v58  ;;  %v3251_v29 = vpop.f32.mrb[81].mxu1  ;;  %3728 = vadd.xlane.f32.xlu1 %v3727_v16  ;;  %v4294_v63 = vmul.f32 %v11110_v31, %v19498_v4  ;;  %v3981_v58 = vsub.f32 %v3853_v5, %v3917_v40  ;;  %11121 = vrsqrt.f32 %v4171_v25 }
 0x36d   :  { %v14878_v33 = vadd.f32 %v14834_v30, %v3251_v29  ;;  %v3371_v53 = vpop.xlane.xlu1 %3370  ;;  %3725 = vadd.xlane.f32.xlu0 %v3724_v44  ;;  %v11114_v10 = vpop.eup %11113  ;;  %v3980_v27 = vsub.f32 %v3852_v41, %v3916_v17  ;;  %v14891_v23 = vmul.f32 %v11112_v45, %v19499_v56  ;;  %11123 = vrsqrt.f32 %v4170_v3 }
 0x36e   :  { %19496 = vst [vmem:[#allocation63_spill] sm:$0xff] %v14871_v43  ;;  %v3477_v46 = vsel %vm1397_vm3, %v14871_v43, 0.0  ;;  %v3368_v16 = vpop.xlane.xlu0 %3367  ;;  %v14893_v5 = vmul.f32 0.03125, %v3371_v53  ;;  %v4548_v31 = vadd.f32 1.0, %v11114_v10  ;;  %v3571_v9 = vmul.f32 %v14871_v43, %v14871_v43  ;;  %v11116_v44 = vpop.eup %11115 }
 0x36f   :  { %19497 = vst [vmem:[#allocation62_spill] sm:$0xff] %v14878_v33  ;;  %v3474_v35 = vsel %vm1397_vm3, %v14878_v33, 0.0  ;;  %v14900_v40 = vmul.f32 0.03125, %v3368_v16  ;;  %v3570_v41 = vmul.f32 %v14878_v33, %v14878_v33  ;;  %v4422_v12 = vmul.f32 0.70710677, %v4294_v63 }
 0x370   :  { %3478 = vadd.xlane.f32.xlu1 %v3477_v46  ;;  %v4045_v45 = vmax.f32 %v3981_v58, 0.0  ;;  %v4612_v6 = vmul.f32 %v4548_v31, %v4356_v57  ;;  %v4044_v17 = vmax.f32 %v3980_v27, 0.0  ;;  %v4423_v46 = vmul.f32 0.70710677, %v14891_v23  ;;  %v11118_v16 = vpop.eup %11117 }
 0x371   :  { %v3627_v29 = vpop.xlane.xlu1 %3626  ;;  %3475 = vadd.xlane.f32.xlu0 %v3474_v35  ;;  %v3919_v56 = vmul.f32 %v14893_v5, %v14893_v5  ;;  %v3733_v57 = vsel %vm1397_vm3, %v3571_v9, 0.0  ;;  %v3918_v3 = vmul.f32 %v14900_v40, %v14900_v40  ;;  %v3730_v31 = vsel %vm1397_vm3, %v3570_v41, 0.0 }
 0x372   :  { %v3855_v4 = vmul.f32 0.03125, %v3627_v29  ;;  %v3624_v53 = vpop.xlane.xlu0 %3623  ;;  %10548 = vmatprep.mubr.msk.f32.mxu1 %vm1397_vm3, %v4612_v6  ;;  %11125 = verf.f32 %v4422_v12  ;;  %v4173_v29 = vadd.f32 1e-05, %v4045_v45  ;;  %v19502_v41 = vsub.f32 %v14446_v61, %v14786_v32 }
 0x373   :  { %v10518_v10 = vpop.f32.mrb[82].mxu1  ;;  %v3854_v25 = vmul.f32 0.03125, %v3624_v53  ;;  %11127 = verf.f32 %v4423_v46  ;;  %v11120_v9 = vpop.eup %11119 }
 0x374   :  { %v14911_v58 = vadd.f32 %v14834_v30, %v10518_v10  ;;  %v3261_v35 = vpop.f32.mrb[83].mxu1  ;;  %3734 = vadd.xlane.f32.xlu1 %v3733_v57  ;;  %v3983_v48 = vsub.f32 %v3855_v4, %v3919_v56  ;;  %v14929_v12 = vmul.f32 %v11118_v16, %v19502_v41  ;;  %v4549_v45 = vadd.f32 1.0, %v11120_v9 }
 0x375   :  { %v14917_v27 = vadd.f32 %v14834_v30, %v3261_v35  ;;  %v3377_v6 = vpop.xlane.xlu1 %3376  ;;  %3731 = vadd.xlane.f32.xlu0 %v3730_v31  ;;  %v3982_v10 = vsub.f32 %v3854_v25, %v3918_v3  ;;  %v4358_v56 = vmul.f32 0.5, %v4294_v63  ;;  %v4172_v25 = vadd.f32 1e-05, %v4044_v17 }
 0x376   :  { %19500 = vst [vmem:[#allocation68_spill] sm:$0xff] %v14911_v58  ;;  %v3483_v53 = vsel %vm1397_vm3, %v14911_v58, 0.0  ;;  %v3374_v21 = vpop.xlane.xlu0 %3373  ;;  %v3573_v35 = vmul.f32 %v14911_v58, %v14911_v58  ;;  %v14931_v4 = vmul.f32 0.03125, %v3377_v6  ;;  %v19503_v58 = vsub.f32 %v14442_v7, %v14780_v8 }
 0x377   :  { %19501 = vst [vmem:[#allocation67_spill] sm:$0xff] %v14917_v27  ;;  %v3480_v57 = vsel %vm1397_vm3, %v14917_v27, 0.0  ;;  %v3572_v46 = vmul.f32 %v14917_v27, %v14917_v27  ;;  %v14937_v31 = vmul.f32 0.03125, %v3374_v21  ;;  %11129 = vrsqrt.f32 %v4173_v29  ;;  %v14948_v27 = vpop.eup %11121 }
 0x378   :  { %3484 = vadd.xlane.f32.xlu1 %v3483_v53  ;;  %v14942_v61 = vmul.f32 %v11116_v44, %v19503_v58  ;;  %v4047_v63 = vmax.f32 %v3983_v48, 0.0  ;;  %v4613_v16 = vmul.f32 %v4549_v45, %v4357_v47  ;;  %v4046_v17 = vmax.f32 %v3982_v10, 0.0  ;;  %v11124_v58 = vpop.eup %11123 }
 0x379   :  { %v3633_v6 = vpop.xlane.xlu1 %3632  ;;  %3481 = vadd.xlane.f32.xlu0 %v3480_v57  ;;  %v3739_v21 = vsel %vm1397_vm3, %v3573_v35, 0.0  ;;  %v4424_v53 = vmul.f32 0.70710677, %v14929_v12  ;;  %v3921_v7 = vmul.f32 %v14931_v4, %v14931_v4  ;;  %v3736_v44 = vsel %vm1397_vm3, %v3572_v46, 0.0 }
 0x37a   :  { %v3857_v9 = vmul.f32 0.03125, %v3633_v6  ;;  %v3630_v41 = vpop.xlane.xlu0 %3629  ;;  %10549 = vmatmul.mubr.msk.f32.gmra.mrb[98].mxu1 %vm1397_vm3, %v4613_v16  ;;  %v3920_v29 = vmul.f32 %v14937_v31, %v14937_v31  ;;  %v4425_v57 = vmul.f32 0.70710677, %v14942_v61  ;;  %v4175_v35 = vadd.f32 1e-05, %v4047_v63 }
 0x37b   :  { %v10521_v3 = vpop.f32.mrb[84].mxu1  ;;  %v3856_v8 = vmul.f32 0.03125, %v3630_v41  ;;  %11131 = verf.f32 %v4424_v53  ;;  %v4359_v6 = vmul.f32 0.5, %v14891_v23  ;;  %v19505_v23 = vsub.f32 %v14464_v15, %v14820_v26 }
 0x37c   :  { %v14954_v47 = vadd.f32 %v14834_v30, %v10521_v3  ;;  %v3271_v48 = vpop.f32.mrb[85].mxu1  ;;  %3740 = vadd.xlane.f32.xlu1 %v3739_v21  ;;  %11133 = vrsqrt.f32 %v4172_v25  ;;  %v3985_v45 = vsub.f32 %v3857_v9, %v3921_v7  ;;  %v11126_v46 = vpop.eup %11125 }
 0x37d   :  { %v14960_v10 = vadd.f32 %v14834_v30, %v3271_v48  ;;  %v3383_v16 = vpop.xlane.xlu1 %3382  ;;  %3737 = vadd.xlane.f32.xlu0 %v3736_v44  ;;  %v3984_v41 = vsub.f32 %v3856_v8, %v3920_v29  ;;  %11135 = verf.f32 %v4425_v57  ;;  %v11128_v53 = vpop.eup %11127  ;;  %v4550_v63 = vadd.f32 1.0, %v11126_v46 }
 0x37e   :  { %19504 = vst [vmem:[#allocation74_spill] sm:$0xff] %v14954_v47  ;;  %v3489_v3 = vsel %vm1397_vm3, %v14954_v47, 0.0  ;;  %v3380_v32 = vpop.xlane.xlu0 %3379  ;;  %v14970_v9 = vmul.f32 0.03125, %v3383_v16  ;;  %v3575_v7 = vmul.f32 %v14954_v47, %v14954_v47  ;;  %v4174_v48 = vadd.f32 1e-05, %v4046_v17 }
 0x37f   :  { %v3486_v21 = vsel %vm1397_vm3, %v14960_v10, 0.0  ;;  %v4551_v44 = vadd.f32 1.0, %v11128_v53  ;;  %v14974_v33 = vmul.f32 0.03125, %v3380_v32  ;;  %v14979_v8 = vmul.f32 %v11124_v58, %v19505_v23 }
 0x380   :  { %3490 = vadd.xlane.f32.xlu1 %v3489_v3  ;;  %11137 = vrsqrt.f32 %v4175_v35  ;;  %v4049_v57 = vmax.f32 %v3985_v45, 0.0  ;;  %v4614_v16 = vmul.f32 %v4550_v63, %v4358_v56  ;;  %v4048_v47 = vmax.f32 %v3984_v41, 0.0 }
 0x381   :  { %v3639_v46 = vpop.xlane.xlu1 %3638  ;;  %3487 = vadd.xlane.f32.xlu0 %v3486_v21  ;;  %v4615_v25 = vmul.f32 %v4551_v44, %v4359_v6  ;;  %v3574_v3 = vmul.f32 %v14960_v10, %v14960_v10  ;;  %v14985_v43 = vpop.eup %11129  ;;  %v3923_v15 = vmul.f32 %v14970_v9, %v14970_v9  ;;  %v3745_v58 = vsel %vm1397_vm3, %v3575_v7, 0.0 }
 0x382   :  { %v3859_v17 = vmul.f32 0.03125, %v3639_v46  ;;  %v3636_v53 = vpop.xlane.xlu0 %3635  ;;  %10551 = vmatprep.mubr.msk.f32.mxu1 %vm1397_vm3, %v4614_v16  ;;  %v3922_v45 = vmul.f32 %v14974_v33, %v14974_v33  ;;  %v4426_v21 = vmul.f32 0.70710677, %v14979_v8  ;;  %v4360_v44 = vmul.f32 0.5, %v14929_v12 }
 0x383   :  { %v10524_v32 = vpop.f32.mrb[86].mxu1  ;;  %v3858_v26 = vmul.f32 0.03125, %v3636_v53  ;;  %10552 = vmatmul.mubr.msk.f32.gmra.mrb[100].mxu1 %vm1397_vm3, %v4615_v25  ;;  %v3742_v41 = vsel %vm1397_vm3, %v3574_v3, 0.0  ;;  %v19508_v25 = vsub.f32 %v14460_v60, %v14812_v37  ;;  %v4177_v53 = vadd.f32 1e-05, %v4049_v57 }
 0x384   :  { %v14991_v56 = vadd.f32 %v14834_v30, %v10524_v32  ;;  %v3281_v35 = vpop.f32.mrb[87].mxu1  ;;  %3746 = vadd.xlane.f32.xlu1 %v3745_v58  ;;  %v3987_v63 = vsub.f32 %v3859_v17, %v3923_v15  ;;  %11139 = verf.f32 %v4426_v21  ;;  %v4176_v60 = vadd.f32 1e-05, %v4048_v47 }
 0x385   :  { %v14998_v6 = vadd.f32 %v14834_v30, %v3281_v35  ;;  %v3389_v23 = vpop.xlane.xlu1 %3388  ;;  %3743 = vadd.xlane.f32.xlu0 %v3742_v41  ;;  %v4299_v16 = vmul.f32 %v14948_v27, %v19508_v25  ;;  %v11132_v46 = vpop.eup %11131  ;;  %v3986_v32 = vsub.f32 %v3858_v26, %v3922_v45  ;;  %11141 = vrsqrt.f32 %v4174_v48 }
 0x386   :  { %19506 = vst [vmem:[#allocation73_spill] sm:$0xff] %v14991_v56  ;;  %v3495_v7 = vsel %vm1397_vm3, %v14991_v56, 0.0  ;;  %v3386_v58 = vpop.xlane.xlu0 %3385  ;;  %v11134_v17 = vpop.eup %11133  ;;  %v4552_v12 = vadd.f32 1.0, %v11132_v46  ;;  %v15011_v15 = vmul.f32 0.03125, %v3389_v23  ;;  %v3577_v35 = vmul.f32 %v14991_v56, %v14991_v56 }
 0x387   :  { %19507 = vst [vmem:[#allocation81_spill] sm:$0xff] %v14998_v6  ;;  %v3492_v3 = vsel %vm1397_vm3, %v14998_v6, 0.0  ;;  %v11136_v41 = vpop.eup %11135  ;;  %v4361_v27 = vmul.f32 0.5, %v14942_v61  ;;  %v4427_v57 = vmul.f32 0.70710677, %v4299_v16  ;;  %v4051_v45 = vmax.f32 %v3987_v63, 0.0 }
 0x388   :  { %3496 = vadd.xlane.f32.xlu1 %v3495_v7  ;;  %v4616_v48 = vmul.f32 %v4552_v12, %v4360_v44  ;;  %v4553_v21 = vadd.f32 1.0, %v11136_v41  ;;  %11143 = vrsqrt.f32 %v4177_v53  ;;  %v4050_v25 = vmax.f32 %v3986_v32, 0.0 }
 0x389   :  { %v3645_v23 = vpop.xlane.xlu1 %3644  ;;  %3493 = vadd.xlane.f32.xlu0 %v3492_v3  ;;  %v15020_v46 = vmul.f32 0.03125, %v3386_v58  ;;  %v3925_v7 = vmul.f32 %v15011_v15, %v15011_v15  ;;  %v3751_v44 = vsel %vm1397_vm3, %v3577_v35, 0.0  ;;  %11145 = verf.f32 %v4427_v57 }
 0x38a   :  { %v3861_v47 = vmul.f32 0.03125, %v3645_v23  ;;  %v3642_v29 = vpop.xlane.xlu0 %3641  ;;  %v15022_v37 = vpop.eup %11137  ;;  %10554 = vmatprep.mubr.msk.f32.mxu1 %vm1397_vm3, %v4616_v48  ;;  %v4617_v61 = vmul.f32 %v4553_v21, %v4361_v27  ;;  %v3576_v3 = vmul.f32 %v14998_v6, %v14998_v6  ;;  %v4179_v12 = vadd.f32 1e-05, %v4051_v45 }
 0x38b   :  { %v10527_v56 = vpop.f32.mrb[88].mxu1  ;;  %v3860_v32 = vmul.f32 0.03125, %v3642_v29  ;;  %v19511_v35 = vsub.f32 %v14481_v28, %v14861_v59  ;;  %11147 = vrsqrt.f32 %v4176_v60  ;;  %v3924_v29 = vmul.f32 %v15020_v46, %v15020_v46 }
 0x38c   :  { %v15028_v63 = vadd.f32 %v14834_v30, %v10527_v56  ;;  %v3291_v53 = vpop.f32.mrb[89].mxu1  ;;  %3752 = vadd.xlane.f32.xlu1 %v3751_v44  ;;  %10555 = vmatmul.mubr.msk.f32.gmra.mrb[102].mxu1 %vm1397_vm3, %v4617_v61  ;;  %v3989_v41 = vsub.f32 %v3861_v47, %v3925_v7  ;;  %v3748_v48 = vsel %vm1397_vm3, %v3576_v3, 0.0  ;;  %v19512_v45 = vsub.f32 %v14477_v13, %v14855_v0 }
 0x38d   :  { %v15032_v58 = vadd.f32 %v14834_v30, %v3291_v53  ;;  %v3395_v27 = vpop.xlane.xlu1 %3394  ;;  %v4300_v57 = vmul.f32 %v11134_v17, %v19511_v35  ;;  %v4178_v47 = vadd.f32 1e-05, %v4050_v25  ;;  %v4362_v61 = vmul.f32 0.5, %v14979_v8  ;;  %3749 = vadd.xlane.f32.xlu0 %v3748_v48 }
 0x38e   :  { %19509 = vst [vmem:[#allocation80_spill] sm:$0xff] %v15028_v63  ;;  %v3501_v56 = vsel %vm1397_vm3, %v15028_v63, 0.0  ;;  %v3392_v21 = vpop.xlane.xlu0 %3391  ;;  %v4301_v23 = vmul.f32 %v14985_v43, %v19512_v45  ;;  %v4363_v7 = vmul.f32 0.5, %v4299_v16  ;;  %v15050_v44 = vmul.f32 0.03125, %v3395_v27  ;;  %v11140_v28 = vpop.eup %11139 }
 0x38f   :  { %19510 = vst [vmem:[#allocation86_spill] sm:$0xff] %v15032_v58  ;;  %v3988_v17 = vsub.f32 %v3860_v32, %v3924_v29  ;;  %v3498_v60 = vsel %vm1397_vm3, %v15032_v58, 0.0  ;;  %v4428_v53 = vmul.f32 0.70710677, %v4300_v57  ;;  %v11142_v13 = vpop.eup %11141  ;;  %11149 = vrsqrt.f32 %v4179_v12 }
 0x390   :  { %3502 = vadd.xlane.f32.xlu1 %v3501_v56  ;;  %v4053_v0 = vmax.f32 %v3989_v41, 0.0  ;;  %v4554_v8 = vadd.f32 1.0, %v11140_v28  ;;  %v15058_v25 = vmul.f32 0.03125, %v3392_v21  ;;  %v4429_v27 = vmul.f32 0.70710677, %v4301_v23 }
 0x391   :  { %v3651_v16 = vpop.xlane.xlu1 %3650  ;;  %v3579_v32 = vmul.f32 %v15028_v63, %v15028_v63  ;;  %11151 = vrsqrt.f32 %v4178_v47  ;;  %v3927_v12 = vmul.f32 %v15050_v44, %v15050_v44  ;;  %3499 = vadd.xlane.f32.xlu0 %v3498_v60  ;;  %v4052_v21 = vmax.f32 %v3988_v17, 0.0 }
 0x392   :  { %v3863_v3 = vmul.f32 0.03125, %v3651_v16  ;;  %v3648_v35 = vpop.xlane.xlu0 %3647  ;;  %v4618_v56 = vmul.f32 %v4554_v8, %v4362_v61  ;;  %v15067_v45 = vpop.eup %11143  ;;  %11153 = verf.f32 %v4428_v53  ;;  %v3578_v60 = vmul.f32 %v15032_v58, %v15032_v58 }
 0x393   :  { %v10530_v48 = vpop.f32.mrb[90].mxu1  ;;  %v3862_v28 = vmul.f32 0.03125, %v3648_v35  ;;  %v3757_v16 = vsel %vm1397_vm3, %v3579_v32, 0.0  ;;  %11155 = verf.f32 %v4429_v27  ;;  %v11146_v8 = vpop.eup %11145  ;;  %v3926_v17 = vmul.f32 %v15058_v25, %v15058_v25 }
 0x394   :  { %v15065_v29 = vadd.f32 %v14834_v30, %v10530_v48  ;;  %v3301_v41 = vpop.f32.mrb[91].mxu1  ;;  %10557 = vmatprep.mubr.msk.f32.mxu1 %vm1397_vm3, %v4618_v56  ;;  %v3991_v59 = vsub.f32 %v3863_v3, %v3927_v12  ;;  %3758 = vadd.xlane.f32.xlu1 %v3757_v16  ;;  %v4181_v48 = vadd.f32 1e-05, %v4053_v0  ;;  %v19515_v3 = vsub.f32 %v14497_v2, %v14900_v40 }
 0x395   :  { %v15072_v47 = vadd.f32 %v14834_v30, %v3301_v41  ;;  %v3401_v61 = vpop.xlane.xlu1 %3400  ;;  %v4555_v32 = vadd.f32 1.0, %v11146_v8  ;;  %v4364_v56 = vmul.f32 0.5, %v4300_v57  ;;  %v3754_v41 = vsel %vm1397_vm3, %v3578_v60, 0.0  ;;  %v15088_v16 = vpop.eup %11147 }
 0x396   :  { %19513 = vst [vmem:[#allocation85_spill] sm:$0xff] %v15065_v29  ;;  %v3398_v53 = vpop.xlane.xlu0 %3397  ;;  %v3507_v35 = vsel %vm1397_vm3, %v15065_v29, 0.0  ;;  %v15083_v27 = vmul.f32 %v11142_v13, %v19515_v3  ;;  %v15085_v12 = vmul.f32 0.03125, %v3401_v61  ;;  %v4365_v43 = vmul.f32 0.5, %v4301_v23  ;;  %3755 = vadd.xlane.f32.xlu0 %v3754_v41 }
 0x397   :  { %19514 = vst [vmem:[#allocation89_spill] sm:$0xff] %v15072_v47  ;;  %v3990_v26 = vsub.f32 %v3862_v28, %v3926_v17  ;;  %v15092_v58 = vmul.f32 0.03125, %v3398_v53  ;;  %v4619_v2 = vmul.f32 %v4555_v32, %v4363_v7  ;;  %v4180_v40 = vadd.f32 1e-05, %v4052_v21 }
 0x398   :  { %v4055_v13 = vmax.f32 %v3991_v59, 0.0  ;;  %3508 = vadd.xlane.f32.xlu1 %v3507_v35  ;;  %v3504_v61 = vsel %vm1397_vm3, %v15072_v47, 0.0  ;;  %11157 = vrsqrt.f32 %v4181_v48  ;;  %v4430_v3 = vmul.f32 0.70710677, %v15083_v27 }
 0x399   :  { %v10533_v63 = vpop.f32.mrb[92].mxu1  ;;  %v3657_v57 = vpop.xlane.xlu1 %3656  ;;  %v19516_v23 = vsub.f32 %v14493_v19, %v14893_v5  ;;  %10558 = vmatmul.mubr.msk.f32.gmra.mrb[104].mxu1 %vm1397_vm3, %v4619_v2  ;;  %v3929_v59 = vmul.f32 %v15085_v12, %v15085_v12  ;;  %v3581_v53 = vmul.f32 %v15065_v29, %v15065_v29  ;;  %v4054_v35 = vmax.f32 %v3990_v26, 0.0 }
 0x39a   :  { %v3311_v60 = vpop.f32.mrb[93].mxu1  ;;  %v3865_v8 = vmul.f32 0.03125, %v3657_v57  ;;  %v3654_v17 = vpop.xlane.xlu0 %3653  ;;  %v15109_v48 = vadd.f32 %v14834_v30, %v10533_v63  ;;  %v3928_v19 = vmul.f32 %v15092_v58, %v15092_v58  ;;  %3505 = vadd.xlane.f32.xlu0 %v3504_v61  ;;  %11159 = verf.f32 %v4430_v3 }
 0x39b   :  { %v15101_v28 = vmul.f32 %v15022_v37, %v19516_v23  ;;  %v15103_v7 = vpop.eup %11149  ;;  %v3864_v21 = vmul.f32 0.03125, %v3654_v17  ;;  %v4183_v32 = vadd.f32 1e-05, %v4055_v13  ;;  %v3763_v2 = vsel %vm1397_vm3, %v3581_v53, 0.0 }
 0x39c   :  { %v15116_v37 = vpop.eup %11151  ;;  %v3993_v41 = vsub.f32 %v3865_v8, %v3929_v59  ;;  %v3580_v63 = vmul.f32 %v15072_v47, %v15072_v47  ;;  %3764 = vadd.xlane.f32.xlu1 %v3763_v2  ;;  %v15124_v61 = vadd.f32 %v14834_v30, %v3311_v60  ;;  %v3513_v53 = vsel %vm1397_vm3, %v15109_v48, 0.0 }
 0x39d   :  { %v4431_v5 = vmul.f32 0.70710677, %v15101_v28  ;;  %v3407_v57 = vpop.xlane.xlu1 %3406  ;;  %v11154_v23 = vpop.eup %11153  ;;  %v3992_v17 = vsub.f32 %v3864_v21, %v3928_v19  ;;  %v4182_v29 = vadd.f32 1e-05, %v4054_v35  ;;  %v4121_v21 = vsub.f32 %v14573_v22, %v15085_v12 }
 0x39e   :  { %v3404_v3 = vpop.xlane.xlu0 %3403  ;;  %v11156_v0 = vpop.eup %11155  ;;  %v4556_v13 = vadd.f32 1.0, %v11154_v23  ;;  %v15126_v8 = vmul.f32 0.03125, %v3407_v57  ;;  %v3760_v59 = vsel %vm1397_vm3, %v3580_v63, 0.0 }
 0x39f   :  { %11161 = verf.f32 %v4431_v5  ;;  %v4557_v47 = vadd.f32 1.0, %v11156_v0  ;;  %3761 = vadd.xlane.f32.xlu0 %v3760_v59  ;;  %v4057_v5 = vmax.f32 %v3993_v41, 0.0  ;;  %v15133_v2 = vmul.f32 0.03125, %v3404_v3 }
 0x3a0   :  { %11163 = vrsqrt.f32 %v4180_v40  ;;  %v4620_v60 = vmul.f32 %v4556_v13, %v4364_v56  ;;  %v4056_v63 = vmax.f32 %v3992_v17, 0.0  ;;  %3514 = vadd.xlane.f32.xlu1 %v3513_v53  ;;  %v3510_v0 = vsel %vm1397_vm3, %v15124_v61, 0.0 }
 0x3a1   :  { %v10536_v19 = vpop.f32.mrb[94].mxu1  ;;  %11165 = vrsqrt.f32 %v4183_v32  ;;  %v3663_v57 = vpop.xlane.xlu1 %3662  ;;  %v4621_v26 = vmul.f32 %v4557_v47, %v4365_v43  ;;  %v3931_v35 = vmul.f32 %v15126_v8, %v15126_v8  ;;  %v19517_v56 = vsub.f32 %v14513_v34, %v14937_v31 }
 0x3a2   :  { %v3321_v23 = vpop.f32.mrb[95].mxu1  ;;  %v3867_v6 = vmul.f32 0.03125, %v3663_v57  ;;  %v3660_v40 = vpop.xlane.xlu0 %3659  ;;  %10560 = vmatprep.mubr.msk.f32.mxu1 %vm1397_vm3, %v4620_v60  ;;  %v19518_v43 = vsub.f32 %v14509_v50, %v14931_v4  ;;  %11167 = vrsqrt.f32 %v4182_v29  ;;  %v4120_v3 = vsub.f32 %v14577_v38, %v15092_v58 }
 0x3a3   :  { %v15144_v32 = vmul.f32 %v15088_v16, %v19517_v56  ;;  %v3866_v41 = vmul.f32 0.03125, %v3660_v40  ;;  %v15152_v17 = vpop.eup %11157  ;;  %10561 = vmatmul.mubr.msk.f32.gmra.mrb[106].mxu1 %vm1397_vm3, %v4621_v26  ;;  %v4366_v34 = vmul.f32 0.5, %v15083_v27  ;;  %3511 = vadd.xlane.f32.xlu0 %v3510_v0  ;;  %v3583_v31 = vmul.f32 %v15109_v48, %v15109_v48 }
 0x3a4   :  { %v15150_v47 = vmul.f32 %v15067_v45, %v19518_v43  ;;  %v3930_v50 = vmul.f32 %v15133_v2, %v15133_v2  ;;  %v3995_v4 = vsub.f32 %v3867_v6, %v3931_v35  ;;  %v11160_v26 = vpop.eup %11159  ;;  %v4185_v29 = vadd.f32 1e-05, %v4057_v5 }
 0x3a5   :  { %v4432_v45 = vmul.f32 0.70710677, %v15144_v32  ;;  %v3413_v13 = vpop.xlane.xlu1 %3412  ;;  %v4184_v59 = vadd.f32 1e-05, %v4056_v63  ;;  %v15165_v53 = vadd.f32 %v14834_v30, %v10536_v19  ;;  %v3769_v27 = vsel %vm1397_vm3, %v3583_v31, 0.0 }
 0x3a6   :  { %v4433_v16 = vmul.f32 0.70710677, %v15150_v47  ;;  %v3410_v60 = vpop.xlane.xlu0 %3409  ;;  %v4558_v57 = vadd.f32 1.0, %v11160_v26  ;;  %v3994_v0 = vsub.f32 %v3866_v41, %v3930_v50  ;;  %3770 = vadd.xlane.f32.xlu1 %v3769_v27  ;;  %v3582_v6 = vmul.f32 %v15124_v61, %v15124_v61 }
 0x3a7   :  { %11169 = verf.f32 %v4432_v45  ;;  %v4367_v35 = vmul.f32 0.5, %v15101_v28  ;;  %v15174_v19 = vadd.f32 %v14834_v30, %v3321_v23  ;;  %v4059_v43 = vmax.f32 %v3995_v4, 0.0 }
 0x3a8   :  { %11171 = verf.f32 %v4433_v16  ;;  %v4622_v63 = vmul.f32 %v4558_v57, %v4366_v34  ;;  %v15176_v31 = vmul.f32 0.03125, %v3410_v60  ;;  %v4122_v45 = vsub.f32 %v14593_v42, %v15133_v2  ;;  %v8218_v2 = vld [vmem:[%s19188_s9 + $0x1f0] sm:$0xff] }
 0x3a9   :  { %v11162_v40 = vpop.eup %11161  ;;  %v3669_v41 = vpop.xlane.xlu1 %3668  ;;  %11173 = vrsqrt.f32 %v4185_v29  ;;  %v15180_v26 = vmul.f32 0.03125, %v3413_v13  ;;  %v3766_v28 = vsel %vm1397_vm3, %v3582_v6, 0.0  ;;  %v4058_v23 = vmax.f32 %v3994_v0, 0.0 }
 0x3aa   :  { %v4559_v56 = vadd.f32 1.0, %v11162_v40  ;;  %v11164_v50 = vpop.eup %11163  ;;  %v3666_v27 = vpop.xlane.xlu0 %3665  ;;  %10563 = vmatprep.mubr.msk.f32.mxu1 %vm1397_vm3, %v4622_v63  ;;  %11175 = vrsqrt.f32 %v4184_v59  ;;  %3767 = vadd.xlane.f32.xlu0 %v3766_v28  ;;  %v3519_v34 = vsel %vm1397_vm3, %v15165_v53, 0.0  ;;  %v3869_v4 = vmul.f32 0.03125, %v3669_v41 }
 0x3ab   :  { %v15183_v16 = vpop.eup %11165  ;;  %3520 = vadd.xlane.f32.xlu1 %v3519_v34  ;;  %v3516_v13 = vsel %vm1397_vm3, %v15174_v19, 0.0  ;;  %v19519_v29 = vsub.f32 %v14529_v18, %v14974_v33  ;;  %v19520_v57 = vsub.f32 %v14525_v55, %v14970_v9  ;;  %v4187_v0 = vadd.f32 1e-05, %v4059_v43 }
 0x3ac   :  { %v4623_v30 = vmul.f32 %v4559_v56, %v4367_v35  ;;  %v3932_v6 = vmul.f32 %v15176_v31, %v15176_v31  ;;  %v3868_v40 = vmul.f32 0.03125, %v3666_v27  ;;  %v3585_v35 = vmul.f32 %v15165_v53, %v15165_v53  ;;  %v11168_v33 = vpop.eup %11167 }
 0x3ad   :  { %v15194_v60 = vmul.f32 %v15116_v37, %v19519_v29  ;;  %v15200_v59 = vmul.f32 %v15103_v7, %v19520_v57  ;;  %v3419_v18 = vpop.xlane.xlu1 %3418  ;;  %v3933_v37 = vmul.f32 %v15180_v26, %v15180_v26  ;;  %v3584_v7 = vmul.f32 %v15174_v19, %v15174_v19 }
 0x3ae   :  { %10564 = vmatmul.mubr.msk.f32.gmra.mrb[108].mxu1 %vm1397_vm3, %v4623_v30  ;;  %v3416_v63 = vpop.xlane.xlu0 %3415  ;;  %v4186_v56 = vadd.f32 1e-05, %v4058_v23  ;;  %3517 = vadd.xlane.f32.xlu0 %v3516_v13  ;;  %v3996_v43 = vsub.f32 %v3868_v40, %v3932_v6  ;;  %v3775_v41 = vsel %vm1397_vm3, %v3585_v35, 0.0  ;;  %v15214_v28 = vmul.f32 0.03125, %v3419_v18 }
 0x3af   :  { %v4434_v55 = vmul.f32 0.70710677, %v15194_v60  ;;  %v4435_v9 = vmul.f32 0.70710677, %v15200_v59  ;;  %v4368_v27 = vmul.f32 0.5, %v15144_v32  ;;  %v3997_v30 = vsub.f32 %v3869_v4, %v3933_v37  ;;  %3776 = vadd.xlane.f32.xlu1 %v3775_v41 }
 0x3b0   :  { %v19521_v34 = vsub.f32 %v14545_v62, %v15020_v46  ;;  %v4369_v5 = vmul.f32 0.5, %v15150_v47  ;;  %v4125_v23 = vsub.f32 %v14605_v1, %v15180_v26  ;;  %v15225_v13 = vmul.f32 0.03125, %v3416_v63 }
 0x3b1   :  { %11177 = verf.f32 %v4434_v55  ;;  %v11170_v57 = vpop.eup %11169  ;;  %v3675_v6 = vpop.xlane.xlu1 %3674  ;;  %v4060_v4 = vmax.f32 %v3996_v43, 0.0  ;;  %v3772_v35 = vsel %vm1397_vm3, %v3584_v7, 0.0  ;;  %v3935_v46 = vmul.f32 %v15214_v28, %v15214_v28 }
 0x3b2   :  { %v15220_v29 = vmul.f32 %v11164_v50, %v19521_v34  ;;  %11179 = verf.f32 %v4435_v9  ;;  %v11172_v40 = vpop.eup %11171  ;;  %v4560_v32 = vadd.f32 1.0, %v11170_v57  ;;  %v3672_v18 = vpop.xlane.xlu0 %3671  ;;  %3773 = vadd.xlane.f32.xlu0 %v3772_v35  ;;  %v3871_v47 = vmul.f32 0.03125, %v3675_v6 }
 0x3b3   :  { %11181 = vrsqrt.f32 %v4187_v0  ;;  %v4561_v62 = vadd.f32 1.0, %v11172_v40  ;;  %v11174_v50 = vpop.eup %11173  ;;  %v4061_v55 = vmax.f32 %v3997_v30, 0.0  ;;  %v19522_v0 = vsub.f32 %v14541_v39, %v15011_v15 }
 0x3b4   :  { %11183 = vrsqrt.f32 %v4186_v56  ;;  %v4624_v37 = vmul.f32 %v4560_v32, %v4368_v27  ;;  %v4436_v9 = vmul.f32 0.70710677, %v15220_v29  ;;  %v11176_v7 = vpop.eup %11175  ;;  %v3934_v56 = vmul.f32 %v15225_v13, %v15225_v13 }
 0x3b5   :  { %v15235_v63 = vmul.f32 %v15152_v17, %v19522_v0  ;;  %v4625_v43 = vmul.f32 %v4561_v62, %v4369_v5  ;;  %v3999_v41 = vsub.f32 %v3871_v47, %v3935_v46  ;;  %v3870_v34 = vmul.f32 0.03125, %v3672_v18  ;;  %v3425_v57 = vpop.xlane.xlu1 %3424 }
 0x3b6   :  { %10566 = vmatprep.mubr.msk.f32.mxu1 %vm1397_vm3, %v4624_v37  ;;  %v4188_v27 = vadd.f32 1e-05, %v4060_v4  ;;  %11185 = verf.f32 %v4436_v9  ;;  %v15241_v6 = vmul.f32 0.03125, %v3425_v57  ;;  %v3422_v39 = vpop.xlane.xlu0 %3421  ;;  %v19523_v40 = vsub.f32 %v14561_v54, %v15058_v25 }
 0x3b7   :  { %v4437_v30 = vmul.f32 0.70710677, %v15235_v63  ;;  %10567 = vmatmul.mubr.msk.f32.gmra.mrb[110].mxu1 %vm1397_vm3, %v4625_v43  ;;  %v4063_v15 = vmax.f32 %v3999_v41, 0.0  ;;  %v3998_v17 = vsub.f32 %v3870_v34, %v3934_v56  ;;  %v15244_v5 = vmul.f32 0.03125, %v3422_v39 }
 0x3b8   :  { %v15249_v32 = vmul.f32 %v11168_v33, %v19523_v40  ;;  %v4124_v4 = vsub.f32 %v14609_v20, %v15176_v31  ;;  %v4370_v35 = vmul.f32 0.5, %v15194_v60  ;;  %v19524_v18 = vsub.f32 %v14557_v52, %v15050_v44 }
 0x3b9   :  { %11187 = verf.f32 %v4437_v30  ;;  %v4189_v46 = vadd.f32 1e-05, %v4061_v55  ;;  %v4371_v47 = vmul.f32 0.5, %v15200_v59  ;;  %v4127_v54 = vsub.f32 %v14621_v36, %v15214_v28  ;;  %v3681_v33 = vpop.xlane.xlu1 %3680 }
 0x3ba   :  { %v15258_v62 = vmul.f32 %v15183_v16, %v19524_v18  ;;  %v4062_v25 = vmax.f32 %v3998_v17, 0.0  ;;  %11189 = vrsqrt.f32 %v4188_v27  ;;  %v3937_v60 = vmul.f32 %v15241_v6, %v15241_v6  ;;  %v3678_v52 = vpop.xlane.xlu0 %3677 }
 0x3bb   :  { %v11178_v37 = vpop.eup %11177  ;;  %v3873_v9 = vmul.f32 0.03125, %v3681_v33  ;;  %v4438_v0 = vmul.f32 0.70710677, %v15249_v32  ;;  %v4191_v43 = vadd.f32 1e-05, %v4063_v15  ;;  %v3936_v59 = vmul.f32 %v15244_v5, %v15244_v5 }
 0x3bc   :  { %v11180_v44 = vpop.eup %11179  ;;  %v4562_v16 = vadd.f32 1.0, %v11178_v37  ;;  %v4439_v55 = vmul.f32 0.70710677, %v15258_v62  ;;  %v4190_v34 = vadd.f32 1e-05, %v4062_v25  ;;  %v3872_v57 = vmul.f32 0.03125, %v3678_v52 }
 0x3bd   :  { %v11182_v56 = vpop.eup %11181  ;;  %v4563_v41 = vadd.f32 1.0, %v11180_v44  ;;  %11191 = verf.f32 %v4438_v0  ;;  %v4001_v39 = vsub.f32 %v3873_v9, %v3937_v60  ;;  %v3431_v17 = vpop.xlane.xlu1 %3430  ;;  %v15272_v40 = vmul.f32 %v11176_v7, %v4120_v3 }
 0x3be   :  { %v11184_v27 = vpop.eup %11183  ;;  %v4626_v30 = vmul.f32 %v4562_v16, %v4370_v35  ;;  %v15277_v15 = vmul.f32 %v11174_v50, %v4121_v21  ;;  %v4126_v25 = vsub.f32 %v14625_v24, %v15225_v13  ;;  %11193 = verf.f32 %v4439_v55  ;;  %v3428_v37 = vpop.xlane.xlu0 %3427  ;;  %v8219_v35 = vld [vmem:[%s19188_s9 + $0x1f8] sm:$0xff] }
 0x3bf   :  { %v4627_v18 = vmul.f32 %v4563_v41, %v4371_v47  ;;  %v4000_v33 = vsub.f32 %v3872_v57, %v3936_v59  ;;  %11195 = vrsqrt.f32 %v4189_v46  ;;  %v15285_v38 = vmul.f32 0.03125, %v3431_v17 }
 0x3c0   :  { %10569 = vmatprep.mubr.msk.f32.mxu1 %vm1397_vm3, %v4626_v30  ;;  %v15287_v58 = vmul.f32 0.03125, %v3428_v37  ;;  %v4440_v22 = vmul.f32 0.70710677, %v15272_v40  ;;  %v11186_v12 = vpop.eup %11185  ;;  %11197 = vrsqrt.f32 %v4191_v43  ;;  %v4372_v21 = vmul.f32 0.5, %v15220_v29  ;;  %8410 = vrot.lane.b32.xlu1 %v8219_v35, %s11870_s24 }
 0x3c1   :  { %10570 = vmatmul.mubr.msk.f32.gmra.mrb[112].mxu1 %vm1397_vm3, %v4627_v18  ;;  %v4373_v3 = vmul.f32 0.5, %v15235_v63  ;;  %v4064_v50 = vmax.f32 %v4000_v33, 0.0  ;;  %v4564_v7 = vadd.f32 1.0, %v11186_v12  ;;  %11199 = vrsqrt.f32 %v4190_v34  ;;  %v3687_v47 = vpop.xlane.xlu1 %3686 }
 0x3c2   :  { %v4065_v46 = vmax.f32 %v4001_v39, 0.0  ;;  %v4441_v60 = vmul.f32 0.70710677, %v15277_v15  ;;  %v3939_v52 = vmul.f32 %v15285_v38, %v15285_v38  ;;  %v3938_v44 = vmul.f32 %v15287_v58, %v15287_v58  ;;  %v3684_v16 = vpop.xlane.xlu0 %3683 }
 0x3c3   :  { %v11188_v9 = vpop.eup %11187  ;;  %v4192_v0 = vadd.f32 1e-05, %v4064_v50  ;;  %v3875_v29 = vmul.f32 0.03125, %v3687_v47  ;;  %v4628_v63 = vmul.f32 %v4564_v7, %v4372_v21  ;;  %11201 = verf.f32 %v4440_v22 }
 0x3c4   :  { %v4565_v43 = vadd.f32 1.0, %v11188_v9  ;;  %v3874_v59 = vmul.f32 0.03125, %v3684_v16  ;;  %v11190_v55 = vpop.eup %11189  ;;  %v4129_v41 = vsub.f32 %v14637_v11, %v15241_v6  ;;  %v4374_v34 = vmul.f32 0.5, %v15249_v32 }
 0x3c5   :  { %v4003_v57 = vsub.f32 %v3875_v29, %v3939_v52  ;;  %v15305_v30 = vmul.f32 %v11184_v27, %v4122_v45  ;;  %10572 = vmatprep.mubr.msk.f32.mxu1 %vm1397_vm3, %v4628_v63  ;;  %v4193_v17 = vadd.f32 1e-05, %v4065_v46  ;;  %11203 = verf.f32 %v4441_v60  ;;  %v3437_v33 = vpop.xlane.xlu1 %3436 }
 0x3c6   :  { %v4629_v39 = vmul.f32 %v4565_v43, %v4373_v3  ;;  %v4002_v18 = vsub.f32 %v3874_v59, %v3938_v44  ;;  %11205 = vrsqrt.f32 %v4192_v0  ;;  %v15308_v35 = vmul.f32 0.03125, %v3437_v33  ;;  %v3434_v22 = vpop.xlane.xlu0 %3433 }
 0x3c7   :  { %v11192_v37 = vpop.eup %11191  ;;  %v4442_v32 = vmul.f32 0.70710677, %v15305_v30  ;;  %v19525_v12 = vsub.f32 %v14589_v49, %v15126_v8  ;;  %v4067_v27 = vmax.f32 %v4003_v57, 0.0  ;;  %v15320_v3 = vmul.f32 0.03125, %v3434_v22 }
 0x3c8   :  { %10573 = vmatmul.mubr.msk.f32.gmra.mrb[114].mxu1 %vm1397_vm3, %v4629_v39  ;;  %v4566_v45 = vadd.f32 1.0, %v11192_v37  ;;  %v4066_v21 = vmax.f32 %v4002_v18, 0.0  ;;  %v11194_v50 = vpop.eup %11193  ;;  %v4128_v7 = vsub.f32 %v14641_v14, %v15244_v5  ;;  %v4375_v46 = vmul.f32 0.5, %v15258_v62  ;;  %8408 = vrot.lane.b32.xlu0 %v8218_v2, %s11870_s24 }
 0x3c9   :  { %v15314_v42 = vmul.f32 %v11182_v56, %v19525_v12  ;;  %11207 = verf.f32 %v4442_v32  ;;  %v15328_v49 = vmul.f32 %v11190_v55, %v4124_v4  ;;  %v11196_v8 = vpop.eup %11195  ;;  %v4567_v47 = vadd.f32 1.0, %v11194_v50  ;;  %v3693_v9 = vpop.xlane.xlu1 %3692  ;;  %v19526_v50 = vld [vmem:[#allocation70_spill] sm:$0xff] }
 0x3ca   :  { %11209 = vrsqrt.f32 %v4193_v17  ;;  %v4630_v56 = vmul.f32 %v4566_v45, %v4374_v34  ;;  %v4194_v60 = vadd.f32 1e-05, %v4066_v21  ;;  %v11198_v0 = vpop.eup %11197  ;;  %v4376_v52 = vmul.f32 0.5, %v15272_v40  ;;  %v3690_v20 = vpop.xlane.xlu0 %3689 }
 0x3cb   :  { %v3941_v62 = vmul.f32 %v15308_v35, %v15308_v35  ;;  %v3877_v44 = vmul.f32 0.03125, %v3693_v9  ;;  %v4443_v29 = vmul.f32 0.70710677, %v15314_v42  ;;  %v11200_v31 = vpop.eup %11199  ;;  %v4631_v4 = vmul.f32 %v4567_v47, %v4375_v46 }
 0x3cc   :  { %10575 = vmatprep.mubr.msk.f32.mxu1 %vm1397_vm3, %v4630_v56  ;;  %v4195_v16 = vadd.f32 1e-05, %v4067_v27  ;;  %v3940_v63 = vmul.f32 %v15320_v3, %v15320_v3  ;;  %v3876_v43 = vmul.f32 0.03125, %v3690_v20  ;;  %v4444_v40 = vmul.f32 0.70710677, %v15328_v49 }
 0x3cd   :  { %v4005_v59 = vsub.f32 %v3877_v44, %v3941_v62  ;;  %11211 = verf.f32 %v4443_v29  ;;  %v15342_v55 = vmul.f32 %v11196_v8, %v4125_v23  ;;  %v11202_v34 = vpop.eup %11201  ;;  %10576 = vmatmul.mubr.msk.f32.gmra.mrb[116].mxu1 %vm1397_vm3, %v4631_v4  ;;  %v4131_v57 = vsub.f32 %v14653_v51, %v15285_v38  ;;  %v3443_v18 = vpop.xlane.xlu1 %3442 }
 0x3ce   :  { %v4377_v39 = vmul.f32 0.5, %v15277_v15  ;;  %11213 = vrsqrt.f32 %v4194_v60  ;;  %v4004_v17 = vsub.f32 %v3876_v43, %v3940_v63  ;;  %v4568_v33 = vadd.f32 1.0, %v11202_v34  ;;  %v3440_v32 = vpop.xlane.xlu0 %3439 }
 0x3cf   :  { %v4069_v37 = vmax.f32 %v4005_v59, 0.0  ;;  %v15348_v22 = vmul.f32 0.03125, %v3443_v18  ;;  %11215 = verf.f32 %v4444_v40  ;;  %v11204_v1 = vpop.eup %11203  ;;  %v15350_v23 = vmul.f32 0.03125, %v3440_v32  ;;  %v19528_v18 = vld [vmem:[#allocation30_spill] sm:$0xff] }
 0x3d0   :  { %11217 = vrsqrt.f32 %v4195_v16  ;;  %v4068_v26 = vmax.f32 %v4004_v17, 0.0  ;;  %v15355_v12 = vmul.f32 %v11200_v31, %v4126_v25  ;;  %v11206_v15 = vpop.eup %11205  ;;  %v4632_v2 = vmul.f32 %v4568_v33, %v4376_v52 }
 0x3d1   :  { %v4569_v45 = vadd.f32 1.0, %v11204_v1  ;;  %v4445_v27 = vmul.f32 0.70710677, %v15342_v55  ;;  %v15361_v21 = vmul.f32 %v11198_v0, %v4127_v54  ;;  %v4130_v46 = vsub.f32 %v19526_v50, %v15287_v58  ;;  %v3699_v24 = vpop.xlane.xlu1 %3698 }
 0x3d2   :  { %v4197_v8 = vadd.f32 1e-05, %v4069_v37  ;;  %v4378_v56 = vmul.f32 0.5, %v15305_v30  ;;  %v4196_v47 = vadd.f32 1e-05, %v4068_v26  ;;  %10578 = vmatprep.mubr.msk.f32.mxu1 %vm1397_vm3, %v4632_v2  ;;  %v3943_v60 = vmul.f32 %v15348_v22, %v15348_v22  ;;  %v3696_v54 = vpop.xlane.xlu0 %3695 }
 0x3d3   :  { %v11208_v13 = vpop.eup %11207  ;;  %v4633_v25 = vmul.f32 %v4569_v45, %v4377_v39  ;;  %v3942_v36 = vmul.f32 %v15350_v23, %v15350_v23  ;;  %v3879_v28 = vmul.f32 0.03125, %v3699_v24  ;;  %v3878_v58 = vmul.f32 0.03125, %v3696_v54 }
 0x3d4   :  { %v11210_v9 = vpop.eup %11209  ;;  %v4570_v0 = vadd.f32 1.0, %v11208_v13  ;;  %11219 = vrsqrt.f32 %v4196_v47  ;;  %v4446_v30 = vmul.f32 0.70710677, %v15355_v12  ;;  %v4379_v52 = vmul.f32 0.5, %v15314_v42 }
 0x3d5   :  { %10579 = vmatmul.mubr.msk.f32.gmra.mrb[118].mxu1 %vm1397_vm3, %v4633_v25  ;;  %v4007_v62 = vsub.f32 %v3879_v28, %v3943_v60  ;;  %11221 = verf.f32 %v4445_v27  ;;  %v4447_v44 = vmul.f32 0.70710677, %v15361_v21  ;;  %v4006_v20 = vsub.f32 %v3878_v58, %v3942_v36  ;;  %v3449_v31 = vpop.xlane.xlu1 %3448  ;;  %v19529_v60 = vld [vmem:[#allocation76_spill] sm:$0xff] }
 0x3d6   :  { %v4634_v29 = vmul.f32 %v4570_v0, %v4378_v56  ;;  %11223 = verf.f32 %v4446_v30  ;;  %v15378_v4 = vmul.f32 %v11206_v15, %v4128_v7  ;;  %v15380_v43 = vmul.f32 0.03125, %v3449_v31  ;;  %v3446_v59 = vpop.xlane.xlu0 %3445  ;;  %v19527_v7 = vld [vmem:[#allocation31_spill] sm:$0xff] }
 0x3d7   :  { %v11212_v16 = vpop.eup %11211  ;;  %v4071_v63 = vmax.f32 %v4007_v62, 0.0  ;;  %11225 = verf.f32 %v4447_v44  ;;  %v15385_v42 = vmul.f32 %v11210_v9, %v4129_v41  ;;  %v4070_v39 = vmax.f32 %v4006_v20, 0.0 }
 0x3d8   :  { %v11214_v40 = vpop.eup %11213  ;;  %11227 = vrsqrt.f32 %v4197_v8  ;;  %10581 = vmatprep.mubr.msk.f32.mxu1 %vm1397_vm3, %v4634_v29  ;;  %v4571_v34 = vadd.f32 1.0, %v11212_v16  ;;  %v15388_v14 = vmul.f32 0.03125, %v3446_v59  ;;  %v4133_v17 = vsub.f32 %v19527_v7, %v15308_v35 }
 0x3d9   :  { %v11216_v5 = vpop.eup %11215  ;;  %v4132_v33 = vsub.f32 %v19528_v18, %v15320_v3  ;;  %v4199_v37 = vadd.f32 1e-05, %v4071_v63  ;;  %v4448_v11 = vmul.f32 0.70710677, %v15378_v4  ;;  %v4380_v32 = vmul.f32 0.5, %v15328_v49  ;;  %v3705_v15 = vpop.xlane.xlu1 %3704 }
 0x3da   :  { %v11218_v6 = vpop.eup %11217  ;;  %v4635_v41 = vmul.f32 %v4571_v34, %v4379_v52  ;;  %v4572_v1 = vadd.f32 1.0, %v11216_v5  ;;  %v3945_v26 = vmul.f32 %v15380_v43, %v15380_v43  ;;  %v4198_v2 = vadd.f32 1e-05, %v4070_v39  ;;  %v3702_v50 = vpop.xlane.xlu0 %3701 }
 0x3db   :  { %v3944_v45 = vmul.f32 %v15388_v14, %v15388_v14  ;;  %v3881_v27 = vmul.f32 0.03125, %v3705_v15  ;;  %v4449_v3 = vmul.f32 0.70710677, %v15385_v42  ;;  %11229 = vrsqrt.f32 %v4199_v37 }
 0x3dc   :  { %10582 = vmatmul.mubr.msk.f32.gmra.mrb[120].mxu1 %vm1397_vm3, %v4635_v41  ;;  %v4636_v8 = vmul.f32 %v4572_v1, %v4380_v32  ;;  %v3880_v56 = vmul.f32 0.03125, %v3702_v50  ;;  %v15402_v47 = vmul.f32 %v11214_v40, %v4130_v46  ;;  %v4381_v49 = vmul.f32 0.5, %v15342_v55  ;;  %v19530_v55 = vld [vmem:[#allocation40_spill] sm:$0xff] }
 0x3dd   :  { %v4009_v24 = vsub.f32 %v3881_v27, %v3945_v26  ;;  %11231 = verf.f32 %v4448_v11  ;;  %v15408_v13 = vmul.f32 %v11218_v6, %v4131_v57  ;;  %v4135_v36 = vsub.f32 %v19529_v60, %v15348_v22  ;;  %v3455_v54 = vpop.xlane.xlu1 %3454 }
 0x3de   :  { %v11220_v25 = vpop.eup %11219  ;;  %10584 = vmatprep.mubr.msk.f32.mxu1 %vm1397_vm3, %v4636_v8  ;;  %v4008_v28 = vsub.f32 %v3880_v56, %v3944_v45  ;;  %11233 = verf.f32 %v4449_v3  ;;  %v4450_v46 = vmul.f32 0.70710677, %v15402_v47  ;;  %v4134_v0 = vsub.f32 %v19530_v55, %v15350_v23  ;;  %v3452_v38 = vpop.xlane.xlu0 %3451  ;;  %v19531_v8 = vld [vmem:[#allocation39_spill] sm:$0xff] }
 0x3df   :  { %v11222_v9 = vpop.eup %11221  ;;  %11235 = vrsqrt.f32 %v4198_v2  ;;  %v4073_v58 = vmax.f32 %v4009_v24, 0.0  ;;  %v15416_v51 = vmul.f32 0.03125, %v3455_v54  ;;  %v15418_v62 = vmul.f32 0.03125, %v3452_v38 }
 0x3e0   :  { %v11224_v57 = vpop.eup %11223  ;;  %v4573_v30 = vadd.f32 1.0, %v11222_v9  ;;  %v4072_v52 = vmax.f32 %v4008_v28, 0.0  ;;  %11237 = verf.f32 %v4450_v46  ;;  %v4382_v20 = vmul.f32 0.5, %v15355_v12 }
 0x3e1   :  { %v11226_v44 = vpop.eup %11225  ;;  %v4201_v29 = vadd.f32 1e-05, %v4073_v58  ;;  %v4574_v31 = vadd.f32 1.0, %v11224_v57  ;;  %v4451_v16 = vmul.f32 0.70710677, %v15408_v13  ;;  %v4383_v40 = vmul.f32 0.5, %v15361_v21  ;;  %v3711_v5 = vpop.xlane.xlu1 %3710 }
 0x3e2   :  { %v11228_v63 = vpop.eup %11227  ;;  %v4637_v59 = vmul.f32 %v4573_v30, %v4381_v49  ;;  %v4575_v34 = vadd.f32 1.0, %v11226_v44  ;;  %v4200_v39 = vadd.f32 1e-05, %v4072_v52  ;;  %v3947_v37 = vmul.f32 %v15416_v51, %v15416_v51  ;;  %v3708_v6 = vpop.xlane.xlu0 %3707 }
 0x3e3   :  { %11239 = vrsqrt.f32 %v4201_v29  ;;  %v4638_v18 = vmul.f32 %v4574_v31, %v4382_v20  ;;  %v3883_v11 = vmul.f32 0.03125, %v3711_v5  ;;  %v3946_v12 = vmul.f32 %v15418_v62, %v15418_v62 }
 0x3e4   :  { %10585 = vmatmul.mubr.msk.f32.gmra.mrb[122].mxu1 %vm1397_vm3, %v4637_v59  ;;  %11241 = vrsqrt.f32 %v4200_v39  ;;  %v3882_v41 = vmul.f32 0.03125, %v3708_v6  ;;  %v15428_v32 = vmul.f32 %v11220_v25, %v4132_v33  ;;  %v4385_v1 = vmul.f32 0.5, %v15385_v42  ;;  %v19532_v42 = vld [vmem:[#allocation77_spill] sm:$0xff] }
 0x3e5   :  { %10587 = vmatprep.mubr.msk.f32.mxu1 %vm1397_vm3, %v4638_v18  ;;  %v4011_v21 = vsub.f32 %v3883_v11, %v3947_v37  ;;  %11243 = verf.f32 %v4451_v16  ;;  %v15435_v26 = vmul.f32 %v11228_v63, %v4133_v17  ;;  %v11230_v15 = vpop.eup %11229  ;;  %v4639_v2 = vmul.f32 %v4575_v34, %v4383_v40  ;;  %v3461_v50 = vpop.xlane.xlu1 %3460 }
 0x3e6   :  { %v4384_v45 = vmul.f32 0.5, %v15378_v4  ;;  %v4010_v27 = vsub.f32 %v3882_v41, %v3946_v12  ;;  %v4452_v33 = vmul.f32 0.70710677, %v15428_v32  ;;  %v4137_v56 = vsub.f32 %v19531_v8, %v15380_v43  ;;  %v3458_v35 = vpop.xlane.xlu0 %3457 }
 0x3e7   :  { %v11232_v3 = vpop.eup %11231  ;;  %v4136_v49 = vsub.f32 %v19532_v42, %v15388_v14  ;;  %v4075_v24 = vmax.f32 %v4011_v21, 0.0  ;;  %v15443_v25 = vmul.f32 0.03125, %v3461_v50  ;;  %v15446_v28 = vmul.f32 0.03125, %v3458_v35 }
 0x3e8   :  { %v11234_v7 = vpop.eup %11233  ;;  %10588 = vmatmul.mubr.msk.f32.gmra.mrb[124].mxu1 %vm1397_vm3, %v4639_v2  ;;  %v4576_v17 = vadd.f32 1.0, %v11232_v3  ;;  %v4074_v4 = vmax.f32 %v4010_v27, 0.0  ;;  %11245 = verf.f32 %v4452_v33  ;;  %v4453_v43 = vmul.f32 0.70710677, %v15435_v26 }
 0x3e9   :  { %v11236_v54 = vpop.eup %11235  ;;  %v4203_v46 = vadd.f32 1e-05, %v4075_v24  ;;  %v4577_v9 = vadd.f32 1.0, %v11234_v7  ;;  %v15452_v14 = vmul.f32 %v11230_v15, %v4135_v36  ;;  %v3949_v30 = vmul.f32 %v15443_v25, %v15443_v25  ;;  %v3717_v52 = vpop.xlane.xlu1 %3716 }
 0x3ea   :  { %v11238_v58 = vpop.eup %11237  ;;  %v4640_v38 = vmul.f32 %v4576_v17, %v4384_v45  ;;  %v4202_v57 = vadd.f32 1e-05, %v4074_v4  ;;  %v4386_v44 = vmul.f32 0.5, %v15402_v47  ;;  %v3885_v20 = vmul.f32 0.03125, %v3717_v52  ;;  %v3714_v16 = vpop.xlane.xlu0 %3713  ;;  %v19533_v17 = vld [vmem:[#allocation45_spill] sm:$0xff] }
 0x3eb   :  { %11247 = vrsqrt.f32 %v4203_v46  ;;  %v4641_v29 = vmul.f32 %v4577_v9, %v4385_v1  ;;  %v4578_v31 = vadd.f32 1.0, %v11238_v58  ;;  %v3948_v22 = vmul.f32 %v15446_v28, %v15446_v28  ;;  %v19534_v9 = vld [vmem:[#allocation44_spill] sm:$0xff] }
 0x3ec   :  { %10590 = vmatprep.mubr.msk.f32.mxu1 %vm1397_vm3, %v4640_v38  ;;  %11249 = vrsqrt.f32 %v4202_v57  ;;  %v3884_v60 = vmul.f32 0.03125, %v3714_v16  ;;  %v15463_v36 = vmul.f32 %v11236_v54, %v4134_v0  ;;  %v4013_v47 = vsub.f32 %v3885_v20, %v3949_v30 }
 0x3ed   :  { %v11240_v63 = vpop.eup %11239  ;;  %10591 = vmatmul.mubr.msk.f32.gmra.mrb[126].mxu1 %vm1397_vm3, %v4641_v29  ;;  %v4642_v59 = vmul.f32 %v4578_v31, %v4386_v44  ;;  %11251 = verf.f32 %v4453_v43  ;;  %v4455_v40 = vmul.f32 0.70710677, %v15452_v14  ;;  %v4387_v39 = vmul.f32 0.5, %v15408_v13  ;;  %v3467_v18 = vpop.xlane.xlu1 %3466 }
 0x3ee   :  { %v11242_v34 = vpop.eup %11241  ;;  %v4012_v5 = vsub.f32 %v3884_v60, %v3948_v22  ;;  %v4454_v37 = vmul.f32 0.70710677, %v15463_v36  ;;  %v15469_v11 = vmul.f32 %v11240_v63, %v4137_v56  ;;  %v4077_v55 = vmax.f32 %v4013_v47, 0.0  ;;  %v3464_v6 = vpop.xlane.xlu0 %3463 }
 0x3ef   :  { %v11244_v23 = vpop.eup %11243  ;;  %10593 = vmatprep.mubr.msk.f32.mxu1 %vm1397_vm3, %v4642_v59  ;;  %v15472_v0 = vmul.f32 0.03125, %v3467_v18  ;;  %11253 = verf.f32 %v4455_v40  ;;  %v15474_v12 = vmul.f32 %v11242_v34, %v4136_v49  ;;  %v15476_v1 = vmul.f32 0.03125, %v3464_v6 }
 0x3f0   :  { %v4579_v41 = vadd.f32 1.0, %v11244_v23  ;;  %v4076_v21 = vmax.f32 %v4012_v5, 0.0  ;;  %11255 = verf.f32 %v4454_v37  ;;  %v4205_v13 = vadd.f32 1e-05, %v4077_v55 }
 0x3f1   :  { %v3951_v27 = vmul.f32 %v15472_v0, %v15472_v0  ;;  %v3723_v50 = vpop.xlane.xlu1 %3722  ;;  %v4388_v33 = vmul.f32 0.5, %v15428_v32  ;;  %v4456_v42 = vmul.f32 0.70710677, %v15474_v12  ;;  %v3950_v49 = vmul.f32 %v15476_v1, %v15476_v1 }
 0x3f2   :  { %v11246_v15 = vpop.eup %11245  ;;  %v4643_v2 = vmul.f32 %v4579_v41, %v4387_v39  ;;  %v4204_v45 = vadd.f32 1e-05, %v4076_v21  ;;  %11257 = vrsqrt.f32 %v4205_v13  ;;  %v3887_v3 = vmul.f32 0.03125, %v3723_v50  ;;  %v3720_v56 = vpop.xlane.xlu0 %3719  ;;  %v19535_v21 = vld [vmem:[#allocation50_spill] sm:$0xff] }
 0x3f3   :  { %v4580_v8 = vadd.f32 1.0, %v11246_v15  ;;  %v3886_v24 = vmul.f32 0.03125, %v3720_v56  ;;  %v4457_v35 = vmul.f32 0.70710677, %v15469_v11  ;;  %v4139_v4 = vsub.f32 %v19533_v17, %v15416_v51  ;;  %v19536_v15 = vld [vmem:[#allocation49_spill] sm:$0xff] }
 0x3f4   :  { %10594 = vmatmul.mubr.msk.f32.gmra.mrb[128].mxu1 %vm1397_vm3, %v4643_v2  ;;  %11259 = vrsqrt.f32 %v4204_v45  ;;  %v4015_v32 = vsub.f32 %v3887_v3, %v3951_v27  ;;  %v4138_v43 = vsub.f32 %v19534_v9, %v15418_v62  ;;  %v4389_v52 = vmul.f32 0.5, %v15435_v26  ;;  %v19537_v9 = vld [vmem:[#allocation54_spill] sm:$0xff] }
 0x3f5   :  { %v11248_v7 = vpop.eup %11247  ;;  %v4644_v54 = vmul.f32 %v4580_v8, %v4388_v33  ;;  %11261 = verf.f32 %v4456_v42  ;;  %v4014_v58 = vsub.f32 %v3886_v24, %v3950_v49  ;;  %v3473_v38 = vpop.xlane.xlu1 %3472  ;;  %v4390_v63 = vmul.f32 0.5, %v15463_v36 }
 0x3f6   :  { %v11250_v46 = vpop.eup %11249  ;;  %11263 = verf.f32 %v4457_v35  ;;  %v4079_v30 = vmax.f32 %v4015_v32, 0.0  ;;  %v15492_v44 = vmul.f32 0.03125, %v3473_v38  ;;  %v3470_v29 = vpop.xlane.xlu0 %3469  ;;  %v15494_v51 = vmul.f32 %v11248_v7, %v4139_v4 }
 0x3f7   :  { %v11252_v57 = vpop.eup %11251  ;;  %10596 = vmatprep.mubr.msk.f32.mxu1 %vm1397_vm3, %v4644_v54  ;;  %v4078_v31 = vmax.f32 %v4014_v58, 0.0  ;;  %v15496_v16 = vmul.f32 0.03125, %v3470_v29  ;;  %v15498_v22 = vmul.f32 %v11250_v46, %v4138_v43  ;;  %v4391_v47 = vmul.f32 0.5, %v15452_v14 }
 0x3f8   :  { %v4581_v20 = vadd.f32 1.0, %v11252_v57  ;;  %v4207_v60 = vadd.f32 1e-05, %v4079_v30  ;;  %v3953_v34 = vmul.f32 %v15492_v44, %v15492_v44  ;;  %v4459_v6 = vmul.f32 0.70710677, %v15494_v51 }
 0x3f9   :  { %v11254_v62 = vpop.eup %11253  ;;  %v4206_v26 = vadd.f32 1e-05, %v4078_v31  ;;  %v3952_v39 = vmul.f32 %v15496_v16, %v15496_v16  ;;  %v3729_v5 = vpop.xlane.xlu1 %3728  ;;  %v4458_v14 = vmul.f32 0.70710677, %v15498_v22  ;;  %v4141_v13 = vsub.f32 %v19535_v21, %v15443_v25 }
 0x3fa   :  { %v11256_v59 = vpop.eup %11255  ;;  %v4645_v40 = vmul.f32 %v4581_v20, %v4389_v52  ;;  %11265 = vrsqrt.f32 %v4207_v60  ;;  %v3889_v18 = vmul.f32 0.03125, %v3729_v5  ;;  %v4583_v23 = vadd.f32 1.0, %v11254_v62  ;;  %v3726_v55 = vpop.xlane.xlu0 %3725 }
 0x3fb   :  { %v4582_v37 = vadd.f32 1.0, %v11256_v59  ;;  %11267 = vrsqrt.f32 %v4206_v26  ;;  %v3888_v36 = vmul.f32 0.03125, %v3726_v55  ;;  %v4140_v2 = vsub.f32 %v19536_v15, %v15446_v28  ;;  %v19538_v59 = vld [vmem:[#allocation53_spill] sm:$0xff] }
 0x3fc   :  { %10597 = vmatmul.mubr.msk.f32.gmra.mrb[130].mxu1 %vm1397_vm3, %v4645_v40  ;;  %v11258_v41 = vpop.eup %11257  ;;  %v4017_v45 = vsub.f32 %v3889_v18, %v3953_v34  ;;  %v4647_v33 = vmul.f32 %v4583_v23, %v4391_v47  ;;  %v4392_v56 = vmul.f32 0.5, %v15474_v12  ;;  %11269 = verf.f32 %v4458_v14 }
 0x3fd   :  { %v4646_v27 = vmul.f32 %v4582_v37, %v4390_v63  ;;  %v4016_v3 = vsub.f32 %v3888_v36, %v3952_v39  ;;  %v3479_v8 = vpop.xlane.xlu1 %3478  ;;  %11271 = verf.f32 %v4459_v6  ;;  %v15517_v25 = vmul.f32 %v11258_v41, %v4141_v13 }
 0x3fe   :  { %v11260_v50 = vpop.eup %11259  ;;  %v4081_v49 = vmax.f32 %v4017_v45, 0.0  ;;  %v15515_v24 = vmul.f32 0.03125, %v3479_v8  ;;  %v3476_v35 = vpop.xlane.xlu0 %3475  ;;  %v4393_v54 = vmul.f32 0.5, %v15469_v11  ;;  %v4143_v43 = vsub.f32 %v19537_v9, %v15472_v0 }
 0x3ff   :  { %v11262_v42 = vpop.eup %11261  ;;  %10599 = vmatprep.mubr.msk.f32.mxu1 %vm1397_vm3, %v4646_v27  ;;  %v4080_v7 = vmax.f32 %v4016_v3, 0.0  ;;  %v15520_v17 = vmul.f32 0.03125, %v3476_v35  ;;  %v15522_v32 = vmul.f32 %v11260_v50, %v4140_v2  ;;  %v4461_v0 = vmul.f32 0.70710677, %v15517_v25  ;;  %v19539_v2 = vld [vmem:[#allocation59_spill] sm:$0xff] }
 0x400   :  { %v11264_v28 = vpop.eup %11263  ;;  %10600 = vmatmul.mubr.msk.f32.gmra.mrb[132].mxu1 %vm1397_vm3, %v4647_v33  ;;  %v4584_v4 = vadd.f32 1.0, %v11262_v42  ;;  %v4209_v12 = vadd.f32 1e-05, %v4081_v49  ;;  %v3955_v38 = vmul.f32 %v15515_v24, %v15515_v24  ;;  %v4142_v40 = vsub.f32 %v19538_v59, %v15476_v1 }
 0x401   :  { %v4585_v46 = vadd.f32 1.0, %v11264_v28  ;;  %v4208_v58 = vadd.f32 1e-05, %v4080_v7  ;;  %v3735_v57 = vpop.xlane.xlu1 %3734  ;;  %v3954_v52 = vmul.f32 %v15520_v17, %v15520_v17  ;;  %v4460_v62 = vmul.f32 0.70710677, %v15522_v32 }
 0x402   :  { %v4648_v30 = vmul.f32 %v4584_v4, %v4392_v56  ;;  %11273 = vrsqrt.f32 %v4209_v12  ;;  %v3891_v29 = vmul.f32 0.03125, %v3735_v57  ;;  %v3732_v31 = vpop.xlane.xlu0 %3731  ;;  %v4395_v14 = vmul.f32 0.5, %v15494_v51  ;;  %v19540_v4 = vld [vmem:[#allocation58_spill] sm:$0xff] }
 0x403   :  { %v4649_v20 = vmul.f32 %v4585_v46, %v4393_v54  ;;  %11275 = vrsqrt.f32 %v4208_v58  ;;  %v3890_v11 = vmul.f32 0.03125, %v3732_v31  ;;  %v4394_v21 = vmul.f32 0.5, %v15498_v22 }
 0x404   :  { %10602 = vmatprep.mubr.msk.f32.mxu1 %vm1397_vm3, %v4648_v30  ;;  %v11266_v60 = vpop.eup %11265  ;;  %v4019_v63 = vsub.f32 %v3891_v29, %v3955_v38  ;;  %11277 = verf.f32 %v4460_v62  ;;  %v4145_v45 = vsub.f32 %v19539_v2, %v15492_v44  ;;  %v4144_v12 = vsub.f32 %v19540_v4, %v15496_v16 }
 0x405   :  { %10603 = vmatmul.mubr.msk.f32.gmra.mrb[134].mxu1 %vm1397_vm3, %v4649_v20  ;;  %v11268_v47 = vpop.eup %11267  ;;  %v4018_v26 = vsub.f32 %v3890_v11, %v3954_v52  ;;  %v3485_v34 = vpop.xlane.xlu1 %3484  ;;  %v15537_v39 = vmul.f32 %v11266_v60, %v4143_v43  ;;  %11279 = verf.f32 %v4461_v0  ;;  %v4396_v16 = vmul.f32 0.5, %v15522_v32 }
 0x406   :  { %v4083_v5 = vmax.f32 %v4019_v63, 0.0  ;;  %v15539_v18 = vmul.f32 0.03125, %v3485_v34  ;;  %v3482_v37 = vpop.xlane.xlu0 %3481  ;;  %v11270_v23 = vpop.eup %11269  ;;  %v15544_v6 = vmul.f32 %v11268_v47, %v4142_v40  ;;  %v4397_v47 = vmul.f32 0.5, %v15517_v25  ;;  %v19541_v25 = vld [vmem:[#allocation63_spill] sm:$0xff] }
 0x407   :  { %v4082_v55 = vmax.f32 %v4018_v26, 0.0  ;;  %v15541_v36 = vmul.f32 0.03125, %v3482_v37  ;;  %v11272_v41 = vpop.eup %11271  ;;  %v4586_v13 = vadd.f32 1.0, %v11270_v23  ;;  %v4463_v15 = vmul.f32 0.70710677, %v15537_v39 }
 0x408   :  { %v4211_v1 = vadd.f32 1e-05, %v4083_v5  ;;  %v3957_v50 = vmul.f32 %v15539_v18, %v15539_v18  ;;  %v4587_v3 = vadd.f32 1.0, %v11272_v41  ;;  %v4462_v35 = vmul.f32 0.70710677, %v15544_v6 }
 0x409   :  { %v4210_v27 = vadd.f32 1e-05, %v4082_v55  ;;  %v3741_v33 = vpop.xlane.xlu1 %3740  ;;  %v3956_v51 = vmul.f32 %v15541_v36, %v15541_v36  ;;  %v4650_v56 = vmul.f32 %v4586_v13, %v4394_v21  ;;  %v19542_v21 = vld [vmem:[#allocation62_spill] sm:$0xff]  ;;  %v4399_v4 = vmul.f32 0.5, %v15537_v39 }
 0x40a   :  { %11281 = vrsqrt.f32 %v4211_v1  ;;  %v3893_v8 = vmul.f32 0.03125, %v3741_v33  ;;  %v3738_v42 = vpop.xlane.xlu0 %3737  ;;  %v4651_v22 = vmul.f32 %v4587_v3, %v4395_v14  ;;  %v4147_v1 = vsub.f32 %v19541_v25, %v15515_v24 }
 0x40b   :  { %11283 = vrsqrt.f32 %v4210_v27  ;;  %v3892_v49 = vmul.f32 0.03125, %v3738_v42  ;;  %10605 = vmatprep.mubr.msk.f32.mxu1 %vm1397_vm3, %v4650_v56  ;;  %v4146_v13 = vsub.f32 %v19542_v21, %v15520_v17  ;;  %v4398_v17 = vmul.f32 0.5, %v15544_v6 }
 0x40c   :  { %v11274_v28 = vpop.eup %11273  ;;  %v4021_v44 = vsub.f32 %v3893_v8, %v3957_v50  ;;  %11285 = verf.f32 %v4463_v15  ;;  %10606 = vmatmul.mubr.msk.f32.gmra.mrb[136].mxu1 %vm1397_vm3, %v4651_v22 }
 0x40d   :  { %v11276_v7 = vpop.eup %11275  ;;  %v4020_v54 = vsub.f32 %v3892_v49, %v3956_v51  ;;  %v3491_v46 = vpop.xlane.xlu1 %3490  ;;  %11287 = verf.f32 %v4462_v35  ;;  %v15559_v9 = vmul.f32 %v11274_v28, %v4145_v45  ;;  %v19543_v49 = vld [vmem:[#allocation68_spill] sm:$0xff] }
 0x40e   :  { %v4085_v43 = vmax.f32 %v4021_v44, 0.0  ;;  %v15561_v58 = vmul.f32 0.03125, %v3491_v46  ;;  %v3488_v38 = vpop.xlane.xlu0 %3487  ;;  %v11278_v57 = vpop.eup %11277  ;;  %v15565_v29 = vmul.f32 %v11276_v7, %v4144_v12  ;;  %v4149_v35 = vsub.f32 %v19543_v49, %v15539_v18  ;;  %v19544_v18 = vld [vmem:[#allocation67_spill] sm:$0xff] }
 0x40f   :  { %v4084_v30 = vmax.f32 %v4020_v54, 0.0  ;;  %v15563_v52 = vmul.f32 0.03125, %v3488_v38  ;;  %v11280_v20 = vpop.eup %11279  ;;  %v4588_v11 = vadd.f32 1.0, %v11278_v57  ;;  %v4465_v62 = vmul.f32 0.70710677, %v15559_v9 }
 0x410   :  { %v4213_v31 = vadd.f32 1e-05, %v4085_v43  ;;  %v3959_v60 = vmul.f32 %v15561_v58, %v15561_v58  ;;  %v4589_v59 = vadd.f32 1.0, %v11280_v20  ;;  %v4464_v23 = vmul.f32 0.70710677, %v15565_v29 }
 0x411   :  { %v4212_v0 = vadd.f32 1e-05, %v4084_v30  ;;  %v3747_v63 = vpop.xlane.xlu1 %3746  ;;  %v3958_v40 = vmul.f32 %v15563_v52, %v15563_v52  ;;  %v4652_v34 = vmul.f32 %v4588_v11, %v4396_v16  ;;  %v4148_v30 = vsub.f32 %v19544_v18, %v15541_v36 }
 0x412   :  { %11289 = vrsqrt.f32 %v4213_v31  ;;  %v3895_v26 = vmul.f32 0.03125, %v3747_v63  ;;  %v3744_v5 = vpop.xlane.xlu0 %3743  ;;  %v4653_v32 = vmul.f32 %v4589_v59, %v4397_v47 }
 0x413   :  { %11291 = vrsqrt.f32 %v4212_v0  ;;  %v3894_v37 = vmul.f32 0.03125, %v3744_v5  ;;  %10608 = vmatprep.mubr.msk.f32.mxu1 %vm1397_vm3, %v4652_v34 }
 0x414   :  { %v11282_v55 = vpop.eup %11281  ;;  %v4023_v14 = vsub.f32 %v3895_v26, %v3959_v60  ;;  %11293 = verf.f32 %v4465_v62  ;;  %10609 = vmatmul.mubr.msk.f32.gmra.mrb[138].mxu1 %vm1397_vm3, %v4653_v32  ;;  %v4400_v32 = vmul.f32 0.5, %v15565_v29 }
 0x415   :  { %v11284_v41 = vpop.eup %11283  ;;  %v4022_v15 = vsub.f32 %v3894_v37, %v3958_v40  ;;  %v3497_v2 = vpop.xlane.xlu1 %3496  ;;  %11295 = verf.f32 %v4464_v23  ;;  %v15585_v42 = vmul.f32 %v11282_v55, %v4147_v1  ;;  %v19545_v23 = vld [vmem:[#allocation74_spill] sm:$0xff] }
 0x416   :  { %v11286_v45 = vpop.eup %11285  ;;  %v4087_v27 = vmax.f32 %v4023_v14, 0.0  ;;  %v15581_v50 = vmul.f32 0.03125, %v3497_v2  ;;  %v3494_v33 = vpop.xlane.xlu0 %3493  ;;  %v15583_v56 = vmul.f32 %v11284_v41, %v4146_v13  ;;  %v4151_v55 = vsub.f32 %v19545_v23, %v15561_v58 }
 0x417   :  { %v11288_v3 = vpop.eup %11287  ;;  %v4086_v51 = vmax.f32 %v4022_v15, 0.0  ;;  %v4591_v8 = vadd.f32 1.0, %v11286_v45  ;;  %v15590_v44 = vmul.f32 0.03125, %v3494_v33  ;;  %v4467_v38 = vmul.f32 0.70710677, %v15585_v42 }
 0x418   :  { %v4215_v24 = vadd.f32 1e-05, %v4087_v27  ;;  %v4590_v22 = vadd.f32 1.0, %v11288_v3  ;;  %v3961_v12 = vmul.f32 %v15581_v50, %v15581_v50  ;;  %v4466_v6 = vmul.f32 0.70710677, %v15583_v56 }
 0x419   :  { %v4214_v28 = vadd.f32 1e-05, %v4086_v51  ;;  %v3753_v7 = vpop.xlane.xlu1 %3752  ;;  %v4655_v43 = vmul.f32 %v4591_v8, %v4399_v4  ;;  %v3960_v16 = vmul.f32 %v15590_v44, %v15590_v44  ;;  %v4401_v41 = vmul.f32 0.5, %v15559_v9 }
 0x41a   :  { %11297 = vrsqrt.f32 %v4215_v24  ;;  %v3897_v54 = vmul.f32 0.03125, %v3753_v7  ;;  %v4654_v46 = vmul.f32 %v4590_v22, %v4398_v17  ;;  %v3750_v39 = vpop.xlane.xlu0 %3749  ;;  %v4150_v58 = vsub.f32 %v14960_v10, %v15563_v52 }
 0x41b   :  { %11299 = vrsqrt.f32 %v4214_v28  ;;  %v3896_v11 = vmul.f32 0.03125, %v3750_v39 }
 0x41c   :  { %v11290_v57 = vpop.eup %11289  ;;  %v4025_v20 = vsub.f32 %v3897_v54, %v3961_v12  ;;  %10611 = vmatprep.mubr.msk.f32.mxu1 %vm1397_vm3, %v4654_v46  ;;  %11301 = verf.f32 %v4466_v6  ;;  %v4403_v6 = vmul.f32 0.5, %v15585_v42 }
 0x41d   :  { %v11292_v31 = vpop.eup %11291  ;;  %10612 = vmatmul.mubr.msk.f32.gmra.mrb[140].mxu1 %vm1397_vm3, %v4655_v43  ;;  %v3503_v62 = vpop.xlane.xlu1 %3502  ;;  %v15603_v0 = vmul.f32 %v11290_v57, %v4149_v35  ;;  %11303 = verf.f32 %v4467_v38  ;;  %v4024_v59 = vsub.f32 %v3896_v11, %v3960_v16  ;;  %v4402_v35 = vmul.f32 0.5, %v15583_v56  ;;  %v19546_v56 = vld [vmem:[#allocation73_spill] sm:$0xff] }
 0x41e   :  { %v11294_v60 = vpop.eup %11293  ;;  %v4089_v63 = vmax.f32 %v4025_v20, 0.0  ;;  %v15605_v47 = vmul.f32 %v11292_v31, %v4148_v30  ;;  %v15607_v40 = vmul.f32 0.03125, %v3503_v62  ;;  %v3500_v5 = vpop.xlane.xlu0 %3499  ;;  %v4153_v39 = vsub.f32 %v19546_v56, %v15581_v50 }
 0x41f   :  { %v11296_v36 = vpop.eup %11295  ;;  %v4593_v26 = vadd.f32 1.0, %v11294_v60  ;;  %v4088_v14 = vmax.f32 %v4024_v59, 0.0  ;;  %v4469_v25 = vmul.f32 0.70710677, %v15603_v0  ;;  %v15614_v1 = vmul.f32 0.03125, %v3500_v5 }
 0x420   :  { %v4217_v34 = vadd.f32 1e-05, %v4089_v63  ;;  %v4592_v37 = vadd.f32 1.0, %v11296_v36  ;;  %v4468_v15 = vmul.f32 0.70710677, %v15605_v47  ;;  %v3963_v29 = vmul.f32 %v15607_v40, %v15607_v40  ;;  %v19547_v63 = vld [vmem:[#allocation81_spill] sm:$0xff] }
 0x421   :  { %v3759_v21 = vpop.xlane.xlu1 %3758  ;;  %v4216_v2 = vadd.f32 1e-05, %v4088_v14  ;;  %v4657_v27 = vmul.f32 %v4593_v26, %v4401_v41  ;;  %v3962_v24 = vmul.f32 %v15614_v1, %v15614_v1  ;;  %v4152_v36 = vsub.f32 %v19547_v63, %v15590_v44 }
 0x422   :  { %11305 = vrsqrt.f32 %v4217_v34  ;;  %v4656_v13 = vmul.f32 %v4592_v37, %v4400_v32  ;;  %v3899_v45 = vmul.f32 0.03125, %v3759_v21 }
 0x423   :  { %11307 = verf.f32 %v4468_v15  ;;  %v3756_v51 = vpop.xlane.xlu0 %3755 }
 0x424   :  { %v11298_v33 = vpop.eup %11297  ;;  %10614 = vmatprep.mubr.msk.f32.mxu1 %vm1397_vm3, %v4656_v13  ;;  %11309 = vrsqrt.f32 %v4216_v2  ;;  %v4027_v3 = vsub.f32 %v3899_v45, %v3963_v29  ;;  %v3898_v17 = vmul.f32 0.03125, %v3756_v51  ;;  %v4405_v29 = vmul.f32 0.5, %v15603_v0 }
 0x425   :  { %v11300_v9 = vpop.eup %11299  ;;  %10615 = vmatmul.mubr.msk.f32.gmra.mrb[142].mxu1 %vm1397_vm3, %v4657_v27  ;;  %v15623_v8 = vmul.f32 %v11298_v33, %v4151_v55  ;;  %v3509_v22 = vpop.xlane.xlu1 %3508  ;;  %11311 = verf.f32 %v4469_v25  ;;  %v4404_v55 = vmul.f32 0.5, %v15605_v47  ;;  %v6608_v27 = vld [vmem:[%s19193_s7] sm:$0xff]  ;;  %v6609_v47 = vld [vmem:[%s19193_s7 + $0x8] sm:$0xff] }
 0x426   :  { %v15627_v49 = vmul.f32 %v11300_v9, %v4150_v58  ;;  %v11302_v10 = vpop.eup %11301  ;;  %v4091_v52 = vmax.f32 %v4027_v3, 0.0  ;;  %v4026_v7 = vsub.f32 %v3898_v17, %v3962_v24  ;;  %v15630_v4 = vmul.f32 0.03125, %v3509_v22  ;;  %v19548_v3 = vld [vmem:[#allocation80_spill] sm:$0xff] }
 0x427   :  { %v11304_v28 = vpop.eup %11303  ;;  %v4594_v12 = vadd.f32 1.0, %v11302_v10  ;;  %v3506_v43 = vpop.xlane.xlu0 %3505  ;;  %v4471_v57 = vmul.f32 0.70710677, %v15623_v8  ;;  %v4155_v51 = vsub.f32 %v19548_v3, %v15607_v40  ;;  %v4407_v56 = vmul.f32 0.5, %v15623_v8 }
 0x428   :  { %v4470_v54 = vmul.f32 0.70710677, %v15627_v49  ;;  %v4219_v46 = vadd.f32 1e-05, %v4091_v52  ;;  %v4595_v38 = vadd.f32 1.0, %v11304_v28  ;;  %v4090_v18 = vmax.f32 %v4026_v7, 0.0 }
 0x429   :  { %v15635_v30 = vmul.f32 0.03125, %v3506_v43  ;;  %v4658_v20 = vmul.f32 %v4594_v12, %v4402_v35  ;;  %v3765_v31 = vpop.xlane.xlu1 %3764  ;;  %v3965_v60 = vmul.f32 %v15630_v4, %v15630_v4  ;;  %v4406_v52 = vmul.f32 0.5, %v15627_v49 }
 0x42a   :  { %11313 = verf.f32 %v4470_v54  ;;  %v4659_v16 = vmul.f32 %v4595_v38, %v4403_v6  ;;  %v4218_v62 = vadd.f32 1e-05, %v4090_v18  ;;  %v3901_v42 = vmul.f32 0.03125, %v3765_v31  ;;  %v19549_v6 = vld [vmem:[#allocation86_spill] sm:$0xff] }
 0x42b   :  { %11315 = vrsqrt.f32 %v4219_v46  ;;  %10617 = vmatprep.mubr.msk.f32.mxu1 %vm1397_vm3, %v4658_v20  ;;  %v3964_v34 = vmul.f32 %v15635_v30, %v15635_v30  ;;  %v10765_v35 = vpack.c.bf16 %v6609_v47, %v6608_v27  ;;  %v4154_v38 = vsub.f32 %v19549_v6, %v15614_v1 }
 0x42c   :  { %v11306_v11 = vpop.eup %11305  ;;  %10618 = vmatmul.mubr.msk.f32.gmra.mrb[144].mxu1 %vm1397_vm3, %v4659_v16  ;;  %v3762_v59 = vpop.xlane.xlu0 %3761  ;;  %11317 = verf.f32 %v4471_v57  ;;  %v4029_v5 = vsub.f32 %v3901_v42, %v3965_v60 }
 0x42d   :  { %v15645_v26 = vmul.f32 %v11306_v11, %v4153_v39  ;;  %v11308_v50 = vpop.eup %11307  ;;  %11319 = vrsqrt.f32 %v4218_v62  ;;  %v3900_v32 = vmul.f32 0.03125, %v3762_v59  ;;  %v3515_v23 = vpop.xlane.xlu1 %3514  ;;  %10766 = vmatprep.subr.bf16.mxu0 %v10765_v35 }
 0x42e   :  { %v11310_v37 = vpop.eup %11309  ;;  %v4596_v14 = vadd.f32 1.0, %v11308_v50  ;;  %v4093_v25 = vmax.f32 %v4029_v5, 0.0  ;;  %v15653_v15 = vmul.f32 0.03125, %v3515_v23  ;;  %10768 = vmatpush3.bf16.msra.mxu0 %v10765_v35  ;;  %v15692_v23 = vld [vmem:[%s19192_s6 + $0x1] ss:$0 sm:$0xff] }
 0x42f   :  { %v4473_v44 = vmul.f32 0.70710677, %v15645_v26  ;;  %v11312_v41 = vpop.eup %11311  ;;  %v4028_v21 = vsub.f32 %v3900_v32, %v3964_v34  ;;  %v15651_v13 = vmul.f32 %v11310_v37, %v4152_v36 }
 0x430   :  { %v4660_v2 = vmul.f32 %v4596_v14, %v4404_v55  ;;  %v4597_v45 = vadd.f32 1.0, %v11312_v41  ;;  %v4221_v33 = vadd.f32 1e-05, %v4093_v25  ;;  %v3512_v9 = vpop.xlane.xlu0 %3511  ;;  %v3967_v7 = vmul.f32 %v15653_v15, %v15653_v15  ;;  %v19550_v14 = vld [vmem:[#allocation85_spill] sm:$0xff] }
 0x431   :  { %v4092_v58 = vmax.f32 %v4028_v21, 0.0  ;;  %11321 = verf.f32 %v4473_v44  ;;  %v4472_v0 = vmul.f32 0.70710677, %v15651_v13  ;;  %v15669_v12 = vmul.f32 0.03125, %v3512_v9  ;;  %v19551_v21 = vld [vmem:[#allocation89_spill] sm:$0xff] }
 0x432   :  { %10620 = vmatprep.mubr.msk.f32.mxu1 %vm1397_vm3, %v4660_v2  ;;  %v4661_v24 = vmul.f32 %v4597_v45, %v4405_v29  ;;  %11323 = vrsqrt.f32 %v4221_v33  ;;  %v4157_v44 = vsub.f32 %v19550_v14, %v15630_v4  ;;  %v4156_v2 = vsub.f32 %v19551_v21, %v15635_v30 }
 0x433   :  { %v4220_v22 = vadd.f32 1e-05, %v4092_v58  ;;  %v3771_v10 = vpop.xlane.xlu1 %3770  ;;  %v3966_v16 = vmul.f32 %v15669_v12, %v15669_v12  ;;  %v4408_v27 = vmul.f32 0.5, %v15651_v13 }
 0x434   :  { %v11314_v17 = vpop.eup %11313  ;;  %v3903_v54 = vmul.f32 0.03125, %v3771_v10  ;;  %10621 = vmatmul.mubr.msk.f32.gmra.mrb[146].mxu1 %vm1397_vm3, %v4661_v24 }
 0x435   :  { %v11316_v28 = vpop.eup %11315  ;;  %v4598_v40 = vadd.f32 1.0, %v11314_v17  ;;  %11325 = vrsqrt.f32 %v4220_v22 }
 0x436   :  { %v15672_v46 = vmul.f32 %v11316_v28, %v4155_v51  ;;  %v11318_v43 = vpop.eup %11317  ;;  %v4031_v49 = vsub.f32 %v3903_v54, %v3967_v7  ;;  %11327 = verf.f32 %v4472_v0  ;;  %v4409_v54 = vmul.f32 0.5, %v15645_v26 }
 0x437   :  { %v4662_v57 = vmul.f32 %v4598_v40, %v4406_v52  ;;  %v11320_v18 = vpop.eup %11319  ;;  %v3768_v20 = vpop.xlane.xlu0 %3767  ;;  %v4599_v39 = vadd.f32 1.0, %v11318_v43 }
 0x438   :  { %v4475_v31 = vmul.f32 0.70710677, %v15672_v46  ;;  %v4095_v11 = vmax.f32 %v4031_v49, 0.0  ;;  %v3902_v62 = vmul.f32 0.03125, %v3768_v20  ;;  %v3521_v60 = vpop.xlane.xlu1 %3520  ;;  %v15681_v1 = vmul.f32 %v11320_v18, %v4154_v38 }
 0x439   :  { %10623 = vmatprep.mubr.msk.f32.mxu1 %vm1397_vm3, %v4662_v57  ;;  %v15683_v42 = vmul.f32 0.03125, %v3521_v60  ;;  %v4663_v63 = vmul.f32 %v4599_v39, %v4407_v56  ;;  %v4159_v20 = vsub.f32 %v15109_v48, %v15653_v15 }
 0x43a   :  { %v4223_v36 = vadd.f32 1e-05, %v4095_v11  ;;  %v4030_v59 = vsub.f32 %v3902_v62, %v3966_v16  ;;  %v4474_v8 = vmul.f32 0.70710677, %v15681_v1  ;;  %11329 = verf.f32 %v4475_v31 }
 0x43b   :  { %v11322_v50 = vpop.eup %11321  ;;  %v3518_v34 = vpop.xlane.xlu0 %3517  ;;  %10624 = vmatmul.mubr.msk.f32.gmra.mrb[148].mxu1 %vm1397_vm3, %v4663_v63  ;;  %v3969_v41 = vmul.f32 %v15683_v42, %v15683_v42  ;;  %v4410_v15 = vmul.f32 0.5, %v15681_v1  ;;  %v4158_v63 = vsub.f32 %v15124_v61, %v15669_v12  ;;  %v4161_v1 = vsub.f32 %v15165_v53, %v15683_v42 }
 0x43c   :  { %11331 = vrsqrt.f32 %v4223_v36  ;;  %v4094_v5 = vmax.f32 %v4030_v59, 0.0  ;;  %v15687_v32 = vmul.f32 0.03125, %v3518_v34  ;;  %v3777_v37 = vpop.xlane.xlu1 %3776  ;;  %v11324_v55 = vpop.eup %11323  ;;  %v4601_v47 = vadd.f32 1.0, %v11322_v50 }
 0x43d   :  { %v3905_v25 = vmul.f32 0.03125, %v3777_v37  ;;  %11333 = verf.f32 %v4474_v8  ;;  %v15706_v24 = vmul.f32 %v11324_v55, %v4157_v44  ;;  %v4411_v36 = vmul.f32 0.5, %v15672_v46 }
 0x43e   :  { %v4222_v29 = vadd.f32 1e-05, %v4094_v5  ;;  %v10547_v45 = vpop.f32.mrb[96].mxu1  ;;  %v3968_v58 = vmul.f32 %v15687_v32, %v15687_v32  ;;  %v4665_v18 = vmul.f32 %v4601_v47, %v4409_v54 }
 0x43f   :  { %v11326_v33 = vpop.eup %11325  ;;  %v4033_v9 = vsub.f32 %v3905_v25, %v3969_v41  ;;  %v3774_v3 = vpop.xlane.xlu0 %3773  ;;  %v15704_v4 = vadd.f32 %v10547_v45, %v15692_v23  ;;  %v4477_v26 = vmul.f32 0.70710677, %v15706_v24  ;;  %v4160_v41 = vsub.f32 %v15174_v19, %v15687_v32 }
 0x440   :  { %v4945_v51 = vpop.f32.mrb[97].mxu1  ;;  %v11328_v0 = vpop.eup %11327  ;;  %11335 = vrsqrt.f32 %v4222_v29  ;;  %v3904_v30 = vmul.f32 0.03125, %v3774_v3  ;;  %v15711_v13 = vmul.f32 %v11326_v33, %v4156_v2  ;;  %v4413_v19 = vmul.f32 0.5, %v15706_v24 }
 0x441   :  { %v15709_v17 = vadd.f32 %v15692_v23, %v4945_v51  ;;  %v4097_v22 = vmax.f32 %v4033_v9, 0.0  ;;  %v5267_v10 = vsel %vm1397_vm3, %v15704_v4, 0.0  ;;  %v4600_v52 = vadd.f32 1.0, %v11328_v0 }
 0x442   :  { %v5457_v35 = vmul.f32 %v15704_v4, %v15704_v4  ;;  %v4032_v28 = vsub.f32 %v3904_v30, %v3968_v58  ;;  %5268 = vadd.xlane.f32.xlu1 %v5267_v10  ;;  %v4476_v38 = vmul.f32 0.70710677, %v15711_v13  ;;  %v4412_v45 = vmul.f32 0.5, %v15711_v13 }
 0x443   :  { %v5264_v7 = vsel %vm1397_vm3, %v15709_v17, 0.0  ;;  %v5456_v40 = vmul.f32 %v15709_v17, %v15709_v17  ;;  %v4225_v43 = vadd.f32 1e-05, %v4097_v22  ;;  %v4664_v6 = vmul.f32 %v4600_v52, %v4408_v27 }
 0x444   :  { %5265 = vadd.xlane.f32.xlu0 %v5264_v7  ;;  %v11330_v49 = vpop.eup %11329  ;;  %v4096_v57 = vmax.f32 %v4032_v28, 0.0  ;;  %v5523_v56 = vsel %vm1397_vm3, %v5457_v35, 0.0 }
 0x445   :  { %11337 = vrsqrt.f32 %v4225_v43  ;;  %10626 = vmatprep.mubr.msk.f32.mxu1 %vm1397_vm3, %v4664_v6  ;;  %v5520_v16 = vsel %vm1397_vm3, %v5456_v40, 0.0  ;;  %v4603_v62 = vadd.f32 1.0, %v11330_v49 }
 0x446   :  { %v11332_v39 = vpop.eup %11331  ;;  %v4224_v31 = vadd.f32 1e-05, %v4096_v57  ;;  %10627 = vmatmul.mubr.msk.f32.gmra.mrb[150].mxu1 %vm1397_vm3, %v4665_v18  ;;  %5524 = vadd.xlane.f32.xlu1 %v5523_v56  ;;  %11339 = verf.f32 %v4476_v38 }
 0x447   :  { %v11334_v11 = vpop.eup %11333  ;;  %11341 = verf.f32 %v4477_v26  ;;  %v15730_v48 = vmul.f32 %v11332_v39, %v4159_v20  ;;  %v4667_v34 = vmul.f32 %v4603_v62, %v4411_v36 }
 0x448   :  { %5521 = vadd.xlane.f32.xlu0 %v5520_v16  ;;  %11343 = vrsqrt.f32 %v4224_v31  ;;  %v4602_v60 = vadd.f32 1.0, %v11334_v11 }
 0x449   :  { %v4479_v59 = vmul.f32 0.70710677, %v15730_v48  ;;  %v4415_v49 = vmul.f32 0.5, %v15730_v48 }
 0x44a   :  { %v11336_v8 = vpop.eup %11335  ;;  %v4666_v50 = vmul.f32 %v4602_v60, %v4410_v15 }
 0x44b   :  { %v4350_v5 = vmul.f32 %v11336_v8, %v4158_v63  ;;  %11345 = verf.f32 %v4479_v59 }
 0x44c   :  { %10629 = vmatprep.mubr.msk.f32.mxu1 %vm1397_vm3, %v4666_v50 }
 0x44d   :  { %v10550_v37 = vpop.f32.mrb[98].mxu1  ;;  %10630 = vmatmul.mubr.msk.f32.gmra.mrb[152].mxu1 %vm1397_vm3, %v4667_v34  ;;  %v4478_v55 = vmul.f32 0.70710677, %v4350_v5  ;;  %v4414_v6 = vmul.f32 0.5, %v4350_v5 }
 0x44e   :  { %v15742_v61 = vadd.f32 %v10550_v37, %v15692_v23  ;;  %v4955_v12 = vpop.f32.mrb[99].mxu1 }
 0x44f   :  { %v11338_v46 = vpop.eup %11337  ;;  %v15745_v14 = vadd.f32 %v15692_v23, %v4955_v12  ;;  %11347 = verf.f32 %v4478_v55 }
 0x450   :  { %v11340_v44 = vpop.eup %11339  ;;  %v5273_v25 = vsel %vm1397_vm3, %v15742_v61, 0.0  ;;  %v5459_v21 = vmul.f32 %v15742_v61, %v15742_v61  ;;  %v4353_v53 = vmul.f32 %v11338_v46, %v4161_v1 }
 0x451   :  { %v11342_v42 = vpop.eup %11341  ;;  %5274 = vadd.xlane.f32.xlu1 %v5273_v25  ;;  %v5270_v2 = vsel %vm1397_vm3, %v15745_v14, 0.0  ;;  %v5458_v29 = vmul.f32 %v15745_v14, %v15745_v14  ;;  %v4604_v27 = vadd.f32 1.0, %v11340_v44  ;;  %v6611_v25 = vld [vmem:[%s19193_s7 + $0x18] sm:$0xff] }
 0x452   :  { %v11344_v47 = vpop.eup %11343  ;;  %5271 = vadd.xlane.f32.xlu0 %v5270_v2  ;;  %v4605_v32 = vadd.f32 1.0, %v11342_v42  ;;  %v4481_v33 = vmul.f32 0.70710677, %v4353_v53  ;;  %v5529_v3 = vsel %vm1397_vm3, %v5459_v21, 0.0  ;;  %v4417_v50 = vmul.f32 0.5, %v4353_v53 }
 0x453   :  { %v4668_v58 = vmul.f32 %v4604_v27, %v4412_v45  ;;  %v4352_v9 = vmul.f32 %v11344_v47, %v4160_v41  ;;  %v5526_v0 = vsel %vm1397_vm3, %v5458_v29, 0.0  ;;  %v6610_v41 = vld [vmem:[%s19193_s7 + $0x10] sm:$0xff] }
 0x454   :  { %v4669_v51 = vmul.f32 %v4605_v32, %v4413_v19  ;;  %11349 = verf.f32 %v4481_v33  ;;  %v10769_v42 = vpack.c.bf16 %v6611_v25, %v6610_v41 }
 0x455   :  { %5530 = vadd.xlane.f32.xlu1 %v5529_v3  ;;  %10632 = vmatprep.mubr.msk.f32.mxu1 %vm1397_vm3, %v4668_v58  ;;  %v4480_v30 = vmul.f32 0.70710677, %v4352_v9  ;;  %v11346_v13 = vpop.eup %11345  ;;  %v4416_v63 = vmul.f32 0.5, %v4352_v9 }
 0x456   :  { %v10553_v22 = vpop.f32.mrb[100].mxu1  ;;  %5527 = vadd.xlane.f32.xlu0 %v5526_v0  ;;  %10633 = vmatmul.mubr.msk.f32.gmra.mrb[154].mxu1 %vm1397_vm3, %v4669_v51  ;;  %v4607_v54 = vadd.f32 1.0, %v11346_v13 }
 0x457   :  { %v15764_v24 = vadd.f32 %v10553_v22, %v15692_v23  ;;  %v4965_v10 = vpop.f32.mrb[101].mxu1  ;;  %11351 = verf.f32 %v4480_v30  ;;  %10770 = vmatprep.subr.bf16.mxu0 %v10769_v42 }
 0x458   :  { %v15767_v52 = vadd.f32 %v15692_v23, %v4965_v10  ;;  %v4671_v20 = vmul.f32 %v4607_v54, %v4415_v49  ;;  %10772 = vmatpush3.bf16.msra.mxu0 %v10769_v42 }
 0x459   :  { %v11348_v35 = vpop.eup %11347  ;;  %v5279_v28 = vsel %vm1397_vm3, %v15764_v24, 0.0  ;;  %v5461_v7 = vmul.f32 %v15764_v24, %v15764_v24 }
 0x45a   :  { %5280 = vadd.xlane.f32.xlu1 %v5279_v28  ;;  %v5276_v40 = vsel %vm1397_vm3, %v15767_v52, 0.0  ;;  %v5460_v43 = vmul.f32 %v15767_v52, %v15767_v52  ;;  %v4606_v38 = vadd.f32 1.0, %v11348_v35 }
 0x45b   :  { %5277 = vadd.xlane.f32.xlu0 %v5276_v40  ;;  %v5535_v18 = vsel %vm1397_vm3, %v5461_v7, 0.0 }
 0x45c   :  { %v4670_v57 = vmul.f32 %v4606_v38, %v4414_v6  ;;  %v5532_v26 = vsel %vm1397_vm3, %v5460_v43, 0.0 }
 0x45e   :  { %v11350_v56 = vpop.eup %11349  ;;  %5536 = vadd.xlane.f32.xlu1 %v5535_v18  ;;  %10635 = vmatprep.mubr.msk.f32.mxu1 %vm1397_vm3, %v4670_v57 }
 0x45f   :  { %v10556_v39 = vpop.f32.mrb[102].mxu1  ;;  %5533 = vadd.xlane.f32.xlu0 %v5532_v26  ;;  %10636 = vmatmul.mubr.msk.f32.gmra.mrb[156].mxu1 %vm1397_vm3, %v4671_v20  ;;  %v4609_v48 = vadd.f32 1.0, %v11350_v56 }
 0x460   :  { %v15783_v31 = vadd.f32 %v10556_v39, %v15692_v23  ;;  %v4975_v16 = vpop.f32.mrb[103].mxu1 }
 0x461   :  { %v11352_v11 = vpop.eup %11351  ;;  %v15786_v62 = vadd.f32 %v15692_v23, %v4975_v16  ;;  %v4673_v5 = vmul.f32 %v4609_v48, %v4417_v50 }
 0x462   :  { %v5285_v15 = vsel %vm1397_vm3, %v15783_v31, 0.0  ;;  %v5463_v60 = vmul.f32 %v15783_v31, %v15783_v31  ;;  %v4608_v36 = vadd.f32 1.0, %v11352_v11 }
 0x463   :  { %5286 = vadd.xlane.f32.xlu1 %v5285_v15  ;;  %v5282_v59 = vsel %vm1397_vm3, %v15786_v62, 0.0  ;;  %v5462_v8 = vmul.f32 %v15786_v62, %v15786_v62 }
 0x464   :  { %5283 = vadd.xlane.f32.xlu0 %v5282_v59  ;;  %v4672_v34 = vmul.f32 %v4608_v36, %v4416_v63  ;;  %v5541_v37 = vsel %vm1397_vm3, %v5463_v60, 0.0 }
 0x465   :  { %v5538_v55 = vsel %vm1397_vm3, %v5462_v8, 0.0 }
 0x466   :  { %10638 = vmatprep.mubr.msk.f32.mxu1 %vm1397_vm3, %v4672_v34 }
 0x467   :  { %5542 = vadd.xlane.f32.xlu1 %v5541_v37  ;;  %10639 = vmatmul.mubr.msk.f32.gmra.mrb[158].mxu1 %vm1397_vm3, %v4673_v5 }
 0x468   :  { %5539 = vadd.xlane.f32.xlu0 %v5538_v55 }
 0x46c   :  { %v10559_v1 = vpop.f32.mrb[104].mxu1 }
 0x46d   :  { %v15801_v12 = vadd.f32 %v10559_v1, %v15692_v23  ;;  %v4985_v46 = vpop.f32.mrb[105].mxu1 }
 0x46e   :  { %v15804_v44 = vadd.f32 %v15692_v23, %v4985_v46 }
 0x46f   :  { %v5291_v21 = vsel %vm1397_vm3, %v15801_v12, 0.0  ;;  %v5465_v53 = vmul.f32 %v15801_v12, %v15801_v12 }
 0x470   :  { %5292 = vadd.xlane.f32.xlu1 %v5291_v21  ;;  %v5288_v2 = vsel %vm1397_vm3, %v15804_v44, 0.0  ;;  %v5464_v29 = vmul.f32 %v15804_v44, %v15804_v44 }
 0x471   :  { %5289 = vadd.xlane.f32.xlu0 %v5288_v2  ;;  %v5547_v45 = vsel %vm1397_vm3, %v5465_v53, 0.0 }
 0x472   :  { %v5544_v27 = vsel %vm1397_vm3, %v5464_v29, 0.0 }
 0x474   :  { %5548 = vadd.xlane.f32.xlu1 %v5547_v45 }
 0x475   :  { %5545 = vadd.xlane.f32.xlu0 %v5544_v27 }
 0x476   :  { %v10562_v47 = vpop.f32.mrb[106].mxu1 }
 0x477   :  { %v15823_v19 = vadd.f32 %v10562_v47, %v15692_v23  ;;  %v4995_v32 = vpop.f32.mrb[107].mxu1 }
 0x478   :  { %v15826_v33 = vadd.f32 %v15692_v23, %v4995_v32 }
 0x479   :  { %v5297_v58 = vsel %vm1397_vm3, %v15823_v19, 0.0  ;;  %v5467_v9 = vmul.f32 %v15823_v19, %v15823_v19 }
 0x47a   :  { %5298 = vadd.xlane.f32.xlu1 %v5297_v58  ;;  %v5294_v3 = vsel %vm1397_vm3, %v15826_v33, 0.0  ;;  %v5466_v51 = vmul.f32 %v15826_v33, %v15826_v33 }
 0x47b   :  { %5295 = vadd.xlane.f32.xlu0 %v5294_v3  ;;  %v5553_v0 = vsel %vm1397_vm3, %v5467_v9, 0.0 }
 0x47c   :  { %v5550_v30 = vsel %vm1397_vm3, %v5466_v51, 0.0 }
 0x47e   :  { %5554 = vadd.xlane.f32.xlu1 %v5553_v0 }
 0x47f   :  { %5551 = vadd.xlane.f32.xlu0 %v5550_v30 }
 0x481   :  { %v10565_v13 = vpop.f32.mrb[108].mxu1 }
 0x482   :  { %v15839_v22 = vadd.f32 %v10565_v13, %v15692_v23  ;;  %v5005_v10 = vpop.f32.mrb[109].mxu1 }
 0x483   :  { %v15842_v35 = vadd.f32 %v15692_v23, %v5005_v10 }
 0x484   :  { %v5303_v28 = vsel %vm1397_vm3, %v15839_v22, 0.0  ;;  %v5469_v7 = vmul.f32 %v15839_v22, %v15839_v22 }
 0x485   :  { %5304 = vadd.xlane.f32.xlu1 %v5303_v28  ;;  %v5300_v54 = vsel %vm1397_vm3, %v15842_v35, 0.0  ;;  %v5468_v40 = vmul.f32 %v15842_v35, %v15842_v35 }
 0x486   :  { %5301 = vadd.xlane.f32.xlu0 %v5300_v54  ;;  %v5559_v43 = vsel %vm1397_vm3, %v5469_v7, 0.0 }
 0x487   :  { %v5556_v6 = vsel %vm1397_vm3, %v5468_v40, 0.0 }
 0x489   :  { %5560 = vadd.xlane.f32.xlu1 %v5559_v43 }
 0x48a   :  { %5557 = vadd.xlane.f32.xlu0 %v5556_v6  ;;  %v10568_v38 = vpop.f32.mrb[110].mxu1 }
 0x48b   :  { %v15855_v49 = vadd.f32 %v10568_v38, %v15692_v23  ;;  %v5015_v57 = vpop.f32.mrb[111].mxu1 }
 0x48c   :  { %v15858_v18 = vadd.f32 %v15692_v23, %v5015_v57 }
 0x48d   :  { %v5309_v20 = vsel %vm1397_vm3, %v15855_v49, 0.0  ;;  %v5471_v56 = vmul.f32 %v15855_v49, %v15855_v49 }
 0x48e   :  { %5310 = vadd.xlane.f32.xlu1 %v5309_v20  ;;  %v5306_v26 = vsel %vm1397_vm3, %v15858_v18, 0.0  ;;  %v5470_v39 = vmul.f32 %v15858_v18, %v15858_v18 }
 0x48f   :  { %5307 = vadd.xlane.f32.xlu0 %v5306_v26  ;;  %v5565_v16 = vsel %vm1397_vm3, %v5471_v56, 0.0 }
 0x490   :  { %v5562_v11 = vsel %vm1397_vm3, %v5470_v39, 0.0 }
 0x492   :  { %5566 = vadd.xlane.f32.xlu1 %v5565_v16 }
 0x493   :  { %5563 = vadd.xlane.f32.xlu0 %v5562_v11 }
 0x494   :  { %v10571_v48 = vpop.f32.mrb[112].mxu1 }
 0x495   :  { %v15871_v15 = vadd.f32 %v10571_v48, %v15692_v23  ;;  %v5025_v60 = vpop.f32.mrb[113].mxu1 }
 0x496   :  { %v15874_v63 = vadd.f32 %v15692_v23, %v5025_v60 }
 0x497   :  { %v5315_v36 = vsel %vm1397_vm3, %v15871_v15, 0.0  ;;  %v5473_v59 = vmul.f32 %v15871_v15, %v15871_v15 }
 0x498   :  { %5316 = vadd.xlane.f32.xlu1 %v5315_v36  ;;  %v5312_v8 = vsel %vm1397_vm3, %v15874_v63, 0.0  ;;  %v5472_v50 = vmul.f32 %v15874_v63, %v15874_v63 }
 0x499   :  { %5313 = vadd.xlane.f32.xlu0 %v5312_v8  ;;  %v5571_v34 = vsel %vm1397_vm3, %v5473_v59, 0.0 }
 0x49a   :  { %v5568_v1 = vsel %vm1397_vm3, %v5472_v50, 0.0 }
 0x49b   :  { %v10574_v5 = vpop.f32.mrb[114].mxu1 }
 0x49c   :  { %5572 = vadd.xlane.f32.xlu1 %v5571_v34  ;;  %v15886_v37 = vadd.f32 %v10574_v5, %v15692_v23  ;;  %v5035_v55 = vpop.f32.mrb[115].mxu1 }
 0x49d   :  { %v15890_v46 = vadd.f32 %v15692_v23, %v5035_v55  ;;  %5569 = vadd.xlane.f32.xlu0 %v5568_v1 }
 0x49e   :  { %v5321_v41 = vsel %vm1397_vm3, %v15886_v37, 0.0  ;;  %v5475_v21 = vmul.f32 %v15886_v37, %v15886_v37 }
 0x49f   :  { %v5318_v25 = vsel %vm1397_vm3, %v15890_v46, 0.0  ;;  %v5474_v53 = vmul.f32 %v15890_v46, %v15890_v46 }
 0x4a0   :  { %5322 = vadd.xlane.f32.xlu1 %v5321_v41  ;;  %v10577_v42 = vpop.f32.mrb[116].mxu1  ;;  %v5577_v45 = vsel %vm1397_vm3, %v5475_v21, 0.0 }
 0x4a1   :  { %5319 = vadd.xlane.f32.xlu0 %v5318_v25  ;;  %v15901_v2 = vadd.f32 %v10577_v42, %v15692_v23  ;;  %v5045_v29 = vpop.f32.mrb[117].mxu1  ;;  %v5574_v47 = vsel %vm1397_vm3, %v5474_v53, 0.0 }
 0x4a2   :  { %v15905_v27 = vadd.f32 %v15692_v23, %v5045_v29 }
 0x4a3   :  { %v5327_v32 = vsel %vm1397_vm3, %v15901_v2, 0.0  ;;  %v5477_v9 = vmul.f32 %v15901_v2, %v15901_v2 }
 0x4a4   :  { %5578 = vadd.xlane.f32.xlu1 %v5577_v45  ;;  %v5324_v58 = vsel %vm1397_vm3, %v15905_v27, 0.0  ;;  %v5476_v51 = vmul.f32 %v15905_v27, %v15905_v27 }
 0x4a5   :  { %5575 = vadd.xlane.f32.xlu0 %v5574_v47  ;;  %v5583_v10 = vsel %vm1397_vm3, %v5477_v9, 0.0 }
 0x4a6   :  { %v5580_v28 = vsel %vm1397_vm3, %v5476_v51, 0.0 }
 0x4a8   :  { %5328 = vadd.xlane.f32.xlu1 %v5327_v32  ;;  %v10580_v3 = vpop.f32.mrb[118].mxu1 }
 0x4a9   :  { %5325 = vadd.xlane.f32.xlu0 %v5324_v58  ;;  %v15917_v0 = vadd.f32 %v10580_v3, %v15692_v23  ;;  %v5055_v30 = vpop.f32.mrb[119].mxu1 }
 0x4aa   :  { %v15920_v13 = vadd.f32 %v15692_v23, %v5055_v30 }
 0x4ab   :  { %v5333_v7 = vsel %vm1397_vm3, %v15917_v0, 0.0  ;;  %v5479_v40 = vmul.f32 %v15917_v0, %v15917_v0 }
 0x4ac   :  { %5584 = vadd.xlane.f32.xlu1 %v5583_v10  ;;  %v5330_v54 = vsel %vm1397_vm3, %v15920_v13, 0.0  ;;  %v5478_v38 = vmul.f32 %v15920_v13, %v15920_v13 }
 0x4ad   :  { %5581 = vadd.xlane.f32.xlu0 %v5580_v28  ;;  %v5589_v56 = vsel %vm1397_vm3, %v5479_v40, 0.0 }
 0x4ae   :  { %v5586_v26 = vsel %vm1397_vm3, %v5478_v38, 0.0  ;;  %v15992_v38 = vpop.permute.xlu0 %8408 }
 0x4af   :  { %v10583_v43 = vpop.f32.mrb[120].mxu1  ;;  %19553 = vst [vmem:[#allocation91_spill] sm:$0xff] %v15992_v38 }
 0x4b0   :  { %5334 = vadd.xlane.f32.xlu1 %v5333_v7  ;;  %v5065_v6 = vpop.f32.mrb[121].mxu1  ;;  %v15933_v57 = vadd.f32 %v10583_v43, %v15692_v23  ;;  %v15988_v43 = vpop.permute.xlu1 %8410 }
 0x4b1   :  { %5331 = vadd.xlane.f32.xlu0 %v5330_v54  ;;  %v15936_v20 = vadd.f32 %v15692_v23, %v5065_v6  ;;  %19552 = vst [vmem:[#allocation87_spill] sm:$0xff] %v15988_v43 }
 0x4b2   :  { %v5339_v39 = vsel %vm1397_vm3, %v15933_v57, 0.0  ;;  %v5481_v11 = vmul.f32 %v15933_v57, %v15933_v57 }
 0x4b3   :  { %v5336_v16 = vsel %vm1397_vm3, %v15936_v20, 0.0  ;;  %v5480_v36 = vmul.f32 %v15936_v20, %v15936_v20 }
 0x4b4   :  { %5590 = vadd.xlane.f32.xlu1 %v5589_v56  ;;  %v5595_v50 = vsel %vm1397_vm3, %v5481_v11, 0.0 }
 0x4b5   :  { %5587 = vadd.xlane.f32.xlu0 %v5586_v26  ;;  %v5592_v5 = vsel %vm1397_vm3, %v5480_v36, 0.0 }
 0x4b7   :  { %v10586_v48 = vpop.f32.mrb[122].mxu1 }
 0x4b8   :  { %5340 = vadd.xlane.f32.xlu1 %v5339_v39  ;;  %v5075_v60 = vpop.f32.mrb[123].mxu1  ;;  %v15949_v59 = vadd.f32 %v10586_v48, %v15692_v23 }
 0x4b9   :  { %5337 = vadd.xlane.f32.xlu0 %v5336_v16  ;;  %v15952_v8 = vadd.f32 %v15692_v23, %v5075_v60 }
 0x4ba   :  { %v5345_v1 = vsel %vm1397_vm3, %v15949_v59, 0.0  ;;  %v5483_v25 = vmul.f32 %v15949_v59, %v15949_v59 }
 0x4bb   :  { %v10589_v34 = vpop.f32.mrb[124].mxu1  ;;  %v5342_v41 = vsel %vm1397_vm3, %v15952_v8, 0.0  ;;  %v5482_v21 = vmul.f32 %v15952_v8, %v15952_v8 }
 0x4bc   :  { %5596 = vadd.xlane.f32.xlu1 %v5595_v50  ;;  %v5085_v55 = vpop.f32.mrb[125].mxu1  ;;  %v15965_v42 = vadd.f32 %v10589_v34, %v15692_v23  ;;  %v5601_v47 = vsel %vm1397_vm3, %v5483_v25, 0.0 }
 0x4bd   :  { %5593 = vadd.xlane.f32.xlu0 %v5592_v5  ;;  %v15968_v45 = vadd.f32 %v15692_v23, %v5085_v55  ;;  %v5598_v32 = vsel %vm1397_vm3, %v5482_v21, 0.0 }
 0x4be   :  { %v5351_v58 = vsel %vm1397_vm3, %v15965_v42, 0.0  ;;  %v5485_v3 = vmul.f32 %v15965_v42, %v15965_v42 }
 0x4bf   :  { %v5348_v9 = vsel %vm1397_vm3, %v15968_v45, 0.0  ;;  %v5484_v30 = vmul.f32 %v15968_v45, %v15968_v45 }
 0x4c0   :  { %5346 = vadd.xlane.f32.xlu1 %v5345_v1  ;;  %v10592_v53 = vpop.f32.mrb[126].mxu1  ;;  %v5607_v54 = vsel %vm1397_vm3, %v5485_v3, 0.0 }
 0x4c1   :  { %5343 = vadd.xlane.f32.xlu0 %v5342_v41  ;;  %v5095_v29 = vpop.f32.mrb[127].mxu1  ;;  %v15981_v28 = vadd.f32 %v10592_v53, %v15692_v23  ;;  %v5604_v40 = vsel %vm1397_vm3, %v5484_v30, 0.0 }
 0x4c2   :  { %v15984_v7 = vadd.f32 %v15692_v23, %v5095_v29 }
 0x4c3   :  { %v5357_v6 = vsel %vm1397_vm3, %v15981_v28, 0.0  ;;  %v5487_v26 = vmul.f32 %v15981_v28, %v15981_v28 }
 0x4c4   :  { %5602 = vadd.xlane.f32.xlu1 %v5601_v47  ;;  %v5354_v56 = vsel %vm1397_vm3, %v15984_v7, 0.0  ;;  %v5486_v16 = vmul.f32 %v15984_v7, %v15984_v7 }
 0x4c5   :  { %5599 = vadd.xlane.f32.xlu0 %v5598_v32  ;;  %v5613_v5 = vsel %vm1397_vm3, %v5487_v26, 0.0 }
 0x4c6   :  { %v5610_v41 = vsel %vm1397_vm3, %v5486_v16, 0.0 }
 0x4c7   :  { %v10595_v51 = vpop.f32.mrb[128].mxu1 }
 0x4c8   :  { %5352 = vadd.xlane.f32.xlu1 %v5351_v58  ;;  %v5105_v10 = vpop.f32.mrb[129].mxu1  ;;  %v16001_v48 = vadd.f32 %v10595_v51, %v15692_v23 }
 0x4c9   :  { %5349 = vadd.xlane.f32.xlu0 %v5348_v9  ;;  %v16004_v36 = vadd.f32 %v15692_v23, %v5105_v10 }
 0x4ca   :  { %v5363_v21 = vsel %vm1397_vm3, %v16001_v48, 0.0  ;;  %v5489_v9 = vmul.f32 %v16001_v48, %v16001_v48 }
 0x4cb   :  { %v5360_v29 = vsel %vm1397_vm3, %v16004_v36, 0.0  ;;  %v5488_v30 = vmul.f32 %v16004_v36, %v16004_v36 }
 0x4cc   :  { %5608 = vadd.xlane.f32.xlu1 %v5607_v54 }
 0x4cd   :  { %5605 = vadd.xlane.f32.xlu0 %v5604_v40 }
 0x4cf   :  { %v10598_v39 = vpop.f32.mrb[130].mxu1  ;;  %v5269_v60 = vpop.xlane.xlu1 %5268 }
 0x4d0   :  { %5358 = vadd.xlane.f32.xlu1 %v5357_v6  ;;  %v5115_v11 = vpop.f32.mrb[131].mxu1  ;;  %v16006_v50 = vmul.f32 0.03125, %v5269_v60  ;;  %v16025_v40 = vadd.f32 %v10598_v39, %v15692_v23  ;;  %v5619_v60 = vsel %vm1397_vm3, %v5489_v9, 0.0 }
 0x4d1   :  { %5355 = vadd.xlane.f32.xlu0 %v5354_v56  ;;  %v5266_v34 = vpop.xlane.xlu0 %5265  ;;  %v16028_v26 = vadd.f32 %v15692_v23, %v5115_v11 }
 0x4d2   :  { %v16009_v1 = vmul.f32 0.03125, %v5266_v34  ;;  %v5841_v47 = vmul.f32 %v16006_v50, %v16006_v50  ;;  %v5491_v11 = vmul.f32 %v16025_v40, %v16025_v40 }
 0x4d3   :  { %v10601_v55 = vpop.f32.mrb[132].mxu1  ;;  %v5525_v53 = vpop.xlane.xlu1 %5524  ;;  %19554 = vst [vmem:[#allocation90_spill] sm:$0xff] %v16028_v26  ;;  %v5366_v39 = vsel %vm1397_vm3, %v16028_v26, 0.0 }
 0x4d4   :  { %5614 = vadd.xlane.f32.xlu1 %v5613_v5  ;;  %v5125_v25 = vpop.f32.mrb[133].mxu1  ;;  %v5777_v32 = vmul.f32 0.03125, %v5525_v53  ;;  %v5840_v3 = vmul.f32 %v16009_v1, %v16009_v1  ;;  %v5616_v5 = vsel %vm1397_vm3, %v5488_v30, 0.0 }
 0x4d5   :  { %5611 = vadd.xlane.f32.xlu0 %v5610_v41  ;;  %v5522_v58 = vpop.xlane.xlu0 %5521 }
 0x4d6   :  { %v5776_v51 = vmul.f32 0.03125, %v5522_v58  ;;  %v5905_v10 = vsub.f32 %v5777_v32, %v5841_v47  ;;  %v16041_v32 = vadd.f32 %v10601_v55, %v15692_v23 }
 0x4d8   :  { %5364 = vadd.xlane.f32.xlu1 %v5363_v21  ;;  %v10604_v54 = vpop.f32.mrb[134].mxu1  ;;  %v5904_v6 = vsub.f32 %v5776_v51, %v5840_v3  ;;  %v5969_v16 = vmax.f32 %v5905_v10, 0.0  ;;  %v5369_v21 = vsel %vm1397_vm3, %v16025_v40, 0.0  ;;  %19555 = vst [vmem:[#allocation93_spill] sm:$0xff] %v16041_v32  ;;  %v16046_v51 = vadd.f32 %v15692_v23, %v5125_v25 }
 0x4d9   :  { %5361 = vadd.xlane.f32.xlu0 %v5360_v29  ;;  %v5135_v56 = vpop.f32.mrb[135].mxu1  ;;  %v5490_v29 = vmul.f32 %v16028_v26, %v16028_v26  ;;  %v5375_v55 = vsel %vm1397_vm3, %v16041_v32, 0.0  ;;  %v16069_v38 = vadd.f32 %v10604_v54, %v15692_v23 }
 0x4da   :  { %v5968_v34 = vmax.f32 %v5904_v6, 0.0  ;;  %v6097_v41 = vadd.f32 1e-05, %v5969_v16  ;;  %19556 = vst [vmem:[#allocation92_spill] sm:$0xff] %v16046_v51  ;;  %v5625_v6 = vsel %vm1397_vm3, %v5491_v11, 0.0  ;;  %v5372_v25 = vsel %vm1397_vm3, %v16046_v51, 0.0 }
 0x4db   :  { %v5622_v16 = vsel %vm1397_vm3, %v5490_v29, 0.0  ;;  %v5493_v11 = vmul.f32 %v16041_v32, %v16041_v32  ;;  %19557 = vst [vmem:[#allocation95_spill] sm:$0xff] %v16069_v38 }
 0x4dc   :  { %5620 = vadd.xlane.f32.xlu1 %v5619_v60  ;;  %v6096_v53 = vadd.f32 1e-05, %v5968_v34  ;;  %11353 = vrsqrt.f32 %v6097_v41 }
 0x4dd   :  { %5617 = vadd.xlane.f32.xlu0 %v5616_v5  ;;  %v5631_v54 = vsel %vm1397_vm3, %v5493_v11, 0.0 }
 0x4de   :  { %11355 = vrsqrt.f32 %v6096_v53  ;;  %v5275_v47 = vpop.xlane.xlu1 %5274 }
 0x4df   :  { %v16043_v58 = vmul.f32 0.03125, %v5275_v47  ;;  %v5272_v9 = vpop.xlane.xlu0 %5271  ;;  %v10607_v3 = vpop.f32.mrb[136].mxu1 }
 0x4e0   :  { %5370 = vadd.xlane.f32.xlu1 %v5369_v21  ;;  %v16048_v30 = vmul.f32 0.03125, %v5272_v9  ;;  %v5145_v10 = vpop.f32.mrb[137].mxu1  ;;  %v5492_v9 = vmul.f32 %v16046_v51, %v16046_v51 }
 0x4e1   :  { %5367 = vadd.xlane.f32.xlu0 %v5366_v39  ;;  %v5843_v34 = vmul.f32 %v16043_v58, %v16043_v58  ;;  %v6033_v39 = vsub.f32 %v15704_v4, %v16006_v50  ;;  %v6032_v50 = vsub.f32 %v15709_v17, %v16009_v1 }
 0x4e2   :  { %v5531_v60 = vpop.xlane.xlu1 %5530  ;;  %v5842_v21 = vmul.f32 %v16048_v30, %v16048_v30 }
 0x4e3   :  { %v5779_v5 = vmul.f32 0.03125, %v5531_v60  ;;  %v5528_v41 = vpop.xlane.xlu0 %5527 }
 0x4e4   :  { %5626 = vadd.xlane.f32.xlu1 %v5625_v6  ;;  %v5778_v53 = vmul.f32 0.03125, %v5528_v41 }
 0x4e5   :  { %5623 = vadd.xlane.f32.xlu0 %v5622_v16  ;;  %v5907_v29 = vsub.f32 %v5779_v5, %v5843_v34 }
 0x4e6   :  { %v11354_v47 = vpop.eup %11353  ;;  %v5906_v6 = vsub.f32 %v5778_v53, %v5842_v21 }
 0x4e7   :  { %v16066_v60 = vmul.f32 %v11354_v47, %v6033_v39  ;;  %v5971_v41 = vmax.f32 %v5907_v29, 0.0  ;;  %v5281_v43 = vpop.xlane.xlu1 %5280  ;;  %v16071_v4 = vpop.f32.mrb[138].mxu1  ;;  %v5628_v47 = vsel %vm1397_vm3, %v5492_v9, 0.0  ;;  %v5495_v9 = vmul.f32 %v16069_v38, %v16069_v38 }
 0x4e8   :  { %5376 = vadd.xlane.f32.xlu1 %v5375_v55  ;;  %v11356_v16 = vpop.eup %11355  ;;  %v16076_v55 = vadd.f32 %v15692_v23, %v5135_v56  ;;  %v5970_v34 = vmax.f32 %v5906_v6, 0.0  ;;  %v16078_v5 = vmul.f32 0.03125, %v5281_v43  ;;  %v5278_v21 = vpop.xlane.xlu0 %5277  ;;  %v5381_v43 = vsel %vm1397_vm3, %v16069_v38, 0.0 }
 0x4e9   :  { %5373 = vadd.xlane.f32.xlu0 %v5372_v25  ;;  %v16080_v53 = vpop.f32.mrb[139].mxu1  ;;  %v6353_v25 = vmul.f32 0.70710677, %v16066_v60  ;;  %v6099_v39 = vadd.f32 1e-05, %v5971_v41  ;;  %v16084_v29 = vmul.f32 0.03125, %v5278_v21  ;;  %v16087_v1 = vmul.f32 %v11356_v16, %v6032_v50 }
 0x4ea   :  { %19558 = vst [vmem:[#allocation94_spill] sm:$0xff] %v16076_v55  ;;  %v6098_v17 = vadd.f32 1e-05, %v5970_v34  ;;  %v5378_v6 = vsel %vm1397_vm3, %v16076_v55, 0.0  ;;  %v5845_v11 = vmul.f32 %v16078_v5, %v16078_v5  ;;  %v5494_v34 = vmul.f32 %v16076_v55, %v16076_v55 }
 0x4eb   :  { %11357 = verf.f32 %v6353_v25  ;;  %v5537_v56 = vpop.xlane.xlu1 %5536  ;;  %v5844_v16 = vmul.f32 %v16084_v29, %v16084_v29 }
 0x4ec   :  { %5632 = vadd.xlane.f32.xlu1 %v5631_v54  ;;  %11359 = vrsqrt.f32 %v6099_v39  ;;  %v5781_v41 = vmul.f32 0.03125, %v5537_v56  ;;  %v5534_v21 = vpop.xlane.xlu0 %5533  ;;  %v6352_v54 = vmul.f32 0.70710677, %v16087_v1  ;;  %v16103_v39 = vadd.f32 %v10607_v3, %v15692_v23 }
 0x4ed   :  { %5629 = vadd.xlane.f32.xlu0 %v5628_v47  ;;  %11361 = vrsqrt.f32 %v6098_v17  ;;  %v5780_v50 = vmul.f32 0.03125, %v5534_v21  ;;  %v16108_v56 = vadd.f32 %v15692_v23, %v5145_v10  ;;  %v5634_v3 = vsel %vm1397_vm3, %v5494_v34, 0.0 }
 0x4ee   :  { %v5909_v25 = vsub.f32 %v5781_v41, %v5845_v11  ;;  %19559 = vst [vmem:[#allocation97_spill] sm:$0xff] %v16103_v39  ;;  %11363 = verf.f32 %v6352_v54  ;;  %v5387_v10 = vsel %vm1397_vm3, %v16103_v39, 0.0  ;;  %v6035_v54 = vsub.f32 %v15742_v61, %v16043_v58 }
 0x4ef   :  { %v5908_v47 = vsub.f32 %v5780_v50, %v5844_v16  ;;  %19560 = vst [vmem:[#allocation96_spill] sm:$0xff] %v16108_v56  ;;  %v6034_v61 = vsub.f32 %v15745_v14, %v16048_v30 }
 0x4f0   :  { %5382 = vadd.xlane.f32.xlu1 %v5381_v43  ;;  %v16105_v17 = vpop.f32.mrb[140].mxu1  ;;  %v5973_v38 = vmax.f32 %v5909_v25, 0.0  ;;  %v5287_v51 = vpop.xlane.xlu1 %5286  ;;  %v5637_v43 = vsel %vm1397_vm3, %v5495_v9, 0.0  ;;  %v5497_v9 = vmul.f32 %v16103_v39, %v16103_v39 }
 0x4f1   :  { %5379 = vadd.xlane.f32.xlu0 %v5378_v6  ;;  %v16110_v21 = vpop.f32.mrb[141].mxu1  ;;  %v5972_v11 = vmax.f32 %v5908_v47, 0.0  ;;  %v16113_v41 = vmul.f32 0.03125, %v5287_v51  ;;  %v5284_v6 = vpop.xlane.xlu0 %5283  ;;  %v5384_v51 = vsel %vm1397_vm3, %v16108_v56, 0.0 }
 0x4f2   :  { %v6101_v16 = vadd.f32 1e-05, %v5973_v38  ;;  %v16116_v50 = vmul.f32 0.03125, %v5284_v6 }
 0x4f3   :  { %v6100_v25 = vadd.f32 1e-05, %v5972_v11  ;;  %v5847_v38 = vmul.f32 %v16113_v41, %v16113_v41 }
 0x4f4   :  { %5638 = vadd.xlane.f32.xlu1 %v5637_v43  ;;  %11365 = vrsqrt.f32 %v6101_v16  ;;  %v5543_v47 = vpop.xlane.xlu1 %5542  ;;  %v5496_v43 = vmul.f32 %v16108_v56, %v16108_v56  ;;  %v5846_v58 = vmul.f32 %v16116_v50, %v16116_v50 }
 0x4f5   :  { %5635 = vadd.xlane.f32.xlu0 %v5634_v3  ;;  %v11358_v34 = vpop.eup %11357  ;;  %11367 = vrsqrt.f32 %v6100_v25  ;;  %v5783_v11 = vmul.f32 0.03125, %v5543_v47  ;;  %v5540_v6 = vpop.xlane.xlu0 %5539  ;;  %v16136_v25 = vadd.f32 %v16071_v4, %v15692_v23  ;;  %v16142_v47 = vadd.f32 %v15692_v23, %v16080_v53 }
 0x4f6   :  { %v11360_v3 = vpop.eup %11359  ;;  %v5782_v16 = vmul.f32 0.03125, %v5540_v6  ;;  %v5643_v6 = vsel %vm1397_vm3, %v5497_v9, 0.0  ;;  %v6037_v53 = vsub.f32 %v15764_v24, %v16078_v5  ;;  %v6288_v9 = vmul.f32 0.5, %v16087_v1 }
 0x4f7   :  { %v11362_v39 = vpop.eup %11361  ;;  %19561 = vst [vmem:[#allocation99_spill] sm:$0xff] %v16136_v25  ;;  %v5911_v55 = vsub.f32 %v5783_v11, %v5847_v38  ;;  %v16138_v56 = vmul.f32 %v11360_v3, %v6035_v54  ;;  %19562 = vst [vmem:[#allocation98_spill] sm:$0xff] %v16142_v47  ;;  %v6289_v38 = vmul.f32 0.5, %v16066_v60  ;;  %v6481_v3 = vadd.f32 1.0, %v11358_v34 }
 0x4f8   :  { %5388 = vadd.xlane.f32.xlu1 %v5387_v10  ;;  %v10616_v32 = vpop.f32.mrb[142].mxu1  ;;  %v5910_v14 = vsub.f32 %v5782_v16, %v5846_v58  ;;  %v16146_v10 = vmul.f32 %v11362_v39, %v6034_v61  ;;  %v11364_v26 = vpop.eup %11363  ;;  %v5393_v39 = vsel %vm1397_vm3, %v16136_v25, 0.0  ;;  %v5390_v60 = vsel %vm1397_vm3, %v16142_v47, 0.0 }
 0x4f9   :  { %5385 = vadd.xlane.f32.xlu0 %v5384_v51  ;;  %v16144_v30 = vpop.f32.mrb[143].mxu1  ;;  %v5640_v51 = vsel %vm1397_vm3, %v5496_v43, 0.0  ;;  %v6355_v4 = vmul.f32 0.70710677, %v16138_v56  ;;  %v5975_v54 = vmax.f32 %v5911_v55, 0.0  ;;  %v6480_v61 = vadd.f32 1.0, %v11364_v26 }
 0x4fa   :  { %v5974_v11 = vmax.f32 %v5910_v14, 0.0  ;;  %v6036_v43 = vsub.f32 %v15767_v52, %v16084_v29  ;;  %v6354_v55 = vmul.f32 0.70710677, %v16146_v10  ;;  %v5499_v24 = vmul.f32 %v16136_v25, %v16136_v25 }
 0x4fb   :  { %11369 = verf.f32 %v6355_v4  ;;  %v5498_v5 = vmul.f32 %v16142_v47, %v16142_v47  ;;  %v6544_v58 = vmul.f32 %v6480_v61, %v6288_v9  ;;  %v6103_v26 = vadd.f32 1e-05, %v5975_v54 }
 0x4fc   :  { %5644 = vadd.xlane.f32.xlu1 %v5643_v6  ;;  %v6102_v34 = vadd.f32 1e-05, %v5974_v11  ;;  %v16168_v52 = vadd.f32 %v16105_v17, %v15692_v23  ;;  %v16172_v1 = vadd.f32 %v15692_v23, %v16110_v21  ;;  %v6545_v14 = vmul.f32 %v6481_v3, %v6289_v38 }
 0x4fd   :  { %5641 = vadd.xlane.f32.xlu0 %v5640_v51  ;;  %v5293_v29 = vpop.xlane.xlu1 %5292  ;;  %10649 = vmatprep.mubr.msk.f32.mxu0 %vm1397_vm3, %v6544_v58  ;;  %11371 = verf.f32 %v6354_v55  ;;  %v5649_v21 = vsel %vm1397_vm3, %v5499_v24, 0.0  ;;  %v5646_v38 = vsel %vm1397_vm3, %v5498_v5, 0.0 }
 0x4fe   :  { %v11366_v16 = vpop.eup %11365  ;;  %19563 = vst [vmem:[#allocation101_spill] sm:$0xff] %v16168_v52  ;;  %19564 = vst [vmem:[#allocation100_spill] sm:$0xff] %v16172_v1  ;;  %v16174_v51 = vmul.f32 0.03125, %v5293_v29  ;;  %v5290_v4 = vpop.xlane.xlu0 %5289  ;;  %10650 = vmatmul.mubr.msk.f32.vlgmr.msra.gmra.mrb[64].mxu0 %vm1397_vm3, %v6545_v14  ;;  %11373 = vrsqrt.f32 %v6102_v34  ;;  %v5399_v3 = vsel %vm1397_vm3, %v16168_v52, 0.0  ;;  %v5396_v61 = vsel %vm1397_vm3, %v16172_v1, 0.0 }
 0x4ff   :  { %v11368_v6 = vpop.eup %11367  ;;  %v16177_v11 = vpop.f32.mrb[144].mxu1  ;;  %v16179_v54 = vmul.f32 0.03125, %v5290_v4  ;;  %v16184_v23 = vmul.f32 %v11366_v16, %v6037_v53  ;;  %11375 = vrsqrt.f32 %v6103_v26  ;;  %v16199_v34 = vld [vmem:[%s19192_s6 + $0x1] ss:$0 sm:$0xff]  ;;  %v5500_v5 = vmul.f32 %v16172_v1, %v16172_v1 }
 0x500   :  { %5394 = vadd.xlane.f32.xlu1 %v5393_v39  ;;  %v5185_v17 = vpop.f32.mrb[145].mxu1  ;;  %v16182_v39 = vmul.f32 %v11368_v6, %v6036_v43  ;;  %v5501_v43 = vmul.f32 %v16168_v52, %v16168_v52  ;;  %v5849_v53 = vmul.f32 %v16174_v51, %v16174_v51  ;;  %v16202_v24 = vadd.f32 %v16199_v34, %v10616_v32 }
 0x501   :  { %5391 = vadd.xlane.f32.xlu0 %v5390_v60  ;;  %v5549_v9 = vpop.xlane.xlu1 %5548  ;;  %v5848_v58 = vmul.f32 %v16179_v54, %v16179_v54  ;;  %v6357_v29 = vmul.f32 0.70710677, %v16184_v23  ;;  %v6039_v14 = vsub.f32 %v15783_v31, %v16113_v41  ;;  %v6038_v6 = vsub.f32 %v15786_v62, %v16116_v50 }
 0x502   :  { %v5785_v60 = vmul.f32 0.03125, %v5549_v9  ;;  %v5546_v55 = vpop.xlane.xlu0 %5545  ;;  %19565 = vst [vmem:[#allocation103_spill] sm:$0xff] %v16202_v24  ;;  %v6356_v26 = vmul.f32 0.70710677, %v16182_v39  ;;  %v16217_v9 = vadd.f32 %v16199_v34, %v16144_v30  ;;  %v5652_v52 = vsel %vm1397_vm3, %v5500_v5, 0.0 }
 0x503   :  { %v5784_v16 = vmul.f32 0.03125, %v5546_v55  ;;  %v5503_v31 = vmul.f32 %v16202_v24, %v16202_v24  ;;  %v5405_v30 = vsel %vm1397_vm3, %v16202_v24, 0.0 }
 0x504   :  { %5650 = vadd.xlane.f32.xlu1 %v5649_v21  ;;  %v5913_v4 = vsub.f32 %v5785_v60, %v5849_v53  ;;  %19566 = vst [vmem:[#allocation102_spill] sm:$0xff] %v16217_v9  ;;  %11377 = verf.f32 %v6356_v26 }
 0x505   :  { %5647 = vadd.xlane.f32.xlu0 %v5646_v38  ;;  %v11370_v32 = vpop.eup %11369  ;;  %v5912_v21 = vsub.f32 %v5784_v16, %v5848_v58  ;;  %v5655_v38 = vsel %vm1397_vm3, %v5501_v43, 0.0  ;;  %11379 = verf.f32 %v6357_v29  ;;  %v6291_v43 = vmul.f32 0.5, %v16138_v56 }
 0x506   :  { %v5977_v55 = vmax.f32 %v5913_v4, 0.0  ;;  %v6290_v58 = vmul.f32 0.5, %v16146_v10  ;;  %v6483_v16 = vadd.f32 1.0, %v11370_v32  ;;  %v5502_v29 = vmul.f32 %v16217_v9, %v16217_v9 }
 0x507   :  { %v5299_v1 = vpop.xlane.xlu1 %5298  ;;  %v16222_v62 = vpop.f32.mrb[146].mxu1  ;;  %v5976_v41 = vmax.f32 %v5912_v21, 0.0  ;;  %v16244_v10 = vadd.f32 %v16199_v34, %v5185_v17  ;;  %v6040_v17 = vsub.f32 %v15804_v44, %v16179_v54 }
 0x508   :  { %5400 = vadd.xlane.f32.xlu1 %v5399_v3  ;;  %v16224_v50 = vmul.f32 0.03125, %v5299_v1  ;;  %v5296_v3 = vpop.xlane.xlu0 %5295  ;;  %v16229_v53 = vpop.f32.mrb[147].mxu1  ;;  %v6105_v60 = vadd.f32 1e-05, %v5977_v55  ;;  %v5402_v1 = vsel %vm1397_vm3, %v16217_v9, 0.0  ;;  %v5661_v55 = vsel %vm1397_vm3, %v5503_v31, 0.0 }
 0x509   :  { %5397 = vadd.xlane.f32.xlu0 %v5396_v61  ;;  %v11372_v61 = vpop.eup %11371  ;;  %v16231_v5 = vmul.f32 0.03125, %v5296_v3  ;;  %v6104_v26 = vadd.f32 1e-05, %v5976_v41  ;;  %v16241_v3 = vadd.f32 %v16199_v34, %v16177_v11  ;;  %19568 = vst [vmem:[#allocation70_spill] sm:$0xff] %v16244_v10  ;;  %v6547_v11 = vmul.f32 %v6483_v16, %v6291_v43 }
 0x50a   :  { %v6482_v4 = vadd.f32 1.0, %v11372_v61  ;;  %v11374_v21 = vpop.eup %11373  ;;  %11381 = vrsqrt.f32 %v6105_v60 }
 0x50b   :  { %v5555_v56 = vpop.xlane.xlu1 %5554  ;;  %19567 = vst [vmem:[#allocation104_spill] sm:$0xff] %v16241_v3  ;;  %v11376_v32 = vpop.eup %11375  ;;  %11383 = vrsqrt.f32 %v6104_v26  ;;  %v5850_v31 = vmul.f32 %v16231_v5, %v16231_v5  ;;  %v5658_v26 = vsel %vm1397_vm3, %v5502_v29, 0.0  ;;  %v16256_v47 = vmul.f32 %v11374_v21, %v6038_v6 }
 0x50c   :  { %5656 = vadd.xlane.f32.xlu1 %v5655_v38  ;;  %v5851_v38 = vmul.f32 %v16224_v50, %v16224_v50  ;;  %v5787_v41 = vmul.f32 0.03125, %v5555_v56  ;;  %v5552_v61 = vpop.xlane.xlu0 %5551  ;;  %v6546_v9 = vmul.f32 %v6482_v4, %v6290_v58  ;;  %v16262_v44 = vmul.f32 %v11376_v32, %v6039_v14 }
 0x50d   :  { %5653 = vadd.xlane.f32.xlu0 %v5652_v52  ;;  %v6041_v52 = vsub.f32 %v15801_v12, %v16174_v51  ;;  %v5786_v60 = vmul.f32 0.03125, %v5552_v61  ;;  %v5505_v12 = vmul.f32 %v16241_v3, %v16241_v3  ;;  %v6293_v51 = vmul.f32 0.5, %v16184_v23 }
 0x50e   :  { %v5915_v24 = vsub.f32 %v5787_v41, %v5851_v38  ;;  %10652 = vmatprep.mubr.msk.f32.mxu0 %vm1397_vm3, %v6546_v9  ;;  %v10625_v56 = vpop.f32.mrb[148].mxu1  ;;  %v11378_v54 = vpop.eup %11377  ;;  %v5411_v9 = vsel %vm1397_vm3, %v16241_v3, 0.0  ;;  %v5408_v6 = vsel %vm1397_vm3, %v16244_v10, 0.0  ;;  %v6292_v14 = vmul.f32 0.5, %v16182_v39 }
 0x50f   :  { %v5914_v58 = vsub.f32 %v5786_v60, %v5850_v31  ;;  %10653 = vmatmul.mubr.msk.f32.gmra.mrb[66].mxu0 %vm1397_vm3, %v6547_v11  ;;  %v5205_v43 = vpop.f32.mrb[149].mxu1  ;;  %v11380_v29 = vpop.eup %11379  ;;  %v6484_v32 = vadd.f32 1.0, %v11378_v54  ;;  %v6358_v61 = vmul.f32 0.70710677, %v16256_v47  ;;  %v5667_v60 = vsel %vm1397_vm3, %v5505_v12, 0.0 }
 0x510   :  { %5406 = vadd.xlane.f32.xlu1 %v5405_v30  ;;  %v5979_v30 = vmax.f32 %v5915_v24, 0.0  ;;  %v6485_v41 = vadd.f32 1.0, %v11380_v29  ;;  %v16280_v39 = vadd.f32 %v16199_v34, %v16222_v62  ;;  %v16287_v12 = vadd.f32 %v16199_v34, %v16229_v53 }
 0x511   :  { %5403 = vadd.xlane.f32.xlu0 %v5402_v1  ;;  %v5504_v1 = vmul.f32 %v16244_v10, %v16244_v10  ;;  %v5978_v4 = vmax.f32 %v5914_v58, 0.0  ;;  %v6548_v11 = vmul.f32 %v6484_v32, %v6292_v14  ;;  %v6359_v58 = vmul.f32 0.70710677, %v16262_v44 }
 0x512   :  { %v5305_v16 = vpop.xlane.xlu1 %5304  ;;  %v6107_v38 = vadd.f32 1e-05, %v5979_v30  ;;  %19569 = vst [vmem:[#allocation31_spill] sm:$0xff] %v16280_v39  ;;  %v6549_v54 = vmul.f32 %v6485_v41, %v6293_v51  ;;  %19570 = vst [vmem:[#allocation30_spill] sm:$0xff] %v16287_v12  ;;  %v16298_v53 = vadd.f32 %v16199_v34, %v10625_v56  ;;  %v16301_v41 = vadd.f32 %v16199_v34, %v5205_v43 }
 0x513   :  { %v16270_v21 = vmul.f32 0.03125, %v5305_v16  ;;  %v5302_v23 = vpop.xlane.xlu0 %5301  ;;  %v6106_v31 = vadd.f32 1e-05, %v5978_v4  ;;  %10655 = vmatprep.mubr.msk.f32.mxu0 %vm1397_vm3, %v6548_v11  ;;  %v5507_v11 = vmul.f32 %v16280_v39, %v16280_v39  ;;  %v5506_v56 = vmul.f32 %v16287_v12, %v16287_v12 }
 0x514   :  { %5662 = vadd.xlane.f32.xlu1 %v5661_v55  ;;  %v16273_v24 = vmul.f32 0.03125, %v5302_v23  ;;  %11385 = vrsqrt.f32 %v6107_v38  ;;  %v5664_v55 = vsel %vm1397_vm3, %v5504_v1, 0.0  ;;  %v11382_v30 = vpop.eup %11381  ;;  %10656 = vmatmul.mubr.msk.f32.gmra.mrb[68].mxu0 %vm1397_vm3, %v6549_v54  ;;  %19571 = vst [vmem:[#allocation76_spill] sm:$0xff] %v16298_v53  ;;  %19572 = vst [vmem:[#allocation40_spill] sm:$0xff] %v16301_v41  ;;  %v5414_v43 = vsel %vm1397_vm3, %v16287_v12, 0.0 }
 0x515   :  { %5659 = vadd.xlane.f32.xlu0 %v5658_v26  ;;  %11387 = vrsqrt.f32 %v6106_v31  ;;  %v5853_v29 = vmul.f32 %v16270_v21, %v16270_v21  ;;  %v11384_v23 = vpop.eup %11383  ;;  %v16293_v51 = vmul.f32 %v11382_v30, %v6041_v52  ;;  %v6042_v52 = vsub.f32 %v15826_v33, %v16231_v5 }
 0x516   :  { %v5561_v16 = vpop.xlane.xlu1 %5560  ;;  %v5852_v62 = vmul.f32 %v16273_v24, %v16273_v24  ;;  %11389 = verf.f32 %v6358_v61 }
 0x517   :  { %v5789_v26 = vmul.f32 0.03125, %v5561_v16  ;;  %v5558_v4 = vpop.xlane.xlu0 %5557  ;;  %11391 = verf.f32 %v6359_v58  ;;  %v6361_v31 = vmul.f32 0.70710677, %v16293_v51 }
 0x518   :  { %5412 = vadd.xlane.f32.xlu1 %v5411_v9  ;;  %v5788_v1 = vmul.f32 0.03125, %v5558_v4  ;;  %v16303_v9 = vmul.f32 %v11384_v23, %v6040_v17  ;;  %v5417_v17 = vsel %vm1397_vm3, %v16280_v39, 0.0  ;;  %v5508_v23 = vmul.f32 %v16301_v41, %v16301_v41 }
 0x519   :  { %v5917_v32 = vsub.f32 %v5789_v26, %v5853_v29  ;;  %5409 = vadd.xlane.f32.xlu0 %v5408_v6  ;;  %v10628_v6 = vpop.f32.mrb[150].mxu1  ;;  %v6295_v29 = vmul.f32 0.5, %v16262_v44  ;;  %v5509_v26 = vmul.f32 %v16298_v53, %v16298_v53  ;;  %11393 = verf.f32 %v6361_v31 }
 0x51a   :  { %v5916_v38 = vsub.f32 %v5788_v1, %v5852_v62  ;;  %v5215_v54 = vpop.f32.mrb[151].mxu1  ;;  %v6360_v33 = vmul.f32 0.70710677, %v16303_v9  ;;  %v5673_v1 = vsel %vm1397_vm3, %v5507_v11, 0.0  ;;  %v16343_v14 = vsel %vm1397_vm3, %v5508_v23, 0.0 }
 0x51b   :  { %v5981_v61 = vmax.f32 %v5917_v32, 0.0  ;;  %v5311_v16 = vpop.xlane.xlu1 %5310  ;;  %v5670_v32 = vsel %vm1397_vm3, %v5506_v56, 0.0  ;;  %v16351_v3 = vadd.f32 %v16199_v34, %v5215_v54  ;;  %v6297_v23 = vmul.f32 0.5, %v16293_v51 }
 0x51c   :  { %v5980_v58 = vmax.f32 %v5916_v38, 0.0  ;;  %5668 = vadd.xlane.f32.xlu1 %v5667_v60  ;;  %v16317_v5 = vmul.f32 0.03125, %v5311_v16  ;;  %v5308_v30 = vpop.xlane.xlu0 %5307  ;;  %11395 = verf.f32 %v6360_v33  ;;  %v5420_v16 = vsel %vm1397_vm3, %v16301_v41, 0.0 }
 0x51d   :  { %5665 = vadd.xlane.f32.xlu0 %v5664_v55  ;;  %v16322_v4 = vmul.f32 0.03125, %v5308_v30  ;;  %v6109_v62 = vadd.f32 1e-05, %v5981_v61  ;;  %v6294_v55 = vmul.f32 0.5, %v16256_v47  ;;  %v5679_v30 = vsel %vm1397_vm3, %v5509_v26, 0.0 }
 0x51e   :  { %v6108_v60 = vadd.f32 1e-05, %v5980_v58  ;;  %v11386_v38 = vpop.eup %11385  ;;  %v5423_v58 = vsel %vm1397_vm3, %v16298_v53, 0.0  ;;  %v5855_v47 = vmul.f32 %v16317_v5, %v16317_v5 }
 0x51f   :  { %v5567_v31 = vpop.xlane.xlu1 %5566  ;;  %v11388_v61 = vpop.eup %11387 }
 0x520   :  { %11397 = vrsqrt.f32 %v6108_v60  ;;  %5418 = vadd.xlane.f32.xlu1 %v5417_v17  ;;  %v5791_v56 = vmul.f32 0.03125, %v5567_v31  ;;  %v5564_v33 = vpop.xlane.xlu0 %5563  ;;  %v11390_v17 = vpop.eup %11389  ;;  %v5854_v60 = vmul.f32 %v16322_v4, %v16322_v4  ;;  %v16345_v53 = vmul.f32 %v11388_v61, %v6042_v52 }
 0x521   :  { %5415 = vadd.xlane.f32.xlu0 %v5414_v43  ;;  %v5790_v44 = vmul.f32 0.03125, %v5564_v33  ;;  %v10631_v41 = vpop.f32.mrb[152].mxu1  ;;  %v11392_v11 = vpop.eup %11391  ;;  %11399 = vrsqrt.f32 %v6109_v62  ;;  %v6486_v39 = vadd.f32 1.0, %v11390_v17  ;;  %v16348_v43 = vadd.f32 %v16199_v34, %v10628_v6 }
 0x522   :  { %v5919_v12 = vsub.f32 %v5791_v56, %v5855_v47  ;;  %v5225_v31 = vpop.f32.mrb[153].mxu1  ;;  %v6487_v10 = vadd.f32 1.0, %v11392_v11  ;;  %v6296_v62 = vmul.f32 0.5, %v16303_v9  ;;  %v6362_v61 = vmul.f32 0.70710677, %v16345_v53 }
 0x523   :  { %v5918_v26 = vsub.f32 %v5790_v44, %v5854_v60  ;;  %v6550_v52 = vmul.f32 %v6486_v39, %v6294_v55  ;;  %v11394_v11 = vpop.eup %11393  ;;  %v5429_v39 = vsel %vm1397_vm3, %v16348_v43, 0.0  ;;  %v5510_v55 = vmul.f32 %v16351_v3, %v16351_v3 }
 0x524   :  { %5674 = vadd.xlane.f32.xlu1 %v5673_v1  ;;  %v5983_v33 = vmax.f32 %v5919_v12, 0.0  ;;  %v6551_v44 = vmul.f32 %v6487_v10, %v6295_v29  ;;  %v19573_v1 = vsub.f32 %v15823_v19, %v16224_v50  ;;  %11401 = verf.f32 %v6362_v61 }
 0x525   :  { %v5317_v25 = vpop.xlane.xlu1 %5316  ;;  %5671 = vadd.xlane.f32.xlu0 %v5670_v32  ;;  %v5982_v47 = vmax.f32 %v5918_v26, 0.0  ;;  %10658 = vmatprep.mubr.msk.f32.mxu0 %vm1397_vm3, %v6550_v52  ;;  %v5426_v19 = vsel %vm1397_vm3, %v16351_v3, 0.0  ;;  %v6489_v50 = vadd.f32 1.0, %v11394_v11  ;;  %v5511_v10 = vmul.f32 %v16348_v43, %v16348_v43 }
 0x526   :  { %v16356_v6 = vmul.f32 0.03125, %v5317_v25  ;;  %v5314_v56 = vpop.xlane.xlu0 %5313  ;;  %v6235_v54 = vmul.f32 %v11386_v38, %v19573_v1  ;;  %v6111_v17 = vadd.f32 1e-05, %v5983_v33  ;;  %v11396_v12 = vpop.eup %11395  ;;  %10659 = vmatmul.mubr.msk.f32.gmra.mrb[70].mxu0 %vm1397_vm3, %v6551_v44  ;;  %v16378_v33 = vadd.f32 %v16199_v34, %v10631_v41 }
 0x527   :  { %v16361_v51 = vmul.f32 0.03125, %v5314_v56  ;;  %v6110_v9 = vadd.f32 1e-05, %v5982_v47  ;;  %v6488_v32 = vadd.f32 1.0, %v11396_v12  ;;  %v6553_v11 = vmul.f32 %v6489_v50, %v6297_v23 }
 0x528   :  { %5424 = vadd.xlane.f32.xlu1 %v5423_v58  ;;  %11403 = vrsqrt.f32 %v6111_v17  ;;  %v5857_v58 = vmul.f32 %v16356_v6, %v16356_v6  ;;  %v6363_v52 = vmul.f32 0.70710677, %v6235_v54  ;;  %v19574_v12 = vsub.f32 %v15842_v35, %v16273_v24 }
 0x529   :  { %v5573_v29 = vpop.xlane.xlu1 %5572  ;;  %5421 = vadd.xlane.f32.xlu0 %v5420_v16  ;;  %v5856_v61 = vmul.f32 %v16361_v51, %v16361_v51  ;;  %v6552_v56 = vmul.f32 %v6488_v32, %v6296_v62  ;;  %v16383_v16 = vadd.f32 %v16199_v34, %v5225_v31  ;;  %v10634_v44 = vpop.f32.mrb[154].mxu1  ;;  %v6046_v25 = vsub.f32 %v15858_v18, %v16322_v4 }
 0x52a   :  { %v11398_v38 = vpop.eup %11397  ;;  %v5793_v60 = vmul.f32 0.03125, %v5573_v29  ;;  %v5570_v26 = vpop.xlane.xlu0 %5569  ;;  %11405 = verf.f32 %v6363_v52  ;;  %v5682_v35 = vsel %vm1397_vm3, %v5510_v55, 0.0  ;;  %v6298_v24 = vmul.f32 0.5, %v16345_v53 }
 0x52b   :  { %v5792_v47 = vmul.f32 0.03125, %v5570_v26  ;;  %v5235_v17 = vpop.f32.mrb[155].mxu1  ;;  %v16388_v41 = vmul.f32 %v11398_v38, %v19574_v12  ;;  %v11400_v29 = vpop.eup %11399  ;;  %11407 = vrsqrt.f32 %v6110_v9  ;;  %10661 = vmatprep.mubr.msk.f32.mxu0 %vm1397_vm3, %v6552_v56  ;;  %v6299_v26 = vmul.f32 0.5, %v6235_v54 }
 0x52c   :  { %v5921_v1 = vsub.f32 %v5793_v60, %v5857_v58  ;;  %5680 = vadd.xlane.f32.xlu1 %v5679_v30  ;;  %v5685_v30 = vsel %vm1397_vm3, %v5511_v10, 0.0  ;;  %10662 = vmatmul.mubr.msk.f32.gmra.mrb[72].mxu0 %vm1397_vm3, %v6553_v11  ;;  %v5432_v10 = vsel %vm1397_vm3, %v16383_v16, 0.0  ;;  %v19575_v52 = vsub.f32 %v15839_v22, %v16270_v21 }
 0x52d   :  { %v5920_v62 = vsub.f32 %v5792_v47, %v5856_v61  ;;  %v5323_v32 = vpop.xlane.xlu1 %5322  ;;  %5677 = vadd.xlane.f32.xlu0 %v16343_v14  ;;  %v5435_v14 = vsel %vm1397_vm3, %v16378_v33, 0.0  ;;  %v6364_v58 = vmul.f32 0.70710677, %v16388_v41  ;;  %v5513_v56 = vmul.f32 %v16378_v33, %v16378_v33 }
 0x52e   :  { %v5985_v31 = vmax.f32 %v5921_v1, 0.0  ;;  %v16395_v23 = vmul.f32 0.03125, %v5323_v32  ;;  %v5320_v50 = vpop.xlane.xlu0 %5319  ;;  %v16410_v55 = vmul.f32 %v11400_v29, %v19575_v52  ;;  %v11402_v53 = vpop.eup %11401 }
 0x52f   :  { %v5984_v38 = vmax.f32 %v5920_v62, 0.0  ;;  %v16400_v9 = vmul.f32 0.03125, %v5320_v50  ;;  %11409 = verf.f32 %v6364_v58  ;;  %v6490_v11 = vadd.f32 1.0, %v11402_v53 }
 0x530   :  { %v6113_v60 = vadd.f32 1e-05, %v5985_v31  ;;  %5430 = vadd.xlane.f32.xlu1 %v5429_v39  ;;  %v5512_v39 = vmul.f32 %v16383_v16, %v16383_v16  ;;  %v5859_v54 = vmul.f32 %v16395_v23, %v16395_v23  ;;  %v6365_v32 = vmul.f32 0.70710677, %v16410_v55 }
 0x531   :  { %v5579_v47 = vpop.xlane.xlu1 %5578  ;;  %5427 = vadd.xlane.f32.xlu0 %v5426_v19  ;;  %v6112_v1 = vadd.f32 1e-05, %v5984_v38  ;;  %v5858_v29 = vmul.f32 %v16400_v9, %v16400_v9  ;;  %v16423_v19 = vadd.f32 %v16199_v34, %v10634_v44  ;;  %v6554_v50 = vmul.f32 %v6490_v11, %v6298_v24 }
 0x532   :  { %v5795_v22 = vmul.f32 0.03125, %v5579_v47  ;;  %v5576_v21 = vpop.xlane.xlu0 %5575  ;;  %v11404_v12 = vpop.eup %11403  ;;  %11411 = vrsqrt.f32 %v6113_v60  ;;  %v16427_v38 = vadd.f32 %v16199_v34, %v5235_v17  ;;  %v5688_v17 = vsel %vm1397_vm3, %v5512_v39, 0.0 }
 0x533   :  { %v5794_v62 = vmul.f32 0.03125, %v5576_v21  ;;  %v10637_v58 = vpop.f32.mrb[156].mxu1  ;;  %v5691_v21 = vsel %vm1397_vm3, %v5513_v56, 0.0  ;;  %11413 = verf.f32 %v6365_v32  ;;  %10664 = vmatprep.mubr.msk.f32.mxu0 %vm1397_vm3, %v6554_v50  ;;  %v19576_v24 = vsub.f32 %v15855_v49, %v16317_v5 }
 0x534   :  { %v5923_v31 = vsub.f32 %v5795_v22, %v5859_v54  ;;  %5686 = vadd.xlane.f32.xlu1 %v5685_v30  ;;  %v16432_v44 = vpop.f32.mrb[157].mxu1  ;;  %v11406_v61 = vpop.eup %11405  ;;  %11415 = vrsqrt.f32 %v6112_v1  ;;  %v5438_v39 = vsel %vm1397_vm3, %v16427_v38, 0.0  ;;  %v6300_v49 = vmul.f32 0.5, %v16388_v41 }
 0x535   :  { %v5922_v53 = vsub.f32 %v5794_v62, %v5858_v29  ;;  %v5329_v47 = vpop.xlane.xlu1 %5328  ;;  %5683 = vadd.xlane.f32.xlu0 %v5682_v35  ;;  %v16441_v54 = vmul.f32 %v11404_v12, %v19576_v24  ;;  %v11408_v35 = vpop.eup %11407  ;;  %v6491_v29 = vadd.f32 1.0, %v11406_v61  ;;  %v5441_v62 = vsel %vm1397_vm3, %v16423_v19, 0.0 }
 0x536   :  { %v16434_v60 = vmul.f32 0.03125, %v5329_v47  ;;  %v5326_v30 = vpop.xlane.xlu0 %5325  ;;  %v5987_v22 = vmax.f32 %v5923_v31, 0.0  ;;  %v5515_v61 = vmul.f32 %v16423_v19, %v16423_v19  ;;  %v5514_v47 = vmul.f32 %v16427_v38, %v16427_v38 }
 0x537   :  { %v5986_v56 = vmax.f32 %v5922_v53, 0.0  ;;  %v16443_v11 = vmul.f32 0.03125, %v5326_v30  ;;  %v6555_v31 = vmul.f32 %v6491_v29, %v6299_v26  ;;  %v16463_v41 = vmul.f32 %v11408_v35, %v6046_v25 }
 0x538   :  { %5436 = vadd.xlane.f32.xlu1 %v5435_v14  ;;  %v5861_v14 = vmul.f32 %v16434_v60, %v16434_v60  ;;  %v6115_v24 = vadd.f32 1e-05, %v5987_v22  ;;  %v6301_v25 = vmul.f32 0.5, %v16410_v55  ;;  %v16472_v35 = vadd.f32 %v16199_v34, %v10637_v58 }
 0x539   :  { %v6114_v12 = vadd.f32 1e-05, %v5986_v56  ;;  %v5585_v32 = vpop.xlane.xlu1 %5584  ;;  %5433 = vadd.xlane.f32.xlu0 %v5432_v10  ;;  %v11410_v30 = vpop.eup %11409  ;;  %v5860_v10 = vmul.f32 %v16443_v11, %v16443_v11  ;;  %10665 = vmatmul.mubr.msk.f32.gmra.mrb[74].mxu0 %vm1397_vm3, %v6555_v31  ;;  %v6367_v56 = vmul.f32 0.70710677, %v16441_v54  ;;  %v6366_v1 = vmul.f32 0.70710677, %v16463_v41 }
 0x53a   :  { %v5797_v50 = vmul.f32 0.03125, %v5585_v32  ;;  %v5582_v53 = vpop.xlane.xlu0 %5581  ;;  %v6492_v32 = vadd.f32 1.0, %v11410_v30  ;;  %v10640_v5 = vpop.f32.mrb[158].mxu1 }
 0x53b   :  { %v5796_v26 = vmul.f32 0.03125, %v5582_v53  ;;  %11417 = vrsqrt.f32 %v6114_v12  ;;  %v5255_v22 = vpop.f32.mrb[159].mxu1 }
 0x53c   :  { %v5925_v29 = vsub.f32 %v5797_v50, %v5861_v14  ;;  %5692 = vadd.xlane.f32.xlu1 %v5691_v21  ;;  %11419 = verf.f32 %v6367_v56  ;;  %v11412_v31 = vpop.eup %11411  ;;  %v6556_v21 = vmul.f32 %v6492_v32, %v6300_v49  ;;  %v5694_v49 = vsel %vm1397_vm3, %v5514_v47, 0.0 }
 0x53d   :  { %v5924_v18 = vsub.f32 %v5796_v26, %v5860_v10  ;;  %v5335_v4 = vpop.xlane.xlu1 %5334  ;;  %5689 = vadd.xlane.f32.xlu0 %v5688_v17  ;;  %11421 = verf.f32 %v6366_v1  ;;  %v11414_v14 = vpop.eup %11413  ;;  %v5697_v17 = vsel %vm1397_vm3, %v5515_v61, 0.0  ;;  %v16482_v26 = vadd.f32 %v16199_v34, %v16432_v44 }
 0x53e   :  { %v5989_v53 = vmax.f32 %v5925_v29, 0.0  ;;  %v16474_v52 = vmul.f32 0.03125, %v5335_v4  ;;  %v5332_v12 = vpop.xlane.xlu0 %5331  ;;  %11423 = vrsqrt.f32 %v6115_v24  ;;  %v11416_v55 = vpop.eup %11415  ;;  %10667 = vmatprep.mubr.msk.f32.mxu0 %vm1397_vm3, %v6556_v21  ;;  %v6493_v58 = vadd.f32 1.0, %v11414_v14 }
 0x53f   :  { %v5988_v50 = vmax.f32 %v5924_v18, 0.0  ;;  %v16476_v30 = vmul.f32 0.03125, %v5332_v12  ;;  %v6053_v1 = vsub.f32 %v15901_v2, %v16434_v60  ;;  %v5447_v61 = vsel %vm1397_vm3, %v16472_v35, 0.0 }
 0x540   :  { %v6117_v10 = vadd.f32 1e-05, %v5989_v53  ;;  %5442 = vadd.xlane.f32.xlu1 %v5441_v62  ;;  %v5517_v62 = vmul.f32 %v16472_v35, %v16472_v35  ;;  %v5863_v29 = vmul.f32 %v16474_v52, %v16474_v52  ;;  %v6557_v32 = vmul.f32 %v6493_v58, %v6301_v25 }
 0x541   :  { %v6116_v24 = vadd.f32 1e-05, %v5988_v50  ;;  %v5591_v56 = vpop.xlane.xlu1 %5590  ;;  %5439 = vadd.xlane.f32.xlu0 %v5438_v39  ;;  %v5862_v47 = vmul.f32 %v16476_v30, %v16476_v30  ;;  %v19577_v39 = vsub.f32 %v15874_v63, %v16361_v51  ;;  %v6052_v12 = vsub.f32 %v15905_v27, %v16443_v11 }
 0x542   :  { %11425 = vrsqrt.f32 %v6117_v10  ;;  %v5799_v44 = vmul.f32 0.03125, %v5591_v56  ;;  %v5588_v18 = vpop.xlane.xlu0 %5587  ;;  %10668 = vmatmul.mubr.msk.f32.gmra.mrb[76].mxu0 %vm1397_vm3, %v6557_v32  ;;  %v5444_v25 = vsel %vm1397_vm3, %v16482_v26, 0.0  ;;  %v19578_v14 = vsub.f32 %v15871_v15, %v16356_v6 }
 0x543   :  { %11427 = vrsqrt.f32 %v6116_v24  ;;  %v5798_v4 = vmul.f32 0.03125, %v5588_v18  ;;  %v16498_v53 = vmul.f32 %v11416_v55, %v19577_v39  ;;  %v16511_v63 = vadd.f32 %v16199_v34, %v10640_v5 }
 0x544   :  { %v5927_v21 = vsub.f32 %v5799_v44, %v5863_v29  ;;  %5698 = vadd.xlane.f32.xlu1 %v5697_v17  ;;  %v16508_v50 = vmul.f32 %v11412_v31, %v19578_v14  ;;  %v5516_v51 = vmul.f32 %v16482_v26, %v16482_v26  ;;  %v6302_v15 = vmul.f32 0.5, %v16463_v41 }
 0x545   :  { %v5926_v10 = vsub.f32 %v5798_v4, %v5862_v47  ;;  %v5341_v58 = vpop.xlane.xlu1 %5340  ;;  %5695 = vadd.xlane.f32.xlu0 %v5694_v49  ;;  %v6368_v55 = vmul.f32 0.70710677, %v16498_v53  ;;  %v11418_v17 = vpop.eup %11417  ;;  %v6303_v6 = vmul.f32 0.5, %v16441_v54  ;;  %v5703_v5 = vsel %vm1397_vm3, %v5517_v62, 0.0 }
 0x546   :  { %v5991_v24 = vmax.f32 %v5927_v21, 0.0  ;;  %v16516_v56 = vmul.f32 0.03125, %v5341_v58  ;;  %v5338_v29 = vpop.xlane.xlu0 %5337  ;;  %v11420_v31 = vpop.eup %11419  ;;  %v16524_v4 = vadd.f32 %v16199_v34, %v5255_v22  ;;  %v6369_v39 = vmul.f32 0.70710677, %v16508_v50 }
 0x547   :  { %v5990_v44 = vmax.f32 %v5926_v10, 0.0  ;;  %v16520_v49 = vmul.f32 0.03125, %v5338_v29  ;;  %11429 = verf.f32 %v6368_v55  ;;  %v11422_v32 = vpop.eup %11421  ;;  %v6495_v47 = vadd.f32 1.0, %v11420_v31 }
 0x548   :  { %v6119_v18 = vadd.f32 1e-05, %v5991_v24  ;;  %5448 = vadd.xlane.f32.xlu1 %v5447_v61  ;;  %v11424_v21 = vpop.eup %11423  ;;  %v6494_v54 = vadd.f32 1.0, %v11422_v32  ;;  %v5700_v10 = vsel %vm1397_vm3, %v5516_v51, 0.0  ;;  %v5453_v62 = vsel %vm1397_vm3, %v16511_v63, 0.0 }
 0x549   :  { %v6118_v41 = vadd.f32 1e-05, %v5990_v44  ;;  %v5597_v14 = vpop.xlane.xlu1 %5596  ;;  %5445 = vadd.xlane.f32.xlu0 %v5444_v25  ;;  %v5865_v61 = vmul.f32 %v16516_v56, %v16516_v56  ;;  %v5864_v34 = vmul.f32 %v16520_v49, %v16520_v49  ;;  %v19579_v25 = vsub.f32 %v15890_v46, %v16400_v9 }
 0x54a   :  { %11431 = vrsqrt.f32 %v6119_v18  ;;  %v5801_v22 = vmul.f32 0.03125, %v5597_v14  ;;  %v5594_v58 = vpop.xlane.xlu0 %5593  ;;  %v6558_v55 = vmul.f32 %v6494_v54, %v6302_v15  ;;  %v6559_v44 = vmul.f32 %v6495_v47, %v6303_v6 }
 0x54b   :  { %11433 = vrsqrt.f32 %v6118_v41  ;;  %v5800_v24 = vmul.f32 0.03125, %v5594_v58  ;;  %v16537_v29 = vmul.f32 %v11418_v17, %v19579_v25  ;;  %v19580_v32 = vsub.f32 %v15886_v37, %v16395_v23 }
 0x54c   :  { %v11426_v51 = vpop.eup %11425  ;;  %v5929_v31 = vsub.f32 %v5801_v22, %v5865_v61  ;;  %5704 = vadd.xlane.f32.xlu1 %v5703_v5  ;;  %11435 = verf.f32 %v6369_v39  ;;  %10670 = vmatprep.mubr.msk.f32.mxu0 %vm1397_vm3, %v6558_v55  ;;  %v5450_v46 = vsel %vm1397_vm3, %v16524_v4, 0.0  ;;  %v5519_v9 = vmul.f32 %v16511_v63, %v16511_v63 }
 0x54d   :  { %v16542_v18 = vmul.f32 %v11424_v21, %v19580_v32  ;;  %v11428_v14 = vpop.eup %11427  ;;  %v5928_v15 = vsub.f32 %v5800_v24, %v5864_v34  ;;  %v5347_v41 = vpop.xlane.xlu1 %5346  ;;  %5701 = vadd.xlane.f32.xlu0 %v5700_v10  ;;  %v6370_v17 = vmul.f32 0.70710677, %v16537_v29  ;;  %10671 = vmatmul.mubr.msk.f32.gmra.mrb[78].mxu0 %vm1397_vm3, %v6559_v44  ;;  %v16557_v47 = vmul.f32 %v11426_v51, %v6053_v1 }
 0x54e   :  { %v5993_v6 = vmax.f32 %v5929_v31, 0.0  ;;  %v16551_v37 = vmul.f32 0.03125, %v5347_v41  ;;  %v5344_v23 = vpop.xlane.xlu0 %5343  ;;  %v16564_v54 = vmul.f32 %v11428_v14, %v6052_v12  ;;  %v6054_v10 = vsub.f32 %v15920_v13, %v16476_v30 }
 0x54f   :  { %v6371_v5 = vmul.f32 0.70710677, %v16542_v18  ;;  %v5992_v39 = vmax.f32 %v5928_v15, 0.0  ;;  %v16559_v21 = vmul.f32 0.03125, %v5344_v23  ;;  %11437 = verf.f32 %v6370_v17 }
 0x550   :  { %v6121_v61 = vadd.f32 1e-05, %v5993_v6  ;;  %5454 = vadd.xlane.f32.xlu1 %v5453_v62  ;;  %v5518_v34 = vmul.f32 %v16524_v4, %v16524_v4  ;;  %v5867_v1 = vmul.f32 %v16551_v37, %v16551_v37  ;;  %v6304_v27 = vmul.f32 0.5, %v16498_v53 }
 0x551   :  { %11439 = verf.f32 %v6371_v5  ;;  %v11430_v2 = vpop.eup %11429  ;;  %v6120_v60 = vadd.f32 1e-05, %v5992_v39  ;;  %v5603_v22 = vpop.xlane.xlu1 %5602  ;;  %5451 = vadd.xlane.f32.xlu0 %v5450_v46  ;;  %v5709_v11 = vsel %vm1397_vm3, %v5519_v9, 0.0  ;;  %v6372_v62 = vmul.f32 0.70710677, %v16564_v54 }
 0x552   :  { %11441 = vrsqrt.f32 %v6121_v61  ;;  %v5803_v12 = vmul.f32 0.03125, %v5603_v22  ;;  %v6496_v13 = vadd.f32 1.0, %v11430_v2  ;;  %v5600_v30 = vpop.xlane.xlu0 %5599  ;;  %v5866_v58 = vmul.f32 %v16559_v21, %v16559_v21 }
 0x553   :  { %11443 = vrsqrt.f32 %v6120_v60  ;;  %v5802_v55 = vmul.f32 0.03125, %v5600_v30  ;;  %v6373_v24 = vmul.f32 0.70710677, %v16557_v47  ;;  %v5706_v53 = vsel %vm1397_vm3, %v5518_v34, 0.0 }
 0x554   :  { %v11432_v25 = vpop.eup %11431  ;;  %v5931_v51 = vsub.f32 %v5803_v12, %v5867_v1  ;;  %v6560_v31 = vmul.f32 %v6496_v13, %v6304_v27  ;;  %5710 = vadd.xlane.f32.xlu1 %v5709_v11  ;;  %11445 = verf.f32 %v6372_v62  ;;  %v6055_v32 = vsub.f32 %v15917_v0, %v16474_v52 }
 0x555   :  { %v11434_v44 = vpop.eup %11433  ;;  %v5930_v14 = vsub.f32 %v5802_v55, %v5866_v58  ;;  %v5353_v15 = vpop.xlane.xlu1 %5352  ;;  %5707 = vadd.xlane.f32.xlu0 %v5706_v53  ;;  %11447 = verf.f32 %v6373_v24  ;;  %v6305_v9 = vmul.f32 0.5, %v16508_v50  ;;  %v6306_v34 = vmul.f32 0.5, %v16537_v29 }
 0x556   :  { %v11436_v41 = vpop.eup %11435  ;;  %v5995_v46 = vmax.f32 %v5931_v51, 0.0  ;;  %10673 = vmatprep.mubr.msk.f32.mxu0 %vm1397_vm3, %v6560_v31  ;;  %v16583_v17 = vmul.f32 0.03125, %v5353_v15  ;;  %v5350_v6 = vpop.xlane.xlu0 %5349  ;;  %v16585_v23 = vmul.f32 %v11434_v44, %v6054_v10  ;;  %v16589_v0 = vmul.f32 %v11432_v25, %v6055_v32 }
 0x557   :  { %v6497_v5 = vadd.f32 1.0, %v11436_v41  ;;  %v5994_v39 = vmax.f32 %v5930_v14, 0.0  ;;  %v16587_v61 = vmul.f32 0.03125, %v5350_v6  ;;  %v6307_v2 = vmul.f32 0.5, %v16542_v18 }
 0x558   :  { %v6123_v52 = vadd.f32 1e-05, %v5995_v46  ;;  %v5869_v50 = vmul.f32 %v16583_v17, %v16583_v17  ;;  %v6374_v62 = vmul.f32 0.70710677, %v16585_v23  ;;  %v6375_v58 = vmul.f32 0.70710677, %v16589_v0 }
 0x559   :  { %v11438_v60 = vpop.eup %11437  ;;  %v6561_v1 = vmul.f32 %v6497_v5, %v6305_v9  ;;  %v6122_v22 = vadd.f32 1e-05, %v5994_v39  ;;  %v5868_v10 = vmul.f32 %v16587_v61, %v16587_v61  ;;  %v5609_v27 = vpop.xlane.xlu1 %5608  ;;  %v6057_v24 = vsub.f32 %v15933_v57, %v16516_v56 }
 0x55a   :  { %11449 = vrsqrt.f32 %v6123_v52  ;;  %v5805_v12 = vmul.f32 0.03125, %v5609_v27  ;;  %v6498_v13 = vadd.f32 1.0, %v11438_v60  ;;  %v5606_v30 = vpop.xlane.xlu0 %5605  ;;  %v6056_v53 = vsub.f32 %v15936_v20, %v16520_v49 }
 0x55b   :  { %v11440_v11 = vpop.eup %11439  ;;  %10674 = vmatmul.mubr.msk.f32.gmra.mrb[80].mxu0 %vm1397_vm3, %v6561_v1  ;;  %11451 = vrsqrt.f32 %v6122_v22  ;;  %v5804_v18 = vmul.f32 0.03125, %v5606_v30  ;;  %v6308_v57 = vmul.f32 0.5, %v16564_v54 }
 0x55c   :  { %v6499_v29 = vadd.f32 1.0, %v11440_v11  ;;  %v11442_v55 = vpop.eup %11441  ;;  %v5933_v25 = vsub.f32 %v5805_v12, %v5869_v50  ;;  %v6562_v51 = vmul.f32 %v6498_v13, %v6306_v34  ;;  %11453 = verf.f32 %v6374_v62 }
 0x55d   :  { %v11444_v31 = vpop.eup %11443  ;;  %v5932_v32 = vsub.f32 %v5804_v18, %v5868_v10  ;;  %v5359_v14 = vpop.xlane.xlu1 %5358  ;;  %11455 = verf.f32 %v6375_v58  ;;  %v16608_v56 = vmul.f32 %v11442_v55, %v6057_v24  ;;  %v6309_v34 = vmul.f32 0.5, %v16557_v47 }
 0x55e   :  { %v6563_v44 = vmul.f32 %v6499_v29, %v6307_v2  ;;  %v11446_v15 = vpop.eup %11445  ;;  %v5997_v41 = vmax.f32 %v5933_v25, 0.0  ;;  %10676 = vmatprep.mubr.msk.f32.mxu0 %vm1397_vm3, %v6562_v51  ;;  %v16605_v46 = vmul.f32 0.03125, %v5359_v14  ;;  %v5356_v9 = vpop.xlane.xlu0 %5355  ;;  %v16613_v39 = vmul.f32 %v11444_v31, %v6056_v53 }
 0x55f   :  { %v11448_v6 = vpop.eup %11447  ;;  %v5996_v5 = vmax.f32 %v5932_v32, 0.0  ;;  %v16611_v20 = vmul.f32 0.03125, %v5356_v9  ;;  %v6500_v49 = vadd.f32 1.0, %v11446_v15  ;;  %v6377_v13 = vmul.f32 0.70710677, %v16608_v56 }
 0x560   :  { %10677 = vmatmul.mubr.msk.f32.gmra.mrb[82].mxu0 %vm1397_vm3, %v6563_v44  ;;  %v6125_v52 = vadd.f32 1e-05, %v5997_v41  ;;  %v6501_v2 = vadd.f32 1.0, %v11448_v6  ;;  %v5871_v1 = vmul.f32 %v16605_v46, %v16605_v46  ;;  %v6376_v47 = vmul.f32 0.70710677, %v16613_v39 }
 0x561   :  { %v6124_v60 = vadd.f32 1e-05, %v5996_v5  ;;  %v5615_v54 = vpop.xlane.xlu1 %5614  ;;  %v6564_v22 = vmul.f32 %v6500_v49, %v6308_v57  ;;  %v5870_v50 = vmul.f32 %v16611_v20, %v16611_v20  ;;  %v6059_v62 = vsub.f32 %v15949_v59, %v16551_v37 }
 0x562   :  { %11457 = vrsqrt.f32 %v6125_v52  ;;  %v5807_v10 = vmul.f32 0.03125, %v5615_v54  ;;  %v6565_v27 = vmul.f32 %v6501_v2, %v6309_v34  ;;  %v5612_v11 = vpop.xlane.xlu0 %5611  ;;  %v6058_v58 = vsub.f32 %v15952_v8, %v16559_v21 }
 0x563   :  { %11459 = vrsqrt.f32 %v6124_v60  ;;  %10679 = vmatprep.mubr.msk.f32.mxu0 %vm1397_vm3, %v6564_v22  ;;  %v5806_v12 = vmul.f32 0.03125, %v5612_v11  ;;  %v6310_v25 = vmul.f32 0.5, %v16585_v23  ;;  %v6311_v21 = vmul.f32 0.5, %v16589_v0 }
 0x564   :  { %v11450_v30 = vpop.eup %11449  ;;  %v5935_v29 = vsub.f32 %v5807_v10, %v5871_v1  ;;  %10680 = vmatmul.mubr.msk.f32.gmra.mrb[84].mxu0 %vm1397_vm3, %v6565_v27  ;;  %11461 = verf.f32 %v6376_v47  ;;  %v6061_v9 = vsub.f32 %v15965_v42, %v16583_v17 }
 0x565   :  { %v11452_v18 = vpop.eup %11451  ;;  %v5934_v55 = vsub.f32 %v5806_v12, %v5870_v50  ;;  %v5365_v24 = vpop.xlane.xlu1 %5364  ;;  %11463 = verf.f32 %v6377_v13  ;;  %v16631_v32 = vmul.f32 %v11450_v30, %v6059_v62  ;;  %v6060_v50 = vsub.f32 %v15968_v45, %v16587_v61 }
 0x566   :  { %v11454_v51 = vpop.eup %11453  ;;  %v5999_v31 = vmax.f32 %v5935_v29, 0.0  ;;  %v16629_v53 = vmul.f32 0.03125, %v5365_v24  ;;  %v5362_v44 = vpop.xlane.xlu0 %5361  ;;  %v16635_v41 = vmul.f32 %v11452_v18, %v6058_v58  ;;  %v6313_v18 = vmul.f32 0.5, %v16608_v56 }
 0x567   :  { %v11456_v59 = vpop.eup %11455  ;;  %v5998_v37 = vmax.f32 %v5934_v55, 0.0  ;;  %v16633_v14 = vmul.f32 0.03125, %v5362_v44  ;;  %v6502_v15 = vadd.f32 1.0, %v11454_v51  ;;  %v6379_v42 = vmul.f32 0.70710677, %v16631_v32 }
 0x568   :  { %v6127_v8 = vadd.f32 1e-05, %v5999_v31  ;;  %v6503_v23 = vadd.f32 1.0, %v11456_v59  ;;  %v5873_v6 = vmul.f32 %v16629_v53, %v16629_v53  ;;  %v6378_v1 = vmul.f32 0.70710677, %v16635_v41 }
 0x569   :  { %v6126_v57 = vadd.f32 1e-05, %v5998_v37  ;;  %v5621_v5 = vpop.xlane.xlu1 %5620  ;;  %v6566_v49 = vmul.f32 %v6502_v15, %v6310_v25  ;;  %v5872_v52 = vmul.f32 %v16633_v14, %v16633_v14  ;;  %v6312_v61 = vmul.f32 0.5, %v16613_v39 }
 0x56a   :  { %11465 = vrsqrt.f32 %v6127_v8  ;;  %v5809_v34 = vmul.f32 0.03125, %v5621_v5  ;;  %v6567_v2 = vmul.f32 %v6503_v23, %v6311_v21  ;;  %v5618_v60 = vpop.xlane.xlu0 %5617  ;;  %v6063_v51 = vsub.f32 %v15981_v28, %v16605_v46 }
 0x56b   :  { %11467 = vrsqrt.f32 %v6126_v57  ;;  %10682 = vmatprep.mubr.msk.f32.mxu0 %vm1397_vm3, %v6566_v49  ;;  %v5808_v0 = vmul.f32 0.03125, %v5618_v60 }
 0x56c   :  { %v11458_v17 = vpop.eup %11457  ;;  %v5937_v54 = vsub.f32 %v5809_v34, %v5873_v6  ;;  %10683 = vmatmul.mubr.msk.f32.gmra.mrb[86].mxu0 %vm1397_vm3, %v6567_v2  ;;  %11469 = verf.f32 %v6378_v1  ;;  %v6062_v6 = vsub.f32 %v15984_v7, %v16611_v20  ;;  %v6314_v7 = vmul.f32 0.5, %v16635_v41 }
 0x56d   :  { %v11460_v22 = vpop.eup %11459  ;;  %v5936_v10 = vsub.f32 %v5808_v0, %v5872_v52  ;;  %v5371_v27 = vpop.xlane.xlu1 %5370  ;;  %v16650_v11 = vmul.f32 %v11458_v17, %v6061_v9  ;;  %11471 = verf.f32 %v6379_v42 }
 0x56e   :  { %v6001_v12 = vmax.f32 %v5937_v54, 0.0  ;;  %v16652_v47 = vmul.f32 0.03125, %v5371_v27  ;;  %v5368_v13 = vpop.xlane.xlu0 %5367  ;;  %v11462_v30 = vpop.eup %11461  ;;  %v16657_v58 = vmul.f32 %v11460_v22, %v6060_v50 }
 0x56f   :  { %v6000_v62 = vmax.f32 %v5936_v10, 0.0  ;;  %v16654_v29 = vmul.f32 0.03125, %v5368_v13  ;;  %v11464_v55 = vpop.eup %11463  ;;  %v6504_v24 = vadd.f32 1.0, %v11462_v30  ;;  %v6381_v25 = vmul.f32 0.70710677, %v16650_v11 }
 0x570   :  { %v6129_v45 = vadd.f32 1e-05, %v6001_v12  ;;  %v5875_v44 = vmul.f32 %v16652_v47, %v16652_v47  ;;  %v6505_v37 = vadd.f32 1.0, %v11464_v55  ;;  %v6380_v9 = vmul.f32 0.70710677, %v16657_v58 }
 0x571   :  { %v6128_v31 = vadd.f32 1e-05, %v6000_v62  ;;  %v5627_v59 = vpop.xlane.xlu1 %5626  ;;  %v5874_v56 = vmul.f32 %v16654_v29, %v16654_v29  ;;  %v6568_v8 = vmul.f32 %v6504_v24, %v6312_v61  ;;  %v6315_v13 = vmul.f32 0.5, %v16631_v32 }
 0x572   :  { %11473 = vrsqrt.f32 %v6129_v45  ;;  %v5811_v15 = vmul.f32 0.03125, %v5627_v59  ;;  %v5624_v21 = vpop.xlane.xlu0 %5623  ;;  %v6569_v39 = vmul.f32 %v6505_v37, %v6313_v18 }
 0x573   :  { %11475 = vrsqrt.f32 %v6128_v31  ;;  %v5810_v23 = vmul.f32 0.03125, %v5624_v21  ;;  %10685 = vmatprep.mubr.msk.f32.mxu0 %vm1397_vm3, %v6568_v8 }
 0x574   :  { %v11466_v57 = vpop.eup %11465  ;;  %v5939_v28 = vsub.f32 %v5811_v15, %v5875_v44  ;;  %11477 = verf.f32 %v6381_v25  ;;  %10686 = vmatmul.mubr.msk.f32.gmra.mrb[88].mxu0 %vm1397_vm3, %v6569_v39  ;;  %v6064_v44 = vsub.f32 %v16004_v36, %v16633_v14  ;;  %v6316_v14 = vmul.f32 0.5, %v16657_v58 }
 0x575   :  { %v11468_v46 = vpop.eup %11467  ;;  %v5938_v5 = vsub.f32 %v5810_v23, %v5874_v56  ;;  %v5377_v49 = vpop.xlane.xlu1 %5376  ;;  %11479 = verf.f32 %v6380_v9  ;;  %v16672_v52 = vmul.f32 %v11466_v57, %v6063_v51  ;;  %v6065_v51 = vsub.f32 %v16001_v48, %v16629_v53 }
 0x576   :  { %v6003_v34 = vmax.f32 %v5939_v28, 0.0  ;;  %v16674_v2 = vmul.f32 0.03125, %v5377_v49  ;;  %v5374_v60 = vpop.xlane.xlu0 %5373  ;;  %v11470_v0 = vpop.eup %11469  ;;  %v16678_v17 = vmul.f32 %v11468_v46, %v6062_v6  ;;  %v6317_v46 = vmul.f32 0.5, %v16650_v11 }
 0x577   :  { %v6002_v1 = vmax.f32 %v5938_v5, 0.0  ;;  %v16676_v42 = vmul.f32 0.03125, %v5374_v60  ;;  %v11472_v54 = vpop.eup %11471  ;;  %v6506_v20 = vadd.f32 1.0, %v11470_v0  ;;  %v6383_v50 = vmul.f32 0.70710677, %v16672_v52 }
 0x578   :  { %v6131_v22 = vadd.f32 1e-05, %v6003_v34  ;;  %v5877_v27 = vmul.f32 %v16674_v2, %v16674_v2  ;;  %v6507_v30 = vadd.f32 1.0, %v11472_v54  ;;  %v6382_v24 = vmul.f32 0.70710677, %v16678_v17 }
 0x579   :  { %v6130_v10 = vadd.f32 1e-05, %v6002_v1  ;;  %v5633_v12 = vpop.xlane.xlu1 %5632  ;;  %v5876_v62 = vmul.f32 %v16676_v42, %v16676_v42  ;;  %v6570_v55 = vmul.f32 %v6506_v20, %v6314_v7  ;;  %v6067_v20 = vsub.f32 %v16025_v40, %v16652_v47 }
 0x57a   :  { %11481 = vrsqrt.f32 %v6131_v22  ;;  %v5813_v18 = vmul.f32 0.03125, %v5633_v12  ;;  %v5630_v45 = vpop.xlane.xlu0 %5629  ;;  %v6571_v41 = vmul.f32 %v6507_v30, %v6315_v13 }
 0x57b   :  { %11483 = vrsqrt.f32 %v6130_v10  ;;  %v5812_v61 = vmul.f32 0.03125, %v5630_v45  ;;  %10688 = vmatprep.mubr.msk.f32.mxu0 %vm1397_vm3, %v6570_v55 }
 0x57c   :  { %v11474_v25 = vpop.eup %11473  ;;  %v5941_v31 = vsub.f32 %v5813_v18, %v5877_v27  ;;  %11485 = verf.f32 %v6383_v50  ;;  %10689 = vmatmul.mubr.msk.f32.gmra.mrb[90].mxu0 %vm1397_vm3, %v6571_v41  ;;  %v19581_v27 = vld [vmem:[#allocation90_spill] sm:$0xff] }
 0x57d   :  { %v11476_v32 = vpop.eup %11475  ;;  %v5940_v59 = vsub.f32 %v5812_v61, %v5876_v62  ;;  %v5383_v37 = vpop.xlane.xlu1 %5382  ;;  %11487 = verf.f32 %v6382_v24  ;;  %v16696_v39 = vmul.f32 %v11474_v25, %v6065_v51  ;;  %v6066_v12 = vsub.f32 %v19581_v27, %v16654_v29 }
 0x57e   :  { %v11478_v56 = vpop.eup %11477  ;;  %v6005_v15 = vmax.f32 %v5941_v31, 0.0  ;;  %v16694_v8 = vmul.f32 0.03125, %v5383_v37  ;;  %v5380_v21 = vpop.xlane.xlu0 %5379  ;;  %v16700_v57 = vmul.f32 %v11476_v32, %v6064_v44  ;;  %v6318_v51 = vmul.f32 0.5, %v16678_v17  ;;  %v19582_v44 = vld [vmem:[#allocation93_spill] sm:$0xff] }
 0x57f   :  { %v11480_v48 = vpop.eup %11479  ;;  %v6004_v53 = vmax.f32 %v5940_v59, 0.0  ;;  %v16698_v23 = vmul.f32 0.03125, %v5380_v21  ;;  %v6509_v9 = vadd.f32 1.0, %v11478_v56  ;;  %v6385_v7 = vmul.f32 0.70710677, %v16696_v39 }
 0x580   :  { %v6133_v36 = vadd.f32 1e-05, %v6005_v15  ;;  %v6508_v28 = vadd.f32 1.0, %v11480_v48  ;;  %v5879_v5 = vmul.f32 %v16694_v8, %v16694_v8  ;;  %v6384_v58 = vmul.f32 0.70710677, %v16700_v57 }
 0x581   :  { %v6132_v6 = vadd.f32 1e-05, %v6004_v53  ;;  %v5878_v49 = vmul.f32 %v16698_v23, %v16698_v23  ;;  %v5639_v34 = vpop.xlane.xlu1 %5638  ;;  %v6573_v1 = vmul.f32 %v6509_v9, %v6317_v46  ;;  %v6319_v32 = vmul.f32 0.5, %v16672_v52 }
 0x582   :  { %11489 = vrsqrt.f32 %v6133_v36  ;;  %v5815_v60 = vmul.f32 0.03125, %v5639_v34  ;;  %v6572_v0 = vmul.f32 %v6508_v28, %v6316_v14  ;;  %v5636_v54 = vpop.xlane.xlu0 %5635  ;;  %v6069_v59 = vsub.f32 %v19582_v44, %v16674_v2 }
 0x583   :  { %11491 = vrsqrt.f32 %v6132_v6  ;;  %v5814_v22 = vmul.f32 0.03125, %v5636_v54  ;;  %v19583_v6 = vld [vmem:[#allocation92_spill] sm:$0xff] }
 0x584   :  { %v11482_v11 = vpop.eup %11481  ;;  %v5943_v50 = vsub.f32 %v5815_v60, %v5879_v5  ;;  %10691 = vmatprep.mubr.msk.f32.mxu0 %vm1397_vm3, %v6572_v0  ;;  %11493 = verf.f32 %v6384_v58  ;;  %v6068_v5 = vsub.f32 %v19583_v6, %v16676_v42 }
 0x585   :  { %v11484_v10 = vpop.eup %11483  ;;  %10692 = vmatmul.mubr.msk.f32.gmra.mrb[92].mxu0 %vm1397_vm3, %v6573_v1  ;;  %v5942_v13 = vsub.f32 %v5814_v22, %v5878_v49  ;;  %v5389_v30 = vpop.xlane.xlu1 %5388  ;;  %11495 = verf.f32 %v6385_v7  ;;  %v16718_v41 = vmul.f32 %v11482_v11, %v6067_v20  ;;  %v6321_v11 = vmul.f32 0.5, %v16696_v39 }
 0x586   :  { %v11486_v62 = vpop.eup %11485  ;;  %v6007_v18 = vmax.f32 %v5943_v50, 0.0  ;;  %v16716_v55 = vmul.f32 0.03125, %v5389_v30  ;;  %v5386_v45 = vpop.xlane.xlu0 %5385  ;;  %v16722_v25 = vmul.f32 %v11484_v10, %v6066_v12  ;;  %v6320_v10 = vmul.f32 0.5, %v16700_v57 }
 0x587   :  { %v11488_v40 = vpop.eup %11487  ;;  %v6006_v47 = vmax.f32 %v5942_v13, 0.0  ;;  %v16720_v61 = vmul.f32 0.03125, %v5386_v45  ;;  %v6511_v24 = vadd.f32 1.0, %v11486_v62  ;;  %v6387_v14 = vmul.f32 0.70710677, %v16718_v41  ;;  %v19584_v13 = vld [vmem:[#allocation95_spill] sm:$0xff] }
 0x588   :  { %v6135_v29 = vadd.f32 1e-05, %v6007_v18  ;;  %v6510_v31 = vadd.f32 1.0, %v11488_v40  ;;  %v5881_v56 = vmul.f32 %v16716_v55, %v16716_v55  ;;  %v6386_v52 = vmul.f32 0.70710677, %v16722_v25 }
 0x589   :  { %v6134_v37 = vadd.f32 1e-05, %v6006_v47  ;;  %v5880_v15 = vmul.f32 %v16720_v61, %v16720_v61  ;;  %v5645_v21 = vpop.xlane.xlu1 %5644  ;;  %v6575_v9 = vmul.f32 %v6511_v24, %v6319_v32  ;;  %v6071_v30 = vsub.f32 %v19584_v13, %v16694_v8 }
 0x58a   :  { %11497 = vrsqrt.f32 %v6135_v29  ;;  %v5817_v48 = vmul.f32 0.03125, %v5645_v21  ;;  %v6574_v53 = vmul.f32 %v6510_v31, %v6318_v51  ;;  %v5642_v36 = vpop.xlane.xlu0 %5641 }
 0x58b   :  { %11499 = vrsqrt.f32 %v6134_v37  ;;  %v5816_v17 = vmul.f32 0.03125, %v5642_v36 }
 0x58c   :  { %v11490_v2 = vpop.eup %11489  ;;  %v5945_v28 = vsub.f32 %v5817_v48, %v5881_v56  ;;  %10694 = vmatprep.mubr.msk.f32.mxu0 %vm1397_vm3, %v6574_v53  ;;  %11501 = verf.f32 %v6386_v52 }
 0x58d   :  { %v11492_v46 = vpop.eup %11491  ;;  %10695 = vmatmul.mubr.msk.f32.gmra.mrb[94].mxu0 %vm1397_vm3, %v6575_v9  ;;  %v5944_v49 = vsub.f32 %v5816_v17, %v5880_v15  ;;  %v5395_v34 = vpop.xlane.xlu1 %5394  ;;  %v16738_v60 = vmul.f32 %v11490_v2, %v6069_v59  ;;  %11503 = verf.f32 %v6387_v14  ;;  %v19585_v59 = vld [vmem:[#allocation94_spill] sm:$0xff] }
 0x58e   :  { %v6009_v0 = vmax.f32 %v5945_v28, 0.0  ;;  %v16740_v1 = vmul.f32 0.03125, %v5395_v34  ;;  %v5392_v54 = vpop.xlane.xlu0 %5391  ;;  %v11494_v22 = vpop.eup %11493  ;;  %v16745_v20 = vmul.f32 %v11492_v46, %v6068_v5  ;;  %v6070_v37 = vsub.f32 %v19585_v59, %v16698_v23 }
 0x58f   :  { %v6008_v58 = vmax.f32 %v5944_v49, 0.0  ;;  %v16742_v7 = vmul.f32 0.03125, %v5392_v54  ;;  %v11496_v42 = vpop.eup %11495  ;;  %v6512_v27 = vadd.f32 1.0, %v11494_v22  ;;  %v6389_v12 = vmul.f32 0.70710677, %v16738_v60 }
 0x590   :  { %v6137_v50 = vadd.f32 1e-05, %v6009_v0  ;;  %v5883_v18 = vmul.f32 %v16740_v1, %v16740_v1  ;;  %v6513_v40 = vadd.f32 1.0, %v11496_v42  ;;  %v6388_v31 = vmul.f32 0.70710677, %v16745_v20 }
 0x591   :  { %v6136_v62 = vadd.f32 1e-05, %v6008_v58  ;;  %v5651_v45 = vpop.xlane.xlu1 %5650  ;;  %v5882_v39 = vmul.f32 %v16742_v7, %v16742_v7  ;;  %v6576_v24 = vmul.f32 %v6512_v27, %v6320_v10  ;;  %v6322_v23 = vmul.f32 0.5, %v16722_v25 }
 0x592   :  { %11505 = vrsqrt.f32 %v6137_v50  ;;  %v5819_v47 = vmul.f32 0.03125, %v5651_v45  ;;  %v5648_v29 = vpop.xlane.xlu0 %5647  ;;  %v6577_v57 = vmul.f32 %v6513_v40, %v6321_v11  ;;  %v6323_v0 = vmul.f32 0.5, %v16718_v41 }
 0x593   :  { %11507 = vrsqrt.f32 %v6136_v62  ;;  %v5818_v51 = vmul.f32 0.03125, %v5648_v29  ;;  %10697 = vmatprep.mubr.msk.f32.mxu0 %vm1397_vm3, %v6576_v24  ;;  %v19587_v62 = vld [vmem:[#allocation96_spill] sm:$0xff] }
 0x594   :  { %v11498_v32 = vpop.eup %11497  ;;  %v5947_v8 = vsub.f32 %v5819_v47, %v5883_v18  ;;  %11509 = verf.f32 %v6389_v12  ;;  %10698 = vmatmul.mubr.msk.f32.gmra.mrb[96].mxu0 %vm1397_vm3, %v6577_v57  ;;  %v19586_v12 = vld [vmem:[#allocation97_spill] sm:$0xff]  ;;  %v6072_v18 = vsub.f32 %v19587_v62, %v16720_v61 }
 0x595   :  { %v11500_v44 = vpop.eup %11499  ;;  %v5946_v56 = vsub.f32 %v5818_v51, %v5882_v39  ;;  %v5401_v15 = vpop.xlane.xlu1 %5400  ;;  %11511 = verf.f32 %v6388_v31  ;;  %v16760_v21 = vmul.f32 %v11498_v32, %v6071_v30  ;;  %v6073_v13 = vsub.f32 %v19586_v12, %v16716_v55 }
 0x596   :  { %v6011_v48 = vmax.f32 %v5947_v8, 0.0  ;;  %v16762_v53 = vmul.f32 0.03125, %v5401_v15  ;;  %v5398_v9 = vpop.xlane.xlu0 %5397  ;;  %v11502_v36 = vpop.eup %11501  ;;  %v16766_v14 = vmul.f32 %v11500_v44, %v6070_v37  ;;  %v6324_v44 = vmul.f32 0.5, %v16745_v20 }
 0x597   :  { %v6010_v17 = vmax.f32 %v5946_v56, 0.0  ;;  %v16764_v52 = vmul.f32 0.03125, %v5398_v9  ;;  %v11504_v2 = vpop.eup %11503  ;;  %v6514_v46 = vadd.f32 1.0, %v11502_v36  ;;  %v6391_v6 = vmul.f32 0.70710677, %v16760_v21 }
 0x598   :  { %v6139_v28 = vadd.f32 1e-05, %v6011_v48  ;;  %v5885_v49 = vmul.f32 %v16762_v53, %v16762_v53  ;;  %v6515_v54 = vadd.f32 1.0, %v11504_v2  ;;  %v6390_v10 = vmul.f32 0.70710677, %v16766_v14 }
 0x599   :  { %v6138_v5 = vadd.f32 1e-05, %v6010_v17  ;;  %v5657_v34 = vpop.xlane.xlu1 %5656  ;;  %v5884_v22 = vmul.f32 %v16764_v52, %v16764_v52  ;;  %v6578_v11 = vmul.f32 %v6514_v46, %v6322_v23  ;;  %v6325_v37 = vmul.f32 0.5, %v16738_v60 }
 0x59a   :  { %11513 = vrsqrt.f32 %v6139_v28  ;;  %v5821_v58 = vmul.f32 0.03125, %v5657_v34  ;;  %v5654_v42 = vpop.xlane.xlu0 %5653  ;;  %v6579_v25 = vmul.f32 %v6515_v54, %v6323_v0  ;;  %v19589_v0 = vld [vmem:[#allocation98_spill] sm:$0xff] }
 0x59b   :  { %11515 = vrsqrt.f32 %v6138_v5  ;;  %v5820_v50 = vmul.f32 0.03125, %v5654_v42  ;;  %10700 = vmatprep.mubr.msk.f32.mxu0 %vm1397_vm3, %v6578_v11  ;;  %v6074_v54 = vsub.f32 %v19589_v0, %v16742_v7 }
 0x59c   :  { %v11506_v27 = vpop.eup %11505  ;;  %v5949_v30 = vsub.f32 %v5821_v58, %v5885_v49  ;;  %11517 = verf.f32 %v6391_v6  ;;  %10701 = vmatmul.mubr.msk.f32.gmra.mrb[98].mxu0 %vm1397_vm3, %v6579_v25  ;;  %v19588_v6 = vld [vmem:[#allocation99_spill] sm:$0xff] }
 0x59d   :  { %v11508_v41 = vpop.eup %11507  ;;  %v5948_v45 = vsub.f32 %v5820_v50, %v5884_v22  ;;  %v5407_v40 = vpop.xlane.xlu1 %5406  ;;  %11519 = verf.f32 %v6390_v10  ;;  %v16784_v57 = vmul.f32 %v11506_v27, %v6073_v13  ;;  %v6075_v5 = vsub.f32 %v19588_v6, %v16740_v1 }
 0x59e   :  { %v11510_v39 = vpop.eup %11509  ;;  %v6013_v47 = vmax.f32 %v5949_v30, 0.0  ;;  %v16782_v24 = vmul.f32 0.03125, %v5407_v40  ;;  %v5404_v29 = vpop.xlane.xlu0 %5403  ;;  %v16788_v8 = vmul.f32 %v11508_v41, %v6072_v18  ;;  %v6326_v41 = vmul.f32 0.5, %v16766_v14 }
 0x59f   :  { %v11512_v55 = vpop.eup %11511  ;;  %v6012_v51 = vmax.f32 %v5948_v45, 0.0  ;;  %v16786_v31 = vmul.f32 0.03125, %v5404_v29  ;;  %v6517_v32 = vadd.f32 1.0, %v11510_v39  ;;  %v6393_v46 = vmul.f32 0.70710677, %v16784_v57  ;;  %v19590_v45 = vld [vmem:[#allocation101_spill] sm:$0xff] }
 0x5a0   :  { %v6141_v61 = vadd.f32 1e-05, %v6013_v47  ;;  %v6516_v59 = vadd.f32 1.0, %v11512_v55  ;;  %v5887_v15 = vmul.f32 %v16782_v24, %v16782_v24  ;;  %v6392_v20 = vmul.f32 0.70710677, %v16788_v8 }
 0x5a1   :  { %v6140_v56 = vadd.f32 1e-05, %v6012_v51  ;;  %v5886_v48 = vmul.f32 %v16786_v31, %v16786_v31  ;;  %v5663_v9 = vpop.xlane.xlu1 %5662  ;;  %v6581_v2 = vmul.f32 %v6517_v32, %v6325_v37  ;;  %v6327_v18 = vmul.f32 0.5, %v16760_v21 }
 0x5a2   :  { %11521 = vrsqrt.f32 %v6141_v61  ;;  %v5823_v36 = vmul.f32 0.03125, %v5663_v9  ;;  %v6580_v17 = vmul.f32 %v6516_v59, %v6324_v44  ;;  %v5660_v28 = vpop.xlane.xlu0 %5659  ;;  %v6077_v40 = vsub.f32 %v19590_v45, %v16762_v53 }
 0x5a3   :  { %11523 = vrsqrt.f32 %v6140_v56  ;;  %v5822_v23 = vmul.f32 0.03125, %v5660_v28  ;;  %v6329_v6 = vmul.f32 0.5, %v16784_v57 }
 0x5a4   :  { %v11514_v60 = vpop.eup %11513  ;;  %v5951_v49 = vsub.f32 %v5823_v36, %v5887_v15  ;;  %10703 = vmatprep.mubr.msk.f32.mxu0 %vm1397_vm3, %v6580_v17  ;;  %11525 = verf.f32 %v6392_v20  ;;  %v19591_v15 = vld [vmem:[#allocation100_spill] sm:$0xff] }
 0x5a5   :  { %v11516_v34 = vpop.eup %11515  ;;  %10704 = vmatmul.mubr.msk.f32.gmra.mrb[100].mxu0 %vm1397_vm3, %v6581_v2  ;;  %v5950_v22 = vsub.f32 %v5822_v23, %v5886_v48  ;;  %v5413_v58 = vpop.xlane.xlu1 %5412  ;;  %11527 = verf.f32 %v6393_v46  ;;  %v16806_v10 = vmul.f32 %v11514_v60, %v6075_v5  ;;  %v6076_v48 = vsub.f32 %v19591_v15, %v16764_v52 }
 0x5a6   :  { %v11518_v11 = vpop.eup %11517  ;;  %v6015_v42 = vmax.f32 %v5951_v49, 0.0  ;;  %v16804_v25 = vmul.f32 0.03125, %v5413_v58  ;;  %v5410_v50 = vpop.xlane.xlu0 %5409  ;;  %v16810_v30 = vmul.f32 %v11516_v34, %v6074_v54  ;;  %v6328_v34 = vmul.f32 0.5, %v16788_v8 }
 0x5a7   :  { %v11520_v1 = vpop.eup %11519  ;;  %v6014_v27 = vmax.f32 %v5950_v22, 0.0  ;;  %v16808_v12 = vmul.f32 0.03125, %v5410_v50  ;;  %v6519_v13 = vadd.f32 1.0, %v11518_v11  ;;  %v6395_v59 = vmul.f32 0.70710677, %v16806_v10  ;;  %v19592_v22 = vld [vmem:[#allocation103_spill] sm:$0xff] }
 0x5a8   :  { %v6143_v7 = vadd.f32 1e-05, %v6015_v42  ;;  %v6518_v62 = vadd.f32 1.0, %v11520_v1  ;;  %v5889_v47 = vmul.f32 %v16804_v25, %v16804_v25  ;;  %v6394_v21 = vmul.f32 0.70710677, %v16810_v30 }
 0x5a9   :  { %v6142_v39 = vadd.f32 1e-05, %v6014_v27  ;;  %v5888_v29 = vmul.f32 %v16808_v12, %v16808_v12  ;;  %v5669_v55 = vpop.xlane.xlu1 %5668  ;;  %v6583_v61 = vmul.f32 %v6519_v13, %v6327_v18  ;;  %v6079_v58 = vsub.f32 %v19592_v22, %v16782_v24 }
 0x5aa   :  { %11529 = vrsqrt.f32 %v6143_v7  ;;  %v5825_v51 = vmul.f32 0.03125, %v5669_v55  ;;  %v6582_v32 = vmul.f32 %v6518_v62, %v6326_v41  ;;  %v5666_v44 = vpop.xlane.xlu0 %5665 }
 0x5ab   :  { %11531 = vrsqrt.f32 %v6142_v39  ;;  %v5824_v14 = vmul.f32 0.03125, %v5666_v44 }
 0x5ac   :  { %v11522_v53 = vpop.eup %11521  ;;  %v5953_v37 = vsub.f32 %v5825_v51, %v5889_v47  ;;  %10706 = vmatprep.mubr.msk.f32.mxu0 %vm1397_vm3, %v6582_v32  ;;  %11533 = verf.f32 %v6394_v21 }
 0x5ad   :  { %v11524_v56 = vpop.eup %11523  ;;  %10707 = vmatmul.mubr.msk.f32.gmra.mrb[102].mxu0 %vm1397_vm3, %v6583_v61  ;;  %v5952_v9 = vsub.f32 %v5824_v14, %v5888_v29  ;;  %v5419_v36 = vpop.xlane.xlu1 %5418  ;;  %v16826_v17 = vmul.f32 %v11522_v53, %v6077_v40  ;;  %11535 = verf.f32 %v6395_v59  ;;  %v19593_v40 = vld [vmem:[#allocation102_spill] sm:$0xff] }
 0x5ae   :  { %v6017_v2 = vmax.f32 %v5953_v37, 0.0  ;;  %v16828_v28 = vmul.f32 0.03125, %v5419_v36  ;;  %v5416_v23 = vpop.xlane.xlu0 %5415  ;;  %v11526_v20 = vpop.eup %11525  ;;  %v16833_v5 = vmul.f32 %v11524_v56, %v6076_v48  ;;  %v6078_v39 = vsub.f32 %v19593_v40, %v16786_v31 }
 0x5af   :  { %v6016_v46 = vmax.f32 %v5952_v9, 0.0  ;;  %v16830_v60 = vmul.f32 0.03125, %v5416_v23  ;;  %v11528_v52 = vpop.eup %11527  ;;  %v6520_v0 = vadd.f32 1.0, %v11526_v20  ;;  %v6397_v54 = vmul.f32 0.70710677, %v16826_v17 }
 0x5b0   :  { %v6145_v49 = vadd.f32 1e-05, %v6017_v2  ;;  %v5891_v42 = vmul.f32 %v16828_v28, %v16828_v28  ;;  %v6521_v1 = vadd.f32 1.0, %v11528_v52  ;;  %v6396_v62 = vmul.f32 0.70710677, %v16833_v5 }
 0x5b1   :  { %v6144_v11 = vadd.f32 1e-05, %v6016_v46  ;;  %v5675_v50 = vpop.xlane.xlu1 %5674  ;;  %v5890_v57 = vmul.f32 %v16830_v60, %v16830_v60  ;;  %v6584_v13 = vmul.f32 %v6520_v0, %v6328_v34  ;;  %v6330_v31 = vmul.f32 0.5, %v16810_v30 }
 0x5b2   :  { %11537 = vrsqrt.f32 %v6145_v49  ;;  %v5827_v27 = vmul.f32 0.03125, %v5675_v50  ;;  %v5672_v7 = vpop.xlane.xlu0 %5671  ;;  %v6585_v8 = vmul.f32 %v6521_v1, %v6329_v6  ;;  %v6331_v2 = vmul.f32 0.5, %v16806_v10 }
 0x5b3   :  { %11539 = vrsqrt.f32 %v6144_v11  ;;  %v5826_v41 = vmul.f32 0.03125, %v5672_v7  ;;  %10709 = vmatprep.mubr.msk.f32.mxu0 %vm1397_vm3, %v6584_v13  ;;  %v19595_v11 = vld [vmem:[#allocation70_spill] sm:$0xff] }
 0x5b4   :  { %v11530_v18 = vpop.eup %11529  ;;  %v5955_v24 = vsub.f32 %v5827_v27, %v5891_v42  ;;  %11541 = verf.f32 %v6397_v54  ;;  %10710 = vmatmul.mubr.msk.f32.gmra.mrb[104].mxu0 %vm1397_vm3, %v6585_v8  ;;  %v19594_v54 = vld [vmem:[#allocation104_spill] sm:$0xff]  ;;  %v6080_v42 = vsub.f32 %v19595_v11, %v16808_v12 }
 0x5b5   :  { %v11532_v45 = vpop.eup %11531  ;;  %v5954_v47 = vsub.f32 %v5826_v41, %v5890_v57  ;;  %v5425_v29 = vpop.xlane.xlu1 %5424  ;;  %11543 = verf.f32 %v6396_v62  ;;  %v16848_v55 = vmul.f32 %v11530_v18, %v6079_v58  ;;  %v6081_v22 = vsub.f32 %v19594_v54, %v16804_v25  ;;  %v19598_v11 = vld [vmem:[#allocation76_spill] sm:$0xff] }
 0x5b6   :  { %v6019_v51 = vmax.f32 %v5955_v24, 0.0  ;;  %v16850_v32 = vmul.f32 0.03125, %v5425_v29  ;;  %v5422_v61 = vpop.xlane.xlu0 %5421  ;;  %v11534_v44 = vpop.eup %11533  ;;  %v16854_v59 = vmul.f32 %v11532_v45, %v6078_v39  ;;  %v6332_v45 = vmul.f32 0.5, %v16833_v5 }
 0x5b7   :  { %v6018_v14 = vmax.f32 %v5954_v47, 0.0  ;;  %v16852_v21 = vmul.f32 0.03125, %v5422_v61  ;;  %v11536_v53 = vpop.eup %11535  ;;  %v6522_v56 = vadd.f32 1.0, %v11534_v44  ;;  %v6399_v15 = vmul.f32 0.70710677, %v16848_v55 }
 0x5b8   :  { %v6147_v37 = vadd.f32 1e-05, %v6019_v51  ;;  %v5893_v9 = vmul.f32 %v16850_v32, %v16850_v32  ;;  %v6523_v23 = vadd.f32 1.0, %v11536_v53  ;;  %v6398_v34 = vmul.f32 0.70710677, %v16854_v59 }
 0x5b9   :  { %v6146_v48 = vadd.f32 1e-05, %v6018_v14  ;;  %v5681_v36 = vpop.xlane.xlu1 %5680  ;;  %v5892_v20 = vmul.f32 %v16852_v21, %v16852_v21  ;;  %v6586_v6 = vmul.f32 %v6522_v56, %v6330_v31  ;;  %v6333_v39 = vmul.f32 0.5, %v16826_v17 }
 0x5ba   :  { %11545 = vrsqrt.f32 %v6147_v37  ;;  %v5829_v46 = vmul.f32 0.03125, %v5681_v36  ;;  %v5678_v52 = vpop.xlane.xlu0 %5677  ;;  %v6587_v30 = vmul.f32 %v6523_v23, %v6331_v2  ;;  %v19597_v2 = vld [vmem:[#allocation30_spill] sm:$0xff] }
 0x5bb   :  { %11547 = vrsqrt.f32 %v6146_v48  ;;  %v5828_v49 = vmul.f32 0.03125, %v5678_v52  ;;  %10712 = vmatprep.mubr.msk.f32.mxu0 %vm1397_vm3, %v6586_v6  ;;  %v6082_v23 = vsub.f32 %v19597_v2, %v16830_v60 }
 0x5bc   :  { %v11538_v0 = vpop.eup %11537  ;;  %v5957_v58 = vsub.f32 %v5829_v46, %v5893_v9  ;;  %11549 = verf.f32 %v6399_v15  ;;  %10713 = vmatmul.mubr.msk.f32.gmra.mrb[106].mxu0 %vm1397_vm3, %v6587_v30  ;;  %v19596_v9 = vld [vmem:[#allocation31_spill] sm:$0xff] }
 0x5bd   :  { %v11540_v10 = vpop.eup %11539  ;;  %v5956_v50 = vsub.f32 %v5828_v49, %v5892_v20  ;;  %v5431_v1 = vpop.xlane.xlu1 %5430  ;;  %11551 = verf.f32 %v6398_v34  ;;  %v16872_v8 = vmul.f32 %v11538_v0, %v6081_v22  ;;  %v6083_v36 = vsub.f32 %v19596_v9, %v16828_v28 }
 0x5be   :  { %v11542_v57 = vpop.eup %11541  ;;  %v6021_v27 = vmax.f32 %v5957_v58, 0.0  ;;  %v16870_v13 = vmul.f32 0.03125, %v5431_v1  ;;  %v5428_v7 = vpop.xlane.xlu0 %5427  ;;  %v16876_v24 = vmul.f32 %v11540_v10, %v6080_v42  ;;  %v6334_v58 = vmul.f32 0.5, %v16854_v59 }
 0x5bf   :  { %v11544_v25 = vpop.eup %11543  ;;  %v6020_v41 = vmax.f32 %v5956_v50, 0.0  ;;  %v16874_v62 = vmul.f32 0.03125, %v5428_v7  ;;  %v6525_v18 = vadd.f32 1.0, %v11542_v57  ;;  %v6401_v56 = vmul.f32 0.70710677, %v16872_v8 }
 0x5c0   :  { %v6149_v12 = vadd.f32 1e-05, %v6021_v27  ;;  %v6524_v40 = vadd.f32 1.0, %v11544_v25  ;;  %v5895_v29 = vmul.f32 %v16870_v13, %v16870_v13  ;;  %v6400_v5 = vmul.f32 0.70710677, %v16876_v24 }
 0x5c1   :  { %v6148_v47 = vadd.f32 1e-05, %v6020_v41  ;;  %v5894_v51 = vmul.f32 %v16874_v62, %v16874_v62  ;;  %v5687_v61 = vpop.xlane.xlu1 %5686  ;;  %v6589_v53 = vmul.f32 %v6525_v18, %v6333_v39  ;;  %v6085_v42 = vsub.f32 %v19598_v11, %v16850_v32 }
 0x5c2   :  { %11553 = vrsqrt.f32 %v6149_v12  ;;  %v5831_v44 = vmul.f32 0.03125, %v5687_v61  ;;  %v6588_v14 = vmul.f32 %v6524_v40, %v6332_v45  ;;  %v5684_v37 = vpop.xlane.xlu0 %5683  ;;  %v6335_v57 = vmul.f32 0.5, %v16848_v55 }
 0x5c3   :  { %11555 = vrsqrt.f32 %v6148_v47  ;;  %v5830_v31 = vmul.f32 0.03125, %v5684_v37 }
 0x5c4   :  { %v11546_v17 = vpop.eup %11545  ;;  %v5959_v15 = vsub.f32 %v5831_v44, %v5895_v29  ;;  %10715 = vmatprep.mubr.msk.f32.mxu0 %vm1397_vm3, %v6588_v14  ;;  %11557 = verf.f32 %v6400_v5  ;;  %v19599_v29 = vld [vmem:[#allocation40_spill] sm:$0xff] }
 0x5c5   :  { %v11548_v48 = vpop.eup %11547  ;;  %10716 = vmatmul.mubr.msk.f32.gmra.mrb[108].mxu0 %vm1397_vm3, %v6589_v53  ;;  %v5958_v20 = vsub.f32 %v5830_v31, %v5894_v51  ;;  %v5437_v46 = vpop.xlane.xlu1 %5436  ;;  %11559 = verf.f32 %v6401_v56  ;;  %v16898_v28 = vmul.f32 %v11546_v17, %v6083_v36  ;;  %v6084_v51 = vsub.f32 %v19599_v29, %v16852_v21 }
 0x5c6   :  { %v11550_v6 = vpop.eup %11549  ;;  %v6023_v52 = vmax.f32 %v5959_v15, 0.0  ;;  %v16892_v30 = vmul.f32 0.03125, %v5437_v46  ;;  %v5434_v49 = vpop.xlane.xlu0 %5433  ;;  %v16896_v22 = vmul.f32 %v11548_v48, %v6082_v23  ;;  %v6336_v31 = vmul.f32 0.5, %v16876_v24 }
 0x5c7   :  { %v11552_v34 = vpop.eup %11551  ;;  %v16894_v0 = vmul.f32 0.03125, %v5434_v49  ;;  %v6527_v54 = vadd.f32 1.0, %v11550_v6  ;;  %v6022_v60 = vmax.f32 %v5958_v20, 0.0  ;;  %v6403_v40 = vmul.f32 0.70710677, %v16898_v28 }
 0x5c8   :  { %v6526_v10 = vadd.f32 1.0, %v11552_v34  ;;  %v6151_v50 = vadd.f32 1e-05, %v6023_v52  ;;  %v5897_v27 = vmul.f32 %v16892_v30, %v16892_v30  ;;  %v6402_v59 = vmul.f32 0.70710677, %v16896_v22 }
 0x5c9   :  { %v5693_v1 = vpop.xlane.xlu1 %5692  ;;  %v5896_v7 = vmul.f32 %v16894_v0, %v16894_v0  ;;  %v6591_v12 = vmul.f32 %v6527_v54, %v6335_v57  ;;  %v6150_v39 = vadd.f32 1e-05, %v6022_v60  ;;  %v6337_v20 = vmul.f32 0.5, %v16872_v8 }
 0x5ca   :  { %v5833_v25 = vmul.f32 0.03125, %v5693_v1  ;;  %v6590_v41 = vmul.f32 %v6526_v10, %v6334_v58  ;;  %v5690_v18 = vpop.xlane.xlu0 %5689  ;;  %11561 = verf.f32 %v6402_v59  ;;  %v16933_v10 = vld [vmem:[%s19194_s8] ss:$0 sm:$0xff]  ;;  %v6087_v29 = vsub.f32 %v16348_v43, %v16870_v13 }
 0x5cb   :  { %v5832_v45 = vmul.f32 0.03125, %v5690_v18  ;;  %11563 = verf.f32 %v6403_v40 }
 0x5cc   :  { %v11554_v32 = vpop.eup %11553  ;;  %v5961_v47 = vsub.f32 %v5833_v25, %v5897_v27  ;;  %10718 = vmatprep.mubr.msk.f32.mxu0 %vm1397_vm3, %v6590_v41  ;;  %11565 = vrsqrt.f32 %v6151_v50 }
 0x5cd   :  { %v11556_v55 = vpop.eup %11555  ;;  %10719 = vmatmul.mubr.msk.f32.gmra.mrb[110].mxu0 %vm1397_vm3, %v6591_v12  ;;  %v5960_v61 = vsub.f32 %v5832_v45, %v5896_v7  ;;  %v5443_v44 = vpop.xlane.xlu1 %5442  ;;  %v16914_v14 = vmul.f32 %v11554_v32, %v6085_v42  ;;  %11567 = vrsqrt.f32 %v6150_v39  ;;  %v6338_v39 = vmul.f32 0.5, %v16896_v22 }
 0x5ce   :  { %v16916_v53 = vmul.f32 0.03125, %v5443_v44  ;;  %v5440_v37 = vpop.xlane.xlu0 %5439  ;;  %v11558_v5 = vpop.eup %11557  ;;  %v16921_v15 = vmul.f32 %v11556_v55, %v6084_v51  ;;  %v6025_v48 = vmax.f32 %v5961_v47, 0.0  ;;  %v6339_v44 = vmul.f32 0.5, %v16898_v28 }
 0x5cf   :  { %v6024_v56 = vmax.f32 %v5960_v61, 0.0  ;;  %v16919_v17 = vmul.f32 0.03125, %v5440_v37  ;;  %v11560_v21 = vpop.eup %11559  ;;  %v6528_v9 = vadd.f32 1.0, %v11558_v5  ;;  %v6405_v36 = vmul.f32 0.70710677, %v16914_v14 }
 0x5d0   :  { %v6529_v46 = vadd.f32 1.0, %v11560_v21  ;;  %v5899_v24 = vmul.f32 %v16916_v53, %v16916_v53  ;;  %v6404_v58 = vmul.f32 0.70710677, %v16921_v15  ;;  %v6153_v8 = vadd.f32 1e-05, %v6025_v48 }
 0x5d1   :  { %v6152_v2 = vadd.f32 1e-05, %v6024_v56  ;;  %v5699_v23 = vpop.xlane.xlu1 %5698  ;;  %v5898_v6 = vmul.f32 %v16919_v17, %v16919_v17  ;;  %v6592_v49 = vmul.f32 %v6528_v9, %v6336_v31  ;;  %v10651_v1 = vpop.f32.mrb[64].mxu0  ;;  %v6086_v22 = vsub.f32 %v16351_v3, %v16874_v62 }
 0x5d2   :  { %v5835_v52 = vmul.f32 0.03125, %v5699_v23  ;;  %v5696_v34 = vpop.xlane.xlu0 %5695  ;;  %v6593_v54 = vmul.f32 %v6529_v46, %v6337_v20  ;;  %v16940_v25 = vadd.f32 %v10651_v1, %v16933_v10  ;;  %v6877_v41 = vpop.f32.mrb[65].mxu0  ;;  %v6088_v46 = vsub.f32 %v16383_v16, %v16894_v0 }
 0x5d3   :  { %11569 = vrsqrt.f32 %v6152_v2  ;;  %v5834_v60 = vmul.f32 0.03125, %v5696_v34  ;;  %10721 = vmatprep.mubr.msk.f32.mxu0 %vm1397_vm3, %v6592_v49  ;;  %v16945_v59 = vadd.f32 %v16933_v10, %v6877_v41  ;;  %v6089_v16 = vsub.f32 %v16378_v33, %v16892_v30 }
 0x5d4   :  { %v5963_v11 = vsub.f32 %v5835_v52, %v5899_v24  ;;  %11571 = verf.f32 %v6405_v36  ;;  %10722 = vmatmul.mubr.msk.f32.gmra.mrb[112].mxu0 %vm1397_vm3, %v6593_v54  ;;  %v11562_v18 = vpop.eup %11561  ;;  %8926 = vrot.lane.b32.xlu1 %v16940_v25, %s11870_s24 }
 0x5d5   :  { %v5962_v42 = vsub.f32 %v5834_v60, %v5898_v6  ;;  %v5449_v50 = vpop.xlane.xlu1 %5448  ;;  %11573 = verf.f32 %v6404_v58  ;;  %v11564_v40 = vpop.eup %11563  ;;  %v6530_v47 = vadd.f32 1.0, %v11562_v18  ;;  %8924 = vrot.lane.b32.xlu0 %v16945_v59, %s11870_s24  ;;  %v6341_v60 = vmul.f32 0.5, %v16914_v14 }
 0x5d6   :  { %v6027_v57 = vmax.f32 %v5963_v11, 0.0  ;;  %v16937_v27 = vmul.f32 0.03125, %v5449_v50  ;;  %v5446_v7 = vpop.xlane.xlu0 %5445  ;;  %11575 = vrsqrt.f32 %v6153_v8  ;;  %v11566_v55 = vpop.eup %11565  ;;  %v6531_v37 = vadd.f32 1.0, %v11564_v40 }
 0x5d7   :  { %v6026_v12 = vmax.f32 %v5962_v42, 0.0  ;;  %v16942_v45 = vmul.f32 0.03125, %v5446_v7  ;;  %v11568_v31 = vpop.eup %11567  ;;  %v6594_v21 = vmul.f32 %v6530_v47, %v6338_v39  ;;  %v16965_v23 = vmul.f32 %v11566_v55, %v6087_v29 }
 0x5d8   :  { %v6155_v32 = vadd.f32 1e-05, %v6027_v57  ;;  %v5901_v5 = vmul.f32 %v16937_v27, %v16937_v27  ;;  %v6595_v13 = vmul.f32 %v6531_v37, %v6339_v44  ;;  %v16963_v2 = vmul.f32 %v11568_v31, %v6086_v22 }
 0x5d9   :  { %v6154_v51 = vadd.f32 1e-05, %v6026_v12  ;;  %v5705_v61 = vpop.xlane.xlu1 %5704  ;;  %v5900_v43 = vmul.f32 %v16942_v45, %v16942_v45  ;;  %10724 = vmatprep.mubr.msk.f32.mxu0 %vm1397_vm3, %v6594_v21  ;;  %v6340_v11 = vmul.f32 0.5, %v16921_v15  ;;  %v6407_v7 = vmul.f32 0.70710677, %v16965_v23 }
 0x5da   :  { %v5837_v56 = vmul.f32 0.03125, %v5705_v61  ;;  %v5702_v48 = vpop.xlane.xlu0 %5701  ;;  %11577 = vrsqrt.f32 %v6155_v32  ;;  %10725 = vmatmul.mubr.msk.f32.gmra.mrb[114].mxu0 %vm1397_vm3, %v6595_v13  ;;  %v6406_v57 = vmul.f32 0.70710677, %v16963_v2  ;;  %v6091_v31 = vsub.f32 %v16423_v19, %v16916_v53 }
 0x5db   :  { %v5836_v28 = vmul.f32 0.03125, %v5702_v48  ;;  %11579 = vrsqrt.f32 %v6154_v51 }
 0x5dc   :  { %v5965_v9 = vsub.f32 %v5837_v56, %v5901_v5  ;;  %v6090_v56 = vsub.f32 %v16427_v38, %v16919_v17 }
 0x5dd   :  { %v11570_v36 = vpop.eup %11569  ;;  %v5964_v3 = vsub.f32 %v5836_v28, %v5900_v43  ;;  %v5455_v62 = vpop.xlane.xlu1 %5454  ;;  %v6093_v28 = vsub.f32 %v16472_v35, %v16937_v27 }
 0x5de   :  { %v11572_v20 = vpop.eup %11571  ;;  %v6029_v24 = vmax.f32 %v5965_v9, 0.0  ;;  %v16969_v6 = vmul.f32 0.03125, %v5455_v62  ;;  %v5452_v52 = vpop.xlane.xlu0 %5451  ;;  %v16975_v50 = vmul.f32 %v11570_v36, %v6088_v46  ;;  %v6092_v36 = vsub.f32 %v16482_v26, %v16942_v45 }
 0x5df   :  { %v11574_v49 = vpop.eup %11573  ;;  %v6028_v34 = vmax.f32 %v5964_v3, 0.0  ;;  %v16971_v54 = vmul.f32 0.03125, %v5452_v52  ;;  %v6533_v58 = vadd.f32 1.0, %v11572_v20 }
 0x5e0   :  { %v6157_v8 = vadd.f32 1e-05, %v6029_v24  ;;  %v6532_v42 = vadd.f32 1.0, %v11574_v49  ;;  %v11576_v41 = vpop.eup %11575  ;;  %v5903_v14 = vmul.f32 %v16969_v6, %v16969_v6  ;;  %v6408_v47 = vmul.f32 0.70710677, %v16975_v50 }
 0x5e1   :  { %v6156_v0 = vadd.f32 1e-05, %v6028_v34  ;;  %v5711_v1 = vpop.xlane.xlu1 %5710  ;;  %v5902_v40 = vmul.f32 %v16971_v54, %v16971_v54  ;;  %v6597_v32 = vmul.f32 %v6533_v58, %v6341_v60  ;;  %v6281_v44 = vmul.f32 %v11576_v41, %v6089_v16 }
 0x5e2   :  { %11581 = vrsqrt.f32 %v6157_v8  ;;  %v5839_v18 = vmul.f32 0.03125, %v5711_v1  ;;  %v6596_v12 = vmul.f32 %v6532_v42, %v6340_v11  ;;  %v5708_v15 = vpop.xlane.xlu0 %5707  ;;  %v10654_v39 = vpop.f32.mrb[66].mxu0  ;;  %v6342_v49 = vmul.f32 0.5, %v16963_v2 }
 0x5e3   :  { %11583 = vrsqrt.f32 %v6156_v0  ;;  %v5838_v33 = vmul.f32 0.03125, %v5708_v15  ;;  %v16989_v51 = vadd.f32 %v10654_v39, %v16933_v10  ;;  %v6887_v61 = vpop.f32.mrb[67].mxu0  ;;  %v6409_v53 = vmul.f32 0.70710677, %v6281_v44 }
 0x5e4   :  { %v5967_v30 = vsub.f32 %v5839_v18, %v5903_v14  ;;  %10727 = vmatprep.mubr.msk.f32.mxu0 %vm1397_vm3, %v6596_v12  ;;  %v11578_v55 = vpop.eup %11577  ;;  %11585 = verf.f32 %v6406_v57  ;;  %v16994_v5 = vadd.f32 %v16933_v10, %v6887_v61  ;;  %v6095_v8 = vsub.f32 %v16511_v63, %v16969_v6 }
 0x5e5   :  { %10728 = vmatmul.mubr.msk.f32.gmra.mrb[116].mxu0 %vm1397_vm3, %v6597_v32  ;;  %v5966_v29 = vsub.f32 %v5838_v33, %v5902_v40  ;;  %v11580_v37 = vpop.eup %11579  ;;  %11587 = verf.f32 %v6407_v7  ;;  %8930 = vrot.lane.b32.xlu1 %v16989_v51, %s11870_s24  ;;  %v6283_v43 = vmul.f32 %v11578_v55, %v6091_v31  ;;  %v6343_v11 = vmul.f32 0.5, %v16965_v23 }
 0x5e6   :  { %v6031_v22 = vmax.f32 %v5967_v30, 0.0  ;;  %8928 = vrot.lane.b32.xlu0 %v16994_v5, %s11870_s24  ;;  %11589 = verf.f32 %v6408_v47  ;;  %v6282_v13 = vmul.f32 %v11580_v37, %v6090_v56  ;;  %v6344_v0 = vmul.f32 0.5, %v16975_v50 }
 0x5e7   :  { %v6030_v21 = vmax.f32 %v5966_v29, 0.0  ;;  %v10657_v38 = vpop.f32.mrb[68].mxu0  ;;  %v6411_v20 = vmul.f32 0.70710677, %v6283_v43  ;;  %v6094_v7 = vsub.f32 %v16524_v4, %v16971_v54  ;;  %v6345_v6 = vmul.f32 0.5, %v6281_v44 }
 0x5e8   :  { %v6159_v48 = vadd.f32 1e-05, %v6031_v22  ;;  %v6410_v17 = vmul.f32 0.70710677, %v6282_v13  ;;  %v17007_v3 = vadd.f32 %v10657_v38, %v16933_v10  ;;  %v6897_v62 = vpop.f32.mrb[69].mxu0  ;;  %v6346_v54 = vmul.f32 0.5, %v6282_v13 }
 0x5e9   :  { %v6158_v19 = vadd.f32 1e-05, %v6030_v21  ;;  %v17010_v24 = vadd.f32 %v16933_v10, %v6897_v62  ;;  %v6347_v30 = vmul.f32 0.5, %v6283_v43 }
 0x5ea   :  { %11591 = vrsqrt.f32 %v6159_v48  ;;  %8934 = vrot.lane.b32.xlu1 %v17007_v3, %s11870_s24 }
 0x5eb   :  { %11593 = vrsqrt.f32 %v6158_v19  ;;  %8932 = vrot.lane.b32.xlu0 %v17010_v24, %s11870_s24 }
 0x5ec   :  { %v11582_v9 = vpop.eup %11581  ;;  %11595 = verf.f32 %v6409_v53 }
 0x5ed   :  { %v11584_v46 = vpop.eup %11583  ;;  %v6285_v52 = vmul.f32 %v11582_v9, %v6093_v28  ;;  %11597 = verf.f32 %v6410_v17  ;;  %v7261_v28 = vand.u32 2147483647, %v16940_v25 }
 0x5ee   :  { %v6284_v35 = vmul.f32 %v11584_v46, %v6092_v36  ;;  %v11586_v26 = vpop.eup %11585  ;;  %11599 = verf.f32 %v6411_v20  ;;  %v7260_v36 = vand.u32 2147483647, %v16945_v59 }
 0x5ef   :  { %v11588_v45 = vpop.eup %11587  ;;  %v6534_v34 = vadd.f32 1.0, %v11586_v26  ;;  %v6413_v60 = vmul.f32 0.70710677, %v6285_v52  ;;  %v6349_v19 = vmul.f32 0.5, %v6285_v52  ;;  %v7325_v26 = vsub.f32 0.0, %v7261_v28 }
 0x5f0   :  { %v6412_v27 = vmul.f32 0.70710677, %v6284_v35  ;;  %v11590_v58 = vpop.eup %11589  ;;  %v6535_v42 = vadd.f32 1.0, %v11588_v45  ;;  %v6348_v56 = vmul.f32 0.5, %v6284_v35  ;;  %v7324_v45 = vsub.f32 0.0, %v7260_v36 }
 0x5f1   :  { %v6598_v16 = vmul.f32 %v6534_v34, %v6342_v49  ;;  %v6536_v1 = vadd.f32 1.0, %v11590_v58 }
 0x5f2   :  { %11601 = verf.f32 %v6412_v27  ;;  %v6599_v2 = vmul.f32 %v6535_v42, %v6343_v11  ;;  %v7388_v58 = vmul.f32 1.442695, %v7324_v45  ;;  %v7262_v42 = vand.u32 2147483647, %v16994_v5 }
 0x5f3   :  { %11603 = verf.f32 %v6413_v60  ;;  %10730 = vmatprep.mubr.msk.f32.mxu0 %vm1397_vm3, %v6598_v16  ;;  %v6600_v14 = vmul.f32 %v6536_v1, %v6344_v0  ;;  %v7390_v60 = vmul.f32 1.442695, %v7325_v26 }
 0x5f4   :  { %v11592_v57 = vpop.eup %11591  ;;  %10731 = vmatmul.mubr.msk.f32.gmra.mrb[118].mxu0 %vm1397_vm3, %v6599_v2 }
 0x5f5   :  { %v11594_v41 = vpop.eup %11593  ;;  %v6287_v18 = vmul.f32 %v11592_v57, %v6095_v8  ;;  %10733 = vmatprep.mubr.msk.f32.mxu0 %vm1397_vm3, %v6600_v14  ;;  %v7263_v8 = vand.u32 2147483647, %v16989_v51 }
 0x5f6   :  { %v11596_v63 = vpop.eup %11595  ;;  %v6286_v23 = vmul.f32 %v11594_v41, %v6094_v7  ;;  %v7326_v7 = vsub.f32 0.0, %v7262_v42 }
 0x5f7   :  { %v6537_v50 = vadd.f32 1.0, %v11596_v63  ;;  %v6415_v12 = vmul.f32 0.70710677, %v6287_v18  ;;  %v11598_v40 = vpop.eup %11597  ;;  %v6351_v27 = vmul.f32 0.5, %v6287_v18  ;;  %v7327_v57 = vsub.f32 0.0, %v7263_v8 }
 0x5f8   :  { %v6414_v15 = vmul.f32 0.70710677, %v6286_v23  ;;  %v11600_v4 = vpop.eup %11599  ;;  %v6538_v33 = vadd.f32 1.0, %v11598_v40  ;;  %v6350_v52 = vmul.f32 0.5, %v6286_v23  ;;  %v7392_v41 = vmul.f32 1.442695, %v7326_v7 }
 0x5f9   :  { %v6601_v32 = vmul.f32 %v6537_v50, %v6345_v6  ;;  %11605 = verf.f32 %v6415_v12  ;;  %v6539_v39 = vadd.f32 1.0, %v11600_v4  ;;  %v10660_v47 = vpop.f32.mrb[70].mxu0  ;;  %v7394_v2 = vmul.f32 1.442695, %v7327_v57 }
 0x5fa   :  { %11607 = verf.f32 %v6414_v15  ;;  %v6602_v29 = vmul.f32 %v6538_v33, %v6346_v54  ;;  %v17028_v61 = vadd.f32 %v10660_v47, %v16933_v10  ;;  %v6907_v44 = vpop.f32.mrb[71].mxu0  ;;  %v7265_v12 = vand.u32 2147483647, %v17007_v3 }
 0x5fb   :  { %10734 = vmatmul.mubr.msk.f32.gmra.mrb[120].mxu0 %vm1397_vm3, %v6601_v32  ;;  %v6603_v31 = vmul.f32 %v6539_v39, %v6347_v30  ;;  %v17031_v22 = vadd.f32 %v16933_v10, %v6907_v44  ;;  %11609 = vpow2.f32 %v7390_v60  ;;  %v7264_v15 = vand.u32 2147483647, %v17010_v24 }
 0x5fc   :  { %v11602_v55 = vpop.eup %11601  ;;  %19600 = vst [vmem:[#allocation39_spill] sm:$0xff] %v17028_v61  ;;  %10736 = vmatprep.mubr.msk.f32.mxu0 %vm1397_vm3, %v6602_v29  ;;  %8938 = vrot.lane.b32.xlu1 %v17028_v61, %s11870_s24  ;;  %11611 = vpow2.f32 %v7388_v58  ;;  %v7329_v4 = vsub.f32 0.0, %v7265_v12  ;;  %v7198_v57 = vmax.f32 %v16994_v5, 0.0 }
 0x5fd   :  { %v11604_v37 = vpop.eup %11603  ;;  %19601 = vst [vmem:[#allocation77_spill] sm:$0xff] %v17031_v22  ;;  %v6540_v21 = vadd.f32 1.0, %v11602_v55  ;;  %8936 = vrot.lane.b32.xlu0 %v17031_v22, %s11870_s24  ;;  %11613 = vpow2.f32 %v7394_v2  ;;  %v7328_v54 = vsub.f32 0.0, %v7264_v15  ;;  %v7197_v2 = vmax.f32 %v16940_v25, 0.0 }
 0x5fe   :  { %v6541_v48 = vadd.f32 1.0, %v11604_v37  ;;  %11615 = vpow2.f32 %v7392_v41  ;;  %v7398_v30 = vmul.f32 1.442695, %v7329_v4 }
 0x5ff   :  { %10737 = vmatmul.mubr.msk.f32.gmra.mrb[122].mxu0 %vm1397_vm3, %v6603_v31  ;;  %v6604_v43 = vmul.f32 %v6540_v21, %v6348_v56  ;;  %v10663_v13 = vpop.f32.mrb[72].mxu0  ;;  %v7396_v29 = vmul.f32 1.442695, %v7328_v54  ;;  %v7267_v31 = vand.u32 2147483647, %v17028_v61 }
 0x600   :  { %v6605_v53 = vmul.f32 %v6541_v48, %v6349_v19  ;;  %v17042_v38 = vadd.f32 %v10663_v13, %v16933_v10  ;;  %v6917_v17 = vpop.f32.mrb[73].mxu0  ;;  %v7266_v48 = vand.u32 2147483647, %v17031_v22 }
 0x601   :  { %10739 = vmatprep.mubr.msk.f32.mxu0 %vm1397_vm3, %v6604_v43  ;;  %v17047_v62 = vadd.f32 %v16933_v10, %v6917_v17  ;;  %v7331_v28 = vsub.f32 0.0, %v7267_v31 }
 0x602   :  { %19602 = vst [vmem:[#allocation45_spill] sm:$0xff] %v17042_v38  ;;  %8942 = vrot.lane.b32.xlu1 %v17042_v38, %s11870_s24 }
 0x603   :  { %v11606_v9 = vpop.eup %11605  ;;  %10740 = vmatmul.mubr.msk.f32.gmra.mrb[124].mxu0 %vm1397_vm3, %v6605_v53  ;;  %19603 = vst [vmem:[#allocation44_spill] sm:$0xff] %v17047_v62  ;;  %8940 = vrot.lane.b32.xlu0 %v17047_v62, %s11870_s24  ;;  %v7402_v26 = vmul.f32 1.442695, %v7331_v28  ;;  %v7268_v15 = vand.u32 2147483647, %v17047_v62 }
 0x604   :  { %v11608_v20 = vpop.eup %11607  ;;  %v6543_v46 = vadd.f32 1.0, %v11606_v9  ;;  %v7330_v9 = vsub.f32 0.0, %v7266_v48 }
 0x605   :  { %v6542_v35 = vadd.f32 1.0, %v11608_v20  ;;  %v11610_v18 = vpop.eup %11609 }
 0x606   :  { %v6607_v34 = vmul.f32 %v6543_v46, %v6351_v27  ;;  %v11612_v6 = vpop.eup %11611  ;;  %v7525_v40 = vadd.f32 1.0, %v11610_v18  ;;  %v7528_v56 = vmul.f32 -0.5, %v11610_v18  ;;  %v7531_v36 = vand.u32 2147483647, %v11610_v18 }
 0x607   :  { %v6606_v49 = vmul.f32 %v6542_v35, %v6350_v52  ;;  %v7516_v32 = vadd.f32 1.0, %v11612_v6  ;;  %v17082_v55 = vpop.eup %11613  ;;  %v7519_v43 = vmul.f32 -0.5, %v11612_v6  ;;  %v7522_v52 = vand.u32 2147483647, %v11612_v6 }
 0x608   :  { %11617 = vlog2.f32 %v7525_v40  ;;  %v17089_v37 = vpop.eup %11615  ;;  %v7543_v21 = vadd.f32 1.0, %v17082_v55  ;;  %v7529_v17 = vadd.f32 1.0, %v7528_v56  ;;  %vm17100_vm4 = vcmp.lt.f32.partialorder %v7531_v36, 0.0004427343 }
 0x609   :  { %10742 = vmatprep.mubr.msk.f32.mxu0 %vm1397_vm3, %v6606_v49  ;;  %11619 = vlog2.f32 %v7516_v32  ;;  %v7534_v19 = vadd.f32 1.0, %v17089_v37  ;;  %v7520_v20 = vadd.f32 1.0, %v7519_v43  ;;  %v7400_v49 = vmul.f32 1.442695, %v7330_v9 }
 0x60a   :  { %10743 = vmatmul.mubr.msk.f32.gmra.mrb[126].mxu0 %vm1397_vm3, %v6607_v34  ;;  %11621 = vpow2.f32 %v7398_v30  ;;  %v7530_v45 = vmul.f32 %v11610_v18, %v7529_v17  ;;  %vm17111_vm5 = vcmp.lt.f32.partialorder %v7522_v52, 0.0004427343  ;;  %v7196_v18 = vmax.f32 %v16945_v59, 0.0 }
 0x60b   :  { %11623 = vpow2.f32 %v7396_v29  ;;  %v7521_v8 = vmul.f32 %v11612_v6, %v7520_v20  ;;  %v7537_v12 = vmul.f32 -0.5, %v17089_v37  ;;  %v7549_v48 = vand.u32 2147483647, %v17082_v55 }
 0x60c   :  { %v10666_v11 = vpop.f32.mrb[74].mxu0  ;;  %11625 = vlog2.f32 %v7543_v21  ;;  %v7332_v43 = vsub.f32 0.0, %v7268_v15  ;;  %v7540_v17 = vand.u32 2147483647, %v17089_v37 }
 0x60d   :  { %v17058_v16 = vadd.f32 %v10666_v11, %v16933_v10  ;;  %v6927_v0 = vpop.f32.mrb[75].mxu0  ;;  %11627 = vlog2.f32 %v7534_v19  ;;  %vm17146_vm6 = vcmp.lt.f32.partialorder %v7549_v48, 0.0004427343 }
 0x60e   :  { %v17061_v1 = vadd.f32 %v16933_v10, %v6927_v0  ;;  %11629 = vpow2.f32 %v7402_v26  ;;  %v7404_v52 = vmul.f32 1.442695, %v7332_v43  ;;  %vm17158_vm7 = vcmp.lt.f32.partialorder %v7540_v17, 0.0004427343 }
 0x60f   :  { %19604 = vst [vmem:[#allocation50_spill] sm:$0xff] %v17058_v16  ;;  %8946 = vrot.lane.b32.xlu1 %v17058_v16, %s11870_s24  ;;  %11631 = vpow2.f32 %v7400_v49 }
 0x610   :  { %19605 = vst [vmem:[#allocation49_spill] sm:$0xff] %v17061_v1  ;;  %8944 = vrot.lane.b32.xlu0 %v17061_v1, %s11870_s24 }
 0x612   :  { %v11618_v53 = vpop.eup %11617 }
 0x613   :  { %v11620_v13 = vpop.eup %11619  ;;  %v7527_v46 = vmul.f32 0.6931472, %v11618_v53 }
 0x614   :  { %v7518_v35 = vmul.f32 0.6931472, %v11620_v13  ;;  %v17104_v11 = vpop.eup %11621  ;;  %v7538_v13 = vadd.f32 1.0, %v7537_v12 }
 0x615   :  { %v10669_v14 = vpop.f32.mrb[76].mxu0  ;;  %v7533_v0 = vsel %vm17100_vm4, %v7530_v45, %v7527_v46  ;;  %v17115_v7 = vpop.eup %11623  ;;  %v7561_v4 = vadd.f32 1.0, %v17104_v11 }
 0x616   :  { %v17068_v63 = vadd.f32 %v10669_v14, %v16933_v10  ;;  %v6937_v23 = vpop.f32.mrb[77].mxu0  ;;  %v7524_v41 = vsel %vm17111_vm5, %v7521_v8, %v7518_v35  ;;  %v7546_v14 = vmul.f32 -0.5, %v17082_v55  ;;  %v8093_v40 = vadd.f32 %v7533_v0, %v7197_v2  ;;  %v11626_v54 = vpop.eup %11625  ;;  %v19620_v35 = vld [vmem:[#allocation2_spill] sm:$0xff] }
 0x617   :  { %v17071_v50 = vadd.f32 %v16933_v10, %v6937_v23  ;;  %v7269_v23 = vand.u32 2147483647, %v17042_v38  ;;  %v7552_v30 = vadd.f32 1.0, %v17115_v7  ;;  %v11628_v31 = vpop.eup %11627  ;;  %v7545_v53 = vmul.f32 0.6931472, %v11626_v54 }
 0x618   :  { %19606 = vst [vmem:[#allocation54_spill] sm:$0xff] %v17068_v63  ;;  %8950 = vrot.lane.b32.xlu1 %v17068_v63, %s11870_s24  ;;  %v7547_v29 = vadd.f32 1.0, %v7546_v14  ;;  %11633 = vlog2.f32 %v7561_v4  ;;  %v7536_v36 = vmul.f32 0.6931472, %v11628_v31  ;;  %v8477_v26 = vmul.f32 %v19620_v35, %v8093_v40  ;;  %v17154_v49 = vpop.eup %11629 }
 0x619   :  { %19607 = vst [vmem:[#allocation53_spill] sm:$0xff] %v17071_v50  ;;  %8948 = vrot.lane.b32.xlu0 %v17071_v50, %s11870_s24  ;;  %v7333_v56 = vsub.f32 0.0, %v7269_v23  ;;  %11635 = vlog2.f32 %v7552_v30  ;;  %v7539_v45 = vmul.f32 %v17089_v37, %v7538_v13  ;;  %v17162_v0 = vpop.eup %11631  ;;  %v7271_v2 = vand.u32 2147483647, %v17058_v16 }
 0x61a   :  { %v7548_v9 = vmul.f32 %v17082_v55, %v7547_v29  ;;  %v7199_v55 = vmax.f32 %v16989_v51, 0.0  ;;  %v7564_v14 = vmul.f32 -0.5, %v17104_v11  ;;  %v7579_v12 = vadd.f32 1.0, %v17154_v49 }
 0x61b   :  { %v7406_v20 = vmul.f32 1.442695, %v7333_v56  ;;  %v7542_v37 = vsel %vm17158_vm7, %v7539_v45, %v7536_v36  ;;  %v7567_v29 = vand.u32 2147483647, %v17104_v11  ;;  %v7558_v13 = vand.u32 2147483647, %v17115_v7 }
 0x61c   :  { %v8094_v15 = vadd.f32 %v7542_v37, %v7198_v57  ;;  %v7565_v30 = vadd.f32 1.0, %v7564_v14  ;;  %v7200_v8 = vmax.f32 %v17010_v24, 0.0  ;;  %v7273_v37 = vand.u32 2147483647, %v17068_v63 }
 0x61d   :  { %11637 = vpow2.f32 %v7406_v20  ;;  %v19626_v20 = vld [vmem:[#allocation6_spill] sm:$0xff]  ;;  %vm17191_vm8 = vcmp.lt.f32.partialorder %v7567_v29, 0.0004427343  ;;  %vm17203_vm9 = vcmp.lt.f32.partialorder %v7558_v13, 0.0004427343 }
 0x61e   :  { %11639 = vpow2.f32 %v7404_v52  ;;  %v7272_v14 = vand.u32 2147483647, %v17071_v50 }
 0x61f   :  { %11641 = vlog2.f32 %v7579_v12 }
 0x620   :  { %v10672_v33 = vpop.f32.mrb[78].mxu0  ;;  %v7336_v29 = vsub.f32 0.0, %v7272_v14 }
 0x621   :  { %v17080_v39 = vadd.f32 %v10672_v33, %v16933_v10  ;;  %v6947_v47 = vpop.f32.mrb[79].mxu0  ;;  %v8092_v33 = vadd.f32 %v7524_v41, %v7196_v18  ;;  %v7270_v18 = vand.u32 2147483647, %v17061_v1 }
 0x622   :  { %v17085_v44 = vadd.f32 %v16933_v10, %v6947_v47  ;;  %v11634_v4 = vpop.eup %11633 }
 0x623   :  { %19608 = vst [vmem:[#allocation59_spill] sm:$0xff] %v17080_v39  ;;  %8954 = vrot.lane.b32.xlu1 %v17080_v39, %s11870_s24  ;;  %v11636_v54 = vpop.eup %11635  ;;  %v7334_v31 = vsub.f32 0.0, %v7270_v18 }
 0x624   :  { %19609 = vst [vmem:[#allocation58_spill] sm:$0xff] %v17085_v44  ;;  %8952 = vrot.lane.b32.xlu0 %v17085_v44, %s11870_s24  ;;  %v7554_v17 = vmul.f32 0.6931472, %v11636_v54  ;;  %v7337_v54 = vsub.f32 0.0, %v7273_v37  ;;  %v7274_v14 = vand.u32 2147483647, %v17085_v44 }
 0x625   :  { %v7408_v36 = vmul.f32 1.442695, %v7334_v31 }
 0x627   :  { %v17196_v35 = vpop.eup %11637 }
 0x62e   :  { %v10675_v27 = vpop.f32.mrb[80].mxu0 }
 0x62f   :  { %v17098_v34 = vadd.f32 %v10675_v27, %v16933_v10  ;;  %v6957_v60 = vpop.f32.mrb[81].mxu0  ;;  %v7551_v27 = vsel %vm17146_vm6, %v7548_v9, %v7545_v53  ;;  %v7563_v53 = vmul.f32 0.6931472, %v11634_v4 }
 0x630   :  { %v17107_v42 = vadd.f32 %v16933_v10, %v6957_v60  ;;  %v19621_v60 = vld [vmem:[#allocation3_spill] sm:$0xff]  ;;  %v8095_v41 = vadd.f32 %v7551_v27, %v7199_v55 }
 0x631   :  { %19610 = vst [vmem:[#allocation63_spill] sm:$0xff] %v17098_v34  ;;  %8958 = vrot.lane.b32.xlu1 %v17098_v34, %s11870_s24  ;;  %v8476_v58 = vmul.f32 %v19621_v60, %v8092_v33  ;;  %v17207_v60 = vpop.eup %11639 }
 0x632   :  { %19613 = vst [vmem:[#allocation62_spill] sm:$0xff] %v17107_v42  ;;  %8956 = vrot.lane.b32.xlu0 %v17107_v42, %s11870_s24  ;;  %v8479_v46 = vmul.f32 %v19626_v20, %v8095_v41  ;;  %v7414_v20 = vmul.f32 1.442695, %v7337_v54 }
 0x633   :  { %v10678_v6 = vpop.f32.mrb[82].mxu0 }
 0x634   :  { %v6967_v32 = vpop.f32.mrb[83].mxu0  ;;  %v17133_v47 = vadd.f32 %v10678_v6, %v16933_v10  ;;  %v7555_v6 = vmul.f32 -0.5, %v17115_v7 }
 0x635   :  { %9182 = vrot.lane.b32.xlu1 %v8093_v40, %s11870_s24  ;;  %v17137_v21 = vadd.f32 %v16933_v10, %v6967_v32  ;;  %v7570_v32 = vadd.f32 1.0, %v17162_v0 }
 0x636   :  { %19616 = vst [vmem:[#allocation68_spill] sm:$0xff] %v17133_v47  ;;  %9180 = vrot.lane.b32.xlu0 %v8092_v33, %s11870_s24  ;;  %v7335_v33 = vsub.f32 0.0, %v7271_v2  ;;  %v7556_v48 = vadd.f32 1.0, %v7555_v6  ;;  %v7582_v2 = vmul.f32 -0.5, %v17154_v49  ;;  %v7597_v6 = vadd.f32 1.0, %v17196_v35 }
 0x637   :  { %19617 = vst [vmem:[#allocation67_spill] sm:$0xff] %v17137_v21  ;;  %v10681_v19 = vpop.f32.mrb[84].mxu0  ;;  %11643 = vlog2.f32 %v7570_v32  ;;  %v11642_v32 = vpop.eup %11641 }
 0x638   :  { %v6977_v28 = vpop.f32.mrb[85].mxu0  ;;  %v17179_v56 = vadd.f32 %v10681_v19, %v16933_v10  ;;  %v7410_v9 = vmul.f32 1.442695, %v7335_v33  ;;  %v7566_v19 = vmul.f32 %v17104_v11, %v7565_v30  ;;  %v7557_v52 = vmul.f32 %v17115_v7, %v7556_v48 }
 0x639   :  { %8962 = vrot.lane.b32.xlu1 %v17133_v47, %s11870_s24  ;;  %v17182_v43 = vadd.f32 %v16933_v10, %v6977_v28  ;;  %v7583_v33 = vadd.f32 1.0, %v7582_v2  ;;  %v7585_v30 = vand.u32 2147483647, %v17154_v49  ;;  %v7600_v2 = vmul.f32 -0.5, %v17196_v35 }
 0x63a   :  { %8960 = vrot.lane.b32.xlu0 %v17137_v21, %s11870_s24  ;;  %19624 = vst [vmem:[#allocation74_spill] sm:$0xff] %v17179_v56  ;;  %v7569_v45 = vsel %vm17191_vm8, %v7566_v19, %v7563_v53  ;;  %v7560_v7 = vsel %vm17203_vm9, %v7557_v52, %v7554_v17  ;;  %11645 = vpow2.f32 %v7410_v9  ;;  %v7581_v17 = vmul.f32 0.6931472, %v11642_v32 }
 0x63b   :  { %19625 = vst [vmem:[#allocation73_spill] sm:$0xff] %v17182_v43  ;;  %11647 = vpow2.f32 %v7408_v36  ;;  %v8096_v12 = vadd.f32 %v7560_v7, %v7200_v8  ;;  %v7576_v9 = vand.u32 2147483647, %v17162_v0  ;;  %vm17243_vm10 = vcmp.lt.f32.partialorder %v7585_v30, 0.0004427343 }
 0x63c   :  { %11649 = vlog2.f32 %v7597_v6  ;;  %v7202_v7 = vmax.f32 %v17031_v22, 0.0 }
 0x63d   :  { %8606 = vrot.lane.b32.xlu1 %v8477_v26, %s11871_s30  ;;  %v19629_v26 = vld [vmem:[#allocation4_spill] sm:$0xff]  ;;  %vm7577_vm11 = vcmp.lt.f32.partialorder %v7576_v9, 0.0004427343 }
 0x63e   :  { %8604 = vrot.lane.b32.xlu0 %v8476_v58, %s11871_s30  ;;  %v8478_v27 = vmul.f32 %v19629_v26, %v8094_v15  ;;  %v7201_v58 = vmax.f32 %v17007_v3, 0.0 }
 0x63f   :  { %v10684_v23 = vpop.f32.mrb[86].mxu0 }
 0x640   :  { %v6987_v40 = vpop.f32.mrb[87].mxu0  ;;  %v8097_v18 = vadd.f32 %v7569_v45, %v7201_v58  ;;  %v17227_v31 = vadd.f32 %v10684_v23, %v16933_v10  ;;  %v7584_v23 = vmul.f32 %v17154_v49, %v7583_v33  ;;  %v19637_v45 = vld [vmem:[#allocation5_spill] sm:$0xff]  ;;  %v7203_v49 = vmax.f32 %v17028_v61, 0.0 }
 0x641   :  { %9186 = vrot.lane.b32.xlu1 %v8095_v41, %s11870_s24  ;;  %v7573_v41 = vmul.f32 -0.5, %v17162_v0  ;;  %v11644_v4 = vpop.eup %11643  ;;  %v17230_v53 = vadd.f32 %v16933_v10, %v6987_v40  ;;  %v7412_v40 = vmul.f32 1.442695, %v7336_v29  ;;  %v8480_v11 = vmul.f32 %v19637_v45, %v8096_v12 }
 0x642   :  { %9184 = vrot.lane.b32.xlu0 %v8094_v15, %s11870_s24  ;;  %v7588_v15 = vadd.f32 1.0, %v17207_v60  ;;  %19632 = vst [vmem:[#allocation81_spill] sm:$0xff] %v17227_v31  ;;  %v7572_v36 = vmul.f32 0.6931472, %v11644_v4  ;;  %v7587_v58 = vsel %vm17243_vm10, %v7584_v23, %v7581_v17  ;;  %v7601_v29 = vadd.f32 1.0, %v7600_v2 }
 0x643   :  { %v7574_v48 = vadd.f32 1.0, %v7573_v41  ;;  %19633 = vst [vmem:[#allocation80_spill] sm:$0xff] %v17230_v53  ;;  %v7591_v41 = vmul.f32 -0.5, %v17207_v60  ;;  %v7338_v17 = vsub.f32 0.0, %v7274_v14  ;;  %v7204_v14 = vmax.f32 %v17047_v62, 0.0  ;;  %v19670_v62 = vld [vmem:[#allocation15_spill] sm:$0xff] }
 0x644   :  { %11651 = vlog2.f32 %v7588_v15 }
 0x645   :  { %8966 = vrot.lane.b32.xlu1 %v17179_v56, %s11870_s24  ;;  %v7575_v26 = vmul.f32 %v17162_v0, %v7574_v48  ;;  %11653 = vpow2.f32 %v7414_v20  ;;  %v7275_v0 = vand.u32 2147483647, %v17080_v39  ;;  %v7603_v48 = vand.u32 2147483647, %v17196_v35 }
 0x646   :  { %8964 = vrot.lane.b32.xlu0 %v17182_v43, %s11870_s24  ;;  %11655 = vpow2.f32 %v7412_v40  ;;  %v7594_v40 = vand.u32 2147483647, %v17207_v60  ;;  %v7416_v52 = vmul.f32 1.442695, %v7338_v17 }
 0x647   :  { %v17201_v55 = vpop.f32.mrb[88].mxu0  ;;  %v7578_v37 = vsel %vm7577_vm11, %v7575_v26, %v7572_v36  ;;  %v7339_v30 = vsub.f32 0.0, %v7275_v0  ;;  %v7592_v36 = vadd.f32 1.0, %v7591_v41  ;;  %v19640_v26 = vld [vmem:[#allocation10_spill] sm:$0xff]  ;;  %vm17287_vm12 = vcmp.lt.f32.partialorder %v7603_v48, 0.0004427343 }
 0x648   :  { %v17214_v57 = vpop.f32.mrb[89].mxu0  ;;  %v17274_v9 = vadd.f32 %v17201_v55, %v16933_v10  ;;  %v7602_v55 = vmul.f32 %v17196_v35, %v7601_v29  ;;  %vm17299_vm13 = vcmp.lt.f32.partialorder %v7594_v40, 0.0004427343  ;;  %v7205_v41 = vmax.f32 %v17042_v38, 0.0 }
 0x649   :  { %8610 = vrot.lane.b32.xlu1 %v8479_v46, %s11871_s30  ;;  %v19634_v46 = vld [vmem:[#allocation8_spill] sm:$0xff]  ;;  %v17278_v20 = vadd.f32 %v16933_v10, %v17214_v57  ;;  %vm9372_vm11 = vcmask 64512  }
 0x64a   :  { %8608 = vrot.lane.b32.xlu0 %v8478_v27, %s11871_s30  ;;  %v8481_v28 = vmul.f32 %v19634_v46, %v8097_v18  ;;  %v17248_v27 = vpop.eup %11645  ;;  %19638 = vst [vmem:[#allocation86_spill] sm:$0xff] %v17274_v9 }
 0x64b   :  { %v17253_v8 = vpop.eup %11647  ;;  %v7615_v6 = vadd.f32 1.0, %v17248_v27  ;;  %19639 = vst [vmem:[#allocation85_spill] sm:$0xff] %v17278_v20 }
 0x64c   :  { %v7606_v32 = vadd.f32 1.0, %v17253_v8  ;;  %v11650_v4 = vpop.eup %11649 }
 0x64d   :  { %9190 = vrot.lane.b32.xlu1 %v8097_v18, %s11870_s24  ;;  %v8099_v18 = vadd.f32 %v7587_v58, %v7203_v49  ;;  %11657 = vlog2.f32 %v7615_v6  ;;  %v7599_v23 = vmul.f32 0.6931472, %v11650_v4  ;;  %v19643_v49 = vld [vmem:[#allocation7_spill] sm:$0xff]  ;;  %v7277_v6 = vand.u32 2147483647, %v17098_v34 }
 0x64e   :  { %9188 = vrot.lane.b32.xlu0 %v8096_v12, %s11870_s24  ;;  %v8098_v12 = vadd.f32 %v7578_v37, %v7202_v7  ;;  %v11652_v33 = vpop.eup %11651  ;;  %11659 = vlog2.f32 %v7606_v32  ;;  %v7609_v32 = vmul.f32 -0.5, %v17253_v8  ;;  %v7276_v4 = vand.u32 2147483647, %v17107_v42 }
 0x64f   :  { %v17232_v13 = vpop.f32.mrb[90].mxu0  ;;  %v7590_v46 = vmul.f32 0.6931472, %v11652_v33  ;;  %v8483_v45 = vmul.f32 %v19640_v26, %v8099_v18  ;;  %v17292_v58 = vpop.eup %11653  ;;  %v7605_v37 = vsel %vm17287_vm12, %v7602_v55, %v7599_v23  ;;  %v7341_v23 = vsub.f32 0.0, %v7277_v6  ;;  %v19651_v6 = vld [vmem:[#allocation9_spill] sm:$0xff] }
 0x650   :  { %v17237_v19 = vpop.f32.mrb[91].mxu0  ;;  %v8482_v7 = vmul.f32 %v19643_v49, %v8098_v12  ;;  %v17303_v2 = vpop.eup %11655  ;;  %v8101_v33 = vadd.f32 %v7605_v37, %v7205_v41  ;;  %v17324_v55 = vadd.f32 %v17232_v13, %v16933_v10  ;;  %vm9501_vm12 = vcmask 195584  }
 0x651   :  { %8970 = vrot.lane.b32.xlu1 %v17227_v31, %s11870_s24  ;;  %v7624_v48 = vadd.f32 1.0, %v17303_v2  ;;  %v17328_v26 = vadd.f32 %v16933_v10, %v17237_v19  ;;  %v7422_v13 = vmul.f32 1.442695, %v7341_v23  ;;  %v19648_v19 = vld [vmem:[#allocation12_spill] sm:$0xff] }
 0x652   :  { %8968 = vrot.lane.b32.xlu0 %v17230_v53, %s11870_s24  ;;  %19646 = vst [vmem:[#allocation89_spill] sm:$0xff] %v17324_v55  ;;  %v8485_v35 = vmul.f32 %v19648_v19, %v8101_v33  ;;  %v17373_v19 = vld [vmem:[%s19194_s8] ss:$0 sm:$0xff] }
 0x653   :  { %19647 = vst [vmem:[#allocation90_spill] sm:$0xff] %v17328_v26 }
 0x655   :  { %8614 = vrot.lane.b32.xlu1 %v8481_v28, %s11871_s30  ;;  %v7418_v28 = vmul.f32 1.442695, %v7339_v30  ;;  %v7633_v30 = vadd.f32 1.0, %v17292_v58 }
 0x656   :  { %8612 = vrot.lane.b32.xlu0 %v8480_v11, %s11871_s30  ;;  %v7593_v11 = vmul.f32 %v17207_v60, %v7592_v36 }
 0x657   :  { %11661 = vpow2.f32 %v7418_v28  ;;  %v11658_v17 = vpop.eup %11657  ;;  %v7340_v28 = vsub.f32 0.0, %v7276_v4 }
 0x658   :  { %v17264_v15 = vpop.f32.mrb[92].mxu0  ;;  %v7596_v60 = vsel %vm17299_vm13, %v7593_v11, %v7590_v46  ;;  %11663 = vpow2.f32 %v7416_v52  ;;  %v11660_v36 = vpop.eup %11659  ;;  %v7621_v46 = vand.u32 2147483647, %v17248_v27  ;;  %v7610_v52 = vadd.f32 1.0, %v7609_v32 }
 0x659   :  { %9194 = vrot.lane.b32.xlu1 %v8099_v18, %s11870_s24  ;;  %v17268_v54 = vpop.f32.mrb[93].mxu0  ;;  %v8100_v29 = vadd.f32 %v7596_v60, %v7204_v14  ;;  %11665 = vlog2.f32 %v7633_v30  ;;  %v7617_v57 = vmul.f32 0.6931472, %v11658_v17  ;;  %v7612_v11 = vand.u32 2147483647, %v17253_v8 }
 0x65a   :  { %9192 = vrot.lane.b32.xlu0 %v8098_v12, %s11870_s24  ;;  %v7618_v12 = vmul.f32 -0.5, %v17248_v27  ;;  %11667 = vlog2.f32 %v7624_v48  ;;  %v7420_v10 = vmul.f32 1.442695, %v7340_v28  ;;  %vm17341_vm14 = vcmp.lt.f32.partialorder %v7621_v46, 0.0004427343 }
 0x65b   :  { %v7611_v14 = vmul.f32 %v17253_v8, %v7610_v52  ;;  %vm7613_vm15 = vcmp.lt.f32.partialorder %v7612_v11, 0.0004427343  ;;  %11669 = vpow2.f32 %v7422_v13  ;;  %v7279_v8 = vand.u32 2147483647, %v17133_v47 }
 0x65c   :  { %v7619_v40 = vadd.f32 1.0, %v7618_v12  ;;  %v8484_v12 = vmul.f32 %v19651_v6, %v8100_v29  ;;  %v7627_v48 = vmul.f32 -0.5, %v17303_v2  ;;  %11671 = vpow2.f32 %v7420_v10 }
 0x65d   :  { %8974 = vrot.lane.b32.xlu1 %v17274_v9, %s11870_s24  ;;  %v7278_v17 = vand.u32 2147483647, %v17137_v21 }
 0x65e   :  { %8972 = vrot.lane.b32.xlu0 %v17278_v20, %s11870_s24  ;;  %v7620_v37 = vmul.f32 %v17248_v27, %v7619_v40  ;;  %v7207_v27 = vmax.f32 %v17058_v16, 0.0  ;;  %v7628_v41 = vadd.f32 1.0, %v7627_v48 }
 0x65f   :  { %v7342_v10 = vsub.f32 0.0, %v7278_v17  ;;  %v19657_v17 = vld [vmem:[#allocation11_spill] sm:$0xff] }
 0x660   :  { %v17297_v0 = vpop.f32.mrb[94].mxu0  ;;  %v7623_v32 = vsel %vm17341_vm14, %v7620_v37, %v7617_v57  ;;  %v7639_v37 = vand.u32 2147483647, %v17292_v58 }
 0x661   :  { %8618 = vrot.lane.b32.xlu1 %v8483_v45, %s11871_s30  ;;  %v17310_v18 = vpop.f32.mrb[95].mxu0  ;;  %v17346_v60 = vpop.eup %11661 }
 0x662   :  { %8616 = vrot.lane.b32.xlu0 %v8482_v7, %s11871_s30  ;;  %v7608_v7 = vmul.f32 0.6931472, %v11660_v36  ;;  %v17351_v4 = vpop.eup %11663  ;;  %v8103_v36 = vadd.f32 %v7623_v32, %v7207_v27  ;;  %v7651_v23 = vadd.f32 1.0, %v17346_v60  ;;  %vm17390_vm0 = vcmp.lt.f32.partialorder %v7639_v37, 0.0004427343 }
 0x663   :  { %v7642_v28 = vadd.f32 1.0, %v17351_v4  ;;  %v11666_v52 = vpop.eup %11665  ;;  %v7280_v37 = vand.u32 2147483647, %v17182_v43 }
 0x664   :  { %v7614_v30 = vsel %vm7613_vm15, %v7611_v14, %v7608_v7  ;;  %v11668_v11 = vpop.eup %11667  ;;  %v7343_v7 = vsub.f32 0.0, %v7279_v8  ;;  %11673 = vlog2.f32 %v7651_v23  ;;  %v17381_v14 = vadd.f32 %v17373_v19, %v17268_v54 }
 0x665   :  { %9198 = vrot.lane.b32.xlu1 %v8101_v33, %s11870_s24  ;;  %v7206_v33 = vmax.f32 %v17061_v1, 0.0  ;;  %v7635_v6 = vmul.f32 0.6931472, %v11666_v52  ;;  %11675 = vlog2.f32 %v7642_v28  ;;  %v7626_v32 = vmul.f32 0.6931472, %v11668_v11  ;;  %v17395_v48 = vpop.eup %11669 }
 0x666   :  { %9196 = vrot.lane.b32.xlu0 %v8100_v29, %s11870_s24  ;;  %v7636_v29 = vmul.f32 -0.5, %v17292_v58  ;;  %19653 = vst [vmem:[#allocation92_spill] sm:$0xff] %v17381_v14  ;;  %v7426_v27 = vmul.f32 1.442695, %v7343_v7  ;;  %v7209_v11 = vmax.f32 %v17068_v63, 0.0  ;;  %v7344_v54 = vsub.f32 0.0, %v7280_v37 }
 0x667   :  { %v17330_v45 = vpop.f32.mrb[96].mxu0  ;;  %v8102_v40 = vadd.f32 %v7614_v30, %v7206_v33  ;;  %v7424_v33 = vmul.f32 1.442695, %v7342_v10  ;;  %v19654_v30 = vld [vmem:[#allocation13_spill] sm:$0xff]  ;;  %v7281_v7 = vand.u32 2147483647, %v17179_v56 }
 0x668   :  { %v17335_v49 = vpop.f32.mrb[97].mxu0  ;;  %v7637_v13 = vadd.f32 1.0, %v7636_v29  ;;  %v8487_v8 = vmul.f32 %v19654_v30, %v8103_v36  ;;  %v7629_v29 = vmul.f32 %v17303_v2, %v7628_v41  ;;  %11677 = vpow2.f32 %v7426_v27 }
 0x669   :  { %8978 = vrot.lane.b32.xlu1 %v17324_v55, %s11870_s24  ;;  %v8486_v23 = vmul.f32 %v19657_v17, %v8102_v40  ;;  %v7654_v10 = vmul.f32 -0.5, %v17346_v60  ;;  %11679 = vpow2.f32 %v7424_v33  ;;  %v17426_v33 = vadd.f32 %v17373_v19, %v17297_v0 }
 0x66a   :  { %8976 = vrot.lane.b32.xlu0 %v17328_v26, %s11870_s24  ;;  %v7657_v17 = vand.u32 2147483647, %v17346_v60  ;;  %v7428_v37 = vmul.f32 1.442695, %v7344_v54 }
 0x66b   :  { %19660 = vst [vmem:[#allocation95_spill] sm:$0xff] %v17426_v33 }
 0x66c   :  { %vm17446_vm3 = vcmp.lt.f32.partialorder %v7657_v17, 0.0004427343  ;;  %v7210_v17 = vmax.f32 %v17085_v44, 0.0 }
 0x66d   :  { %8622 = vrot.lane.b32.xlu1 %v8485_v35, %s11871_s30  ;;  %v17377_v35 = vadd.f32 %v17373_v19, %v17264_v15  ;;  %v7638_v15 = vmul.f32 %v17292_v58, %v7637_v13  ;;  %v7208_v13 = vmax.f32 %v17071_v50, 0.0  ;;  %v17453_v50 = vpop.permute.xlu0 %8924 }
 0x66e   :  { %8620 = vrot.lane.b32.xlu0 %v8484_v12, %s11871_s30  ;;  %v7630_v12 = vand.u32 2147483647, %v17303_v2 }
 0x66f   :  { %v17362_v46 = vpop.f32.mrb[98].mxu0  ;;  %19652 = vst [vmem:[#allocation93_spill] sm:$0xff] %v17377_v35  ;;  %v7641_v28 = vsel %vm17390_vm0, %v7638_v15, %v7635_v6  ;;  %v7645_v6 = vmul.f32 -0.5, %v17351_v4 }
 0x670   :  { %v17366_v57 = vpop.f32.mrb[99].mxu0  ;;  %vm17402_vm1 = vcmp.lt.f32.partialorder %v7630_v12, 0.0004427343  ;;  %v8105_v41 = vadd.f32 %v7641_v28, %v7209_v11  ;;  %v7669_v12 = vadd.f32 1.0, %v17395_v48  ;;  %v17431_v28 = vadd.f32 %v17373_v19, %v17310_v18 }
 0x671   :  { %9202 = vrot.lane.b32.xlu1 %v8103_v36, %s11870_s24  ;;  %v17406_v36 = vpop.eup %11671  ;;  %v7632_v2 = vsel %vm17402_vm1, %v7629_v29, %v7626_v32  ;;  %v7655_v29 = vadd.f32 1.0, %v7654_v10  ;;  %v17443_v10 = vpop.permute.xlu1 %8926 }
 0x672   :  { %9200 = vrot.lane.b32.xlu0 %v8102_v40, %s11870_s24  ;;  %v8104_v15 = vadd.f32 %v7632_v2, %v7208_v13  ;;  %v7660_v32 = vadd.f32 1.0, %v17406_v36  ;;  %v11674_v30 = vpop.eup %11673  ;;  %11681 = vlog2.f32 %v7669_v12  ;;  %19661 = vst [vmem:[#allocation94_spill] sm:$0xff] %v17431_v28  ;;  %v7666_v61 = vand.u32 2147483647, %v17406_v36 }
 0x673   :  { %v11676_v27 = vpop.eup %11675  ;;  %v7653_v11 = vmul.f32 0.6931472, %v11674_v30  ;;  %v7656_v18 = vmul.f32 %v17346_v60, %v7655_v29  ;;  %v7211_v29 = vmax.f32 %v17080_v39, 0.0 }
 0x674   :  { %11683 = vlog2.f32 %v7660_v32  ;;  %v7644_v13 = vmul.f32 0.6931472, %v11676_v27  ;;  %v19665_v27 = vld [vmem:[#allocation14_spill] sm:$0xff]  ;;  %vm17522_vm6 = vcmp.lt.f32.partialorder %v7666_v61, 0.0004427343 }
 0x675   :  { %8982 = vrot.lane.b32.xlu1 %v17377_v35, %s11870_s24  ;;  %v8488_v54 = vmul.f32 %v19665_v27, %v8104_v15  ;;  %v7659_v63 = vsel %vm17446_vm3, %v7656_v18, %v7653_v11  ;;  %v7282_v11 = vand.u32 2147483647, %v17230_v53  ;;  %v7284_v61 = vand.u32 2147483647, %v17278_v20 }
 0x676   :  { %8980 = vrot.lane.b32.xlu0 %v17381_v14, %s11870_s24  ;;  %v8107_v18 = vadd.f32 %v7659_v63, %v7211_v29  ;;  %v7675_v29 = vand.u32 2147483647, %v17395_v48 }
 0x677   :  { %v7346_v44 = vsub.f32 0.0, %v7282_v11 }
 0x678   :  { %v17400_v52 = vpop.f32.mrb[100].mxu0  ;;  %vm17505_vm5 = vcmp.lt.f32.partialorder %v7675_v29, 0.0004427343 }
 0x679   :  { %8626 = vrot.lane.b32.xlu1 %v8487_v8, %s11871_s30  ;;  %v17413_v40 = vpop.f32.mrb[101].mxu0  ;;  %v7345_v8 = vsub.f32 0.0, %v7281_v7  ;;  %v7648_v7 = vand.u32 2147483647, %v17351_v4 }
 0x67a   :  { %8624 = vrot.lane.b32.xlu0 %v8486_v23, %s11871_s30  ;;  %v7646_v23 = vadd.f32 1.0, %v7645_v6  ;;  %v19662_v6 = vld [vmem:[#allocation16_spill] sm:$0xff] }
 0x67b   :  { %v7430_v2 = vmul.f32 1.442695, %v7345_v8  ;;  %v8489_v12 = vmul.f32 %v19662_v6, %v8105_v41  ;;  %v17451_v8 = vpop.eup %11677  ;;  %vm17458_vm4 = vcmp.lt.f32.partialorder %v7648_v7, 0.0004427343  ;;  %v17473_v7 = vpop.permute.xlu1 %8930 }
 0x67c   :  { %v7647_v32 = vmul.f32 %v17351_v4, %v7646_v23  ;;  %v7672_v23 = vmul.f32 -0.5, %v17395_v48  ;;  %v7687_v6 = vadd.f32 1.0, %v17451_v8 }
 0x67d   :  { %9206 = vrot.lane.b32.xlu1 %v8105_v41, %s11870_s24  ;;  %v17462_v41 = vpop.eup %11679  ;;  %11685 = vpow2.f32 %v7430_v2  ;;  %v7663_v2 = vmul.f32 -0.5, %v17406_v36 }
 0x67e   :  { %9204 = vrot.lane.b32.xlu0 %v8104_v15, %s11870_s24  ;;  %v7650_v4 = vsel %vm17458_vm4, %v7647_v32, %v7644_v13  ;;  %11687 = vpow2.f32 %v7428_v37  ;;  %v7283_v15 = vand.u32 2147483647, %v17227_v31  ;;  %v7678_v37 = vadd.f32 1.0, %v17462_v41  ;;  %v11682_v32 = vpop.eup %11681 }
 0x67f   :  { %v8106_v13 = vadd.f32 %v7650_v4, %v7210_v17  ;;  %v7673_v63 = vadd.f32 1.0, %v7672_v23  ;;  %v17487_v39 = vpop.permute.xlu1 %8934  ;;  %v19669_v4 = vld [vmem:[#allocation18_spill] sm:$0xff]  ;;  %v7664_v1 = vadd.f32 1.0, %v7663_v2  ;;  %11689 = vlog2.f32 %v7687_v6 }
 0x680   :  { %v17433_v58 = vpop.f32.mrb[102].mxu0  ;;  %v7347_v60 = vsub.f32 0.0, %v7283_v15  ;;  %19668 = vst [vmem:[#allocation97_spill] sm:$0xff] %v17487_v39  ;;  %v8491_v17 = vmul.f32 %v19669_v4, %v8107_v18  ;;  %v7671_v22 = vmul.f32 0.6931472, %v11682_v32  ;;  %11691 = vlog2.f32 %v7678_v37 }
 0x681   :  { %8986 = vrot.lane.b32.xlu1 %v17426_v33, %s11870_s24  ;;  %v17438_v0 = vpop.f32.mrb[103].mxu0  ;;  %v8490_v38 = vmul.f32 %v19670_v62, %v8106_v13  ;;  %v7674_v11 = vmul.f32 %v17395_v48, %v7673_v63  ;;  %v17501_v2 = vadd.f32 %v17373_v19, %v17330_v45  ;;  %v7681_v4 = vmul.f32 -0.5, %v17462_v41 }
 0x682   :  { %8984 = vrot.lane.b32.xlu0 %v17431_v28, %s11870_s24  ;;  %v7434_v23 = vmul.f32 1.442695, %v7347_v60  ;;  %v7690_v60 = vmul.f32 -0.5, %v17451_v8 }
 0x683   :  { %v17503_v62 = vpop.permute.xlu1 %8938 }
 0x684   :  { %19671 = vst [vmem:[#allocation96_spill] sm:$0xff] %v17503_v62  ;;  %11693 = vpow2.f32 %v7434_v23 }
 0x685   :  { %8630 = vrot.lane.b32.xlu1 %v8489_v12, %s11871_s30  ;;  %v17477_v12 = vpop.permute.xlu0 %8928 }
 0x686   :  { %8628 = vrot.lane.b32.xlu0 %v8488_v54, %s11871_s30  ;;  %v11684_v54 = vpop.eup %11683 }
 0x687   :  { %v17479_v30 = vpop.f32.mrb[104].mxu0  ;;  %v7662_v15 = vmul.f32 0.6931472, %v11684_v54  ;;  %v17497_v39 = vpop.eup %11685  ;;  %v7213_v54 = vmax.f32 %v17098_v34, 0.0 }
 0x688   :  { %v17483_v27 = vpop.f32.mrb[105].mxu0  ;;  %v17510_v37 = vpop.eup %11687 }
 0x689   :  { %9210 = vrot.lane.b32.xlu1 %v8107_v18, %s11870_s24  ;;  %v17490_v16 = vpop.permute.xlu0 %8932  ;;  %v7432_v18 = vmul.f32 1.442695, %v7346_v44  ;;  %v7677_v44 = vsel %vm17505_vm5, %v7674_v11, %v7671_v22  ;;  %v7212_v22 = vmax.f32 %v17107_v42, 0.0  ;;  %v17539_v63 = vpop.permute.xlu1 %8942  ;;  %v7696_v23 = vadd.f32 1.0, %v17510_v37 }
 0x68a   :  { %9208 = vrot.lane.b32.xlu0 %v8106_v13, %s11870_s24  ;;  %v7665_v13 = vmul.f32 %v17406_v36, %v7664_v1  ;;  %v7285_v1 = vand.u32 2147483647, %v17274_v9  ;;  %19679 = vst [vmem:[#allocation100_spill] sm:$0xff] %v17539_v63  ;;  %v8109_v29 = vadd.f32 %v7677_v44, %v7213_v54  ;;  %v11690_v6 = vpop.eup %11689  ;;  %v7348_v42 = vsub.f32 0.0, %v7284_v61  ;;  %v19682_v44 = vld [vmem:[#allocation20_spill] sm:$0xff] }
 0x68b   :  { %11695 = vpow2.f32 %v7432_v18  ;;  %v11692_v32 = vpop.eup %11691  ;;  %v7691_v18 = vadd.f32 1.0, %v7690_v60  ;;  %v7693_v63 = vand.u32 2147483647, %v17451_v8  ;;  %v7689_v62 = vmul.f32 0.6931472, %v11690_v6 }
 0x68c   :  { %v8493_v54 = vmul.f32 %v19682_v44, %v8109_v29  ;;  %v7684_v61 = vand.u32 2147483647, %v17462_v41  ;;  %v7436_v44 = vmul.f32 1.442695, %v7348_v42  ;;  %v17578_v42 = vadd.f32 %v17373_v19, %v17366_v57 }
 0x68d   :  { %8634 = vrot.lane.b32.xlu1 %v8491_v17, %s11871_s30  ;;  %v17516_v48 = vpop.permute.xlu0 %8936  ;;  %v7705_v17 = vadd.f32 1.0, %v17497_v39  ;;  %v17548_v34 = vpop.permute.xlu1 %8946  ;;  %vm17569_vm7 = vcmp.lt.f32.partialorder %v7693_v63, 0.0004427343 }
 0x68e   :  { %8632 = vrot.lane.b32.xlu0 %v8490_v38, %s11871_s30  ;;  %v17514_v38 = vadd.f32 %v17373_v19, %v17335_v49  ;;  %19675 = vst [vmem:[#allocation98_spill] sm:$0xff] %v17516_v48  ;;  %v7668_v49 = vsel %vm17522_vm6, %v7665_v13, %v7662_v15  ;;  %v7349_v13 = vsub.f32 0.0, %v7285_v1  ;;  %19681 = vst [vmem:[#allocation102_spill] sm:$0xff] %v17548_v34  ;;  %v7682_v48 = vadd.f32 1.0, %v7681_v4 }
 0x68f   :  { %v17520_v45 = vpop.f32.mrb[106].mxu0  ;;  %v8108_v11 = vadd.f32 %v7668_v49, %v7212_v22  ;;  %11697 = vlog2.f32 %v7705_v17  ;;  %v19684_v22 = vld [vmem:[#allocation17_spill] sm:$0xff]  ;;  %v7692_v4 = vmul.f32 %v17451_v8, %v7691_v18  ;;  %v17565_v17 = vadd.f32 %v17373_v19, %v17362_v46 }
 0x690   :  { %19674 = vst [vmem:[#allocation99_spill] sm:$0xff] %v17514_v38  ;;  %v17532_v36 = vpop.f32.mrb[107].mxu0  ;;  %11699 = vlog2.f32 %v7696_v23  ;;  %v7683_v23 = vmul.f32 %v17462_v41, %v7682_v48  ;;  %vm17584_vm8 = vcmp.lt.f32.partialorder %v7684_v61, 0.0004427343  ;;  %v7214_v41 = vmax.f32 %v17137_v21, 0.0 }
 0x691   :  { %8990 = vrot.lane.b32.xlu1 %v17501_v2, %s11870_s24  ;;  %19678 = vst [vmem:[#allocation101_spill] sm:$0xff] %v17532_v36  ;;  %v17543_v15 = vpop.permute.xlu0 %8940  ;;  %v7438_v36 = vmul.f32 1.442695, %v7349_v13  ;;  %v17574_v13 = vpop.eup %11693  ;;  %v7695_v46 = vsel %vm17569_vm7, %v7692_v4, %v7689_v62  ;;  %v7287_v62 = vand.u32 2147483647, %v17324_v55  ;;  %v7708_v48 = vmul.f32 -0.5, %v17497_v39 }
 0x692   :  { %8988 = vrot.lane.b32.xlu0 %v17514_v38, %s11870_s24  ;;  %19680 = vst [vmem:[#allocation103_spill] sm:$0xff] %v17543_v15  ;;  %v8492_v15 = vmul.f32 %v19684_v22, %v8108_v11  ;;  %v7286_v18 = vand.u32 2147483647, %v17328_v26  ;;  %v7699_v22 = vmul.f32 -0.5, %v17510_v37  ;;  %v7723_v61 = vadd.f32 1.0, %v17574_v13 }
 0x693   :  { %11701 = vpow2.f32 %v7438_v36 }
 0x694   :  { %11703 = vpow2.f32 %v7436_v44 }
 0x695   :  { %9214 = vrot.lane.b32.xlu1 %v8109_v29, %s11870_s24  ;;  %v17552_v49 = vpop.permute.xlu0 %8944  ;;  %v7680_v29 = vmul.f32 0.6931472, %v11692_v32  ;;  %v17588_v63 = vpop.eup %11695  ;;  %v7215_v32 = vmax.f32 %v17133_v47, 0.0  ;;  %v7351_v47 = vsub.f32 0.0, %v7287_v62  ;;  %11705 = vlog2.f32 %v7723_v61 }
 0x696   :  { %9212 = vrot.lane.b32.xlu0 %v8108_v11, %s11870_s24  ;;  %19683 = vst [vmem:[#allocation104_spill] sm:$0xff] %v17552_v49  ;;  %v17567_v11 = vpop.permute.xlu1 %8950  ;;  %v7714_v6 = vadd.f32 1.0, %v17588_v63  ;;  %v19698_v49 = vld [vmem:[#allocation19_spill] sm:$0xff] }
 0x697   :  { %19685 = vst [vmem:[#allocation70_spill] sm:$0xff] %v17567_v11  ;;  %v7686_v57 = vsel %vm17584_vm8, %v7683_v23, %v7680_v29  ;;  %v8111_v36 = vadd.f32 %v7695_v46, %v7215_v32  ;;  %v7709_v46 = vadd.f32 1.0, %v7708_v48  ;;  %v7711_v32 = vand.u32 2147483647, %v17497_v39 }
 0x698   :  { %v17555_v1 = vpop.f32.mrb[108].mxu0  ;;  %v8110_v4 = vadd.f32 %v7686_v57, %v7214_v41  ;;  %v19696_v57 = vld [vmem:[#allocation22_spill] sm:$0xff]  ;;  %11707 = vlog2.f32 %v7714_v6  ;;  %v7442_v48 = vmul.f32 1.442695, %v7351_v47  ;;  %v7217_v6 = vmax.f32 %v17179_v56, 0.0  ;;  %v19709_v56 = vld [vmem:[#allocation24_spill] sm:$0xff] }
 0x699   :  { %8638 = vrot.lane.b32.xlu1 %v8493_v54, %s11871_s30  ;;  %v17559_v60 = vpop.f32.mrb[109].mxu0  ;;  %v11698_v23 = vpop.eup %11697  ;;  %v8495_v41 = vmul.f32 %v19696_v57, %v8111_v36  ;;  %vm17631_vm9 = vcmp.lt.f32.partialorder %v7711_v32, 0.0004427343  ;;  %v7717_v57 = vmul.f32 -0.5, %v17588_v63 }
 0x69a   :  { %8636 = vrot.lane.b32.xlu0 %v8492_v15, %s11871_s30  ;;  %v17580_v15 = vpop.permute.xlu0 %8948  ;;  %v17601_v54 = vpop.permute.xlu1 %8954  ;;  %v8494_v34 = vmul.f32 %v19698_v49, %v8110_v4  ;;  %11709 = vpow2.f32 %v7442_v48 }
 0x69b   :  { %19688 = vst [vmem:[#allocation31_spill] sm:$0xff] %v17580_v15  ;;  %19691 = vst [vmem:[#allocation30_spill] sm:$0xff] %v17601_v54  ;;  %v11700_v21 = vpop.eup %11699  ;;  %v7350_v54 = vsub.f32 0.0, %v7286_v18  ;;  %v7710_v18 = vmul.f32 %v17497_v39, %v7709_v46 }
 0x69c   :  { %v7698_v62 = vmul.f32 0.6931472, %v11700_v21 }
 0x69d   :  { %8994 = vrot.lane.b32.xlu1 %v17565_v17, %s11870_s24 }
 0x69e   :  { %8992 = vrot.lane.b32.xlu0 %v17578_v42, %s11870_s24  ;;  %v17605_v29 = vpop.permute.xlu0 %8952 }
 0x69f   :  { %19692 = vst [vmem:[#allocation76_spill] sm:$0xff] %v17605_v29  ;;  %v7700_v29 = vadd.f32 1.0, %v7699_v22  ;;  %v17629_v22 = vadd.f32 %v17373_v19, %v17400_v52 }
 0x6a0   :  { %v17607_v44 = vpop.f32.mrb[110].mxu0 }
 0x6a1   :  { %19693 = vst [vmem:[#allocation40_spill] sm:$0xff] %v17607_v44  ;;  %9218 = vrot.lane.b32.xlu1 %v8111_v36, %s11870_s24  ;;  %v17611_v8 = vpop.f32.mrb[111].mxu0  ;;  %v7707_v44 = vmul.f32 0.6931472, %v11698_v23  ;;  %v7440_v36 = vmul.f32 1.442695, %v7350_v54 }
 0x6a2   :  { %19694 = vst [vmem:[#allocation2_spill] sm:$0xff] %v17611_v8  ;;  %9216 = vrot.lane.b32.xlu0 %v8110_v4, %s11870_s24  ;;  %v7702_v8 = vand.u32 2147483647, %v17510_v37  ;;  %19699 = vst [vmem:[#allocation4_spill] sm:$0xff] %v17629_v22  ;;  %v7701_v4 = vmul.f32 %v17510_v37, %v7700_v29  ;;  %v7289_v37 = vand.u32 2147483647, %v17377_v35 }
 0x6a3   :  { %v17615_v15 = vpop.permute.xlu1 %8958  ;;  %v7713_v47 = vsel %vm17631_vm9, %v7710_v18, %v7707_v44  ;;  %v7216_v44 = vmax.f32 %v17182_v43, 0.0  ;;  %v7288_v23 = vand.u32 2147483647, %v17381_v14  ;;  %11711 = vpow2.f32 %v7440_v36 }
 0x6a4   :  { %19695 = vst [vmem:[#allocation3_spill] sm:$0xff] %v17615_v15  ;;  %v17618_v11 = vpop.permute.xlu0 %8956  ;;  %v17625_v15 = vpop.eup %11701  ;;  %vm17648_vm10 = vcmp.lt.f32.partialorder %v7702_v8, 0.0004427343  ;;  %v7726_v8 = vmul.f32 -0.5, %v17574_v13  ;;  %v8113_v32 = vadd.f32 %v7713_v47, %v7217_v6  ;;  %v7729_v47 = vand.u32 2147483647, %v17574_v13 }
 0x6a5   :  { %19697 = vst [vmem:[#allocation6_spill] sm:$0xff] %v17618_v11  ;;  %8642 = vrot.lane.b32.xlu1 %v8495_v41, %s11871_s30  ;;  %v17636_v21 = vpop.eup %11703  ;;  %v7741_v41 = vadd.f32 1.0, %v17625_v15  ;;  %v7352_v43 = vsub.f32 0.0, %v7288_v23  ;;  %v7718_v11 = vadd.f32 1.0, %v7717_v57 }
 0x6a6   :  { %8640 = vrot.lane.b32.xlu0 %v8494_v34, %s11871_s30  ;;  %v17640_v34 = vadd.f32 %v17373_v19, %v17413_v40  ;;  %v7704_v40 = vsel %vm17648_vm10, %v7701_v4, %v7698_v62  ;;  %v7732_v48 = vadd.f32 1.0, %v17636_v21  ;;  %v11706_v61 = vpop.eup %11705  ;;  %v7353_v4 = vsub.f32 0.0, %v7289_v37 }
 0x6a7   :  { %v9183_v49 = vpop.permute.xlu1 %9182  ;;  %v17646_v52 = vpop.f32.mrb[112].mxu0  ;;  %v8112_v18 = vadd.f32 %v7704_v40, %v7216_v44  ;;  %v7727_v36 = vadd.f32 1.0, %v7726_v8  ;;  %v7720_v40 = vand.u32 2147483647, %v17588_v63  ;;  %11713 = vlog2.f32 %v7741_v41 }
 0x6a8   :  { %19702 = vst [vmem:[#allocation8_spill] sm:$0xff] %v17640_v34  ;;  %v17642_v39 = vpop.permute.xlu0 %9180  ;;  %19703 = vst [vmem:[#allocation5_spill] sm:$0xff] %v17646_v52  ;;  %v17658_v29 = vpop.f32.mrb[113].mxu0  ;;  %v7725_v23 = vmul.f32 0.6931472, %v11706_v61  ;;  %11715 = vlog2.f32 %v7732_v48  ;;  %v7218_v61 = vmax.f32 %v17230_v53, 0.0 }
 0x6a9   :  { %8998 = vrot.lane.b32.xlu1 %v17629_v22, %s11870_s24  ;;  %19706 = vst [vmem:[#allocation10_spill] sm:$0xff] %v17658_v29  ;;  %v11708_v54 = vpop.eup %11707  ;;  %v7444_v57 = vmul.f32 1.442695, %v7352_v43  ;;  %v7728_v41 = vmul.f32 %v17574_v13, %v7727_v36  ;;  %vm17689_vm13 = vcmp.lt.f32.partialorder %v7729_v47, 0.0004427343  ;;  %v17705_v13 = vadd.f32 %v17373_v19, %v17438_v0 }
 0x6aa   :  { %8996 = vrot.lane.b32.xlu0 %v17640_v34, %s11870_s24  ;;  %v7446_v34 = vmul.f32 1.442695, %v7353_v4  ;;  %v17701_v48 = vpop.eup %11709  ;;  %vm17715_vm14 = vcmp.lt.f32.partialorder %v7720_v40, 0.0004427343  ;;  %v7219_v0 = vmax.f32 %v17227_v31, 0.0 }
 0x6ab   :  { %v17665_v46 = vpop.permute.xlu1 %8962  ;;  %19714 = vst [vmem:[#allocation13_spill] sm:$0xff] %v17705_v13  ;;  %v7290_v4 = vand.u32 2147483647, %v17431_v28  ;;  %v7759_v40 = vadd.f32 1.0, %v17701_v48 }
 0x6ac   :  { %19707 = vst [vmem:[#allocation7_spill] sm:$0xff] %v17665_v46  ;;  %v17669_v62 = vpop.permute.xlu0 %8960  ;;  %v8497_v46 = vmul.f32 %v19709_v56, %v8113_v32  ;;  %11717 = vpow2.f32 %v7446_v34 }
 0x6ad   :  { %19708 = vst [vmem:[#allocation12_spill] sm:$0xff] %v17669_v62  ;;  %9222 = vrot.lane.b32.xlu1 %v8113_v32, %s11870_s24  ;;  %v19710_v62 = vld [vmem:[#allocation21_spill] sm:$0xff]  ;;  %v17679_v52 = vpop.f32.mrb[114].mxu0  ;;  %v7716_v32 = vmul.f32 0.6931472, %v11708_v54  ;;  %v7744_v54 = vmul.f32 -0.5, %v17625_v15  ;;  %11719 = vpow2.f32 %v7444_v57 }
 0x6ae   :  { %9220 = vrot.lane.b32.xlu0 %v8112_v18, %s11870_s24  ;;  %v8496_v29 = vmul.f32 %v19710_v62, %v8112_v18  ;;  %v17683_v56 = vpop.f32.mrb[115].mxu0  ;;  %11721 = vlog2.f32 %v7759_v40  ;;  %v17766_v40 = vadd.f32 %v17373_v19, %v17479_v30 }
 0x6af   :  { %v8607_v6 = vpop.permute.xlu1 %8606  ;;  %v7745_v62 = vadd.f32 1.0, %v7744_v54 }
 0x6b0   :  { %v8797_v44 = vadd.f32 %v8607_v6, %v16940_v25  ;;  %v8605_v37 = vpop.permute.xlu0 %8604  ;;  %v7735_v6 = vmul.f32 -0.5, %v17636_v21  ;;  %19722 = vst [vmem:[#allocation16_spill] sm:$0xff] %v17766_v40 }
 0x6b1   :  { %v8796_v8 = vadd.f32 %v8605_v37, %v16945_v59  ;;  %8646 = vrot.lane.b32.xlu1 %v8497_v46, %s11871_s30  ;;  %v17695_v59 = vadd.f32 %v17373_v19, %v17433_v58 }
 0x6b2   :  { %v9374_v25 = vsel %vm9372_vm11, %v8797_v44, %v17443_v10  ;;  %8644 = vrot.lane.b32.xlu0 %v8496_v29, %s11871_s30  ;;  %v7719_v10 = vmul.f32 %v17588_v63, %v7718_v11  ;;  %v17719_v63 = vpop.eup %11711  ;;  %v7291_v29 = vand.u32 2147483647, %v17426_v33  ;;  %v7738_v11 = vand.u32 2147483647, %v17636_v21 }
 0x6b3   :  { %19713 = vst [vmem:[#allocation9_spill] sm:$0xff] %v17695_v59  ;;  %v9438_v46 = vsel %vm748_vm2, %v9374_v25, %v9183_v49  ;;  %v9373_v43 = vsel %vm9372_vm11, %v8796_v8, %v17453_v50  ;;  %v9187_v18 = vpop.permute.xlu1 %9186  ;;  %v7731_v50 = vsel %vm17689_vm13, %v7728_v41, %v7725_v23  ;;  %v7750_v34 = vadd.f32 1.0, %v17719_v63  ;;  %v11714_v8 = vpop.eup %11713 }
 0x6b4   :  { %9503 = vst.msk [vmem:[%s19195_s10 + $0x8] sm:$0xff] %vm9501_vm12, %v9438_v46  ;;  %v9437_v58 = vsel %vm748_vm2, %v9373_v43, %v17642_v39  ;;  %v9185_v49 = vpop.permute.xlu0 %9184  ;;  %v7722_v39 = vsel %vm17715_vm14, %v7719_v10, %v7716_v32  ;;  %v8115_v47 = vadd.f32 %v7731_v50, %v7219_v0  ;;  %v7355_v32 = vsub.f32 0.0, %v7291_v29  ;;  %v11716_v57 = vpop.eup %11715  ;;  %v19718_v10 = vld [vmem:[#allocation25_spill] sm:$0xff] }
 0x6b5   :  { %9502 = vst.msk [vmem:[%s19195_s10] sm:$0xff] %vm9501_vm12, %v9437_v58  ;;  %9002 = vrot.lane.b32.xlu1 %v17695_v59, %s11870_s24  ;;  %v8114_v37 = vadd.f32 %v7722_v39, %v7218_v61  ;;  %v7354_v41 = vsub.f32 0.0, %v7290_v4  ;;  %v7747_v46 = vand.u32 2147483647, %v17625_v15  ;;  %v7736_v50 = vadd.f32 1.0, %v7735_v6  ;;  %v19719_v39 = vld [vmem:[#allocation23_spill] sm:$0xff] }
 0x6b6   :  { %9000 = vrot.lane.b32.xlu0 %v17705_v13, %s11870_s24  ;;  %v8499_v58 = vmul.f32 %v19718_v10, %v8115_v47  ;;  %v7743_v53 = vmul.f32 0.6931472, %v11714_v8  ;;  %11723 = vlog2.f32 %v7750_v34  ;;  %v7450_v4 = vmul.f32 1.442695, %v7355_v32  ;;  %v17772_v8 = vpop.eup %11717 }
 0x6b7   :  { %v17736_v36 = vpop.permute.xlu1 %8966  ;;  %v8498_v61 = vmul.f32 %v19719_v39, %v8114_v37  ;;  %v7734_v54 = vmul.f32 0.6931472, %v11716_v57  ;;  %v7746_v6 = vmul.f32 %v17625_v15, %v7745_v62  ;;  %vm17760_vm15 = vcmp.lt.f32.partialorder %v7747_v46, 0.0004427343 }
 0x6b8   :  { %v17740_v44 = vpop.permute.xlu0 %8964  ;;  %v17742_v23 = vpop.f32.mrb[116].mxu0  ;;  %v17776_v15 = vadd.f32 %v17373_v19, %v17483_v27  ;;  %vm17785_vm0 = vcmp.lt.f32.partialorder %v7738_v11, 0.0004427343  ;;  %v7221_v27 = vmax.f32 %v17274_v9, 0.0  ;;  %v7293_v32 = vand.u32 2147483647, %v17501_v2 }
 0x6b9   :  { %19717 = vst [vmem:[#allocation11_spill] sm:$0xff] %v17740_v44  ;;  %9226 = vrot.lane.b32.xlu1 %v8115_v47, %s11870_s24  ;;  %v17746_v25 = vpop.f32.mrb[117].mxu0  ;;  %v7448_v44 = vmul.f32 1.442695, %v7354_v41  ;;  %11725 = vpow2.f32 %v7450_v4  ;;  %v7292_v57 = vand.u32 2147483647, %v17514_v38 }
 0x6ba   :  { %9224 = vrot.lane.b32.xlu0 %v8114_v37, %s11870_s24  ;;  %19723 = vst [vmem:[#allocation14_spill] sm:$0xff] %v17776_v15  ;;  %v7762_v41 = vmul.f32 -0.5, %v17701_v48  ;;  %v7777_v10 = vadd.f32 1.0, %v17772_v8  ;;  %v7765_v4 = vand.u32 2147483647, %v17701_v48 }
 0x6bb   :  { %v8611_v43 = vpop.permute.xlu1 %8610  ;;  %11727 = vpow2.f32 %v7448_v44 }
 0x6bc   :  { %v8799_v0 = vadd.f32 %v8611_v43, %v16989_v51  ;;  %v8609_v29 = vpop.permute.xlu0 %8608  ;;  %v7753_v43 = vmul.f32 -0.5, %v17719_v63  ;;  %v7763_v44 = vadd.f32 1.0, %v7762_v41  ;;  %11729 = vlog2.f32 %v7777_v10  ;;  %v19729_v41 = vld [vmem:[#allocation97_spill] sm:$0xff] }
 0x6bd   :  { %v8798_v31 = vadd.f32 %v8609_v29, %v16994_v5  ;;  %8650 = vrot.lane.b32.xlu1 %v8499_v58, %s11871_s30  ;;  %v7357_v29 = vsub.f32 0.0, %v7293_v32  ;;  %vm17830_vm1 = vcmp.lt.f32.partialorder %v7765_v4, 0.0004427343  ;;  %v7223_v4 = vmax.f32 %v17324_v55, 0.0 }
 0x6be   :  { %v9376_v47 = vsel %vm9372_vm11, %v8799_v0, %v17473_v7  ;;  %8648 = vrot.lane.b32.xlu0 %v8498_v61, %s11871_s30  ;;  %v7737_v7 = vmul.f32 %v17636_v21, %v7736_v50  ;;  %v17789_v21 = vpop.eup %11719  ;;  %v7356_v61 = vsub.f32 0.0, %v7292_v57  ;;  %v7754_v51 = vadd.f32 1.0, %v7753_v43 }
 0x6bf   :  { %v9440_v5 = vsel %vm748_vm2, %v9376_v47, %v9187_v18  ;;  %v9375_v37 = vsel %vm9372_vm11, %v8798_v31, %v17477_v12  ;;  %v9191_v34 = vpop.permute.xlu1 %9190  ;;  %v7749_v31 = vsel %vm17760_vm15, %v7746_v6, %v7743_v53  ;;  %v7768_v11 = vadd.f32 1.0, %v17789_v21  ;;  %v11722_v0 = vpop.eup %11721  ;;  %v19727_v47 = vld [vmem:[#allocation27_spill] sm:$0xff] }
 0x6c0   :  { %9505 = vst.msk [vmem:[%s19195_s10 + $0x18] sm:$0xff] %vm9501_vm12, %v9440_v5  ;;  %v9439_v30 = vsel %vm748_vm2, %v9375_v37, %v9185_v49  ;;  %v9189_v18 = vpop.permute.xlu0 %9188  ;;  %v7740_v53 = vsel %vm17785_vm0, %v7737_v7, %v7734_v54  ;;  %v7220_v49 = vmax.f32 %v17278_v20, 0.0  ;;  %v8117_v46 = vadd.f32 %v7749_v31, %v7221_v27  ;;  %v11724_v39 = vpop.eup %11723 }
 0x6c1   :  { %9504 = vst.msk [vmem:[%s19195_s10 + $0x10] sm:$0xff] %vm9501_vm12, %v9439_v30  ;;  %9006 = vrot.lane.b32.xlu1 %v17766_v40, %s11870_s24  ;;  %v7756_v5 = vand.u32 2147483647, %v17719_v63  ;;  %v19728_v30 = vld [vmem:[#allocation26_spill] sm:$0xff]  ;;  %v7761_v12 = vmul.f32 0.6931472, %v11722_v0  ;;  %11731 = vlog2.f32 %v7768_v11 }
 0x6c2   :  { %9004 = vrot.lane.b32.xlu0 %v17776_v15, %s11870_s24  ;;  %v8116_v50 = vadd.f32 %v7740_v53, %v7220_v49  ;;  %v8501_v6 = vmul.f32 %v19727_v47, %v8117_v46  ;;  %v7454_v27 = vmul.f32 1.442695, %v7357_v29  ;;  %v7752_v49 = vmul.f32 0.6931472, %v11724_v39 }
 0x6c3   :  { %v17806_v62 = vpop.permute.xlu1 %8970  ;;  %v7452_v57 = vmul.f32 1.442695, %v7356_v61  ;;  %v7755_v29 = vmul.f32 %v17719_v63, %v7754_v51  ;;  %v17842_v39 = vpop.eup %11725  ;;  %v19733_v61 = vld [vmem:[#allocation101_spill] sm:$0xff]  ;;  %vm17857_vm3 = vcmp.lt.f32.partialorder %v7756_v5, 0.0004427343  ;;  %v7222_v47 = vmax.f32 %v17328_v26, 0.0 }
 0x6c4   :  { %v17810_v58 = vpop.permute.xlu0 %8968  ;;  %v8500_v31 = vmul.f32 %v19728_v30, %v8116_v50  ;;  %11733 = vpow2.f32 %v7454_v27  ;;  %v7780_v5 = vmul.f32 -0.5, %v17772_v8 }
 0x6c5   :  { %19726 = vst [vmem:[#allocation18_spill] sm:$0xff] %v17810_v58  ;;  %9230 = vrot.lane.b32.xlu1 %v8117_v46, %s11870_s24  ;;  %11735 = vpow2.f32 %v7452_v57  ;;  %v19776_v58 = vld [vmem:[#allocation102_spill] sm:$0xff] }
 0x6c6   :  { %9228 = vrot.lane.b32.xlu0 %v8116_v50, %s11870_s24 }
 0x6c7   :  { %v8615_v54 = vpop.permute.xlu1 %8614  ;;  %v17820_v32 = vpop.f32.mrb[118].mxu0 }
 0x6c8   :  { %v8801_v37 = vadd.f32 %v8615_v54, %v17007_v3  ;;  %v8613_v7 = vpop.permute.xlu0 %8612  ;;  %v17826_v43 = vpop.f32.mrb[119].mxu0  ;;  %v7764_v3 = vmul.f32 %v17701_v48, %v7763_v44  ;;  %v17846_v48 = vadd.f32 %v17373_v19, %v19733_v61  ;;  %v7295_v54 = vand.u32 2147483647, %v17565_v17  ;;  %v19739_v61 = vld [vmem:[#allocation29_spill] sm:$0xff] }
 0x6c9   :  { %v8800_v53 = vadd.f32 %v8613_v7, %v17010_v24  ;;  %8654 = vrot.lane.b32.xlu1 %v8501_v6, %s11871_s30  ;;  %v17836_v24 = vadd.f32 %v17373_v19, %v17520_v45  ;;  %v17861_v44 = vpop.eup %11727  ;;  %v7294_v6 = vand.u32 2147483647, %v17578_v42 }
 0x6ca   :  { %v9378_v46 = vsel %vm9372_vm11, %v8801_v37, %v19729_v41  ;;  %8652 = vrot.lane.b32.xlu0 %v8500_v31, %s11871_s30  ;;  %19734 = vst [vmem:[#allocation20_spill] sm:$0xff] %v17846_v48  ;;  %v7771_v31 = vmul.f32 -0.5, %v17789_v21  ;;  %v11730_v41 = vpop.eup %11729 }
 0x6cb   :  { %19732 = vst [vmem:[#allocation15_spill] sm:$0xff] %v17836_v24  ;;  %v9442_v50 = vsel %vm748_vm2, %v9378_v46, %v9191_v34  ;;  %v9377_v11 = vsel %vm9372_vm11, %v8800_v53, %v17490_v16  ;;  %v9195_v0 = vpop.permute.xlu1 %9194  ;;  %v7767_v16 = vsel %vm17830_vm1, %v7764_v3, %v7761_v12  ;;  %v7795_v12 = vadd.f32 1.0, %v17842_v39  ;;  %v11732_v3 = vpop.eup %11731 }
 0x6cc   :  { %9507 = vst.msk [vmem:[%s19195_s10 + $0x28] sm:$0xff] %vm9501_vm12, %v9442_v50  ;;  %v9441_v45 = vsel %vm748_vm2, %v9377_v11, %v9189_v18  ;;  %v17853_v34 = vpop.permute.xlu0 %9192  ;;  %v7758_v18 = vsel %vm17857_vm3, %v7755_v29, %v7752_v49  ;;  %v8119_v30 = vadd.f32 %v7767_v16, %v7223_v4  ;;  %v7786_v49 = vadd.f32 1.0, %v17861_v44 }
 0x6cd   :  { %9506 = vst.msk [vmem:[%s19195_s10 + $0x20] sm:$0xff] %vm9501_vm12, %v9441_v45  ;;  %9010 = vrot.lane.b32.xlu1 %v17836_v24, %s11870_s24  ;;  %v8118_v53 = vadd.f32 %v7758_v18, %v7222_v47  ;;  %v7359_v46 = vsub.f32 0.0, %v7295_v54  ;;  %v7358_v57 = vsub.f32 0.0, %v7294_v6  ;;  %v7781_v50 = vadd.f32 1.0, %v7780_v5  ;;  %v19740_v54 = vld [vmem:[#allocation39_spill] sm:$0xff]  ;;  %v19741_v6 = vld [vmem:[#allocation28_spill] sm:$0xff] }
 0x6ce   :  { %v17875_v51 = vpop.f32.mrb[120].mxu0  ;;  %9008 = vrot.lane.b32.xlu0 %v17846_v48, %s11870_s24  ;;  %v7783_v11 = vand.u32 2147483647, %v17772_v8  ;;  %v8503_v45 = vmul.f32 %v19739_v61, %v8119_v30  ;;  %v7772_v63 = vadd.f32 1.0, %v7771_v31  ;;  %v7774_v4 = vand.u32 2147483647, %v17789_v21 }
 0x6cf   :  { %v17880_v37 = vpop.permute.xlu1 %8974  ;;  %v17882_v7 = vpop.f32.mrb[121].mxu0  ;;  %11737 = vlog2.f32 %v7795_v12  ;;  %v8502_v26 = vmul.f32 %v19741_v6, %v8118_v53  ;;  %v7779_v55 = vmul.f32 0.6931472, %v11730_v41  ;;  %v19742_v5 = vld [vmem:[#allocation77_spill] sm:$0xff]  ;;  %v7770_v20 = vmul.f32 0.6931472, %v11732_v3 }
 0x6d0   :  { %19737 = vst [vmem:[#allocation17_spill] sm:$0xff] %v17880_v37  ;;  %v17886_v27 = vpop.permute.xlu0 %8972  ;;  %11739 = vlog2.f32 %v7786_v49  ;;  %v19743_v61 = vld [vmem:[#allocation96_spill] sm:$0xff]  ;;  %v7782_v12 = vmul.f32 %v17772_v8, %v7781_v50  ;;  %vm17906_vm4 = vcmp.lt.f32.partialorder %v7783_v11, 0.0004427343  ;;  %v17914_v49 = vadd.f32 %v17373_v19, %v17555_v1  ;;  %v17922_v8 = vpop.eup %11733 }
 0x6d1   :  { %19738 = vst [vmem:[#allocation22_spill] sm:$0xff] %v17886_v27  ;;  %9234 = vrot.lane.b32.xlu1 %v8119_v30, %s11870_s24  ;;  %v7458_v27 = vmul.f32 1.442695, %v7359_v46  ;;  %v7456_v30 = vmul.f32 1.442695, %v7358_v57  ;;  %v19746_v46 = vld [vmem:[#allocation98_spill] sm:$0xff]  ;;  %v17926_v50 = vadd.f32 %v17373_v19, %v17559_v60  ;;  %v17940_v11 = vpop.eup %11735 }
 0x6d2   :  { %9232 = vrot.lane.b32.xlu0 %v8118_v53, %s11870_s24  ;;  %v17891_v10 = vpop.f32.mrb[122].mxu0  ;;  %vm17936_vm5 = vcmp.lt.f32.partialorder %v7774_v4, 0.0004427343  ;;  %v7225_v19 = vmax.f32 %v17377_v35, 0.0  ;;  %v7297_v60 = vand.u32 2147483647, %v17629_v22 }
 0x6d3   :  { %v8619_v29 = vpop.permute.xlu1 %8618  ;;  %v17895_v16 = vpop.f32.mrb[123].mxu0  ;;  %19748 = vst [vmem:[#allocation24_spill] sm:$0xff] %v17926_v50  ;;  %11741 = vpow2.f32 %v7458_v27  ;;  %v7789_v6 = vmul.f32 -0.5, %v17861_v44  ;;  %v7804_v27 = vadd.f32 1.0, %v17940_v11  ;;  %v19758_v35 = vld [vmem:[#allocation32_spill] sm:$0xff] }
 0x6d4   :  { %v8803_v18 = vadd.f32 %v8619_v29, %v19740_v54  ;;  %v8617_v47 = vpop.permute.xlu0 %8616  ;;  %v7798_v54 = vmul.f32 -0.5, %v17842_v39  ;;  %11743 = vpow2.f32 %v7456_v30 }
 0x6d5   :  { %v8802_v37 = vadd.f32 %v8617_v47, %v19742_v5  ;;  %8658 = vrot.lane.b32.xlu1 %v8503_v45, %s11871_s30  ;;  %v7813_v5 = vadd.f32 1.0, %v17922_v8 }
 0x6d6   :  { %v9380_v31 = vsel %vm9372_vm11, %v8803_v18, %v19743_v61  ;;  %8656 = vrot.lane.b32.xlu0 %v8502_v26, %s11871_s30  ;;  %v17910_v53 = vpop.f32.mrb[124].mxu0  ;;  %v7773_v26 = vmul.f32 %v17789_v21, %v7772_v63  ;;  %v7785_v21 = vsel %vm17906_vm4, %v7782_v12, %v7779_v55  ;;  %v19751_v63 = vld [vmem:[#allocation8_spill] sm:$0xff]  ;;  %v7361_v12 = vsub.f32 0.0, %v7297_v60  ;;  %v19757_v60 = vld [vmem:[#allocation45_spill] sm:$0xff] }
 0x6d7   :  { %v9444_v41 = vsel %vm748_vm2, %v9380_v31, %v9195_v0  ;;  %v9379_v3 = vsel %vm9372_vm11, %v8802_v37, %v19746_v46  ;;  %v9199_v57 = vpop.permute.xlu1 %9198  ;;  %v17920_v45 = vpop.f32.mrb[125].mxu0  ;;  %v7296_v4 = vand.u32 2147483647, %v19751_v63  ;;  %v8121_v47 = vadd.f32 %v7785_v21, %v7225_v19  ;;  %v19756_v21 = vld [vmem:[#allocation33_spill] sm:$0xff] }
 0x6d8   :  { %19747 = vst [vmem:[#allocation19_spill] sm:$0xff] %v17920_v45  ;;  %9509 = vst.msk [vmem:[%s19195_s10 + $0x38] sm:$0xff] %vm9501_vm12, %v9444_v41  ;;  %v9443_v1 = vsel %vm748_vm2, %v9379_v3, %v17853_v34  ;;  %v9197_v0 = vpop.permute.xlu0 %9196  ;;  %v7776_v55 = vsel %vm17936_vm5, %v7773_v26, %v7770_v20  ;;  %v7224_v34 = vmax.f32 %v17381_v14, 0.0  ;;  %v7799_v3 = vadd.f32 1.0, %v7798_v54  ;;  %v19760_v45 = vld [vmem:[#allocation100_spill] sm:$0xff] }
 0x6d9   :  { %9508 = vst.msk [vmem:[%s19195_s10 + $0x30] sm:$0xff] %vm9501_vm12, %v9443_v1  ;;  %9014 = vrot.lane.b32.xlu1 %v17914_v49, %s11870_s24  ;;  %v11738_v31 = vpop.eup %11737  ;;  %v7360_v30 = vsub.f32 0.0, %v7296_v4  ;;  %v7801_v26 = vand.u32 2147483647, %v17842_v39  ;;  %v8505_v37 = vmul.f32 %v19756_v21, %v8121_v47  ;;  %v7790_v19 = vadd.f32 1.0, %v7789_v6 }
 0x6da   :  { %9012 = vrot.lane.b32.xlu0 %v17926_v50, %s11870_s24  ;;  %v8120_v20 = vadd.f32 %v7776_v55, %v7224_v34  ;;  %v11740_v41 = vpop.eup %11739  ;;  %v7792_v55 = vand.u32 2147483647, %v17861_v44  ;;  %11745 = vlog2.f32 %v7813_v5  ;;  %v7797_v4 = vmul.f32 0.6931472, %v11738_v31 }
 0x6db   :  { %v17957_v18 = vpop.permute.xlu1 %8978  ;;  %11747 = vlog2.f32 %v7804_v27  ;;  %v7788_v54 = vmul.f32 0.6931472, %v11740_v41  ;;  %v7460_v9 = vmul.f32 1.442695, %v7360_v30  ;;  %v7800_v6 = vmul.f32 %v17842_v39, %v7799_v3  ;;  %v19773_v3 = vld [vmem:[#allocation50_spill] sm:$0xff] }
 0x6dc   :  { %19752 = vst [vmem:[#allocation21_spill] sm:$0xff] %v17957_v18  ;;  %v17961_v61 = vpop.permute.xlu0 %8976  ;;  %v7462_v18 = vmul.f32 1.442695, %v7361_v12  ;;  %vm17981_vm6 = vcmp.lt.f32.partialorder %v7801_v26, 0.0004427343  ;;  %v7791_v39 = vmul.f32 %v17861_v44, %v7790_v19  ;;  %v7227_v26 = vmax.f32 %v17426_v33, 0.0 }
 0x6dd   :  { %19753 = vst [vmem:[#allocation25_spill] sm:$0xff] %v17961_v61  ;;  %9238 = vrot.lane.b32.xlu1 %v8121_v47, %s11870_s24  ;;  %v17965_v29 = vpop.f32.mrb[126].mxu0  ;;  %v8504_v61 = vmul.f32 %v19758_v35, %v8120_v20  ;;  %v17988_v35 = vld [vmem:[%s19194_s8] ss:$0 sm:$0xff]  ;;  %v17998_v12 = vpop.eup %11741  ;;  %vm18011_vm7 = vcmp.lt.f32.partialorder %v7792_v55, 0.0004427343 }
 0x6de   :  { %19754 = vst [vmem:[#allocation23_spill] sm:$0xff] %v17965_v29  ;;  %9236 = vrot.lane.b32.xlu0 %v8120_v20, %s11870_s24  ;;  %v17968_v46 = vpop.f32.mrb[127].mxu0  ;;  %v19759_v29 = vld [vmem:[#allocation44_spill] sm:$0xff]  ;;  %v18015_v44 = vpop.eup %11743  ;;  %v7226_v21 = vmax.f32 %v17431_v28, 0.0  ;;  %11749 = vpow2.f32 %v7462_v18  ;;  %v7816_v19 = vmul.f32 -0.5, %v17922_v8  ;;  %v19775_v33 = vld [vmem:[#allocation49_spill] sm:$0xff] }
 0x6df   :  { %19755 = vst [vmem:[#allocation27_spill] sm:$0xff] %v17968_v46  ;;  %v8623_v1 = vpop.permute.xlu1 %8622  ;;  %11751 = vpow2.f32 %v7460_v9  ;;  %v7822_v18 = vadd.f32 1.0, %v18015_v44 }
 0x6e0   :  { %v8805_v34 = vadd.f32 %v8623_v1, %v19757_v60  ;;  %v8621_v14 = vpop.permute.xlu0 %8620  ;;  %v7299_v1 = vand.u32 2147483647, %v17695_v59  ;;  %v7817_v9 = vadd.f32 1.0, %v7816_v19 }
 0x6e1   :  { %v8804_v46 = vadd.f32 %v8621_v14, %v19759_v29  ;;  %8662 = vrot.lane.b32.xlu1 %v8505_v37, %s11871_s30  ;;  %v19763_v14 = vld [vmem:[#allocation40_spill] sm:$0xff]  ;;  %v19766_v29 = vld [vmem:[#allocation2_spill] sm:$0xff]  ;;  %v7298_v37 = vand.u32 2147483647, %v17705_v13 }
 0x6e2   :  { %v9382_v47 = vsel %vm9372_vm11, %v8805_v34, %v19760_v45  ;;  %8660 = vrot.lane.b32.xlu0 %v8504_v61, %s11871_s30  ;;  %v17992_v20 = vadd.f32 %v17988_v35, %v19763_v14  ;;  %v19765_v45 = vld [vmem:[#allocation103_spill] sm:$0xff]  ;;  %v18002_v41 = vadd.f32 %v17988_v35, %v19766_v29  ;;  %v7807_v34 = vmul.f32 -0.5, %v17940_v11 }
 0x6e3   :  { %v9446_v27 = vsel %vm748_vm2, %v9382_v47, %v9199_v57  ;;  %v9381_v61 = vsel %vm9372_vm11, %v8804_v46, %v19765_v45  ;;  %v9203_v31 = vpop.permute.xlu1 %9202  ;;  %v7803_v46 = vsel %vm17981_vm6, %v7800_v6, %v7797_v4  ;;  %v7831_v4 = vadd.f32 1.0, %v17998_v12 }
 0x6e4   :  { %19764 = vst [vmem:[#allocation26_spill] sm:$0xff] %v17992_v20  ;;  %19767 = vst [vmem:[#allocation97_spill] sm:$0xff] %v18002_v41  ;;  %v9445_v30 = vsel %vm748_vm2, %v9381_v61, %v9197_v0  ;;  %v9201_v57 = vpop.permute.xlu0 %9200  ;;  %v7794_v0 = vsel %vm18011_vm7, %v7791_v39, %v7788_v54  ;;  %v8123_v60 = vadd.f32 %v7803_v46, %v7227_v26  ;;  %v11746_v6 = vpop.eup %11745  ;;  %v7363_v5 = vsub.f32 0.0, %v7299_v1  ;;  %v19772_v39 = vld [vmem:[#allocation37_spill] sm:$0xff]  ;;  %v19774_v1 = vld [vmem:[#allocation34_spill] sm:$0xff] }
 0x6e5   :  { %9511 = vst.msk [vmem:[%s19195_s10 + $0x48] sm:$0xff] %vm9501_vm12, %v9446_v27  ;;  %9510 = vst.msk [vmem:[%s19195_s10 + $0x40] sm:$0xff] %vm9501_vm12, %v9445_v30  ;;  %9018 = vrot.lane.b32.xlu1 %v17992_v20, %s11870_s24  ;;  %v8122_v54 = vadd.f32 %v7794_v0, %v7226_v21  ;;  %v11748_v14 = vpop.eup %11747  ;;  %v7362_v27 = vsub.f32 0.0, %v7298_v37  ;;  %v7819_v45 = vand.u32 2147483647, %v17922_v8  ;;  %v7808_v30 = vadd.f32 1.0, %v7807_v34 }
 0x6e6   :  { %9016 = vrot.lane.b32.xlu0 %v18002_v41, %s11870_s24  ;;  %v8507_v29 = vmul.f32 %v19772_v39, %v8123_v60  ;;  %v7810_v46 = vand.u32 2147483647, %v17940_v11  ;;  %11753 = vlog2.f32 %v7831_v4  ;;  %v7815_v28 = vmul.f32 0.6931472, %v11746_v6  ;;  %v19781_v6 = vld [vmem:[#allocation104_spill] sm:$0xff] }
 0x6e7   :  { %v18032_v55 = vpop.permute.xlu1 %8982  ;;  %v8506_v21 = vmul.f32 %v19774_v1, %v8122_v54  ;;  %11755 = vlog2.f32 %v7822_v18  ;;  %v7466_v37 = vmul.f32 1.442695, %v7363_v5  ;;  %v7806_v19 = vmul.f32 0.6931472, %v11748_v14 }
 0x6e8   :  { %19770 = vst [vmem:[#allocation101_spill] sm:$0xff] %v18032_v55  ;;  %v18036_v47 = vpop.permute.xlu0 %8980  ;;  %v7464_v55 = vmul.f32 1.442695, %v7362_v27  ;;  %v7818_v34 = vmul.f32 %v17922_v8, %v7817_v9  ;;  %vm18052_vm8 = vcmp.lt.f32.partialorder %v7819_v45, 0.0004427343  ;;  %v18064_v27 = vpop.eup %11749  ;;  %v7229_v39 = vmax.f32 %v17501_v2, 0.0 }
 0x6e9   :  { %19771 = vst [vmem:[#allocation29_spill] sm:$0xff] %v18036_v47  ;;  %9242 = vrot.lane.b32.xlu1 %v8123_v60, %s11870_s24  ;;  %vm18077_vm9 = vcmp.lt.f32.partialorder %v7810_v46, 0.0004427343  ;;  %11757 = vpow2.f32 %v7466_v37  ;;  %v7834_v46 = vmul.f32 -0.5, %v17998_v12  ;;  %v7849_v1 = vadd.f32 1.0, %v18064_v27 }
 0x6ea   :  { %9240 = vrot.lane.b32.xlu0 %v8122_v54, %s11870_s24  ;;  %v19779_v54 = vld [vmem:[#allocation5_spill] sm:$0xff]  ;;  %11759 = vpow2.f32 %v7464_v55 }
 0x6eb   :  { %v8627_v61 = vpop.permute.xlu1 %8626  ;;  %v18058_v18 = vadd.f32 %v17988_v35, %v19779_v54  ;;  %v7835_v55 = vadd.f32 1.0, %v7834_v46  ;;  %11761 = vlog2.f32 %v7849_v1  ;;  %v19788_v1 = vld [vmem:[#allocation70_spill] sm:$0xff] }
 0x6ec   :  { %v8807_v26 = vadd.f32 %v8627_v61, %v19773_v3  ;;  %v8625_v0 = vpop.permute.xlu0 %8624  ;;  %v19782_v61 = vld [vmem:[#allocation10_spill] sm:$0xff] }
 0x6ed   :  { %v8806_v47 = vadd.f32 %v8625_v0, %v19775_v33  ;;  %8666 = vrot.lane.b32.xlu1 %v8507_v29, %s11871_s30  ;;  %19780 = vst [vmem:[#allocation39_spill] sm:$0xff] %v18058_v18  ;;  %v18068_v8 = vadd.f32 %v17988_v35, %v19782_v61  ;;  %v7301_v29 = vand.u32 2147483647, %v17766_v40  ;;  %v7825_v0 = vmul.f32 -0.5, %v18015_v44 }
 0x6ee   :  { %v9384_v60 = vsel %vm9372_vm11, %v8807_v26, %v19776_v58  ;;  %8664 = vrot.lane.b32.xlu0 %v8506_v21, %s11871_s30  ;;  %v7809_v58 = vmul.f32 %v17940_v11, %v7808_v30  ;;  %v18081_v11 = vpop.eup %11751  ;;  %v7300_v30 = vand.u32 2147483647, %v17776_v15  ;;  %v7828_v61 = vand.u32 2147483647, %v18015_v44 }
 0x6ef   :  { %v9448_v33 = vsel %vm748_vm2, %v9384_v60, %v9203_v31  ;;  %v9383_v5 = vsel %vm9372_vm11, %v8806_v47, %v19781_v6  ;;  %v9207_v14 = vpop.permute.xlu1 %9206  ;;  %19783 = vst [vmem:[#allocation28_spill] sm:$0xff] %v18068_v8  ;;  %v7821_v47 = vsel %vm18052_vm8, %v7818_v34, %v7815_v28  ;;  %v7840_v37 = vadd.f32 1.0, %v18081_v11 }
 0x6f0   :  { %9513 = vst.msk [vmem:[%s19195_s10 + $0x58] sm:$0xff] %vm9501_vm12, %v9448_v33  ;;  %v9447_v9 = vsel %vm748_vm2, %v9383_v5, %v9201_v57  ;;  %v9205_v31 = vpop.permute.xlu0 %9204  ;;  %v7812_v28 = vsel %vm18077_vm9, %v7809_v58, %v7806_v19  ;;  %v7228_v57 = vmax.f32 %v17514_v38, 0.0  ;;  %v8125_v26 = vadd.f32 %v7821_v47, %v7229_v39  ;;  %v11754_v60 = vpop.eup %11753  ;;  %v19786_v47 = vld [vmem:[#allocation54_spill] sm:$0xff] }
 0x6f1   :  { %9512 = vst.msk [vmem:[%s19195_s10 + $0x50] sm:$0xff] %vm9501_vm12, %v9447_v9  ;;  %9022 = vrot.lane.b32.xlu1 %v18058_v18, %s11870_s24  ;;  %v7365_v34 = vsub.f32 0.0, %v7301_v29  ;;  %v11756_v4 = vpop.eup %11755  ;;  %v7364_v54 = vsub.f32 0.0, %v7300_v30  ;;  %v7837_v33 = vand.u32 2147483647, %v17998_v12  ;;  %v18110_v6 = vadd.f32 %v17988_v35, %v17679_v52  ;;  %v19787_v30 = vld [vmem:[#allocation53_spill] sm:$0xff] }
 0x6f2   :  { %9020 = vrot.lane.b32.xlu0 %v18068_v8, %s11870_s24  ;;  %v8124_v19 = vadd.f32 %v7812_v28, %v7228_v57  ;;  %v7826_v58 = vadd.f32 1.0, %v7825_v0  ;;  %v18115_v9 = vadd.f32 %v17988_v35, %v17683_v56  ;;  %v7833_v29 = vmul.f32 0.6931472, %v11754_v60 }
 0x6f3   :  { %v18098_v3 = vpop.permute.xlu1 %8986  ;;  %11763 = vlog2.f32 %v7840_v37  ;;  %v7231_v28 = vmax.f32 %v17565_v17, 0.0  ;;  %v7470_v57 = vmul.f32 1.442695, %v7365_v34  ;;  %v7824_v46 = vmul.f32 0.6931472, %v11756_v4  ;;  %v19791_v34 = vld [vmem:[#allocation31_spill] sm:$0xff] }
 0x6f4   :  { %v18102_v21 = vpop.permute.xlu0 %8984  ;;  %v7468_v0 = vmul.f32 1.442695, %v7364_v54  ;;  %v7836_v56 = vmul.f32 %v17998_v12, %v7835_v55  ;;  %vm18127_vm10 = vcmp.lt.f32.partialorder %v7837_v33, 0.0004427343  ;;  %v19792_v4 = vld [vmem:[#allocation41_spill] sm:$0xff]  ;;  %v19793_v33 = vld [vmem:[#allocation38_spill] sm:$0xff] }
 0x6f5   :  { %9246 = vrot.lane.b32.xlu1 %v8125_v26, %s11870_s24  ;;  %v8509_v54 = vmul.f32 %v19792_v4, %v8125_v26  ;;  %vm18146_vm13 = vcmp.lt.f32.partialorder %v7828_v61, 0.0004427343  ;;  %v7303_v26 = vand.u32 2147483647, %v17836_v24  ;;  %v7230_v61 = vmax.f32 %v17578_v42, 0.0  ;;  %v19796_v37 = vld [vmem:[#allocation59_spill] sm:$0xff] }
 0x6f6   :  { %9244 = vrot.lane.b32.xlu0 %v8124_v19, %s11870_s24  ;;  %11765 = vpow2.f32 %v7470_v57 }
 0x6f7   :  { %v8631_v5 = vpop.permute.xlu1 %8630  ;;  %11767 = vpow2.f32 %v7468_v0  ;;  %v19798_v0 = vld [vmem:[#allocation30_spill] sm:$0xff] }
 0x6f8   :  { %v8809_v45 = vadd.f32 %v8631_v5, %v19786_v47  ;;  %v8629_v39 = vpop.permute.xlu0 %8628 }
 0x6f9   :  { %v8808_v52 = vadd.f32 %v8629_v39, %v19787_v30  ;;  %9026 = vrot.lane.b32.xlu1 %v18110_v6, %s11870_s24  ;;  %v7827_v39 = vmul.f32 %v18015_v44, %v7826_v58  ;;  %v7302_v58 = vand.u32 2147483647, %v17846_v48 }
 0x6fa   :  { %v9386_v38 = vsel %vm9372_vm11, %v8809_v45, %v19788_v1  ;;  %9024 = vrot.lane.b32.xlu0 %v18115_v9, %s11870_s24  ;;  %v18136_v45 = vpop.eup %11757 }
 0x6fb   :  { %v9450_v60 = vsel %vm748_vm2, %v9386_v38, %v9207_v14  ;;  %v9385_v5 = vsel %vm9372_vm11, %v8808_v52, %v19791_v34  ;;  %v9211_v47 = vpop.permute.xlu1 %9210  ;;  %v8508_v38 = vmul.f32 %v19793_v33, %v8124_v19  ;;  %v7839_v14 = vsel %vm18127_vm10, %v7836_v56, %v7833_v29  ;;  %v18150_v44 = vpop.eup %11759 }
 0x6fc   :  { %9515 = vst.msk [vmem:[%s19195_s10 + $0x68] sm:$0xff] %vm9501_vm12, %v9450_v60  ;;  %v9449_v12 = vsel %vm748_vm2, %v9385_v5, %v9205_v31  ;;  %v9209_v55 = vpop.permute.xlu0 %9208  ;;  %v7830_v31 = vsel %vm18146_vm13, %v7827_v39, %v7824_v46  ;;  %v7852_v19 = vmul.f32 -0.5, %v18064_v27  ;;  %v7843_v29 = vmul.f32 -0.5, %v18081_v11  ;;  %v11762_v4 = vpop.eup %11761 }
 0x6fd   :  { %9514 = vst.msk [vmem:[%s19195_s10 + $0x60] sm:$0xff] %vm9501_vm12, %v9449_v12  ;;  %8670 = vrot.lane.b32.xlu1 %v8509_v54, %s11871_s30  ;;  %v8127_v1 = vadd.f32 %v7839_v14, %v7231_v28  ;;  %v7867_v56 = vadd.f32 1.0, %v18136_v45  ;;  %v8126_v5 = vadd.f32 %v7830_v31, %v7230_v61  ;;  %v7858_v46 = vadd.f32 1.0, %v18150_v44  ;;  %v19797_v12 = vld [vmem:[#allocation58_spill] sm:$0xff]  ;;  %v19799_v61 = vld [vmem:[#allocation76_spill] sm:$0xff] }
 0x6fe   :  { %8668 = vrot.lane.b32.xlu0 %v8508_v38, %s11871_s30  ;;  %v7367_v54 = vsub.f32 0.0, %v7303_v26  ;;  %v7366_v39 = vsub.f32 0.0, %v7302_v58  ;;  %v7853_v33 = vadd.f32 1.0, %v7852_v19  ;;  %v11764_v38 = vpop.eup %11763  ;;  %v7855_v14 = vand.u32 2147483647, %v18064_v27 }
 0x6ff   :  { %v8635_v52 = vpop.permute.xlu1 %8634  ;;  %v7844_v30 = vadd.f32 1.0, %v7843_v29  ;;  %v7846_v31 = vand.u32 2147483647, %v18081_v11  ;;  %v18177_v26 = vadd.f32 %v17988_v35, %v17742_v23  ;;  %11769 = vlog2.f32 %v7867_v56 }
 0x700   :  { %v8811_v60 = vadd.f32 %v8635_v52, %v19796_v37  ;;  %v8633_v34 = vpop.permute.xlu0 %8632  ;;  %v18186_v37 = vadd.f32 %v17988_v35, %v17746_v25  ;;  %11771 = vlog2.f32 %v7858_v46  ;;  %v7842_v25 = vmul.f32 0.6931472, %v11764_v38  ;;  %v19800_v46 = vld [vmem:[#allocation43_spill] sm:$0xff]  ;;  %v19803_v38 = vld [vmem:[#allocation42_spill] sm:$0xff] }
 0x701   :  { %v8810_v57 = vadd.f32 %v8633_v34, %v19797_v12  ;;  %9250 = vrot.lane.b32.xlu1 %v8127_v1, %s11870_s24  ;;  %v7474_v56 = vmul.f32 1.442695, %v7367_v54  ;;  %v7305_v34 = vand.u32 2147483647, %v17914_v49  ;;  %v8511_v12 = vmul.f32 %v19800_v46, %v8127_v1  ;;  %v19806_v46 = vld [vmem:[#allocation63_spill] sm:$0xff] }
 0x702   :  { %v9388_v28 = vsel %vm9372_vm11, %v8811_v60, %v19798_v0  ;;  %9248 = vrot.lane.b32.xlu0 %v8126_v5, %s11870_s24  ;;  %v7472_v60 = vmul.f32 1.442695, %v7366_v39  ;;  %vm18206_vm14 = vcmp.lt.f32.partialorder %v7855_v14, 0.0004427343  ;;  %v7845_v0 = vmul.f32 %v18081_v11, %v7844_v30 }
 0x703   :  { %v9452_v58 = vsel %vm748_vm2, %v9388_v28, %v9211_v47  ;;  %v9387_v19 = vsel %vm9372_vm11, %v8810_v57, %v19799_v61  ;;  %v18182_v52 = vpop.permute.xlu1 %8990  ;;  %v7851_v47 = vmul.f32 0.6931472, %v11762_v4  ;;  %v18211_v28 = vpop.eup %11765  ;;  %v7304_v54 = vand.u32 2147483647, %v17926_v50 }
 0x704   :  { %9517 = vst.msk [vmem:[%s19195_s10 + $0x78] sm:$0xff] %vm9501_vm12, %v9452_v58  ;;  %v9451_v23 = vsel %vm748_vm2, %v9387_v19, %v9209_v55  ;;  %v18193_v29 = vpop.permute.xlu0 %8988  ;;  %v7854_v55 = vmul.f32 %v18064_v27, %v7853_v33  ;;  %v8510_v58 = vmul.f32 %v19803_v38, %v8126_v5  ;;  %vm18217_vm15 = vcmp.lt.f32.partialorder %v7846_v31, 0.0004427343  ;;  %v18221_v1 = vpop.eup %11767  ;;  %v19807_v33 = vld [vmem:[#allocation62_spill] sm:$0xff] }
 0x705   :  { %9516 = vst.msk [vmem:[%s19195_s10 + $0x70] sm:$0xff] %vm9501_vm12, %v9451_v23  ;;  %9030 = vrot.lane.b32.xlu1 %v18177_v26, %s11870_s24  ;;  %v7233_v14 = vmax.f32 %v17629_v22, 0.0  ;;  %v7848_v11 = vsel %vm18217_vm15, %v7845_v0, %v7842_v25  ;;  %v7870_v30 = vmul.f32 -0.5, %v18136_v45  ;;  %v7232_v5 = vmax.f32 %v19751_v63, 0.0  ;;  %v19819_v22 = vld [vmem:[#allocation7_spill] sm:$0xff] }
 0x706   :  { %9028 = vrot.lane.b32.xlu0 %v18186_v37, %s11870_s24  ;;  %v7857_v27 = vsel %vm18206_vm14, %v7854_v55, %v7851_v47  ;;  %11773 = vpow2.f32 %v7474_v56  ;;  %v7861_v31 = vmul.f32 -0.5, %v18150_v44  ;;  %v7369_v61 = vsub.f32 0.0, %v7305_v34 }
 0x707   :  { %v9215_v4 = vpop.permute.xlu1 %9214  ;;  %11775 = vpow2.f32 %v7472_v60  ;;  %v8129_v23 = vadd.f32 %v7857_v27, %v7233_v14  ;;  %v7885_v47 = vadd.f32 1.0, %v18211_v28  ;;  %v7368_v55 = vsub.f32 0.0, %v7304_v54  ;;  %v19808_v54 = vld [vmem:[#allocation3_spill] sm:$0xff] }
 0x708   :  { %v9213_v39 = vpop.permute.xlu0 %9212  ;;  %v8128_v25 = vadd.f32 %v7848_v11, %v7232_v5  ;;  %v7876_v0 = vadd.f32 1.0, %v18221_v1  ;;  %v7307_v56 = vand.u32 2147483647, %v17992_v20  ;;  %v7871_v60 = vadd.f32 1.0, %v7870_v30  ;;  %v19809_v30 = vld [vmem:[#allocation6_spill] sm:$0xff] }
 0x709   :  { %8674 = vrot.lane.b32.xlu1 %v8511_v12, %s11871_s30  ;;  %v11770_v38 = vpop.eup %11769  ;;  %v7873_v34 = vand.u32 2147483647, %v18136_v45  ;;  %v7306_v14 = vand.u32 2147483647, %v18002_v41  ;;  %v7862_v11 = vadd.f32 1.0, %v7861_v31  ;;  %11777 = vlog2.f32 %v7885_v47 }
 0x70a   :  { %8672 = vrot.lane.b32.xlu0 %v8510_v58, %s11871_s30  ;;  %v11772_v27 = vpop.eup %11771  ;;  %v7864_v5 = vand.u32 2147483647, %v18150_v44  ;;  %11779 = vlog2.f32 %v7876_v0  ;;  %v7476_v47 = vmul.f32 1.442695, %v7368_v55  ;;  %v19811_v0 = vld [vmem:[#allocation47_spill] sm:$0xff]  ;;  %v7235_v55 = vmax.f32 %v17695_v59, 0.0 }
 0x70b   :  { %v8639_v19 = vpop.permute.xlu1 %8638  ;;  %vm18273_vm0 = vcmp.lt.f32.partialorder %v7873_v34, 0.0004427343  ;;  %v7309_v34 = vand.u32 2147483647, %v18058_v18  ;;  %v19818_v59 = vld [vmem:[#allocation67_spill] sm:$0xff] }
 0x70c   :  { %v8813_v12 = vadd.f32 %v8639_v19, %v19806_v46  ;;  %v8637_v57 = vpop.permute.xlu0 %8636  ;;  %v18245_v46 = vadd.f32 %v17988_v35, %v17820_v32  ;;  %vm18284_vm1 = vcmp.lt.f32.partialorder %v7864_v5, 0.0004427343 }
 0x70d   :  { %v8812_v58 = vadd.f32 %v8637_v57, %v19807_v33  ;;  %9254 = vrot.lane.b32.xlu1 %v8129_v23, %s11870_s24 }
 0x70e   :  { %v9390_v19 = vsel %vm9372_vm11, %v8813_v12, %v19808_v54  ;;  %9252 = vrot.lane.b32.xlu0 %v8128_v25, %s11870_s24  ;;  %v18254_v12 = vadd.f32 %v17988_v35, %v17826_v43  ;;  %v7478_v54 = vmul.f32 1.442695, %v7369_v61  ;;  %v7860_v43 = vmul.f32 0.6931472, %v11772_v27  ;;  %v19814_v27 = vld [vmem:[#allocation46_spill] sm:$0xff] }
 0x70f   :  { %v9454_v57 = vsel %vm748_vm2, %v9390_v19, %v9215_v4  ;;  %v9389_v33 = vsel %vm9372_vm11, %v8812_v58, %v19809_v30  ;;  %v18250_v63 = vpop.permute.xlu1 %8994  ;;  %v7869_v4 = vmul.f32 0.6931472, %v11770_v38  ;;  %v7371_v58 = vsub.f32 0.0, %v7307_v56 }
 0x710   :  { %9519 = vst.msk [vmem:[%s19195_s10 + $0x88] sm:$0xff] %vm9501_vm12, %v9454_v57  ;;  %v9453_v32 = vsel %vm748_vm2, %v9389_v33, %v9213_v39  ;;  %v18261_v31 = vpop.permute.xlu0 %8992  ;;  %v7872_v39 = vmul.f32 %v18136_v45, %v7871_v60  ;;  %v7370_v19 = vsub.f32 0.0, %v7306_v14  ;;  %v8513_v61 = vmul.f32 %v19811_v0, %v8129_v23  ;;  %v18278_v33 = vpop.eup %11773  ;;  %v19817_v57 = vld [vmem:[#allocation68_spill] sm:$0xff] }
 0x711   :  { %19810 = vst [vmem:[#allocation77_spill] sm:$0xff] %v18261_v31  ;;  %9518 = vst.msk [vmem:[%s19195_s10 + $0x80] sm:$0xff] %vm9501_vm12, %v9453_v32  ;;  %9034 = vrot.lane.b32.xlu1 %v18245_v46, %s11870_s24  ;;  %v7863_v30 = vmul.f32 %v18150_v44, %v7862_v11  ;;  %v8512_v32 = vmul.f32 %v19814_v27, %v8128_v25  ;;  %v18288_v23 = vpop.eup %11775  ;;  %11781 = vpow2.f32 %v7478_v54  ;;  %v7888_v14 = vmul.f32 -0.5, %v18211_v28 }
 0x712   :  { %9032 = vrot.lane.b32.xlu0 %v18254_v12, %s11870_s24  ;;  %v7875_v45 = vsel %vm18273_vm0, %v7872_v39, %v7869_v4  ;;  %v7234_v25 = vmax.f32 %v17705_v13, 0.0  ;;  %11783 = vpow2.f32 %v7476_v47  ;;  %v7879_v11 = vmul.f32 -0.5, %v18221_v1 }
 0x713   :  { %v9219_v38 = vpop.permute.xlu1 %9218  ;;  %v7866_v44 = vsel %vm18284_vm1, %v7863_v30, %v7860_v43  ;;  %v7482_v5 = vmul.f32 1.442695, %v7371_v58  ;;  %v7480_v4 = vmul.f32 1.442695, %v7370_v19  ;;  %v8131_v54 = vadd.f32 %v7875_v45, %v7235_v55  ;;  %v11778_v13 = vpop.eup %11777 }
 0x714   :  { %v9217_v56 = vpop.permute.xlu0 %9216  ;;  %v7903_v0 = vadd.f32 1.0, %v18278_v33  ;;  %v8130_v30 = vadd.f32 %v7866_v44, %v7234_v25  ;;  %v7894_v60 = vadd.f32 1.0, %v18288_v23  ;;  %v7373_v47 = vsub.f32 0.0, %v7309_v34  ;;  %v11780_v55 = vpop.eup %11779 }
 0x715   :  { %8678 = vrot.lane.b32.xlu1 %v8513_v61, %s11871_s30  ;;  %v7308_v61 = vand.u32 2147483647, %v18068_v8  ;;  %v7889_v58 = vadd.f32 1.0, %v7888_v14  ;;  %v7891_v19 = vand.u32 2147483647, %v18211_v28  ;;  %v7880_v44 = vadd.f32 1.0, %v7879_v11 }
 0x716   :  { %8676 = vrot.lane.b32.xlu0 %v8512_v32, %s11871_s30  ;;  %v7311_v45 = vand.u32 2147483647, %v18110_v6  ;;  %v7882_v25 = vand.u32 2147483647, %v18221_v1  ;;  %v18312_v34 = vadd.f32 %v17988_v35, %v17875_v51  ;;  %v19820_v14 = vld [vmem:[#allocation12_spill] sm:$0xff]  ;;  %11785 = vlog2.f32 %v7903_v0 }
 0x717   :  { %v8643_v39 = vpop.permute.xlu1 %8642  ;;  %11787 = vlog2.f32 %v7894_v60  ;;  %v7372_v0 = vsub.f32 0.0, %v7308_v61  ;;  %vm18345_vm3 = vcmp.lt.f32.partialorder %v7891_v19, 0.0004427343 }
 0x718   :  { %v8815_v27 = vadd.f32 %v8643_v39, %v19817_v57  ;;  %v8641_v43 = vpop.permute.xlu0 %8640  ;;  %11789 = vpow2.f32 %v7482_v5  ;;  %v7310_v5 = vand.u32 2147483647, %v18115_v9  ;;  %v7375_v61 = vsub.f32 0.0, %v7311_v45 }
 0x719   :  { %v8814_v32 = vadd.f32 %v8641_v43, %v19818_v59  ;;  %9258 = vrot.lane.b32.xlu1 %v8131_v54, %s11870_s24  ;;  %11791 = vpow2.f32 %v7480_v4  ;;  %v7881_v4 = vmul.f32 %v18221_v1, %v7880_v44  ;;  %vm18355_vm4 = vcmp.lt.f32.partialorder %v7882_v25, 0.0004427343 }
 0x71a   :  { %v9392_v31 = vsel %vm9372_vm11, %v8815_v27, %v19819_v22  ;;  %9256 = vrot.lane.b32.xlu0 %v8130_v30, %s11870_s24  ;;  %v18321_v22 = vadd.f32 %v17988_v35, %v17882_v7  ;;  %v7236_v27 = vmax.f32 %v17776_v15, 0.0  ;;  %v7878_v7 = vmul.f32 0.6931472, %v11780_v55  ;;  %v19829_v15 = vld [vmem:[#allocation73_spill] sm:$0xff] }
 0x71b   :  { %v9456_v59 = vsel %vm748_vm2, %v9392_v31, %v9219_v38  ;;  %v9391_v39 = vsel %vm9372_vm11, %v8814_v32, %v19820_v14  ;;  %v18317_v57 = vpop.permute.xlu1 %8998  ;;  %v7887_v31 = vmul.f32 0.6931472, %v11778_v13  ;;  %v7237_v38 = vmax.f32 %v17766_v40, 0.0  ;;  %v18341_v43 = vpop.eup %11781  ;;  %v19822_v32 = vld [vmem:[#allocation51_spill] sm:$0xff] }
 0x71c   :  { %9521 = vst.msk [vmem:[%s19195_s10 + $0x98] sm:$0xff] %vm9501_vm12, %v9456_v59  ;;  %v9455_v51 = vsel %vm748_vm2, %v9391_v39, %v9217_v56  ;;  %v18328_v11 = vpop.permute.xlu0 %8996  ;;  %v7486_v56 = vmul.f32 1.442695, %v7373_v47  ;;  %v7890_v13 = vmul.f32 %v18211_v28, %v7889_v58  ;;  %v8515_v59 = vmul.f32 %v19822_v32, %v8131_v54  ;;  %v18350_v47 = vpop.eup %11783  ;;  %v19825_v39 = vld [vmem:[#allocation48_spill] sm:$0xff]  ;;  %v19828_v58 = vld [vmem:[#allocation74_spill] sm:$0xff] }
 0x71d   :  { %19821 = vst [vmem:[#allocation96_spill] sm:$0xff] %v18328_v11  ;;  %9520 = vst.msk [vmem:[%s19195_s10 + $0x90] sm:$0xff] %vm9501_vm12, %v9455_v51  ;;  %9038 = vrot.lane.b32.xlu1 %v18312_v34, %s11870_s24  ;;  %v8514_v51 = vmul.f32 %v19825_v39, %v8130_v30  ;;  %v7884_v1 = vsel %vm18355_vm4, %v7881_v4, %v7878_v7  ;;  %v7906_v45 = vmul.f32 -0.5, %v18278_v33  ;;  %v7484_v44 = vmul.f32 1.442695, %v7372_v0 }
 0x71e   :  { %9036 = vrot.lane.b32.xlu0 %v18321_v22, %s11870_s24  ;;  %v7893_v28 = vsel %vm18345_vm3, %v7890_v13, %v7887_v31  ;;  %v7313_v31 = vand.u32 2147483647, %v18177_v26  ;;  %v7897_v25 = vmul.f32 -0.5, %v18288_v23  ;;  %11793 = vpow2.f32 %v7486_v56 }
 0x71f   :  { %v9223_v60 = vpop.permute.xlu1 %9222  ;;  %v7374_v13 = vsub.f32 0.0, %v7310_v5  ;;  %v8133_v14 = vadd.f32 %v7893_v28, %v7237_v38  ;;  %v7490_v39 = vmul.f32 1.442695, %v7375_v61  ;;  %v8132_v19 = vadd.f32 %v7884_v1, %v7236_v27 }
 0x720   :  { %v9221_v55 = vpop.permute.xlu0 %9220  ;;  %v7912_v30 = vadd.f32 1.0, %v18350_v47  ;;  %v11786_v0 = vpop.eup %11785  ;;  %v7312_v54 = vand.u32 2147483647, %v18186_v37  ;;  %v7907_v56 = vadd.f32 1.0, %v7906_v45  ;;  %v7909_v5 = vand.u32 2147483647, %v18278_v33 }
 0x721   :  { %8682 = vrot.lane.b32.xlu1 %v8515_v59, %s11871_s30  ;;  %v7921_v59 = vadd.f32 1.0, %v18341_v43  ;;  %v11788_v38 = vpop.eup %11787  ;;  %v7377_v28 = vsub.f32 0.0, %v7313_v31  ;;  %v7898_v27 = vadd.f32 1.0, %v7897_v25  ;;  %v7900_v1 = vand.u32 2147483647, %v18288_v23 }
 0x722   :  { %8680 = vrot.lane.b32.xlu0 %v8514_v51, %s11871_s30  ;;  %v18395_v25 = vadd.f32 %v17988_v35, %v17895_v16  ;;  %v7896_v16 = vmul.f32 0.6931472, %v11788_v38  ;;  %vm18415_vm5 = vcmp.lt.f32.partialorder %v7909_v5, 0.0004427343  ;;  %v19836_v38 = vld [vmem:[#allocation52_spill] sm:$0xff] }
 0x723   :  { %v8647_v32 = vpop.permute.xlu1 %8646  ;;  %11795 = vlog2.f32 %v7921_v59  ;;  %vm18424_vm6 = vcmp.lt.f32.partialorder %v7900_v1, 0.0004427343 }
 0x724   :  { %v8817_v7 = vadd.f32 %v8647_v32, %v19828_v58  ;;  %v8645_v4 = vpop.permute.xlu0 %8644  ;;  %v18380_v32 = vpop.eup %11789  ;;  %v19830_v58 = vld [vmem:[#allocation11_spill] sm:$0xff]  ;;  %11797 = vlog2.f32 %v7912_v30  ;;  %v7908_v30 = vmul.f32 %v18278_v33, %v7907_v56 }
 0x725   :  { %v8816_v51 = vadd.f32 %v8645_v4, %v19829_v15  ;;  %9262 = vrot.lane.b32.xlu1 %v8133_v14, %s11870_s24  ;;  %v18384_v15 = vadd.f32 %v17988_v35, %v17891_v10  ;;  %11799 = vpow2.f32 %v7484_v44  ;;  %v7494_v44 = vmul.f32 1.442695, %v7377_v28 }
 0x726   :  { %v9394_v61 = vsel %vm9372_vm11, %v8817_v7, %v17736_v36  ;;  %9260 = vrot.lane.b32.xlu0 %v8132_v19, %s11870_s24  ;;  %v18391_v36 = vpop.eup %11791  ;;  %v7905_v7 = vmul.f32 0.6931472, %v11786_v0  ;;  %11801 = vpow2.f32 %v7490_v39  ;;  %v8516_v39 = vmul.f32 %v19836_v38, %v8132_v19  ;;  %v19840_v0 = vld [vmem:[#allocation81_spill] sm:$0xff] }
 0x727   :  { %v9458_v45 = vsel %vm748_vm2, %v9394_v61, %v9223_v60  ;;  %v9393_v4 = vsel %vm9372_vm11, %v8816_v51, %v19830_v58  ;;  %v18389_v31 = vpop.permute.xlu1 %9002  ;;  %v7376_v61 = vsub.f32 0.0, %v7312_v54  ;;  %v19835_v58 = vld [vmem:[#allocation55_spill] sm:$0xff]  ;;  %v7939_v33 = vadd.f32 1.0, %v18380_v32 }
 0x728   :  { %19831 = vst [vmem:[#allocation98_spill] sm:$0xff] %v18389_v31  ;;  %9523 = vst.msk [vmem:[%s19195_s10 + $0xa8] sm:$0xff] %vm9501_vm12, %v9458_v45  ;;  %v9457_v10 = vsel %vm748_vm2, %v9393_v4, %v9221_v55  ;;  %v18402_v60 = vpop.permute.xlu0 %9000  ;;  %v7488_v55 = vmul.f32 1.442695, %v7374_v13  ;;  %v8517_v4 = vmul.f32 %v19835_v58, %v8133_v14  ;;  %v7911_v13 = vsel %vm18415_vm5, %v7908_v30, %v7905_v7  ;;  %v18429_v56 = vpop.eup %11793 }
 0x729   :  { %19832 = vst [vmem:[#allocation33_spill] sm:$0xff] %v18402_v60  ;;  %9522 = vst.msk [vmem:[%s19195_s10 + $0xa0] sm:$0xff] %vm9501_vm12, %v9457_v10  ;;  %9042 = vrot.lane.b32.xlu1 %v18384_v15, %s11870_s24  ;;  %v7899_v10 = vmul.f32 %v18288_v23, %v7898_v27  ;;  %v7924_v23 = vmul.f32 -0.5, %v18341_v43  ;;  %v7915_v19 = vmul.f32 -0.5, %v18350_v47  ;;  %v7930_v14 = vadd.f32 1.0, %v18391_v36  ;;  %v19842_v27 = vld [vmem:[#allocation80_spill] sm:$0xff] }
 0x72a   :  { %9040 = vrot.lane.b32.xlu0 %v18395_v25, %s11870_s24  ;;  %11803 = vpow2.f32 %v7488_v55  ;;  %v7492_v7 = vmul.f32 1.442695, %v7376_v61  ;;  %v7927_v28 = vand.u32 2147483647, %v18341_v43 }
 0x72b   :  { %v9227_v45 = vpop.permute.xlu1 %9226  ;;  %v7902_v54 = vsel %vm18424_vm6, %v7899_v10, %v7896_v16  ;;  %11805 = vpow2.f32 %v7494_v44  ;;  %v19839_v16 = vmax.f32 %v17836_v24, 0.0  ;;  %v19841_v10 = vmax.f32 %v17846_v48, 0.0 }
 0x72c   :  { %v9225_v59 = vpop.permute.xlu0 %9224  ;;  %11807 = vlog2.f32 %v7939_v33  ;;  %v7925_v44 = vadd.f32 1.0, %v7924_v23  ;;  %v7916_v61 = vadd.f32 1.0, %v7915_v19  ;;  %v7933_v33 = vmul.f32 -0.5, %v18391_v36 }
 0x72d   :  { %8686 = vrot.lane.b32.xlu1 %v8517_v4, %s11871_s30  ;;  %v8135_v30 = vadd.f32 %v7911_v13, %v19839_v16  ;;  %v8134_v38 = vadd.f32 %v7902_v54, %v19841_v10  ;;  %v11796_v55 = vpop.eup %11795  ;;  %11809 = vlog2.f32 %v7930_v14  ;;  %v7942_v54 = vmul.f32 -0.5, %v18380_v32  ;;  %v19843_v14 = vld [vmem:[#allocation18_spill] sm:$0xff]  ;;  %v19845_v10 = vld [vmem:[#allocation19_spill] sm:$0xff] }
 0x72e   :  { %8684 = vrot.lane.b32.xlu0 %v8516_v39, %s11871_s30  ;;  %v11798_v1 = vpop.eup %11797  ;;  %v18461_v23 = vadd.f32 %v17988_v35, %v17910_v53  ;;  %v18473_v5 = vadd.f32 %v17988_v35, %v19845_v10  ;;  %vm18490_vm7 = vcmp.lt.f32.partialorder %v7927_v28, 0.0004427343  ;;  %v7957_v48 = vadd.f32 1.0, %v18429_v56 }
 0x72f   :  { %v8651_v51 = vpop.permute.xlu1 %8650  ;;  %v18456_v16 = vpop.eup %11799  ;;  %11811 = vpow2.f32 %v7492_v7  ;;  %v7936_v10 = vand.u32 2147483647, %v18391_v36 }
 0x730   :  { %v8819_v58 = vadd.f32 %v8651_v51, %v19840_v0  ;;  %v8649_v4 = vpop.permute.xlu0 %8648  ;;  %v7918_v51 = vand.u32 2147483647, %v18350_v47  ;;  %11813 = vlog2.f32 %v7957_v48 }
 0x731   :  { %v8818_v39 = vadd.f32 %v8649_v4, %v19842_v27  ;;  %9266 = vrot.lane.b32.xlu1 %v8135_v30, %s11870_s24  ;;  %v7315_v27 = vand.u32 2147483647, %v18245_v46  ;;  %v7314_v4 = vand.u32 2147483647, %v18254_v12  ;;  %vm18570_vm10 = vcmp.lt.f32.partialorder %v7936_v10, 0.0004427343 }
 0x732   :  { %v9396_v13 = vsel %vm9372_vm11, %v8819_v58, %v17806_v62  ;;  %9264 = vrot.lane.b32.xlu0 %v8134_v38, %s11870_s24  ;;  %v18468_v58 = vpop.eup %11801  ;;  %vm18500_vm8 = vcmp.lt.f32.partialorder %v7918_v51, 0.0004427343  ;;  %v7951_v10 = vmul.f32 -0.5, %v18456_v16 }
 0x733   :  { %v9460_v19 = vsel %vm748_vm2, %v9396_v13, %v9227_v45  ;;  %v9395_v62 = vsel %vm9372_vm11, %v8818_v39, %v19843_v14  ;;  %v18466_v0 = vpop.permute.xlu1 %9006  ;;  %v7923_v39 = vmul.f32 0.6931472, %v11796_v55  ;;  %v7317_v13 = vand.u32 2147483647, %v18312_v34 }
 0x734   :  { %19844 = vst [vmem:[#allocation45_spill] sm:$0xff] %v18466_v0  ;;  %9525 = vst.msk [vmem:[%s19195_s10 + $0xb8] sm:$0xff] %vm9501_vm12, %v9460_v19  ;;  %v9459_v53 = vsel %vm748_vm2, %v9395_v62, %v9225_v59  ;;  %v18480_v45 = vpop.permute.xlu0 %9004  ;;  %v7926_v14 = vmul.f32 %v18341_v43, %v7925_v44  ;;  %v7914_v59 = vmul.f32 0.6931472, %v11798_v1  ;;  %v7943_v55 = vadd.f32 1.0, %v7942_v54  ;;  %v18504_v1 = vpop.eup %11803  ;;  %v19852_v54 = vld [vmem:[#allocation56_spill] sm:$0xff] }
 0x735   :  { %19846 = vst [vmem:[#allocation32_spill] sm:$0xff] %v18480_v45  ;;  %9524 = vst.msk [vmem:[%s19195_s10 + $0xb0] sm:$0xff] %vm9501_vm12, %v9459_v53  ;;  %9046 = vrot.lane.b32.xlu1 %v18461_v23, %s11870_s24  ;;  %v7945_v19 = vand.u32 2147483647, %v18380_v32  ;;  %v7934_v62 = vadd.f32 1.0, %v7933_v33  ;;  %v7379_v53 = vsub.f32 0.0, %v7315_v27  ;;  %v7917_v43 = vmul.f32 %v18350_v47, %v7916_v61  ;;  %v18510_v31 = vpop.eup %11805 }
 0x736   :  { %9044 = vrot.lane.b32.xlu0 %v18473_v5, %s11870_s24  ;;  %v19849_v45 = vld [vmem:[#allocation57_spill] sm:$0xff]  ;;  %v7378_v44 = vsub.f32 0.0, %v7314_v4  ;;  %v8518_v60 = vmul.f32 %v19852_v54, %v8134_v38  ;;  %v7929_v33 = vsel %vm18490_vm7, %v7926_v14, %v7923_v39  ;;  %v7948_v27 = vadd.f32 1.0, %v18456_v16  ;;  %v11808_v51 = vpop.eup %11807 }
 0x737   :  { %v9231_v24 = vpop.permute.xlu1 %9230  ;;  %v8519_v0 = vmul.f32 %v19849_v45, %v8135_v30  ;;  %v7381_v30 = vsub.f32 0.0, %v7317_v13  ;;  %v7316_v47 = vand.u32 2147483647, %v18321_v22  ;;  %v7920_v61 = vsel %vm18500_vm8, %v7917_v43, %v7914_v59  ;;  %v11810_v45 = vpop.eup %11809  ;;  %v19856_v59 = vld [vmem:[#allocation86_spill] sm:$0xff]  ;;  %v19858_v54 = vld [vmem:[#allocation85_spill] sm:$0xff] }
 0x738   :  { %v9229_v40 = vpop.permute.xlu0 %9228  ;;  %v18518_v38 = vmul.f32 %v18380_v32, %v7943_v55  ;;  %vm18520_vm9 = vcmp.lt.f32.partialorder %v7945_v19, 0.0004427343  ;;  %v18525_v7 = vmul.f32 %v18391_v36, %v7934_v62  ;;  %v7498_v39 = vmul.f32 1.442695, %v7379_v53 }
 0x739   :  { %8690 = vrot.lane.b32.xlu1 %v8519_v0, %s11871_s30  ;;  %v19855_v13 = vmax.f32 %v17914_v49, 0.0  ;;  %v7496_v32 = vmul.f32 1.442695, %v7378_v44  ;;  %v19857_v43 = vmax.f32 %v17926_v50, 0.0  ;;  %11815 = vlog2.f32 %v7948_v27  ;;  %v19891_v50 = vld [vmem:[#allocation101_spill] sm:$0xff] }
 0x73a   :  { %8688 = vrot.lane.b32.xlu0 %v8518_v60, %s11871_s30  ;;  %v7960_v60 = vmul.f32 -0.5, %v18429_v56  ;;  %v7502_v62 = vmul.f32 1.442695, %v7381_v30  ;;  %v7380_v48 = vsub.f32 0.0, %v7316_v47  ;;  %v7319_v53 = vand.u32 2147483647, %v18384_v15 }
 0x73b   :  { %v8655_v0 = vpop.permute.xlu1 %8654  ;;  %v8137_v14 = vadd.f32 %v7929_v33, %v19855_v13  ;;  %v8136_v28 = vadd.f32 %v7920_v61, %v19857_v43  ;;  %v7318_v36 = vand.u32 2147483647, %v18395_v25  ;;  %v19859_v33 = vld [vmem:[#allocation17_spill] sm:$0xff]  ;;  %v7932_v13 = vmul.f32 0.6931472, %v11810_v45  ;;  %v19861_v47 = vld [vmem:[#allocation22_spill] sm:$0xff] }
 0x73c   :  { %v8821_v55 = vadd.f32 %v8655_v0, %v19856_v59  ;;  %v8653_v19 = vpop.permute.xlu0 %8652  ;;  %v7941_v0 = vmul.f32 0.6931472, %v11808_v51  ;;  %v19860_v59 = vld [vmem:[#allocation23_spill] sm:$0xff]  ;;  %v7975_v43 = vadd.f32 1.0, %v18468_v58  ;;  %11817 = vpow2.f32 %v7498_v39 }
 0x73d   :  { %v8820_v11 = vadd.f32 %v8653_v19, %v19858_v54  ;;  %9270 = vrot.lane.b32.xlu1 %v8137_v14, %s11870_s24  ;;  %v18543_v27 = vadd.f32 %v17988_v35, %v19860_v59  ;;  %v19862_v54 = vld [vmem:[#allocation27_spill] sm:$0xff]  ;;  %11819 = vpow2.f32 %v7496_v32  ;;  %v7500_v45 = vmul.f32 1.442695, %v7380_v48  ;;  %v18579_v48 = vpop.eup %11811 }
 0x73e   :  { %v9398_v44 = vsel %vm9372_vm11, %v8821_v55, %v19859_v33  ;;  %9268 = vrot.lane.b32.xlu0 %v8136_v28, %s11870_s24  ;;  %v18553_v55 = vadd.f32 %v17988_v35, %v19862_v54  ;;  %v19863_v35 = vld [vmem:[#allocation61_spill] sm:$0xff]  ;;  %11821 = vpow2.f32 %v7502_v62  ;;  %v7947_v32 = vsel %vm18520_vm9, %v18518_v38, %v7941_v0  ;;  %v11814_v62 = vpop.eup %11813 }
 0x73f   :  { %v9462_v30 = vsel %vm748_vm2, %v9398_v44, %v9231_v24  ;;  %v9397_v61 = vsel %vm9372_vm11, %v8820_v11, %v19861_v47  ;;  %v18548_v19 = vpop.permute.xlu1 %9010  ;;  %v7966_v11 = vadd.f32 1.0, %v18504_v1  ;;  %v8521_v39 = vmul.f32 %v19863_v35, %v8137_v14  ;;  %v19866_v47 = vld [vmem:[#allocation60_spill] sm:$0xff]  ;;  %v19869_v38 = vld [vmem:[#allocation89_spill] sm:$0xff] }
 0x740   :  { %9527 = vst.msk [vmem:[%s19195_s10 + $0xc8] sm:$0xff] %vm9501_vm12, %v9462_v30  ;;  %v9461_v51 = vsel %vm748_vm2, %v9397_v61, %v9229_v40  ;;  %v18560_v24 = vpop.permute.xlu0 %9008  ;;  %v7383_v40 = vsub.f32 0.0, %v7319_v53  ;;  %v7382_v44 = vsub.f32 0.0, %v7318_v36  ;;  %v7321_v59 = vand.u32 2147483647, %v18461_v23 }
 0x741   :  { %9526 = vst.msk [vmem:[%s19195_s10 + $0xc0] sm:$0xff] %vm9501_vm12, %v9461_v51  ;;  %9050 = vrot.lane.b32.xlu1 %v18543_v27, %s11870_s24  ;;  %v7938_v14 = vsel %vm18570_vm10, %v18525_v7, %v7932_v13  ;;  %11823 = vlog2.f32 %v7975_v43  ;;  %v8520_v61 = vmul.f32 %v19866_v47, %v8136_v28  ;;  %v7961_v4 = vadd.f32 1.0, %v7960_v60 }
 0x742   :  { %9048 = vrot.lane.b32.xlu0 %v18553_v55, %s11870_s24  ;;  %11825 = vlog2.f32 %v7966_v11  ;;  %v19867_v0 = vmax.f32 %v17992_v20, 0.0  ;;  %v7963_v7 = vand.u32 2147483647, %v18429_v56  ;;  %v7506_v43 = vmul.f32 1.442695, %v7383_v40 }
 0x743   :  { %v9235_v30 = vpop.permute.xlu1 %9234  ;;  %11827 = vpow2.f32 %v7500_v45  ;;  %v11816_v13 = vpop.eup %11815  ;;  %v7504_v51 = vmul.f32 1.442695, %v7382_v44  ;;  %v19868_v35 = vmax.f32 %v18002_v41, 0.0  ;;  %v7993_v60 = vadd.f32 1.0, %v18510_v31 }
 0x744   :  { %v9233_v36 = vpop.permute.xlu0 %9232  ;;  %v8139_v54 = vadd.f32 %v7947_v32, %v19867_v0  ;;  %v7385_v11 = vsub.f32 0.0, %v7321_v59  ;;  %v7320_v45 = vand.u32 2147483647, %v18473_v5  ;;  %v7952_v47 = vadd.f32 1.0, %v7951_v10 }
 0x745   :  { %8694 = vrot.lane.b32.xlu1 %v8521_v39, %s11871_s30  ;;  %v8138_v28 = vadd.f32 %v7938_v14, %v19868_v35  ;;  %v7959_v39 = vmul.f32 0.6931472, %v11814_v62  ;;  %v7962_v53 = vmul.f32 %v18429_v56, %v7961_v4  ;;  %v7954_v40 = vand.u32 2147483647, %v18456_v16  ;;  %v19871_v14 = vld [vmem:[#allocation65_spill] sm:$0xff]  ;;  %v19875_v4 = vld [vmem:[#allocation64_spill] sm:$0xff] }
 0x746   :  { %8692 = vrot.lane.b32.xlu0 %v8520_v61, %s11871_s30  ;;  %v7984_v44 = vadd.f32 1.0, %v18579_v48  ;;  %v19870_v61 = vld [vmem:[#allocation90_spill] sm:$0xff]  ;;  %v8523_v59 = vmul.f32 %v19871_v14, %v8139_v54  ;;  %vm18605_vm13 = vcmp.lt.f32.partialorder %v7963_v7, 0.0004427343  ;;  %v7950_v10 = vmul.f32 0.6931472, %v11816_v13  ;;  %v18609_v62 = vpop.eup %11817 }
 0x747   :  { %v8659_v33 = vpop.permute.xlu1 %8658  ;;  %11829 = vlog2.f32 %v7993_v60  ;;  %v19876_v7 = vld [vmem:[#allocation25_spill] sm:$0xff]  ;;  %v7953_v20 = vmul.f32 %v18456_v16, %v7952_v47  ;;  %vm18636_vm14 = vcmp.lt.f32.partialorder %v7954_v40, 0.0004427343  ;;  %v7384_v47 = vsub.f32 0.0, %v7320_v45 }
 0x748   :  { %v8823_v32 = vadd.f32 %v8659_v33, %v19869_v38  ;;  %v8657_v0 = vpop.permute.xlu0 %8656  ;;  %v19874_v38 = vld [vmem:[#allocation21_spill] sm:$0xff]  ;;  %v8522_v33 = vmul.f32 %v19875_v4, %v8138_v28  ;;  %11831 = vlog2.f32 %v7984_v44  ;;  %v8011_v45 = vadd.f32 1.0, %v18609_v62 }
 0x749   :  { %v8822_v41 = vadd.f32 %v8657_v0, %v19870_v61  ;;  %9274 = vrot.lane.b32.xlu1 %v8139_v54, %s11870_s24  ;;  %v7978_v0 = vmul.f32 -0.5, %v18468_v58  ;;  %v18616_v61 = vpop.eup %11819  ;;  %11833 = vpow2.f32 %v7506_v43  ;;  %v19881_v35 = vmax.f32 %v18058_v18, 0.0 }
 0x74a   :  { %v9400_v56 = vsel %vm9372_vm11, %v8823_v32, %v19874_v38  ;;  %9272 = vrot.lane.b32.xlu0 %v8138_v28, %s11870_s24  ;;  %v7969_v32 = vmul.f32 -0.5, %v18504_v1  ;;  %v18625_v38 = vpop.eup %11821  ;;  %11835 = vpow2.f32 %v7504_v51 }
 0x74b   :  { %v9464_v54 = vsel %vm748_vm2, %v9400_v56, %v9235_v30  ;;  %v9399_v14 = vsel %vm9372_vm11, %v8822_v41, %v19876_v7  ;;  %v18621_v13 = vpop.permute.xlu1 %9014  ;;  %v7965_v41 = vsel %vm18605_vm13, %v7962_v53, %v7959_v39  ;;  %v11824_v16 = vpop.eup %11823  ;;  %v7323_v56 = vand.u32 2147483647, %v18543_v27 }
 0x74c   :  { %19877 = vst [vmem:[#allocation44_spill] sm:$0xff] %v18621_v13  ;;  %9529 = vst.msk [vmem:[%s19195_s10 + $0xd8] sm:$0xff] %vm9501_vm12, %v9464_v54  ;;  %v9463_v28 = vsel %vm748_vm2, %v9399_v14, %v9233_v36  ;;  %v18632_v60 = vpop.permute.xlu0 %9012  ;;  %v7956_v53 = vsel %vm18636_vm14, %v7953_v20, %v7950_v10  ;;  %v11826_v36 = vpop.eup %11825  ;;  %v7322_v39 = vand.u32 2147483647, %v18553_v55  ;;  %v7979_v43 = vadd.f32 1.0, %v7978_v0 }
 0x74d   :  { %19878 = vst [vmem:[#allocation100_spill] sm:$0xff] %v18632_v60  ;;  %9528 = vst.msk [vmem:[%s19195_s10 + $0xd0] sm:$0xff] %vm9501_vm12, %v9463_v28  ;;  %8698 = vrot.lane.b32.xlu1 %v8523_v59, %s11871_s30  ;;  %v18651_v40 = vpop.eup %11827  ;;  %v8141_v4 = vadd.f32 %v7965_v41, %v19881_v35  ;;  %v7981_v59 = vand.u32 2147483647, %v18468_v58  ;;  %v7970_v54 = vadd.f32 1.0, %v7969_v32  ;;  %v19882_v7 = vmax.f32 %v18068_v8, 0.0 }
 0x74e   :  { %8696 = vrot.lane.b32.xlu0 %v8522_v33, %s11871_s30  ;;  %v7972_v20 = vand.u32 2147483647, %v18504_v1  ;;  %v7510_v10 = vmul.f32 1.442695, %v7385_v11  ;;  %v7977_v33 = vmul.f32 0.6931472, %v11824_v16  ;;  %v7980_v32 = vmul.f32 %v18468_v58, %v7979_v43 }
 0x74f   :  { %v9239_v44 = vpop.permute.xlu1 %9238  ;;  %v8140_v14 = vadd.f32 %v7956_v53, %v19882_v7  ;;  %v8002_v0 = vadd.f32 1.0, %v18616_v61  ;;  %v7508_v28 = vmul.f32 1.442695, %v7384_v47  ;;  %v7387_v30 = vsub.f32 0.0, %v7323_v56  ;;  %v19883_v53 = vld [vmem:[#allocation69_spill] sm:$0xff]  ;;  %v19889_v43 = vld [vmem:[#allocation66_spill] sm:$0xff] }
 0x750   :  { %v9237_v51 = vpop.permute.xlu0 %9236  ;;  %v7968_v60 = vmul.f32 0.6931472, %v11826_v36  ;;  %v7996_v41 = vmul.f32 -0.5, %v18510_v31  ;;  %v7386_v35 = vsub.f32 0.0, %v7322_v39  ;;  %v7987_v11 = vmul.f32 -0.5, %v18579_v48  ;;  %v19888_v39 = vld [vmem:[#allocation93_spill] sm:$0xff] }
 0x751   :  { %9278 = vrot.lane.b32.xlu1 %v8141_v4, %s11870_s24  ;;  %11837 = vlog2.f32 %v8011_v45  ;;  %v8525_v16 = vmul.f32 %v19883_v53, %v8141_v4  ;;  %vm18666_vm15 = vcmp.lt.f32.partialorder %v7981_v59, 0.0004427343  ;;  %v7971_v47 = vmul.f32 %v18504_v1, %v7970_v54  ;;  %v11830_v36 = vpop.eup %11829  ;;  %v19890_v4 = vld [vmem:[#allocation92_spill] sm:$0xff]  ;;  %v19892_v7 = vld [vmem:[#allocation29_spill] sm:$0xff] }
 0x752   :  { %9276 = vrot.lane.b32.xlu0 %v8140_v14, %s11870_s24  ;;  %vm18671_vm0 = vcmp.lt.f32.partialorder %v7972_v20, 0.0004427343  ;;  %v8524_v13 = vmul.f32 %v19889_v43, %v8140_v14  ;;  %v7983_v45 = vsel %vm18666_vm15, %v7980_v32, %v7977_v33  ;;  %11839 = vlog2.f32 %v8002_v0  ;;  %v11832_v53 = vpop.eup %11831 }
 0x753   :  { %v8663_v8 = vpop.permute.xlu1 %8662  ;;  %v7974_v1 = vsel %vm18671_vm0, %v7971_v47, %v7968_v60  ;;  %v7997_v54 = vadd.f32 1.0, %v7996_v41  ;;  %v7999_v20 = vand.u32 2147483647, %v18510_v31  ;;  %v7988_v14 = vadd.f32 1.0, %v7987_v11  ;;  %v18689_v32 = vpop.eup %11833 }
 0x754   :  { %v8825_v18 = vadd.f32 %v8663_v8, %v19888_v39  ;;  %v8661_v58 = vpop.permute.xlu0 %8660  ;;  %v7990_v33 = vand.u32 2147483647, %v18579_v48  ;;  %v8029_v0 = vadd.f32 1.0, %v18625_v38  ;;  %v19893_v47 = vmax.f32 %v18110_v6, 0.0 }
 0x755   :  { %v8824_v59 = vadd.f32 %v8661_v58, %v19890_v4  ;;  %8702 = vrot.lane.b32.xlu1 %v8525_v16, %s11871_s30  ;;  %v8014_v58 = vmul.f32 -0.5, %v18609_v62  ;;  %v8020_v43 = vadd.f32 1.0, %v18651_v40  ;;  %11841 = vpow2.f32 %v7510_v10 }
 0x756   :  { %v9402_v8 = vsel %vm9372_vm11, %v8825_v18, %v19891_v50  ;;  %8700 = vrot.lane.b32.xlu0 %v8524_v13, %s11871_s30  ;;  %v8143_v56 = vadd.f32 %v7983_v45, %v19893_v47  ;;  %v7995_v50 = vmul.f32 0.6931472, %v11830_v36  ;;  %v18698_v18 = vpop.eup %11835  ;;  %v7514_v36 = vmul.f32 1.442695, %v7387_v30 }
 0x757   :  { %v9466_v16 = vsel %vm748_vm2, %v9402_v8, %v9239_v44  ;;  %v9401_v60 = vsel %vm9372_vm11, %v8824_v59, %v19892_v7  ;;  %v18694_v41 = vpop.permute.xlu1 %9018  ;;  %v19894_v44 = vmax.f32 %v18115_v9, 0.0  ;;  %v7986_v45 = vmul.f32 0.6931472, %v11832_v53 }
 0x758   :  { %9531 = vst.msk [vmem:[%s19195_s10 + $0xe8] sm:$0xff] %vm9501_vm12, %v9466_v16  ;;  %v9465_v13 = vsel %vm748_vm2, %v9401_v60, %v9237_v51  ;;  %v18705_v11 = vpop.permute.xlu0 %9016  ;;  %v7998_v51 = vmul.f32 %v18510_v31, %v7997_v54  ;;  %11843 = vpow2.f32 %v7508_v28  ;;  %v7512_v4 = vmul.f32 1.442695, %v7386_v35  ;;  %v19898_v35 = vld [vmem:[#allocation72_spill] sm:$0xff] }
 0x759   :  { %v8142_v39 = vadd.f32 %v7974_v1, %v19894_v44  ;;  %9530 = vst.msk [vmem:[%s19195_s10 + $0xe0] sm:$0xff] %vm9501_vm12, %v9465_v13  ;;  %9282 = vrot.lane.b32.xlu1 %v8143_v56, %s11870_s24  ;;  %vm18718_vm1 = vcmp.lt.f32.partialorder %v7999_v20, 0.0004427343  ;;  %v8005_v10 = vmul.f32 -0.5, %v18616_v61  ;;  %v19897_v1 = vld [vmem:[#allocation75_spill] sm:$0xff]  ;;  %v7989_v7 = vmul.f32 %v18579_v48, %v7988_v14 }
 0x75a   :  { %v8527_v8 = vmul.f32 %v19897_v1, %v8143_v56  ;;  %v8001_v16 = vsel %vm18718_vm1, %v7998_v51, %v7995_v50  ;;  %11845 = vlog2.f32 %v8029_v0  ;;  %vm18728_vm3 = vcmp.lt.f32.partialorder %v7990_v33, 0.0004427343 }
 0x75b   :  { %9280 = vrot.lane.b32.xlu0 %v8142_v39, %s11870_s24  ;;  %v9243_v30 = vpop.permute.xlu1 %9242  ;;  %v11838_v31 = vpop.eup %11837  ;;  %v8526_v54 = vmul.f32 %v19898_v35, %v8142_v39  ;;  %v8015_v53 = vadd.f32 1.0, %v8014_v58  ;;  %11847 = vlog2.f32 %v8020_v43  ;;  %v7248_v60 = vmax.f32 %v18186_v37, 0.0  ;;  %v19902_v43 = vld [vmem:[#allocation95_spill] sm:$0xff] }
 0x75c   :  { %v9241_v28 = vpop.permute.xlu0 %9240  ;;  %v7992_v47 = vsel %vm18728_vm3, %v7989_v7, %v7986_v45  ;;  %v8017_v48 = vand.u32 2147483647, %v18609_v62  ;;  %v11840_v14 = vpop.eup %11839  ;;  %v7251_v0 = vmax.f32 %v18245_v46, 0.0  ;;  %11849 = vpow2.f32 %v7514_v36  ;;  %v19906_v35 = vld [vmem:[#allocation79_spill] sm:$0xff] }
 0x75d   :  { %8706 = vrot.lane.b32.xlu1 %v8527_v8, %s11871_s30  ;;  %v19901_v33 = vmax.f32 %v18177_v26, 0.0  ;;  %v8006_v50 = vadd.f32 1.0, %v8005_v10  ;;  %11851 = vpow2.f32 %v7512_v4  ;;  %v8013_v44 = vmul.f32 0.6931472, %v11838_v31  ;;  %v19903_v8 = vld [vmem:[#allocation94_spill] sm:$0xff] }
 0x75e   :  { %v8008_v39 = vand.u32 2147483647, %v18616_v61  ;;  %v8047_v58 = vadd.f32 1.0, %v18689_v32  ;;  %v8144_v59 = vadd.f32 %v7992_v47, %v7248_v60  ;;  %v8016_v1 = vmul.f32 %v18609_v62, %v8015_v53 }
 0x75f   :  { %8704 = vrot.lane.b32.xlu0 %v8526_v54, %s11871_s30  ;;  %v8145_v56 = vadd.f32 %v8001_v16, %v19901_v33  ;;  %v8667_v13 = vpop.permute.xlu1 %8666  ;;  %v8038_v36 = vadd.f32 1.0, %v18698_v18  ;;  %vm18748_vm4 = vcmp.lt.f32.partialorder %v8017_v48, 0.0004427343  ;;  %v8004_v10 = vmul.f32 0.6931472, %v11840_v14  ;;  %v18759_v53 = vpop.eup %11841 }
 0x760   :  { %v8827_v51 = vadd.f32 %v8667_v13, %v19902_v43  ;;  %v8665_v45 = vpop.permute.xlu0 %8664  ;;  %v8032_v16 = vmul.f32 -0.5, %v18625_v38  ;;  %v8007_v54 = vmul.f32 %v18616_v61, %v8006_v50  ;;  %v8023_v20 = vmul.f32 -0.5, %v18651_v40 }
 0x761   :  { %v8826_v7 = vadd.f32 %v8665_v45, %v19903_v8  ;;  %9286 = vrot.lane.b32.xlu1 %v8145_v56, %s11870_s24  ;;  %v8529_v62 = vmul.f32 %v19906_v35, %v8145_v56  ;;  %11853 = vlog2.f32 %v8047_v58  ;;  %vm18778_vm5 = vcmp.lt.f32.partialorder %v8008_v39, 0.0004427343  ;;  %v19912_v35 = vld [vmem:[#allocation83_spill] sm:$0xff] }
 0x762   :  { %v9404_v31 = vsel %vm9372_vm11, %v8827_v51, %v18098_v3  ;;  %v8019_v3 = vsel %vm18748_vm4, %v8016_v1, %v8013_v44  ;;  %v18768_v14 = vpop.eup %11843  ;;  %11855 = vlog2.f32 %v8038_v36  ;;  %v8035_v13 = vand.u32 2147483647, %v18625_v38 }
 0x763   :  { %9284 = vrot.lane.b32.xlu0 %v8144_v59, %s11870_s24  ;;  %v9468_v60 = vsel %vm748_vm2, %v9404_v31, %v9243_v30  ;;  %v9403_v47 = vsel %vm9372_vm11, %v8826_v7, %v18102_v21  ;;  %v18764_v48 = vpop.permute.xlu1 %9022  ;;  %v19907_v30 = vld [vmem:[#allocation78_spill] sm:$0xff]  ;;  %v7250_v39 = vmax.f32 %v18254_v12, 0.0  ;;  %v8147_v58 = vadd.f32 %v8019_v3, %v7251_v0 }
 0x764   :  { %9533 = vst.msk [vmem:[%s19195_s10 + $0xf8] sm:$0xff] %vm9501_vm12, %v9468_v60  ;;  %v9467_v61 = vsel %vm748_vm2, %v9403_v47, %v9241_v28  ;;  %v18775_v33 = vpop.permute.xlu0 %9020  ;;  %v8528_v56 = vmul.f32 %v19907_v30, %v8144_v59  ;;  %v11846_v50 = vpop.eup %11845  ;;  %v8010_v28 = vsel %vm18778_vm5, %v8007_v54, %v8004_v10  ;;  %v8033_v43 = vadd.f32 1.0, %v8032_v16  ;;  %v19915_v21 = vld [vmem:[#allocation82_spill] sm:$0xff] }
 0x765   :  { %9532 = vst.msk [vmem:[%s19195_s10 + $0xf0] sm:$0xff] %vm9501_vm12, %v9467_v61  ;;  %8710 = vrot.lane.b32.xlu1 %v8529_v62, %s11871_s30  ;;  %v11848_v44 = vpop.eup %11847  ;;  %v8024_v51 = vadd.f32 1.0, %v8023_v20  ;;  %v8026_v59 = vand.u32 2147483647, %v18651_v40  ;;  %v8065_v1 = vadd.f32 1.0, %v18759_v53  ;;  %v8146_v7 = vadd.f32 %v8010_v28, %v7250_v39 }
 0x766   :  { %v18794_v36 = vpop.eup %11849  ;;  %v8031_v4 = vmul.f32 0.6931472, %v11846_v50  ;;  %v8056_v10 = vadd.f32 1.0, %v18768_v14  ;;  %vm18800_vm6 = vcmp.lt.f32.partialorder %v8035_v13, 0.0004427343  ;;  %v8531_v62 = vmul.f32 %v19912_v35, %v8147_v58 }
 0x767   :  { %8708 = vrot.lane.b32.xlu0 %v8528_v56, %s11871_s30  ;;  %v9247_v45 = vpop.permute.xlu1 %9246  ;;  %v18797_v31 = vpop.eup %11851  ;;  %v8022_v16 = vmul.f32 0.6931472, %v11848_v44  ;;  %v8034_v54 = vmul.f32 %v18625_v38, %v8033_v43  ;;  %v8025_v20 = vmul.f32 %v18651_v40, %v8024_v51  ;;  %v8050_v60 = vmul.f32 -0.5, %v18689_v32 }
 0x768   :  { %v9245_v8 = vpop.permute.xlu0 %9244  ;;  %vm18811_vm7 = vcmp.lt.f32.partialorder %v8026_v59, 0.0004427343  ;;  %v8041_v61 = vmul.f32 -0.5, %v18698_v18  ;;  %11857 = vlog2.f32 %v8065_v1  ;;  %v8083_v30 = vadd.f32 1.0, %v18794_v36 }
 0x769   :  { %9290 = vrot.lane.b32.xlu1 %v8147_v58, %s11870_s24  ;;  %v8530_v50 = vmul.f32 %v19915_v21, %v8146_v7  ;;  %v8037_v38 = vsel %vm18800_vm6, %v8034_v54, %v8031_v4  ;;  %11859 = vlog2.f32 %v8056_v10  ;;  %v8074_v40 = vadd.f32 1.0, %v18797_v31 }
 0x76a   :  { %v7253_v13 = vmax.f32 %v18312_v34, 0.0  ;;  %v8028_v44 = vsel %vm18811_vm7, %v8025_v20, %v8022_v16  ;;  %v8053_v39 = vand.u32 2147483647, %v18689_v32  ;;  %v7252_v43 = vmax.f32 %v18321_v22, 0.0  ;;  %v19916_v16 = vld [vmem:[#allocation99_spill] sm:$0xff] }
 0x76b   :  { %9288 = vrot.lane.b32.xlu0 %v8146_v7, %s11870_s24  ;;  %v18809_v47 = vpop.permute.xlu1 %9026  ;;  %v11854_v28 = vpop.eup %11853  ;;  %v8051_v51 = vadd.f32 1.0, %v8050_v60  ;;  %v8042_v7 = vadd.f32 1.0, %v8041_v61  ;;  %v8044_v4 = vand.u32 2147483647, %v18698_v18  ;;  %11861 = vlog2.f32 %v8083_v30 }
 0x76c   :  { %v18817_v56 = vpop.permute.xlu0 %9024  ;;  %v11856_v58 = vpop.eup %11855  ;;  %v8149_v1 = vadd.f32 %v8037_v38, %v7253_v13  ;;  %v8148_v35 = vadd.f32 %v8028_v44, %v7252_v43  ;;  %11863 = vlog2.f32 %v8074_v40  ;;  %vm18834_vm8 = vcmp.lt.f32.partialorder %v8053_v39, 0.0004427343  ;;  %v19919_v40 = vld [vmem:[#allocation88_spill] sm:$0xff] }
 0x76d   :  { %8714 = vrot.lane.b32.xlu1 %v8531_v62, %s11871_s30  ;;  %v8049_v62 = vmul.f32 0.6931472, %v11854_v28  ;;  %v8040_v60 = vmul.f32 0.6931472, %v11856_v58  ;;  %v8068_v61 = vmul.f32 -0.5, %v18759_v53  ;;  %v8059_v30 = vmul.f32 -0.5, %v18768_v14 }
 0x76e   :  { %v8533_v28 = vmul.f32 %v19919_v40, %v8149_v1  ;;  %v8043_v13 = vmul.f32 %v18698_v18, %v8042_v7  ;;  %v19920_v44 = vld [vmem:[#allocation84_spill] sm:$0xff]  ;;  %vm18857_vm9 = vcmp.lt.f32.partialorder %v8044_v4, 0.0004427343  ;;  %v7255_v18 = vmax.f32 %v18384_v15, 0.0 }
 0x76f   :  { %8712 = vrot.lane.b32.xlu0 %v8530_v50, %s11871_s30  ;;  %v8671_v59 = vpop.permute.xlu1 %8670  ;;  %v8532_v39 = vmul.f32 %v19920_v44, %v8148_v35  ;;  %v8071_v43 = vand.u32 2147483647, %v18759_v53  ;;  %v8060_v7 = vadd.f32 1.0, %v8059_v30  ;;  %v8086_v4 = vmul.f32 -0.5, %v18794_v36 }
 0x770   :  { %v8829_v10 = vadd.f32 %v8671_v59, %v17501_v2  ;;  %v8669_v0 = vpop.permute.xlu0 %8668  ;;  %v8052_v2 = vmul.f32 %v18689_v32, %v8051_v51  ;;  %v7254_v59 = vmax.f32 %v18395_v25, 0.0  ;;  %v8089_v40 = vand.u32 2147483647, %v18794_v36 }
 0x771   :  { %v8828_v54 = vadd.f32 %v8669_v0, %v19916_v16  ;;  %9294 = vrot.lane.b32.xlu1 %v8149_v1, %s11870_s24  ;;  %v8069_v1 = vadd.f32 1.0, %v8068_v61  ;;  %vm18880_vm10 = vcmp.lt.f32.partialorder %v8071_v43, 0.0004427343  ;;  %v7257_v43 = vmax.f32 %v18461_v23, 0.0 }
 0x772   :  { %v9406_v3 = vsel %vm9372_vm11, %v8829_v10, %v18182_v52  ;;  %v11858_v58 = vpop.eup %11857  ;;  %vm18908_vm14 = vcmp.lt.f32.partialorder %v8089_v40, 0.0004427343 }
 0x773   :  { %9292 = vrot.lane.b32.xlu0 %v8148_v35, %s11870_s24  ;;  %v9470_v21 = vsel %vm748_vm2, %v9406_v3, %v9247_v45  ;;  %v9405_v50 = vsel %vm9372_vm11, %v8828_v54, %v18193_v29  ;;  %v9251_v38 = vpop.permute.xlu1 %9250  ;;  %v8055_v45 = vsel %vm18834_vm8, %v8052_v2, %v8049_v62  ;;  %v11860_v51 = vpop.eup %11859  ;;  %v8062_v35 = vand.u32 2147483647, %v18768_v14 }
 0x774   :  { %9535 = vst.msk [vmem:[%s19195_s10 + $0x108] sm:$0xff] %vm9501_vm12, %v9470_v21  ;;  %v9469_v52 = vsel %vm748_vm2, %v9405_v50, %v9245_v8  ;;  %v9249_v32 = vpop.permute.xlu0 %9248  ;;  %v8046_v8 = vsel %vm18857_vm9, %v8043_v13, %v8040_v60  ;;  %v8151_v0 = vadd.f32 %v8055_v45, %v7255_v18  ;;  %v8077_v62 = vmul.f32 -0.5, %v18797_v31  ;;  %v19925_v13 = vld [vmem:[#allocation105_spill] sm:$0xff]  ;;  %v19928_v18 = vld [vmem:[#allocation71_spill] sm:$0xff] }
 0x775   :  { %9534 = vst.msk [vmem:[%s19195_s10 + $0x100] sm:$0xff] %vm9501_vm12, %v9469_v52  ;;  %8718 = vrot.lane.b32.xlu1 %v8533_v28, %s11871_s30  ;;  %v8150_v54 = vadd.f32 %v8046_v8, %v7254_v59  ;;  %v8067_v20 = vmul.f32 0.6931472, %v11858_v58  ;;  %v11862_v60 = vpop.eup %11861  ;;  %v8058_v2 = vmul.f32 0.6931472, %v11860_v51  ;;  %v8070_v30 = vmul.f32 %v18759_v53, %v8069_v1 }
 0x776   :  { %v11864_v61 = vpop.eup %11863  ;;  %v8061_v21 = vmul.f32 %v18768_v14, %v8060_v7  ;;  %v8087_v50 = vadd.f32 1.0, %v8086_v4  ;;  %v8535_v52 = vmul.f32 %v19925_v13, %v8151_v0  ;;  %vm18889_vm13 = vcmp.lt.f32.partialorder %v8062_v35, 0.0004427343  ;;  %v19931_v35 = vld [vmem:[#allocation77_spill] sm:$0xff] }
 0x777   :  { %8716 = vrot.lane.b32.xlu0 %v8532_v39, %s11871_s30  ;;  %v18873_v10 = vpop.permute.xlu1 %9030  ;;  %v8078_v39 = vadd.f32 1.0, %v8077_v62  ;;  %v8080_v45 = vand.u32 2147483647, %v18797_v31  ;;  %v8534_v53 = vmul.f32 %v19928_v18, %v8150_v54  ;;  %v8073_v14 = vsel %vm18880_vm10, %v8070_v30, %v8067_v20  ;;  %v19932_v30 = vld [vmem:[#allocation36_spill] sm:$0xff] }
 0x778   :  { %v18877_v16 = vpop.permute.xlu0 %9028  ;;  %v8085_v8 = vmul.f32 0.6931472, %v11862_v60  ;;  %v8064_v59 = vsel %vm18889_vm13, %v8061_v21, %v8058_v2  ;;  %v8076_v1 = vmul.f32 0.6931472, %v11864_v61  ;;  %v7256_v7 = vmax.f32 %v18473_v5, 0.0 }
 0x779   :  { %9298 = vrot.lane.b32.xlu1 %v8151_v0, %s11870_s24  ;;  %v8088_v4 = vmul.f32 %v18794_v36, %v8087_v50  ;;  %v8153_v20 = vadd.f32 %v8073_v14, %v7257_v43  ;;  %v8079_v60 = vmul.f32 %v18797_v31, %v8078_v39  ;;  %vm8081_vm15 = vcmp.lt.f32.partialorder %v8080_v45, 0.0004427343  ;;  %v19934_v39 = vld [vmem:[#allocation87_spill] sm:$0xff] }
 0x77a   :  { %v8152_v3 = vadd.f32 %v8064_v59, %v7256_v7  ;;  %v7258_v61 = vmax.f32 %v18553_v55, 0.0 }
 0x77b   :  { %9296 = vrot.lane.b32.xlu0 %v8150_v54, %s11870_s24  ;;  %v8675_v28 = vpop.permute.xlu1 %8674  ;;  %v8091_v2 = vsel %vm18908_vm14, %v8088_v4, %v8085_v8  ;;  %v8082_v31 = vsel %vm8081_vm15, %v8079_v60, %v8076_v1  ;;  %v8537_v21 = vmul.f32 %v19932_v30, %v8153_v20  ;;  %v19937_v8 = vld [vmem:[#allocation8_spill] sm:$0xff]  ;;  %v19940_v60 = vld [vmem:[#allocation13_spill] sm:$0xff] }
 0x77c   :  { %v8831_v29 = vadd.f32 %v8675_v28, %v17565_v17  ;;  %v8673_v58 = vpop.permute.xlu0 %8672  ;;  %v19933_v28 = vld [vmem:[#allocation35_spill] sm:$0xff]  ;;  %v19938_v1 = vld [vmem:[#allocation96_spill] sm:$0xff] }
 0x77d   :  { %v8830_v51 = vadd.f32 %v8673_v58, %v17578_v42  ;;  %8722 = vrot.lane.b32.xlu1 %v8535_v52, %s11871_s30  ;;  %v8536_v13 = vmul.f32 %v19933_v28, %v8152_v3  ;;  %v8154_v52 = vadd.f32 %v8082_v31, %v7258_v61 }
 0x77e   :  { %v9408_v17 = vsel %vm9372_vm11, %v8831_v29, %v18250_v63  ;;  %v19935_v29 = vld [vmem:[#allocation4_spill] sm:$0xff] }
 0x77f   :  { %8720 = vrot.lane.b32.xlu0 %v8534_v53, %s11871_s30  ;;  %v9472_v42 = vsel %vm748_vm2, %v9408_v17, %v9251_v38  ;;  %v9407_v62 = vsel %vm9372_vm11, %v8830_v51, %v19931_v35  ;;  %v9255_v54 = vpop.permute.xlu1 %9254  ;;  %v7259_v38 = vmax.f32 %v18543_v27, 0.0  ;;  %v19936_v53 = vld [vmem:[#allocation91_spill] sm:$0xff] }
 0x780   :  { %9537 = vst.msk [vmem:[%s19195_s10 + $0x118] sm:$0xff] %vm9501_vm12, %v9472_v42  ;;  %v9471_v63 = vsel %vm748_vm2, %v9407_v62, %v9249_v32  ;;  %v9253_v36 = vpop.permute.xlu0 %9252  ;;  %v8538_v14 = vmul.f32 %v19936_v53, %v8154_v52  ;;  %v19939_v62 = vld [vmem:[#allocation9_spill] sm:$0xff] }
 0x781   :  { %9536 = vst.msk [vmem:[%s19195_s10 + $0x110] sm:$0xff] %vm9501_vm12, %v9471_v63  ;;  %9302 = vrot.lane.b32.xlu1 %v8153_v20, %s11870_s24  ;;  %v8155_v50 = vadd.f32 %v8091_v2, %v7259_v38  ;;  %v19942_v38 = vld [vmem:[#allocation33_spill] sm:$0xff] }
 0x783   :  { %9300 = vrot.lane.b32.xlu0 %v8152_v3, %s11870_s24  ;;  %v18931_v32 = vpop.permute.xlu1 %9034  ;;  %v8539_v45 = vmul.f32 %v19934_v39, %v8155_v50 }
 0x784   :  { %v18934_v40 = vpop.permute.xlu0 %9032 }
 0x785   :  { %8726 = vrot.lane.b32.xlu1 %v8537_v21, %s11871_s30 }
 0x787   :  { %8724 = vrot.lane.b32.xlu0 %v8536_v13, %s11871_s30  ;;  %v8679_v44 = vpop.permute.xlu1 %8678 }
 0x788   :  { %v8833_v58 = vadd.f32 %v8679_v44, %v19935_v29  ;;  %v8677_v18 = vpop.permute.xlu0 %8676 }
 0x789   :  { %v8832_v43 = vadd.f32 %v8677_v18, %v19937_v8  ;;  %8730 = vrot.lane.b32.xlu1 %v8539_v45, %s11871_s30  ;;  %v19944_v45 = vld [vmem:[#allocation14_spill] sm:$0xff] }
 0x78a   :  { %v9410_v51 = vsel %vm9372_vm11, %v8833_v58, %v18317_v57  ;;  %v19945_v58 = vld [vmem:[#allocation45_spill] sm:$0xff] }
 0x78b   :  { %8728 = vrot.lane.b32.xlu0 %v8538_v14, %s11871_s30  ;;  %v9474_v59 = vsel %vm748_vm2, %v9410_v51, %v9255_v54  ;;  %v9409_v7 = vsel %vm9372_vm11, %v8832_v43, %v19938_v1  ;;  %v9259_v17 = vpop.permute.xlu1 %9258  ;;  %v19946_v14 = vld [vmem:[#allocation32_spill] sm:$0xff] }
 0x78c   :  { %9539 = vst.msk [vmem:[%s19195_s10 + $0x128] sm:$0xff] %vm9501_vm12, %v9474_v59  ;;  %v9473_v4 = vsel %vm748_vm2, %v9409_v7, %v9253_v36  ;;  %v9257_v0 = vpop.permute.xlu0 %9256  ;;  %v19941_v36 = vld [vmem:[#allocation98_spill] sm:$0xff] }
 0x78d   :  { %9538 = vst.msk [vmem:[%s19195_s10 + $0x120] sm:$0xff] %vm9501_vm12, %v9473_v4  ;;  %9306 = vrot.lane.b32.xlu1 %v8155_v50, %s11870_s24  ;;  %v19947_v4 = vld [vmem:[#allocation15_spill] sm:$0xff] }
 0x78f   :  { %9304 = vrot.lane.b32.xlu0 %v8154_v52, %s11870_s24  ;;  %v18961_v57 = vpop.permute.xlu1 %9038  ;;  %v19943_v52 = vld [vmem:[#allocation16_spill] sm:$0xff] }
 0x790   :  { %v18963_v42 = vpop.permute.xlu0 %9036 }
 0x793   :  { %v8683_v35 = vpop.permute.xlu1 %8682 }
 0x794   :  { %v8835_v54 = vadd.f32 %v8683_v35, %v19939_v62  ;;  %v8681_v20 = vpop.permute.xlu0 %8680  ;;  %v19948_v62 = vld [vmem:[#allocation20_spill] sm:$0xff] }
 0x795   :  { %v8834_v63 = vadd.f32 %v8681_v20, %v19940_v60 }
 0x796   :  { %v9412_v3 = vsel %vm9372_vm11, %v8835_v54, %v19941_v36 }
 0x797   :  { %v9476_v2 = vsel %vm748_vm2, %v9412_v3, %v9259_v17  ;;  %v9411_v31 = vsel %vm9372_vm11, %v8834_v63, %v19942_v38  ;;  %v9263_v61 = vpop.permute.xlu1 %9262 }
 0x798   :  { %9541 = vst.msk [vmem:[%s19195_s10 + $0x138] sm:$0xff] %vm9501_vm12, %v9476_v2  ;;  %v9475_v30 = vsel %vm748_vm2, %v9411_v31, %v9257_v0  ;;  %v9261_v21 = vpop.permute.xlu0 %9260 }
 0x799   :  { %9540 = vst.msk [vmem:[%s19195_s10 + $0x130] sm:$0xff] %vm9501_vm12, %v9475_v30  ;;  %v19949_v30 = vld [vmem:[#allocation24_spill] sm:$0xff] }
 0x79b   :  { %v18981_v50 = vpop.permute.xlu1 %9042 }
 0x79c   :  { %v18983_v28 = vpop.permute.xlu0 %9040 }
 0x79f   :  { %v8687_v13 = vpop.permute.xlu1 %8686 }
 0x7a0   :  { %v8837_v44 = vadd.f32 %v8687_v13, %v19943_v52  ;;  %v8685_v39 = vpop.permute.xlu0 %8684  ;;  %v19950_v13 = vld [vmem:[#allocation44_spill] sm:$0xff] }
 0x7a1   :  { %v8836_v29 = vadd.f32 %v8685_v39, %v19944_v45  ;;  %v19951_v39 = vld [vmem:[#allocation100_spill] sm:$0xff] }
 0x7a2   :  { %v9414_v18 = vsel %vm9372_vm11, %v8837_v44, %v19945_v58 }
 0x7a3   :  { %v9478_v53 = vsel %vm748_vm2, %v9414_v18, %v9263_v61  ;;  %v9413_v8 = vsel %vm9372_vm11, %v8836_v29, %v19946_v14  ;;  %v9267_v43 = vpop.permute.xlu1 %9266 }
 0x7a4   :  { %9543 = vst.msk [vmem:[%s19195_s10 + $0x148] sm:$0xff] %vm9501_vm12, %v9478_v53  ;;  %v9477_v51 = vsel %vm748_vm2, %v9413_v8, %v9261_v21  ;;  %v9265_v59 = vpop.permute.xlu0 %9264  ;;  %v19952_v53 = vld [vmem:[#allocation26_spill] sm:$0xff] }
 0x7a5   :  { %9542 = vst.msk [vmem:[%s19195_s10 + $0x140] sm:$0xff] %vm9501_vm12, %v9477_v51 }
 0x7a7   :  { %v19001_v1 = vpop.permute.xlu1 %9046 }
 0x7a8   :  { %v19003_v7 = vpop.permute.xlu0 %9044 }
 0x7ab   :  { %v8691_v17 = vpop.permute.xlu1 %8690 }
 0x7ac   :  { %v8839_v0 = vadd.f32 %v8691_v17, %v19947_v4  ;;  %v8689_v35 = vpop.permute.xlu0 %8688 }
 0x7ad   :  { %v8838_v54 = vadd.f32 %v8689_v35, %v19948_v62 }
 0x7ae   :  { %v9416_v20 = vsel %vm9372_vm11, %v8839_v0, %v18548_v19 }
 0x7af   :  { %v9480_v60 = vsel %vm748_vm2, %v9416_v20, %v9267_v43  ;;  %v9415_v63 = vsel %vm9372_vm11, %v8838_v54, %v18560_v24  ;;  %v9271_v36 = vpop.permute.xlu1 %9270  ;;  %v19953_v43 = vld [vmem:[#allocation97_spill] sm:$0xff]  ;;  %v19954_v54 = vld [vmem:[#allocation39_spill] sm:$0xff] }
 0x7b0   :  { %9545 = vst.msk [vmem:[%s19195_s10 + $0x158] sm:$0xff] %vm9501_vm12, %v9480_v60  ;;  %v9479_v3 = vsel %vm748_vm2, %v9415_v63, %v9265_v59  ;;  %v9269_v2 = vpop.permute.xlu0 %9268  ;;  %v19955_v63 = vld [vmem:[#allocation28_spill] sm:$0xff] }
 0x7b1   :  { %9544 = vst.msk [vmem:[%s19195_s10 + $0x150] sm:$0xff] %vm9501_vm12, %v9479_v3 }
 0x7b3   :  { %v19021_v19 = vpop.permute.xlu1 %9050 }
 0x7b4   :  { %v19023_v38 = vpop.permute.xlu0 %9048 }
 0x7b7   :  { %v8695_v31 = vpop.permute.xlu1 %8694 }
 0x7b8   :  { %v8841_v24 = vadd.f32 %v8695_v31, %v17914_v49  ;;  %v8693_v61 = vpop.permute.xlu0 %8692 }
 0x7b9   :  { %v8840_v21 = vadd.f32 %v8693_v61, %v19949_v30 }
 0x7ba   :  { %v9418_v52 = vsel %vm9372_vm11, %v8841_v24, %v19950_v13 }
 0x7bb   :  { %v9482_v44 = vsel %vm748_vm2, %v9418_v52, %v9271_v36  ;;  %v9417_v45 = vsel %vm9372_vm11, %v8840_v21, %v19951_v39  ;;  %v9275_v29 = vpop.permute.xlu1 %9274 }
 0x7bc   :  { %9547 = vst.msk [vmem:[%s19195_s10 + $0x168] sm:$0xff] %vm9501_vm12, %v9482_v44  ;;  %v9481_v58 = vsel %vm748_vm2, %v9417_v45, %v9269_v2  ;;  %v9273_v49 = vpop.permute.xlu0 %9272 }
 0x7bd   :  { %9546 = vst.msk [vmem:[%s19195_s10 + $0x160] sm:$0xff] %vm9501_vm12, %v9481_v58 }
 0x7bf   :  { %v8699_v18 = vpop.permute.xlu1 %8698 }
 0x7c0   :  { %v8843_v14 = vadd.f32 %v8699_v18, %v19952_v53  ;;  %v8697_v8 = vpop.permute.xlu0 %8696 }
 0x7c1   :  { %v8842_v51 = vadd.f32 %v8697_v8, %v19953_v43 }
 0x7c2   :  { %v9420_v59 = vsel %vm9372_vm11, %v8843_v14, %v18694_v41 }
 0x7c3   :  { %v9484_v17 = vsel %vm748_vm2, %v9420_v59, %v9275_v29  ;;  %v9419_v4 = vsel %vm9372_vm11, %v8842_v51, %v18705_v11  ;;  %v9279_v0 = vpop.permute.xlu1 %9278 }
 0x7c4   :  { %9549 = vst.msk [vmem:[%s19195_s10 + $0x178] sm:$0xff] %vm9501_vm12, %v9484_v17  ;;  %v9483_v35 = vsel %vm748_vm2, %v9419_v4, %v9273_v49  ;;  %v9277_v62 = vpop.permute.xlu0 %9276 }
 0x7c5   :  { %9548 = vst.msk [vmem:[%s19195_s10 + $0x170] sm:$0xff] %vm9501_vm12, %v9483_v35 }
 0x7c7   :  { %v8703_v41 = vpop.permute.xlu1 %8702 }
 0x7c8   :  { %v8845_v20 = vadd.f32 %v8703_v41, %v19954_v54  ;;  %v8701_v60 = vpop.permute.xlu0 %8700 }
 0x7c9   :  { %v8844_v11 = vadd.f32 %v8701_v60, %v19955_v63 }
 0x7ca   :  { %v9422_v36 = vsel %vm9372_vm11, %v8845_v20, %v18764_v48 }
 0x7cb   :  { %v9486_v3 = vsel %vm748_vm2, %v9422_v36, %v9279_v0  ;;  %v9421_v2 = vsel %vm9372_vm11, %v8844_v11, %v18775_v33  ;;  %v9283_v31 = vpop.permute.xlu1 %9282 }
 0x7cc   :  { %9551 = vst.msk [vmem:[%s19195_s10 + $0x188] sm:$0xff] %vm9501_vm12, %v9486_v3  ;;  %v9485_v24 = vsel %vm748_vm2, %v9421_v2, %v9277_v62 }
 0x7cd   :  { %v9281_v61 = vpop.permute.xlu0 %9280  ;;  %9550 = vst.msk [vmem:[%s19195_s10 + $0x180] sm:$0xff] %vm9501_vm12, %v9485_v24 }
 0x7cf   :  { %v8707_v48 = vpop.permute.xlu1 %8706 }
 0x7d0   :  { %v8847_v30 = vadd.f32 %v8707_v48, %v18110_v6 }
 0x7d1   :  { %v8705_v21 = vpop.permute.xlu0 %8704 }
 0x7d2   :  { %v8846_v33 = vadd.f32 %v8705_v21, %v18115_v9  ;;  %v9424_v13 = vsel %vm9372_vm11, %v8847_v30, %v18809_v47 }
 0x7d3   :  { %v9488_v52 = vsel %vm748_vm2, %v9424_v13, %v9283_v31  ;;  %v9287_v39 = vpop.permute.xlu1 %9286 }
 0x7d4   :  { %v9423_v44 = vsel %vm9372_vm11, %v8846_v33, %v18817_v56  ;;  %9553 = vst.msk [vmem:[%s19195_s10 + $0x198] sm:$0xff] %vm9501_vm12, %v9488_v52 }
 0x7d5   :  { %v9487_v45 = vsel %vm748_vm2, %v9423_v44, %v9281_v61  ;;  %v9285_v6 = vpop.permute.xlu0 %9284 }
 0x7d6   :  { %9552 = vst.msk [vmem:[%s19195_s10 + $0x190] sm:$0xff] %vm9501_vm12, %v9487_v45 }
 0x7d7   :  { %v8711_v9 = vpop.permute.xlu1 %8710 }
 0x7d8   :  { %v8849_v47 = vadd.f32 %v8711_v9, %v18177_v26 }
 0x7d9   :  { %v8709_v29 = vpop.permute.xlu0 %8708 }
 0x7da   :  { %v8848_v56 = vadd.f32 %v8709_v29, %v18186_v37  ;;  %v9426_v58 = vsel %vm9372_vm11, %v8849_v47, %v18873_v10 }
 0x7db   :  { %v9490_v49 = vsel %vm748_vm2, %v9426_v58, %v9287_v39  ;;  %v9291_v53 = vpop.permute.xlu1 %9290 }
 0x7dc   :  { %v9425_v18 = vsel %vm9372_vm11, %v8848_v56, %v18877_v16  ;;  %9555 = vst.msk [vmem:[%s19195_s10 + $0x1a8] sm:$0xff] %vm9501_vm12, %v9490_v49 }
 0x7dd   :  { %v9489_v14 = vsel %vm748_vm2, %v9425_v18, %v9285_v6  ;;  %v9289_v26 = vpop.permute.xlu0 %9288 }
 0x7de   :  { %9554 = vst.msk [vmem:[%s19195_s10 + $0x1a0] sm:$0xff] %vm9501_vm12, %v9489_v14 }
 0x7df   :  { %v8715_v37 = vpop.permute.xlu1 %8714 }
 0x7e0   :  { %v8851_v10 = vadd.f32 %v8715_v37, %v18245_v46 }
 0x7e1   :  { %v8713_v8 = vpop.permute.xlu0 %8712 }
 0x7e2   :  { %v8850_v16 = vadd.f32 %v8713_v8, %v18254_v12  ;;  %v9428_v43 = vsel %vm9372_vm11, %v8851_v10, %v18931_v32 }
 0x7e3   :  { %v9492_v51 = vsel %vm748_vm2, %v9428_v43, %v9291_v53  ;;  %v9295_v17 = vpop.permute.xlu1 %9294 }
 0x7e4   :  { %v9427_v59 = vsel %vm9372_vm11, %v8850_v16, %v18934_v40  ;;  %9557 = vst.msk [vmem:[%s19195_s10 + $0x1b8] sm:$0xff] %vm9501_vm12, %v9492_v51 }
 0x7e5   :  { %v9491_v4 = vsel %vm748_vm2, %v9427_v59, %v9289_v26  ;;  %v9293_v46 = vpop.permute.xlu0 %9292 }
 0x7e6   :  { %9556 = vst.msk [vmem:[%s19195_s10 + $0x1b0] sm:$0xff] %vm9501_vm12, %v9491_v4 }
 0x7e7   :  { %v8719_v12 = vpop.permute.xlu1 %8718 }
 0x7e8   :  { %v8853_v32 = vadd.f32 %v8719_v12, %v18312_v34 }
 0x7e9   :  { %v8717_v0 = vpop.permute.xlu0 %8716 }
 0x7ea   :  { %v8852_v40 = vadd.f32 %v8717_v0, %v18321_v22  ;;  %v9430_v35 = vsel %vm9372_vm11, %v8853_v32, %v18961_v57 }
 0x7eb   :  { %v9494_v62 = vsel %vm748_vm2, %v9430_v35, %v9295_v17  ;;  %v9299_v54 = vpop.permute.xlu1 %9298 }
 0x7ec   :  { %v9429_v41 = vsel %vm9372_vm11, %v8852_v40, %v18963_v42  ;;  %9559 = vst.msk [vmem:[%s19195_s10 + $0x1c8] sm:$0xff] %vm9501_vm12, %v9494_v62 }
 0x7ed   :  { %v9493_v20 = vsel %vm748_vm2, %v9429_v41, %v9293_v46  ;;  %v9297_v34 = vpop.permute.xlu0 %9296 }
 0x7ee   :  { %9558 = vst.msk [vmem:[%s19195_s10 + $0x1c0] sm:$0xff] %vm9501_vm12, %v9493_v20 }
 0x7ef   :  { %v8723_v22 = vpop.permute.xlu1 %8722 }
 0x7f0   :  { %v8855_v57 = vadd.f32 %v8723_v22, %v18384_v15 }
 0x7f1   :  { %v8721_v60 = vpop.permute.xlu0 %8720 }
 0x7f2   :  { %v8854_v42 = vadd.f32 %v8721_v60, %v18395_v25  ;;  %v9432_v63 = vsel %vm9372_vm11, %v8855_v57, %v18981_v50 }
 0x7f3   :  { %v9496_v11 = vsel %vm748_vm2, %v9432_v63, %v9299_v54  ;;  %v9303_v3 = vpop.permute.xlu1 %9302 }
 0x7f4   :  { %v9431_v36 = vsel %vm9372_vm11, %v8854_v42, %v18983_v28  ;;  %9561 = vst.msk [vmem:[%s19195_s10 + $0x1d8] sm:$0xff] %vm9501_vm12, %v9496_v11 }
 0x7f5   :  { %v9495_v2 = vsel %vm748_vm2, %v9431_v36, %v9297_v34  ;;  %v9301_v15 = vpop.permute.xlu0 %9300 }
 0x7f6   :  { %9560 = vst.msk [vmem:[%s19195_s10 + $0x1d0] sm:$0xff] %vm9501_vm12, %v9495_v2 }
 0x7f7   :  { %v8727_v25 = vpop.permute.xlu1 %8726 }
 0x7f8   :  { %v8857_v50 = vadd.f32 %v8727_v25, %v18461_v23 }
 0x7f9   :  { %v8725_v31 = vpop.permute.xlu0 %8724 }
 0x7fa   :  { %v8856_v28 = vadd.f32 %v8725_v31, %v18473_v5  ;;  %v9434_v24 = vsel %vm9372_vm11, %v8857_v50, %v19001_v1 }
 0x7fb   :  { %v9498_v61 = vsel %vm748_vm2, %v9434_v24, %v9303_v3  ;;  %v8731_v30 = vpop.permute.xlu1 %8730 }
 0x7fc   :  { %v9433_v48 = vsel %vm9372_vm11, %v8856_v28, %v19003_v7  ;;  %9563 = vst.msk [vmem:[%s19195_s10 + $0x1e8] sm:$0xff] %vm9501_vm12, %v9498_v61  ;;  %v8859_v23 = vadd.f32 %v8731_v30, %v18543_v27 }
 0x7fd   :  { %v9497_v21 = vsel %vm748_vm2, %v9433_v48, %v9301_v15  ;;  %v8729_v33 = vpop.permute.xlu0 %8728 }
 0x7fe   :  { %9562 = vst.msk [vmem:[%s19195_s10 + $0x1e0] sm:$0xff] %vm9501_vm12, %v9497_v21  ;;  %v8858_v5 = vadd.f32 %v8729_v33, %v18553_v55  ;;  %v9436_v1 = vsel %vm9372_vm11, %v8859_v23, %v19021_v19 }
 0x7ff   :  { %v9307_v7 = vpop.permute.xlu1 %9306 }
 0x800   :  { %v9435_v13 = vsel %vm9372_vm11, %v8858_v5, %v19023_v38  ;;  %v9500_v52 = vsel %vm748_vm2, %v9436_v1, %v9307_v7 }
 0x801   :  { %v9305_v44 = vpop.permute.xlu0 %9304  ;;  %9565 = vst.msk [vmem:[%s19195_s10 + $0x1f8] sm:$0xff] %vm9501_vm12, %v9500_v52 }
 0x802   :  { %v9499_v27 = vsel %vm748_vm2, %v9435_v13, %v9305_v44 }
 0x803   :  { %9564 = vst.msk [vmem:[%s19195_s10 + $0x1f0] sm:$0xff] %vm9501_vm12, %v9499_v27 }

</bundles_post_ra>
